<compile_context>
chip_gen: v7x
topology: tpu7x:2x2x1
jax: 0.10.0
libtpu: 0.0.40
codegen_flags: <defaults>
</compile_context>

<pallas_src>
import functools

import jax
import jax.numpy as jnp
from jax import lax
from jax.experimental import pallas as pl
from jax.experimental.pallas import tpu as pltpu


_PACK = 4                      # images lane-packed per 128-lane group (4 * 32 ch)
_LANES = _PACK * 32            # 128
_TAP_OFFS = tuple(kh * 16 + kw for kh in range(3) for kw in range(3))  # max 34
_C1_CHUNK = 128                # conv1 row-chunk size (bounds vreg pressure)


# --------------------------- Kernel A: conv stack ---------------------------

def _conv_pool_kernel(x_ref, sel_ref, w1_ref, b1_ref, w2_ref, b2_ref, o_ref,
                      xb_scr, y1_scr, y2_scr):
    """Per grid step: conv1+ReLU -> conv2+ReLU -> 2x2 maxpool for gb packed
    groups (gb*4 images), all activations resident in VMEM."""
    gb = o_ref.shape[0]
    R = gb * 256                                   # packed rows this step
    w1 = w1_ref[...]                               # [9, 128]
    b1 = b1_ref[...]                               # [1, 128]
    b2 = b2_ref[...]                               # [1, 128]

    # ---- lane-broadcast of the packed input, hoisted out of the tap loop ----
    # xb[r, 32*i + c] = x(image i of the group, flat row r); one small MXU
    # matmul per group instead of 9 per-tap lane broadcasts.
    for g in range(gb):
        xb_scr[pl.ds(256 * g, 256), :] = jnp.dot(
            x_ref[pl.ds(256 * g, 256), :], sel_ref[...],
            preferred_element_type=jnp.float32)

    # ---- conv1 (1->32) + ReLU: 9 VPU FMAs over shifted row slices ----------
    # Zero the junk tail first with an 8-aligned store, then overwrite the
    # valid rows (rows >= R-34 stay zero and are only read by junk conv2 rows).
    y1_scr[pl.ds(R - 48, 48), :] = jnp.zeros((48, _LANES), jnp.float32)
    nv = R - 34
    n_full = nv // _C1_CHUNK
    rem = nv - n_full * _C1_CHUNK
    for c in range(n_full + (1 if rem else 0)):
        base = c * _C1_CHUNK
        rows = _C1_CHUNK if c < n_full else rem
        acc = xb_scr[pl.ds(base + _TAP_OFFS[0], rows), :] * w1[0:1, :]
        for t in range(1, 9):
            acc = acc + xb_scr[pl.ds(base + _TAP_OFFS[t], rows), :] * w1[t:t + 1, :]
        y1_scr[pl.ds(base, rows), :] = jnp.maximum(acc + b1, 0.0)

    # ---- conv2 (32->32, block-diag over 4 images) + ReLU + 2x2 maxpool -----
    for g in range(gb):
        for hh in range(2):                        # two 96-row halves of 192 rows
            rbase = 256 * g + 96 * hh
            acc = jnp.dot(y1_scr[pl.ds(rbase + _TAP_OFFS[0], 96), :], w2_ref[0],
                          preferred_element_type=jnp.float32)
            for t in range(1, 9):
                acc = acc + jnp.dot(y1_scr[pl.ds(rbase + _TAP_OFFS[t], 96), :],
                                    w2_ref[t], preferred_element_type=jnp.float32)
            y2_scr[pl.ds(192 * g + 96 * hh, 96), :] = jnp.maximum(acc + b2, 0.0)

        # width pairs via stride-2 sublane loads, height pairs via aligned
        # 8-row value slices; one lane-dense [48,128] store per group.
        even = y2_scr[pl.ds(192 * g, 96, 2), :]
        odd = y2_scr[pl.ds(192 * g + 1, 96, 2), :]
        wpool = jnp.maximum(even, odd)                               # [96, 128]
        o_ref[g] = jnp.concatenate(
            [jnp.maximum(wpool[16 * i:16 * i + 8, :],
                         wpool[16 * i + 8:16 * i + 16, :]) for i in range(6)],
            axis=0)                                                  # [48, 128]


# ----------------------------- Kernel B: MLP head ----------------------------

def _mlp_kernel(x_ref, w1_ref, b1_ref, w2_ref, b2_ref, w3_ref, b3_ref,
                out_ref, emb_ref):
    """flat[bm,1536] -> fc1(128pad)+ReLU -> fc2(128pad)+ReLU -> fc3(128pad)."""
    h = jnp.dot(x_ref[...], w1_ref[...], preferred_element_type=jnp.float32)
    h = jnp.maximum(h + b1_ref[...], 0.0)
    e = jnp.dot(h, w2_ref[...], preferred_element_type=jnp.float32)
    e = jnp.maximum(e + b2_ref[...], 0.0)
    o = jnp.dot(e, w3_ref[...], preferred_element_type=jnp.float32) + b3_ref[...]
    emb_ref[...] = e
    out_ref[...] = o


# ------------------------- weight pre-layout (once) --------------------------

def prepare_params(p):
    """Re-lay out PyTorch-shaped weights into kernel-ready arrays (run once per
    checkpoint, outside jit)."""
    f32 = jnp.float32
    n_classes = p["fc3_w"].shape[0]
    eye = jnp.eye(_PACK, dtype=f32)

    sel = jnp.kron(eye, jnp.ones((1, 32), f32))               # [4, 128]
    sel = jnp.pad(sel, ((0, 8 - _PACK), (0, 0)))              # [8, 128]

    w1b = p["conv1_w"].reshape(32, 9).T.astype(f32)           # [tap, cout]
    w1t = jnp.tile(w1b, (1, _PACK))                           # [9, 128]
    b1t = jnp.tile(p["conv1_b"].reshape(1, 32).astype(f32), (1, _PACK))

    w2b = p["conv2_w"].transpose(2, 3, 1, 0).reshape(9, 32, 32).astype(f32)
    w2bd = jnp.einsum("tij,ab->taibj", w2b, eye).reshape(9, _LANES, _LANES)
    b2t = jnp.tile(p["conv2_b"].reshape(1, 32).astype(f32), (1, _PACK))

    # fc1 columns permuted to the kernel's (h, w, c) flatten order, with zero
    # columns for the two junk width slots (w = 6, 7); N padded 120 -> 128.
    wf = p["fc1_w"].reshape(120, 32, 6, 6).transpose(2, 3, 1, 0)   # [h,w,c,n]
    wf = jnp.pad(wf, ((0, 0), (0, 2), (0, 0), (0, 0)))             # [6,8,32,120]
    w1fc = jnp.pad(wf.reshape(48 * 32, 120), ((0, 0), (0, 8))).astype(f32)
    b1fc = jnp.pad(p["fc1_b"].reshape(1, 120), ((0, 0), (0, 8))).astype(f32)
    w2fc = jnp.pad(p["fc2_w"].T, ((0, 8), (0, 44))).astype(f32)        # [128,128]
    b2fc = jnp.pad(p["fc2_b"].reshape(1, 84), ((0, 0), (0, 44))).astype(f32)
    w3fc = jnp.pad(p["fc3_w"].T,
                   ((0, 128 - 84), (0, 128 - n_classes))).astype(f32)  # [128,128]
    b3fc = jnp.pad(p["fc3_b"].reshape(1, n_classes),
                   ((0, 0), (0, 128 - n_classes))).astype(f32)

    return dict(sel=sel, w1t=w1t, b1t=b1t, w2bd=w2bd, b2t=b2t,
                w1fc=w1fc, b1fc=b1fc, w2fc=w2fc, b2fc=b2fc,
                w3fc=w3fc, b3fc=b3fc)


# ------------------------------ forward wrapper ------------------------------

def digits_backbone_forward(x, kp, *, n_classes=10, training=False,
                            groups_per_step=4, mlp_block=256):
    """DigitsBackbone.forward; x: [B, 1, 16, 16] NCHW float32."""
    B = x.shape[0]
    f32 = jnp.float32

    # ---- pack 4 images per 128-lane group: rows = h*16 + w, lanes = image ----
    g_needed = -(-B // _PACK)
    gb = max(1, min(groups_per_step, g_needed))
    steps = -(-g_needed // gb)
    G = steps * gb
    Bp = G * _PACK
    xf = x.astype(f32).reshape(B, 256)
    xf = jnp.pad(xf, ((0, Bp - B), (0, 0)))
    xp = xf.reshape(G, _PACK, 256).transpose(0, 2, 1)           # [G, 256, 4]
    xp = jnp.pad(xp, ((0, 0), (0, 0), (0, 8 - _PACK)))          # pad K to 8
    xp = xp.reshape(G * 256, 8)

    pooled = pl.pallas_call(
        _conv_pool_kernel,
        out_shape=jax.ShapeDtypeStruct((G, 48, _LANES), f32),
        grid=(steps,),
        in_specs=[
            pl.BlockSpec((gb * 256, 8), lambda s: (s, 0)),
            pl.BlockSpec((8, _LANES), lambda s: (0, 0)),
            pl.BlockSpec((9, _LANES), lambda s: (0, 0)),
            pl.BlockSpec((1, _LANES), lambda s: (0, 0)),
            pl.BlockSpec((9, _LANES, _LANES), lambda s: (0, 0, 0)),
            pl.BlockSpec((1, _LANES), lambda s: (0, 0)),
        ],
        out_specs=pl.BlockSpec((gb, 48, _LANES), lambda s: (s, 0, 0)),
        scratch_shapes=[
            pltpu.VMEM((gb * 256, _LANES), f32),    # broadcast input
            pltpu.VMEM((gb * 256, _LANES), f32),    # conv1 output
            pltpu.VMEM((gb * 192, _LANES), f32),    # conv2 output
        ],
        compiler_params=pltpu.CompilerParams(dimension_semantics=("parallel",)),
    )(xp, kp["sel"], kp["w1t"], kp["b1t"], kp["w2bd"], kp["b2t"])

    # Un-pack image lanes -> rows (tiny XLA transpose); feature order is
    # k = 32*(8*h + w) + c, matching the w1fc layout built in prepare_params.
    flat = pooled.reshape(G, 48, _PACK, 32).transpose(0, 2, 1, 3)
    flat = flat.reshape(Bp, 48 * 32)

    # ---- fused fc1 + fc2 + fc3, all dims lane-padded to 128 ----
    bm = min(mlp_block, -(-Bp // 8) * 8)
    B2 = -(-Bp // bm) * bm
    if B2 != Bp:
        flat = jnp.pad(flat, ((0, B2 - Bp), (0, 0)))

    out_p, emb_p = pl.pallas_call(
        _mlp_kernel,
        out_shape=(jax.ShapeDtypeStruct((B2, 128), f32),
                   jax.ShapeDtypeStruct((B2, 128), f32)),
        grid=(B2 // bm,),
        in_specs=[
            pl.BlockSpec((bm, 48 * 32), lambda i: (i, 0)),
            pl.BlockSpec((48 * 32, 128), lambda i: (0, 0)),
            pl.BlockSpec((1, 128), lambda i: (0, 0)),
            pl.BlockSpec((128, 128), lambda i: (0, 0)),
            pl.BlockSpec((1, 128), lambda i: (0, 0)),
            pl.BlockSpec((128, 128), lambda i: (0, 0)),
            pl.BlockSpec((1, 128), lambda i: (0, 0)),
        ],
        out_specs=(pl.BlockSpec((bm, 128), lambda i: (i, 0)),
                   pl.BlockSpec((bm, 128), lambda i: (i, 0))),
        compiler_params=pltpu.CompilerParams(dimension_semantics=("parallel",)),
    )(flat, kp["w1fc"], kp["b1fc"], kp["w2fc"], kp["b2fc"],
      kp["w3fc"], kp["b3fc"])

    out = out_p[:B, :n_classes]
    if training:
        # TODO(synk): train-mode Dropout(0.5) RNG (pltpu.prng_*) is not applied;
        # this returns the eval-mode forward in the training tuple shape.
        return out, emb_p[:B, :84]
    return out


# ------------------------- params + pure-JAX reference -----------------------

def init_params(key, n_classes=10, hidden_dim=1152):
    ks = jax.random.split(key, 10)
    s = 0.05
    return {
        "conv1_w": s * jax.random.normal(ks[0], (32, 1, 3, 3), jnp.float32),
        "conv1_b": s * jax.random.normal(ks[1], (32,), jnp.float32),
        "conv2_w": s * jax.random.normal(ks[2], (32, 32, 3, 3), jnp.float32),
        "conv2_b": s * jax.random.normal(ks[3], (32,), jnp.float32),
        "fc1_w": s * jax.random.normal(ks[4], (120, hidden_dim), jnp.float32),
        "fc1_b": s * jax.random.normal(ks[5], (120,), jnp.float32),
        "fc2_w": s * jax.random.normal(ks[6], (84, 120), jnp.float32),
        "fc2_b": s * jax.random.normal(ks[7], (84,), jnp.float32),
        "fc3_w": s * jax.random.normal(ks[8], (n_classes, 84), jnp.float32),
        "fc3_b": s * jax.random.normal(ks[9], (n_classes,), jnp.float32),
    }


def reference_forward(x, p):
    dn = ("NCHW", "OIHW", "NCHW")
    y = lax.conv_general_dilated(x, p["conv1_w"], (1, 1), "VALID", dimension_numbers=dn)
    y = jax.nn.relu(y + p["conv1_b"].reshape(1, -1, 1, 1))
    y = lax.conv_general_dilated(y, p["conv2_w"], (1, 1), "VALID", dimension_numbers=dn)
    y = jax.nn.relu(y + p["conv2_b"].reshape(1, -1, 1, 1))
    y = lax.reduce_window(y, -jnp.inf, lax.max, (1, 1, 2, 2), (1, 1, 2, 2), "VALID")
    y = y.reshape(y.shape[0], -1)
    y = jax.nn.relu(y @ p["fc1_w"].T + p["fc1_b"])
    emb = jax.nn.relu(y @ p["fc2_w"].T + p["fc2_b"])
    return emb @ p["fc3_w"].T + p["fc3_b"]


if __name__ == "__main__":
    key = jax.random.PRNGKey(0)
    kx, kparams = jax.random.split(key)
    x = jax.random.normal(kx, (8, 1, 16, 16), jnp.float32)    # NCHW, as in PyTorch
    raw = init_params(kparams, n_classes=10, hidden_dim=1152)
    kp = prepare_params(raw)                                  # once per checkpoint

    fwd = jax.jit(functools.partial(digits_backbone_forward,
                                    n_classes=10, training=False))
    out = jax.block_until_ready(fwd(x, kp))
    assert out.shape == (8, 10), out.shape

    ref = jax.block_until_ready(reference_forward(x, raw))
    max_err = float(jnp.max(jnp.abs(out - ref)))
    assert jnp.allclose(out, ref, rtol=5e-3, atol=5e-3), max_err

    print("KERNEL_OK")
</pallas_src>

<mosaic_0001>
module attributes {stable_mosaic.version = 11 : i64} {
  func.func @_conv_pool_kernel(%arg0: i32, %arg1: memref<512x8xf32, #tpu.memory_space<vmem>>, %arg2: memref<8x128xf32, #tpu.memory_space<vmem>>, %arg3: memref<9x128xf32, #tpu.memory_space<vmem>>, %arg4: memref<1x128xf32, #tpu.memory_space<vmem>>, %arg5: memref<9x128x128xf32, #tpu.memory_space<vmem>>, %arg6: memref<1x128xf32, #tpu.memory_space<vmem>>, %arg7: memref<2x48x128xf32, #tpu.memory_space<vmem>>, %arg8: memref<512x128xf32, #tpu.memory_space<vmem>>, %arg9: memref<512x128xf32, #tpu.memory_space<vmem>>, %arg10: memref<384x128xf32, #tpu.memory_space<vmem>>) attributes {dimension_semantics = [#tpu.dimension_semantics<parallel>], iteration_bounds = array<i64: 1>, scalar_prefetch = 0 : i64, scratch_operands = 3 : i64, tpu.core_type = #tpu.core_type<tc>, window_params = [{transform_indices = @transform_0, window_bounds = array<i64: 512, 8>}, {pipeline_mode = #tpu.pipeline_mode<synchronous>, transform_indices = @transform_1, window_bounds = array<i64: 8, 128>}, {pipeline_mode = #tpu.pipeline_mode<synchronous>, transform_indices = @transform_2, window_bounds = array<i64: 9, 128>}, {pipeline_mode = #tpu.pipeline_mode<synchronous>, transform_indices = @transform_3, window_bounds = array<i64: 1, 128>}, {pipeline_mode = #tpu.pipeline_mode<synchronous>, transform_indices = @transform_4, window_bounds = array<i64: 9, 128, 128>}, {pipeline_mode = #tpu.pipeline_mode<synchronous>, transform_indices = @transform_5, window_bounds = array<i64: 1, 128>}, {transform_indices = @transform_6, window_bounds = array<i64: 2, 48, 128>}]} {
    %c0 = arith.constant 0 : index
    %c0_0 = arith.constant 0 : index
    %0 = vector.load %arg3[%c0, %c0_0] : memref<9x128xf32, #tpu.memory_space<vmem>>, vector<9x128xf32>
    %c0_1 = arith.constant 0 : index
    %c0_2 = arith.constant 0 : index
    %1 = vector.load %arg4[%c0_1, %c0_2] : memref<1x128xf32, #tpu.memory_space<vmem>>, vector<1x128xf32>
    %c0_3 = arith.constant 0 : index
    %c0_4 = arith.constant 0 : index
    %2 = vector.load %arg6[%c0_3, %c0_4] : memref<1x128xf32, #tpu.memory_space<vmem>>, vector<1x128xf32>
    %c0_5 = arith.constant 0 : index
    %c0_6 = arith.constant 0 : index
    %3 = vector.load %arg1[%c0_5, %c0_6] : memref<512x8xf32, #tpu.memory_space<vmem>>, vector<256x8xf32>
    %c0_7 = arith.constant 0 : index
    %c0_8 = arith.constant 0 : index
    %4 = vector.load %arg2[%c0_7, %c0_8] : memref<8x128xf32, #tpu.memory_space<vmem>>, vector<8x128xf32>
    %cst = arith.constant dense<0.000000e+00> : vector<256x128xf32>
    %5 = tpu.matmul %3, %4, %cst {dimension_numbers = #tpu.dot_dimension_numbers<[1], [0], [0], [1], [0, 0, 1, 1], [], []>} : vector<256x8xf32>, vector<8x128xf32>, vector<256x128xf32> -> vector<256x128xf32>
    %c0_9 = arith.constant 0 : index
    %c0_10 = arith.constant 0 : index
    %6 = vector.load %arg8[%c0_9, %c0_10] : memref<512x128xf32, #tpu.memory_space<vmem>>, vector<256x128xf32>
    tpu.vector_store %arg8[%c0_9, %c0_10], %5 {strides = array<i32>} : memref<512x128xf32, #tpu.memory_space<vmem>>, vector<256x128xf32>,
    %c256 = arith.constant 256 : index
    %c0_11 = arith.constant 0 : index
    %7 = vector.load %arg1[%c256, %c0_11] : memref<512x8xf32, #tpu.memory_space<vmem>>, vector<256x8xf32>
    %c0_12 = arith.constant 0 : index
    %c0_13 = arith.constant 0 : index
    %8 = vector.load %arg2[%c0_12, %c0_13] : memref<8x128xf32, #tpu.memory_space<vmem>>, vector<8x128xf32>
    %cst_14 = arith.constant dense<0.000000e+00> : vector<256x128xf32>
    %9 = tpu.matmul %7, %8, %cst_14 {dimension_numbers = #tpu.dot_dimension_numbers<[1], [0], [0], [1], [0, 0, 1, 1], [], []>} : vector<256x8xf32>, vector<8x128xf32>, vector<256x128xf32> -> vector<256x128xf32>
    %c256_15 = arith.constant 256 : index
    %c0_16 = arith.constant 0 : index
    %10 = vector.load %arg8[%c256_15, %c0_16] : memref<512x128xf32, #tpu.memory_space<vmem>>, vector<256x128xf32>
    tpu.vector_store %arg8[%c256_15, %c0_16], %9 {strides = array<i32>} : memref<512x128xf32, #tpu.memory_space<vmem>>, vector<256x128xf32>,
    %cst_17 = arith.constant 0.000000e+00 : f32
    %11 = vector.broadcast %cst_17 : f32 to vector<48x128xf32>
    %c464 = arith.constant 464 : index
    %c0_18 = arith.constant 0 : index
    %12 = vector.load %arg9[%c464, %c0_18] : memref<512x128xf32, #tpu.memory_space<vmem>>, vector<48x128xf32>
    tpu.vector_store %arg9[%c464, %c0_18], %11 {strides = array<i32>} : memref<512x128xf32, #tpu.memory_space<vmem>>, vector<48x128xf32>,
    %c0_19 = arith.constant 0 : index
    %c0_20 = arith.constant 0 : index
    %13 = vector.load %arg8[%c0_19, %c0_20] : memref<512x128xf32, #tpu.memory_space<vmem>>, vector<128x128xf32>
    %14 = vector.extract_strided_slice %0 {offsets = [0, 0], sizes = [1, 128], strides = [1, 1]} : vector<9x128xf32> to vector<1x128xf32>
    %15 = vector.broadcast %14 : vector<1x128xf32> to vector<128x128xf32>
    %16 = arith.mulf %13, %15 : vector<128x128xf32>
    %c1 = arith.constant 1 : index
    %c0_21 = arith.constant 0 : index
    %17 = vector.load %arg8[%c1, %c0_21] : memref<512x128xf32, #tpu.memory_space<vmem>>, vector<128x128xf32>
    %18 = vector.extract_strided_slice %0 {offsets = [1, 0], sizes = [1, 128], strides = [1, 1]} : vector<9x128xf32> to vector<1x128xf32>
    %19 = vector.broadcast %18 : vector<1x128xf32> to vector<128x128xf32>
    %20 = arith.mulf %17, %19 : vector<128x128xf32>
    %21 = arith.addf %16, %20 : vector<128x128xf32>
    %c2 = arith.constant 2 : index
    %c0_22 = arith.constant 0 : index
    %22 = vector.load %arg8[%c2, %c0_22] : memref<512x128xf32, #tpu.memory_space<vmem>>, vector<128x128xf32>
    %23 = vector.extract_strided_slice %0 {offsets = [2, 0], sizes = [1, 128], strides = [1, 1]} : vector<9x128xf32> to vector<1x128xf32>
    %24 = vector.broadcast %23 : vector<1x128xf32> to vector<128x128xf32>
    %25 = arith.mulf %22, %24 : vector<128x128xf32>
    %26 = arith.addf %21, %25 : vector<128x128xf32>
    %c16 = arith.constant 16 : index
    %c0_23 = arith.constant 0 : index
    %27 = vector.load %arg8[%c16, %c0_23] : memref<512x128xf32, #tpu.memory_space<vmem>>, vector<128x128xf32>
    %28 = vector.extract_strided_slice %0 {offsets = [3, 0], sizes = [1, 128], strides = [1, 1]} : vector<9x128xf32> to vector<1x128xf32>
    %29 = vector.broadcast %28 : vector<1x128xf32> to vector<128x128xf32>
    %30 = arith.mulf %27, %29 : vector<128x128xf32>
    %31 = arith.addf %26, %30 : vector<128x128xf32>
    %c17 = arith.constant 17 : index
    %c0_24 = arith.constant 0 : index
    %32 = vector.load %arg8[%c17, %c0_24] : memref<512x128xf32, #tpu.memory_space<vmem>>, vector<128x128xf32>
    %33 = vector.extract_strided_slice %0 {offsets = [4, 0], sizes = [1, 128], strides = [1, 1]} : vector<9x128xf32> to vector<1x128xf32>
    %34 = vector.broadcast %33 : vector<1x128xf32> to vector<128x128xf32>
    %35 = arith.mulf %32, %34 : vector<128x128xf32>
    %36 = arith.addf %31, %35 : vector<128x128xf32>
    %c18 = arith.constant 18 : index
    %c0_25 = arith.constant 0 : index
    %37 = vector.load %arg8[%c18, %c0_25] : memref<512x128xf32, #tpu.memory_space<vmem>>, vector<128x128xf32>
    %38 = vector.extract_strided_slice %0 {offsets = [5, 0], sizes = [1, 128], strides = [1, 1]} : vector<9x128xf32> to vector<1x128xf32>
    %39 = vector.broadcast %38 : vector<1x128xf32> to vector<128x128xf32>
    %40 = arith.mulf %37, %39 : vector<128x128xf32>
    %41 = arith.addf %36, %40 : vector<128x128xf32>
    %c32 = arith.constant 32 : index
    %c0_26 = arith.constant 0 : index
    %42 = vector.load %arg8[%c32, %c0_26] : memref<512x128xf32, #tpu.memory_space<vmem>>, vector<128x128xf32>
    %43 = vector.extract_strided_slice %0 {offsets = [6, 0], sizes = [1, 128], strides = [1, 1]} : vector<9x128xf32> to vector<1x128xf32>
    %44 = vector.broadcast %43 : vector<1x128xf32> to vector<128x128xf32>
    %45 = arith.mulf %42, %44 : vector<128x128xf32>
    %46 = arith.addf %41, %45 : vector<128x128xf32>
    %c33 = arith.constant 33 : index
    %c0_27 = arith.constant 0 : index
    %47 = vector.load %arg8[%c33, %c0_27] : memref<512x128xf32, #tpu.memory_space<vmem>>, vector<128x128xf32>
    %48 = vector.extract_strided_slice %0 {offsets = [7, 0], sizes = [1, 128], strides = [1, 1]} : vector<9x128xf32> to vector<1x128xf32>
    %49 = vector.broadcast %48 : vector<1x128xf32> to vector<128x128xf32>
    %50 = arith.mulf %47, %49 : vector<128x128xf32>
    %51 = arith.addf %46, %50 : vector<128x128xf32>
    %c34 = arith.constant 34 : index
    %c0_28 = arith.constant 0 : index
    %52 = vector.load %arg8[%c34, %c0_28] : memref<512x128xf32, #tpu.memory_space<vmem>>, vector<128x128xf32>
    %53 = vector.extract_strided_slice %0 {offsets = [8, 0], sizes = [1, 128], strides = [1, 1]} : vector<9x128xf32> to vector<1x128xf32>
    %54 = vector.broadcast %53 : vector<1x128xf32> to vector<128x128xf32>
    %55 = arith.mulf %52, %54 : vector<128x128xf32>
    %56 = arith.addf %51, %55 : vector<128x128xf32>
    %57 = vector.broadcast %1 : vector<1x128xf32> to vector<128x128xf32>
    %58 = arith.addf %56, %57 : vector<128x128xf32>
    %cst_29 = arith.constant 0.000000e+00 : f32
    %59 = vector.broadcast %cst_29 : f32 to vector<128x128xf32>
    %60 = arith.maximumf %58, %59 : vector<128x128xf32>
    %c0_30 = arith.constant 0 : index
    %c0_31 = arith.constant 0 : index
    %61 = vector.load %arg9[%c0_30, %c0_31] : memref<512x128xf32, #tpu.memory_space<vmem>>, vector<128x128xf32>
    tpu.vector_store %arg9[%c0_30, %c0_31], %60 {strides = array<i32>} : memref<512x128xf32, #tpu.memory_space<vmem>>, vector<128x128xf32>,
    %c128 = arith.constant 128 : index
    %c0_32 = arith.constant 0 : index
    %62 = vector.load %arg8[%c128, %c0_32] : memref<512x128xf32, #tpu.memory_space<vmem>>, vector<128x128xf32>
    %63 = vector.extract_strided_slice %0 {offsets = [0, 0], sizes = [1, 128], strides = [1, 1]} : vector<9x128xf32> to vector<1x128xf32>
    %64 = vector.broadcast %63 : vector<1x128xf32> to vector<128x128xf32>
    %65 = arith.mulf %62, %64 : vector<128x128xf32>
    %c129 = arith.constant 129 : index
    %c0_33 = arith.constant 0 : index
    %66 = vector.load %arg8[%c129, %c0_33] : memref<512x128xf32, #tpu.memory_space<vmem>>, vector<128x128xf32>
    %67 = vector.extract_strided_slice %0 {offsets = [1, 0], sizes = [1, 128], strides = [1, 1]} : vector<9x128xf32> to vector<1x128xf32>
    %68 = vector.broadcast %67 : vector<1x128xf32> to vector<128x128xf32>
    %69 = arith.mulf %66, %68 : vector<128x128xf32>
    %70 = arith.addf %65, %69 : vector<128x128xf32>
    %c130 = arith.constant 130 : index
    %c0_34 = arith.constant 0 : index
    %71 = vector.load %arg8[%c130, %c0_34] : memref<512x128xf32, #tpu.memory_space<vmem>>, vector<128x128xf32>
    %72 = vector.extract_strided_slice %0 {offsets = [2, 0], sizes = [1, 128], strides = [1, 1]} : vector<9x128xf32> to vector<1x128xf32>
    %73 = vector.broadcast %72 : vector<1x128xf32> to vector<128x128xf32>
    %74 = arith.mulf %71, %73 : vector<128x128xf32>
    %75 = arith.addf %70, %74 : vector<128x128xf32>
    %c144 = arith.constant 144 : index
    %c0_35 = arith.constant 0 : index
    %76 = vector.load %arg8[%c144, %c0_35] : memref<512x128xf32, #tpu.memory_space<vmem>>, vector<128x128xf32>
    %77 = vector.extract_strided_slice %0 {offsets = [3, 0], sizes = [1, 128], strides = [1, 1]} : vector<9x128xf32> to vector<1x128xf32>
    %78 = vector.broadcast %77 : vector<1x128xf32> to vector<128x128xf32>
    %79 = arith.mulf %76, %78 : vector<128x128xf32>
    %80 = arith.addf %75, %79 : vector<128x128xf32>
    %c145 = arith.constant 145 : index
    %c0_36 = arith.constant 0 : index
    %81 = vector.load %arg8[%c145, %c0_36] : memref<512x128xf32, #tpu.memory_space<vmem>>, vector<128x128xf32>
    %82 = vector.extract_strided_slice %0 {offsets = [4, 0], sizes = [1, 128], strides = [1, 1]} : vector<9x128xf32> to vector<1x128xf32>
    %83 = vector.broadcast %82 : vector<1x128xf32> to vector<128x128xf32>
    %84 = arith.mulf %81, %83 : vector<128x128xf32>
    %85 = arith.addf %80, %84 : vector<128x128xf32>
    %c146 = arith.constant 146 : index
    %c0_37 = arith.constant 0 : index
    %86 = vector.load %arg8[%c146, %c0_37] : memref<512x128xf32, #tpu.memory_space<vmem>>, vector<128x128xf32>
    %87 = vector.extract_strided_slice %0 {offsets = [5, 0], sizes = [1, 128], strides = [1, 1]} : vector<9x128xf32> to vector<1x128xf32>
    %88 = vector.broadcast %87 : vector<1x128xf32> to vector<128x128xf32>
    %89 = arith.mulf %86, %88 : vector<128x128xf32>
    %90 = arith.addf %85, %89 : vector<128x128xf32>
    %c160 = arith.constant 160 : index
    %c0_38 = arith.constant 0 : index
    %91 = vector.load %arg8[%c160, %c0_38] : memref<512x128xf32, #tpu.memory_space<vmem>>, vector<128x128xf32>
    %92 = vector.extract_strided_slice %0 {offsets = [6, 0], sizes = [1, 128], strides = [1, 1]} : vector<9x128xf32> to vector<1x128xf32>
    %93 = vector.broadcast %92 : vector<1x128xf32> to vector<128x128xf32>
    %94 = arith.mulf %91, %93 : vector<128x128xf32>
    %95 = arith.addf %90, %94 : vector<128x128xf32>
    %c161 = arith.constant 161 : index
    %c0_39 = arith.constant 0 : index
    %96 = vector.load %arg8[%c161, %c0_39] : memref<512x128xf32, #tpu.memory_space<vmem>>, vector<128x128xf32>
    %97 = vector.extract_strided_slice %0 {offsets = [7, 0], sizes = [1, 128], strides = [1, 1]} : vector<9x128xf32> to vector<1x128xf32>
    %98 = vector.broadcast %97 : vector<1x128xf32> to vector<128x128xf32>
    %99 = arith.mulf %96, %98 : vector<128x128xf32>
    %100 = arith.addf %95, %99 : vector<128x128xf32>
    %c162 = arith.constant 162 : index
    %c0_40 = arith.constant 0 : index
    %101 = vector.load %arg8[%c162, %c0_40] : memref<512x128xf32, #tpu.memory_space<vmem>>, vector<128x128xf32>
    %102 = vector.extract_strided_slice %0 {offsets = [8, 0], sizes = [1, 128], strides = [1, 1]} : vector<9x128xf32> to vector<1x128xf32>
    %103 = vector.broadcast %102 : vector<1x128xf32> to vector<128x128xf32>
    %104 = arith.mulf %101, %103 : vector<128x128xf32>
    %105 = arith.addf %100, %104 : vector<128x128xf32>
    %106 = vector.broadcast %1 : vector<1x128xf32> to vector<128x128xf32>
    %107 = arith.addf %105, %106 : vector<128x128xf32>
    %cst_41 = arith.constant 0.000000e+00 : f32
    %108 = vector.broadcast %cst_41 : f32 to vector<128x128xf32>
    %109 = arith.maximumf %107, %108 : vector<128x128xf32>
    %c128_42 = arith.constant 128 : index
    %c0_43 = arith.constant 0 : index
    %110 = vector.load %arg9[%c128_42, %c0_43] : memref<512x128xf32, #tpu.memory_space<vmem>>, vector<128x128xf32>
    tpu.vector_store %arg9[%c128_42, %c0_43], %109 {strides = array<i32>} : memref<512x128xf32, #tpu.memory_space<vmem>>, vector<128x128xf32>,
    %c256_44 = arith.constant 256 : index
    %c0_45 = arith.constant 0 : index
    %111 = vector.load %arg8[%c256_44, %c0_45] : memref<512x128xf32, #tpu.memory_space<vmem>>, vector<128x128xf32>
    %112 = vector.extract_strided_slice %0 {offsets = [0, 0], sizes = [1, 128], strides = [1, 1]} : vector<9x128xf32> to vector<1x128xf32>
    %113 = vector.broadcast %112 : vector<1x128xf32> to vector<128x128xf32>
    %114 = arith.mulf %111, %113 : vector<128x128xf32>
    %c257 = arith.constant 257 : index
    %c0_46 = arith.constant 0 : index
    %115 = vector.load %arg8[%c257, %c0_46] : memref<512x128xf32, #tpu.memory_space<vmem>>, vector<128x128xf32>
    %116 = vector.extract_strided_slice %0 {offsets = [1, 0], sizes = [1, 128], strides = [1, 1]} : vector<9x128xf32> to vector<1x128xf32>
    %117 = vector.broadcast %116 : vector<1x128xf32> to vector<128x128xf32>
    %118 = arith.mulf %115, %117 : vector<128x128xf32>
    %119 = arith.addf %114, %118 : vector<128x128xf32>
    %c258 = arith.constant 258 : index
    %c0_47 = arith.constant 0 : index
    %120 = vector.load %arg8[%c258, %c0_47] : memref<512x128xf32, #tpu.memory_space<vmem>>, vector<128x128xf32>
    %121 = vector.extract_strided_slice %0 {offsets = [2, 0], sizes = [1, 128], strides = [1, 1]} : vector<9x128xf32> to vector<1x128xf32>
    %122 = vector.broadcast %121 : vector<1x128xf32> to vector<128x128xf32>
    %123 = arith.mulf %120, %122 : vector<128x128xf32>
    %124 = arith.addf %119, %123 : vector<128x128xf32>
    %c272 = arith.constant 272 : index
    %c0_48 = arith.constant 0 : index
    %125 = vector.load %arg8[%c272, %c0_48] : memref<512x128xf32, #tpu.memory_space<vmem>>, vector<128x128xf32>
    %126 = vector.extract_strided_slice %0 {offsets = [3, 0], sizes = [1, 128], strides = [1, 1]} : vector<9x128xf32> to vector<1x128xf32>
    %127 = vector.broadcast %126 : vector<1x128xf32> to vector<128x128xf32>
    %128 = arith.mulf %125, %127 : vector<128x128xf32>
    %129 = arith.addf %124, %128 : vector<128x128xf32>
    %c273 = arith.constant 273 : index
    %c0_49 = arith.constant 0 : index
    %130 = vector.load %arg8[%c273, %c0_49] : memref<512x128xf32, #tpu.memory_space<vmem>>, vector<128x128xf32>
    %131 = vector.extract_strided_slice %0 {offsets = [4, 0], sizes = [1, 128], strides = [1, 1]} : vector<9x128xf32> to vector<1x128xf32>
    %132 = vector.broadcast %131 : vector<1x128xf32> to vector<128x128xf32>
    %133 = arith.mulf %130, %132 : vector<128x128xf32>
    %134 = arith.addf %129, %133 : vector<128x128xf32>
    %c274 = arith.constant 274 : index
    %c0_50 = arith.constant 0 : index
    %135 = vector.load %arg8[%c274, %c0_50] : memref<512x128xf32, #tpu.memory_space<vmem>>, vector<128x128xf32>
    %136 = vector.extract_strided_slice %0 {offsets = [5, 0], sizes = [1, 128], strides = [1, 1]} : vector<9x128xf32> to vector<1x128xf32>
    %137 = vector.broadcast %136 : vector<1x128xf32> to vector<128x128xf32>
    %138 = arith.mulf %135, %137 : vector<128x128xf32>
    %139 = arith.addf %134, %138 : vector<128x128xf32>
    %c288 = arith.constant 288 : index
    %c0_51 = arith.constant 0 : index
    %140 = vector.load %arg8[%c288, %c0_51] : memref<512x128xf32, #tpu.memory_space<vmem>>, vector<128x128xf32>
    %141 = vector.extract_strided_slice %0 {offsets = [6, 0], sizes = [1, 128], strides = [1, 1]} : vector<9x128xf32> to vector<1x128xf32>
    %142 = vector.broadcast %141 : vector<1x128xf32> to vector<128x128xf32>
    %143 = arith.mulf %140, %142 : vector<128x128xf32>
    %144 = arith.addf %139, %143 : vector<128x128xf32>
    %c289 = arith.constant 289 : index
    %c0_52 = arith.constant 0 : index
    %145 = vector.load %arg8[%c289, %c0_52] : memref<512x128xf32, #tpu.memory_space<vmem>>, vector<128x128xf32>
    %146 = vector.extract_strided_slice %0 {offsets = [7, 0], sizes = [1, 128], strides = [1, 1]} : vector<9x128xf32> to vector<1x128xf32>
    %147 = vector.broadcast %146 : vector<1x128xf32> to vector<128x128xf32>
    %148 = arith.mulf %145, %147 : vector<128x128xf32>
    %149 = arith.addf %144, %148 : vector<128x128xf32>
    %c290 = arith.constant 290 : index
    %c0_53 = arith.constant 0 : index
    %150 = vector.load %arg8[%c290, %c0_53] : memref<512x128xf32, #tpu.memory_space<vmem>>, vector<128x128xf32>
    %151 = vector.extract_strided_slice %0 {offsets = [8, 0], sizes = [1, 128], strides = [1, 1]} : vector<9x128xf32> to vector<1x128xf32>
    %152 = vector.broadcast %151 : vector<1x128xf32> to vector<128x128xf32>
    %153 = arith.mulf %150, %152 : vector<128x128xf32>
    %154 = arith.addf %149, %153 : vector<128x128xf32>
    %155 = vector.broadcast %1 : vector<1x128xf32> to vector<128x128xf32>
    %156 = arith.addf %154, %155 : vector<128x128xf32>
    %cst_54 = arith.constant 0.000000e+00 : f32
    %157 = vector.broadcast %cst_54 : f32 to vector<128x128xf32>
    %158 = arith.maximumf %156, %157 : vector<128x128xf32>
    %c256_55 = arith.constant 256 : index
    %c0_56 = arith.constant 0 : index
    %159 = vector.load %arg9[%c256_55, %c0_56] : memref<512x128xf32, #tpu.memory_space<vmem>>, vector<128x128xf32>
    tpu.vector_store %arg9[%c256_55, %c0_56], %158 {strides = array<i32>} : memref<512x128xf32, #tpu.memory_space<vmem>>, vector<128x128xf32>,
    %c384 = arith.constant 384 : index
    %c0_57 = arith.constant 0 : index
    %160 = vector.load %arg8[%c384, %c0_57] : memref<512x128xf32, #tpu.memory_space<vmem>>, vector<94x128xf32>
    %161 = vector.extract_strided_slice %0 {offsets = [0, 0], sizes = [1, 128], strides = [1, 1]} : vector<9x128xf32> to vector<1x128xf32>
    %162 = vector.broadcast %161 : vector<1x128xf32> to vector<94x128xf32>
    %163 = arith.mulf %160, %162 : vector<94x128xf32>
    %c385 = arith.constant 385 : index
    %c0_58 = arith.constant 0 : index
    %164 = vector.load %arg8[%c385, %c0_58] : memref<512x128xf32, #tpu.memory_space<vmem>>, vector<94x128xf32>
    %165 = vector.extract_strided_slice %0 {offsets = [1, 0], sizes = [1, 128], strides = [1, 1]} : vector<9x128xf32> to vector<1x128xf32>
    %166 = vector.broadcast %165 : vector<1x128xf32> to vector<94x128xf32>
    %167 = arith.mulf %164, %166 : vector<94x128xf32>
    %168 = arith.addf %163, %167 : vector<94x128xf32>
    %c386 = arith.constant 386 : index
    %c0_59 = arith.constant 0 : index
    %169 = vector.load %arg8[%c386, %c0_59] : memref<512x128xf32, #tpu.memory_space<vmem>>, vector<94x128xf32>
    %170 = vector.extract_strided_slice %0 {offsets = [2, 0], sizes = [1, 128], strides = [1, 1]} : vector<9x128xf32> to vector<1x128xf32>
    %171 = vector.broadcast %170 : vector<1x128xf32> to vector<94x128xf32>
    %172 = arith.mulf %169, %171 : vector<94x128xf32>
    %173 = arith.addf %168, %172 : vector<94x128xf32>
    %c400 = arith.constant 400 : index
    %c0_60 = arith.constant 0 : index
    %174 = vector.load %arg8[%c400, %c0_60] : memref<512x128xf32, #tpu.memory_space<vmem>>, vector<94x128xf32>
    %175 = vector.extract_strided_slice %0 {offsets = [3, 0], sizes = [1, 128], strides = [1, 1]} : vector<9x128xf32> to vector<1x128xf32>
    %176 = vector.broadcast %175 : vector<1x128xf32> to vector<94x128xf32>
    %177 = arith.mulf %174, %176 : vector<94x128xf32>
    %178 = arith.addf %173, %177 : vector<94x128xf32>
    %c401 = arith.constant 401 : index
    %c0_61 = arith.constant 0 : index
    %179 = vector.load %arg8[%c401, %c0_61] : memref<512x128xf32, #tpu.memory_space<vmem>>, vector<94x128xf32>
    %180 = vector.extract_strided_slice %0 {offsets = [4, 0], sizes = [1, 128], strides = [1, 1]} : vector<9x128xf32> to vector<1x128xf32>
    %181 = vector.broadcast %180 : vector<1x128xf32> to vector<94x128xf32>
    %182 = arith.mulf %179, %181 : vector<94x128xf32>
    %183 = arith.addf %178, %182 : vector<94x128xf32>
    %c402 = arith.constant 402 : index
    %c0_62 = arith.constant 0 : index
    %184 = vector.load %arg8[%c402, %c0_62] : memref<512x128xf32, #tpu.memory_space<vmem>>, vector<94x128xf32>
    %185 = vector.extract_strided_slice %0 {offsets = [5, 0], sizes = [1, 128], strides = [1, 1]} : vector<9x128xf32> to vector<1x128xf32>
    %186 = vector.broadcast %185 : vector<1x128xf32> to vector<94x128xf32>
    %187 = arith.mulf %184, %186 : vector<94x128xf32>
    %188 = arith.addf %183, %187 : vector<94x128xf32>
    %c416 = arith.constant 416 : index
    %c0_63 = arith.constant 0 : index
    %189 = vector.load %arg8[%c416, %c0_63] : memref<512x128xf32, #tpu.memory_space<vmem>>, vector<94x128xf32>
    %190 = vector.extract_strided_slice %0 {offsets = [6, 0], sizes = [1, 128], strides = [1, 1]} : vector<9x128xf32> to vector<1x128xf32>
    %191 = vector.broadcast %190 : vector<1x128xf32> to vector<94x128xf32>
    %192 = arith.mulf %189, %191 : vector<94x128xf32>
    %193 = arith.addf %188, %192 : vector<94x128xf32>
    %c417 = arith.constant 417 : index
    %c0_64 = arith.constant 0 : index
    %194 = vector.load %arg8[%c417, %c0_64] : memref<512x128xf32, #tpu.memory_space<vmem>>, vector<94x128xf32>
    %195 = vector.extract_strided_slice %0 {offsets = [7, 0], sizes = [1, 128], strides = [1, 1]} : vector<9x128xf32> to vector<1x128xf32>
    %196 = vector.broadcast %195 : vector<1x128xf32> to vector<94x128xf32>
    %197 = arith.mulf %194, %196 : vector<94x128xf32>
    %198 = arith.addf %193, %197 : vector<94x128xf32>
    %c418 = arith.constant 418 : index
    %c0_65 = arith.constant 0 : index
    %199 = vector.load %arg8[%c418, %c0_65] : memref<512x128xf32, #tpu.memory_space<vmem>>, vector<94x128xf32>
    %200 = vector.extract_strided_slice %0 {offsets = [8, 0], sizes = [1, 128], strides = [1, 1]} : vector<9x128xf32> to vector<1x128xf32>
    %201 = vector.broadcast %200 : vector<1x128xf32> to vector<94x128xf32>
    %202 = arith.mulf %199, %201 : vector<94x128xf32>
    %203 = arith.addf %198, %202 : vector<94x128xf32>
    %204 = vector.broadcast %1 : vector<1x128xf32> to vector<94x128xf32>
    %205 = arith.addf %203, %204 : vector<94x128xf32>
    %cst_66 = arith.constant 0.000000e+00 : f32
    %206 = vector.broadcast %cst_66 : f32 to vector<94x128xf32>
    %207 = arith.maximumf %205, %206 : vector<94x128xf32>
    %c384_67 = arith.constant 384 : index
    %c0_68 = arith.constant 0 : index
    %208 = vector.load %arg9[%c384_67, %c0_68] : memref<512x128xf32, #tpu.memory_space<vmem>>, vector<94x128xf32>
    tpu.vector_store %arg9[%c384_67, %c0_68], %207 {strides = array<i32>} : memref<512x128xf32, #tpu.memory_space<vmem>>, vector<94x128xf32>,
    %c0_69 = arith.constant 0 : index
    %c0_70 = arith.constant 0 : index
    %209 = vector.load %arg9[%c0_69, %c0_70] : memref<512x128xf32, #tpu.memory_space<vmem>>, vector<96x128xf32>
    %c0_71 = arith.constant 0 : index
    %c0_72 = arith.constant 0 : index
    %c0_73 = arith.constant 0 : index
    %210 = vector.load %arg5[%c0_71, %c0_72, %c0_73] : memref<9x128x128xf32, #tpu.memory_space<vmem>>, vector<1x128x128xf32>
    %211 = vector.shape_cast %210 : vector<1x128x128xf32> to vector<128x128xf32>
    %cst_74 = arith.constant dense<0.000000e+00> : vector<96x128xf32>
    %212 = tpu.matmul %209, %211, %cst_74 {dimension_numbers = #tpu.dot_dimension_numbers<[1], [0], [0], [1], [0, 0, 1, 1], [], []>} : vector<96x128xf32>, vector<128x128xf32>, vector<96x128xf32> -> vector<96x128xf32>
    %c1_75 = arith.constant 1 : index
    %c0_76 = arith.constant 0 : index
    %213 = vector.load %arg9[%c1_75, %c0_76] : memref<512x128xf32, #tpu.memory_space<vmem>>, vector<96x128xf32>
    %c1_77 = arith.constant 1 : index
    %c0_78 = arith.constant 0 : index
    %c0_79 = arith.constant 0 : index
    %214 = vector.load %arg5[%c1_77, %c0_78, %c0_79] : memref<9x128x128xf32, #tpu.memory_space<vmem>>, vector<1x128x128xf32>
    %215 = vector.shape_cast %214 : vector<1x128x128xf32> to vector<128x128xf32>
    %cst_80 = arith.constant dense<0.000000e+00> : vector<96x128xf32>
    %216 = tpu.matmul %213, %215, %cst_80 {dimension_numbers = #tpu.dot_dimension_numbers<[1], [0], [0], [1], [0, 0, 1, 1], [], []>} : vector<96x128xf32>, vector<128x128xf32>, vector<96x128xf32> -> vector<96x128xf32>
    %217 = arith.addf %212, %216 : vector<96x128xf32>
    %c2_81 = arith.constant 2 : index
    %c0_82 = arith.constant 0 : index
    %218 = vector.load %arg9[%c2_81, %c0_82] : memref<512x128xf32, #tpu.memory_space<vmem>>, vector<96x128xf32>
    %c2_83 = arith.constant 2 : index
    %c0_84 = arith.constant 0 : index
    %c0_85 = arith.constant 0 : index
    %219 = vector.load %arg5[%c2_83, %c0_84, %c0_85] : memref<9x128x128xf32, #tpu.memory_space<vmem>>, vector<1x128x128xf32>
    %220 = vector.shape_cast %219 : vector<1x128x128xf32> to vector<128x128xf32>
    %cst_86 = arith.constant dense<0.000000e+00> : vector<96x128xf32>
    %221 = tpu.matmul %218, %220, %cst_86 {dimension_numbers = #tpu.dot_dimension_numbers<[1], [0], [0], [1], [0, 0, 1, 1], [], []>} : vector<96x128xf32>, vector<128x128xf32>, vector<96x128xf32> -> vector<96x128xf32>
    %222 = arith.addf %217, %221 : vector<96x128xf32>
    %c16_87 = arith.constant 16 : index
    %c0_88 = arith.constant 0 : index
    %223 = vector.load %arg9[%c16_87, %c0_88] : memref<512x128xf32, #tpu.memory_space<vmem>>, vector<96x128xf32>
    %c3 = arith.constant 3 : index
    %c0_89 = arith.constant 0 : index
    %c0_90 = arith.constant 0 : index
    %224 = vector.load %arg5[%c3, %c0_89, %c0_90] : memref<9x128x128xf32, #tpu.memory_space<vmem>>, vector<1x128x128xf32>
    %225 = vector.shape_cast %224 : vector<1x128x128xf32> to vector<128x128xf32>
    %cst_91 = arith.constant dense<0.000000e+00> : vector<96x128xf32>
    %226 = tpu.matmul %223, %225, %cst_91 {dimension_numbers = #tpu.dot_dimension_numbers<[1], [0], [0], [1], [0, 0, 1, 1], [], []>} : vector<96x128xf32>, vector<128x128xf32>, vector<96x128xf32> -> vector<96x128xf32>
    %227 = arith.addf %222, %226 : vector<96x128xf32>
    %c17_92 = arith.constant 17 : index
    %c0_93 = arith.constant 0 : index
    %228 = vector.load %arg9[%c17_92, %c0_93] : memref<512x128xf32, #tpu.memory_space<vmem>>, vector<96x128xf32>
    %c4 = arith.constant 4 : index
    %c0_94 = arith.constant 0 : index
    %c0_95 = arith.constant 0 : index
    %229 = vector.load %arg5[%c4, %c0_94, %c0_95] : memref<9x128x128xf32, #tpu.memory_space<vmem>>, vector<1x128x128xf32>
    %230 = vector.shape_cast %229 : vector<1x128x128xf32> to vector<128x128xf32>
    %cst_96 = arith.constant dense<0.000000e+00> : vector<96x128xf32>
    %231 = tpu.matmul %228, %230, %cst_96 {dimension_numbers = #tpu.dot_dimension_numbers<[1], [0], [0], [1], [0, 0, 1, 1], [], []>} : vector<96x128xf32>, vector<128x128xf32>, vector<96x128xf32> -> vector<96x128xf32>
    %232 = arith.addf %227, %231 : vector<96x128xf32>
    %c18_97 = arith.constant 18 : index
    %c0_98 = arith.constant 0 : index
    %233 = vector.load %arg9[%c18_97, %c0_98] : memref<512x128xf32, #tpu.memory_space<vmem>>, vector<96x128xf32>
    %c5 = arith.constant 5 : index
    %c0_99 = arith.constant 0 : index
    %c0_100 = arith.constant 0 : index
    %234 = vector.load %arg5[%c5, %c0_99, %c0_100] : memref<9x128x128xf32, #tpu.memory_space<vmem>>, vector<1x128x128xf32>
    %235 = vector.shape_cast %234 : vector<1x128x128xf32> to vector<128x128xf32>
    %cst_101 = arith.constant dense<0.000000e+00> : vector<96x128xf32>
    %236 = tpu.matmul %233, %235, %cst_101 {dimension_numbers = #tpu.dot_dimension_numbers<[1], [0], [0], [1], [0, 0, 1, 1], [], []>} : vector<96x128xf32>, vector<128x128xf32>, vector<96x128xf32> -> vector<96x128xf32>
    %237 = arith.addf %232, %236 : vector<96x128xf32>
    %c32_102 = arith.constant 32 : index
    %c0_103 = arith.constant 0 : index
    %238 = vector.load %arg9[%c32_102, %c0_103] : memref<512x128xf32, #tpu.memory_space<vmem>>, vector<96x128xf32>
    %c6 = arith.constant 6 : index
    %c0_104 = arith.constant 0 : index
    %c0_105 = arith.constant 0 : index
    %239 = vector.load %arg5[%c6, %c0_104, %c0_105] : memref<9x128x128xf32, #tpu.memory_space<vmem>>, vector<1x128x128xf32>
    %240 = vector.shape_cast %239 : vector<1x128x128xf32> to vector<128x128xf32>
    %cst_106 = arith.constant dense<0.000000e+00> : vector<96x128xf32>
    %241 = tpu.matmul %238, %240, %cst_106 {dimension_numbers = #tpu.dot_dimension_numbers<[1], [0], [0], [1], [0, 0, 1, 1], [], []>} : vector<96x128xf32>, vector<128x128xf32>, vector<96x128xf32> -> vector<96x128xf32>
    %242 = arith.addf %237, %241 : vector<96x128xf32>
    %c33_107 = arith.constant 33 : index
    %c0_108 = arith.constant 0 : index
    %243 = vector.load %arg9[%c33_107, %c0_108] : memref<512x128xf32, #tpu.memory_space<vmem>>, vector<96x128xf32>
    %c7 = arith.constant 7 : index
    %c0_109 = arith.constant 0 : index
    %c0_110 = arith.constant 0 : index
    %244 = vector.load %arg5[%c7, %c0_109, %c0_110] : memref<9x128x128xf32, #tpu.memory_space<vmem>>, vector<1x128x128xf32>
    %245 = vector.shape_cast %244 : vector<1x128x128xf32> to vector<128x128xf32>
    %cst_111 = arith.constant dense<0.000000e+00> : vector<96x128xf32>
    %246 = tpu.matmul %243, %245, %cst_111 {dimension_numbers = #tpu.dot_dimension_numbers<[1], [0], [0], [1], [0, 0, 1, 1], [], []>} : vector<96x128xf32>, vector<128x128xf32>, vector<96x128xf32> -> vector<96x128xf32>
    %247 = arith.addf %242, %246 : vector<96x128xf32>
    %c34_112 = arith.constant 34 : index
    %c0_113 = arith.constant 0 : index
    %248 = vector.load %arg9[%c34_112, %c0_113] : memref<512x128xf32, #tpu.memory_space<vmem>>, vector<96x128xf32>
    %c8 = arith.constant 8 : index
    %c0_114 = arith.constant 0 : index
    %c0_115 = arith.constant 0 : index
    %249 = vector.load %arg5[%c8, %c0_114, %c0_115] : memref<9x128x128xf32, #tpu.memory_space<vmem>>, vector<1x128x128xf32>
    %250 = vector.shape_cast %249 : vector<1x128x128xf32> to vector<128x128xf32>
    %cst_116 = arith.constant dense<0.000000e+00> : vector<96x128xf32>
    %251 = tpu.matmul %248, %250, %cst_116 {dimension_numbers = #tpu.dot_dimension_numbers<[1], [0], [0], [1], [0, 0, 1, 1], [], []>} : vector<96x128xf32>, vector<128x128xf32>, vector<96x128xf32> -> vector<96x128xf32>
    %252 = arith.addf %247, %251 : vector<96x128xf32>
    %253 = vector.broadcast %2 : vector<1x128xf32> to vector<96x128xf32>
    %254 = arith.addf %252, %253 : vector<96x128xf32>
    %cst_117 = arith.constant 0.000000e+00 : f32
    %255 = vector.broadcast %cst_117 : f32 to vector<96x128xf32>
    %256 = arith.maximumf %254, %255 : vector<96x128xf32>
    %c0_118 = arith.constant 0 : index
    %c0_119 = arith.constant 0 : index
    %257 = vector.load %arg10[%c0_118, %c0_119] : memref<384x128xf32, #tpu.memory_space<vmem>>, vector<96x128xf32>
    tpu.vector_store %arg10[%c0_118, %c0_119], %256 {strides = array<i32>} : memref<384x128xf32, #tpu.memory_space<vmem>>, vector<96x128xf32>,
    %c96 = arith.constant 96 : index
    %c0_120 = arith.constant 0 : index
    %258 = vector.load %arg9[%c96, %c0_120] : memref<512x128xf32, #tpu.memory_space<vmem>>, vector<96x128xf32>
    %c0_121 = arith.constant 0 : index
    %c0_122 = arith.constant 0 : index
    %c0_123 = arith.constant 0 : index
    %259 = vector.load %arg5[%c0_121, %c0_122, %c0_123] : memref<9x128x128xf32, #tpu.memory_space<vmem>>, vector<1x128x128xf32>
    %260 = vector.shape_cast %259 : vector<1x128x128xf32> to vector<128x128xf32>
    %cst_124 = arith.constant dense<0.000000e+00> : vector<96x128xf32>
    %261 = tpu.matmul %258, %260, %cst_124 {dimension_numbers = #tpu.dot_dimension_numbers<[1], [0], [0], [1], [0, 0, 1, 1], [], []>} : vector<96x128xf32>, vector<128x128xf32>, vector<96x128xf32> -> vector<96x128xf32>
    %c97 = arith.constant 97 : index
    %c0_125 = arith.constant 0 : index
    %262 = vector.load %arg9[%c97, %c0_125] : memref<512x128xf32, #tpu.memory_space<vmem>>, vector<96x128xf32>
    %c1_126 = arith.constant 1 : index
    %c0_127 = arith.constant 0 : index
    %c0_128 = arith.constant 0 : index
    %263 = vector.load %arg5[%c1_126, %c0_127, %c0_128] : memref<9x128x128xf32, #tpu.memory_space<vmem>>, vector<1x128x128xf32>
    %264 = vector.shape_cast %263 : vector<1x128x128xf32> to vector<128x128xf32>
    %cst_129 = arith.constant dense<0.000000e+00> : vector<96x128xf32>
    %265 = tpu.matmul %262, %264, %cst_129 {dimension_numbers = #tpu.dot_dimension_numbers<[1], [0], [0], [1], [0, 0, 1, 1], [], []>} : vector<96x128xf32>, vector<128x128xf32>, vector<96x128xf32> -> vector<96x128xf32>
    %266 = arith.addf %261, %265 : vector<96x128xf32>
    %c98 = arith.constant 98 : index
    %c0_130 = arith.constant 0 : index
    %267 = vector.load %arg9[%c98, %c0_130] : memref<512x128xf32, #tpu.memory_space<vmem>>, vector<96x128xf32>
    %c2_131 = arith.constant 2 : index
    %c0_132 = arith.constant 0 : index
    %c0_133 = arith.constant 0 : index
    %268 = vector.load %arg5[%c2_131, %c0_132, %c0_133] : memref<9x128x128xf32, #tpu.memory_space<vmem>>, vector<1x128x128xf32>
    %269 = vector.shape_cast %268 : vector<1x128x128xf32> to vector<128x128xf32>
    %cst_134 = arith.constant dense<0.000000e+00> : vector<96x128xf32>
    %270 = tpu.matmul %267, %269, %cst_134 {dimension_numbers = #tpu.dot_dimension_numbers<[1], [0], [0], [1], [0, 0, 1, 1], [], []>} : vector<96x128xf32>, vector<128x128xf32>, vector<96x128xf32> -> vector<96x128xf32>
    %271 = arith.addf %266, %270 : vector<96x128xf32>
    %c112 = arith.constant 112 : index
    %c0_135 = arith.constant 0 : index
    %272 = vector.load %arg9[%c112, %c0_135] : memref<512x128xf32, #tpu.memory_space<vmem>>, vector<96x128xf32>
    %c3_136 = arith.constant 3 : index
    %c0_137 = arith.constant 0 : index
    %c0_138 = arith.constant 0 : index
    %273 = vector.load %arg5[%c3_136, %c0_137, %c0_138] : memref<9x128x128xf32, #tpu.memory_space<vmem>>, vector<1x128x128xf32>
    %274 = vector.shape_cast %273 : vector<1x128x128xf32> to vector<128x128xf32>
    %cst_139 = arith.constant dense<0.000000e+00> : vector<96x128xf32>
    %275 = tpu.matmul %272, %274, %cst_139 {dimension_numbers = #tpu.dot_dimension_numbers<[1], [0], [0], [1], [0, 0, 1, 1], [], []>} : vector<96x128xf32>, vector<128x128xf32>, vector<96x128xf32> -> vector<96x128xf32>
    %276 = arith.addf %271, %275 : vector<96x128xf32>
    %c113 = arith.constant 113 : index
    %c0_140 = arith.constant 0 : index
    %277 = vector.load %arg9[%c113, %c0_140] : memref<512x128xf32, #tpu.memory_space<vmem>>, vector<96x128xf32>
    %c4_141 = arith.constant 4 : index
    %c0_142 = arith.constant 0 : index
    %c0_143 = arith.constant 0 : index
    %278 = vector.load %arg5[%c4_141, %c0_142, %c0_143] : memref<9x128x128xf32, #tpu.memory_space<vmem>>, vector<1x128x128xf32>
    %279 = vector.shape_cast %278 : vector<1x128x128xf32> to vector<128x128xf32>
    %cst_144 = arith.constant dense<0.000000e+00> : vector<96x128xf32>
    %280 = tpu.matmul %277, %279, %cst_144 {dimension_numbers = #tpu.dot_dimension_numbers<[1], [0], [0], [1], [0, 0, 1, 1], [], []>} : vector<96x128xf32>, vector<128x128xf32>, vector<96x128xf32> -> vector<96x128xf32>
    %281 = arith.addf %276, %280 : vector<96x128xf32>
    %c114 = arith.constant 114 : index
    %c0_145 = arith.constant 0 : index
    %282 = vector.load %arg9[%c114, %c0_145] : memref<512x128xf32, #tpu.memory_space<vmem>>, vector<96x128xf32>
    %c5_146 = arith.constant 5 : index
    %c0_147 = arith.constant 0 : index
    %c0_148 = arith.constant 0 : index
    %283 = vector.load %arg5[%c5_146, %c0_147, %c0_148] : memref<9x128x128xf32, #tpu.memory_space<vmem>>, vector<1x128x128xf32>
    %284 = vector.shape_cast %283 : vector<1x128x128xf32> to vector<128x128xf32>
    %cst_149 = arith.constant dense<0.000000e+00> : vector<96x128xf32>
    %285 = tpu.matmul %282, %284, %cst_149 {dimension_numbers = #tpu.dot_dimension_numbers<[1], [0], [0], [1], [0, 0, 1, 1], [], []>} : vector<96x128xf32>, vector<128x128xf32>, vector<96x128xf32> -> vector<96x128xf32>
    %286 = arith.addf %281, %285 : vector<96x128xf32>
    %c128_150 = arith.constant 128 : index
    %c0_151 = arith.constant 0 : index
    %287 = vector.load %arg9[%c128_150, %c0_151] : memref<512x128xf32, #tpu.memory_space<vmem>>, vector<96x128xf32>
    %c6_152 = arith.constant 6 : index
    %c0_153 = arith.constant 0 : index
    %c0_154 = arith.constant 0 : index
    %288 = vector.load %arg5[%c6_152, %c0_153, %c0_154] : memref<9x128x128xf32, #tpu.memory_space<vmem>>, vector<1x128x128xf32>
    %289 = vector.shape_cast %288 : vector<1x128x128xf32> to vector<128x128xf32>
    %cst_155 = arith.constant dense<0.000000e+00> : vector<96x128xf32>
    %290 = tpu.matmul %287, %289, %cst_155 {dimension_numbers = #tpu.dot_dimension_numbers<[1], [0], [0], [1], [0, 0, 1, 1], [], []>} : vector<96x128xf32>, vector<128x128xf32>, vector<96x128xf32> -> vector<96x128xf32>
    %291 = arith.addf %286, %290 : vector<96x128xf32>
    %c129_156 = arith.constant 129 : index
    %c0_157 = arith.constant 0 : index
    %292 = vector.load %arg9[%c129_156, %c0_157] : memref<512x128xf32, #tpu.memory_space<vmem>>, vector<96x128xf32>
    %c7_158 = arith.constant 7 : index
    %c0_159 = arith.constant 0 : index
    %c0_160 = arith.constant 0 : index
    %293 = vector.load %arg5[%c7_158, %c0_159, %c0_160] : memref<9x128x128xf32, #tpu.memory_space<vmem>>, vector<1x128x128xf32>
    %294 = vector.shape_cast %293 : vector<1x128x128xf32> to vector<128x128xf32>
    %cst_161 = arith.constant dense<0.000000e+00> : vector<96x128xf32>
    %295 = tpu.matmul %292, %294, %cst_161 {dimension_numbers = #tpu.dot_dimension_numbers<[1], [0], [0], [1], [0, 0, 1, 1], [], []>} : vector<96x128xf32>, vector<128x128xf32>, vector<96x128xf32> -> vector<96x128xf32>
    %296 = arith.addf %291, %295 : vector<96x128xf32>
    %c130_162 = arith.constant 130 : index
    %c0_163 = arith.constant 0 : index
    %297 = vector.load %arg9[%c130_162, %c0_163] : memref<512x128xf32, #tpu.memory_space<vmem>>, vector<96x128xf32>
    %c8_164 = arith.constant 8 : index
    %c0_165 = arith.constant 0 : index
    %c0_166 = arith.constant 0 : index
    %298 = vector.load %arg5[%c8_164, %c0_165, %c0_166] : memref<9x128x128xf32, #tpu.memory_space<vmem>>, vector<1x128x128xf32>
    %299 = vector.shape_cast %298 : vector<1x128x128xf32> to vector<128x128xf32>
    %cst_167 = arith.constant dense<0.000000e+00> : vector<96x128xf32>
    %300 = tpu.matmul %297, %299, %cst_167 {dimension_numbers = #tpu.dot_dimension_numbers<[1], [0], [0], [1], [0, 0, 1, 1], [], []>} : vector<96x128xf32>, vector<128x128xf32>, vector<96x128xf32> -> vector<96x128xf32>
    %301 = arith.addf %296, %300 : vector<96x128xf32>
    %302 = vector.broadcast %2 : vector<1x128xf32> to vector<96x128xf32>
    %303 = arith.addf %301, %302 : vector<96x128xf32>
    %cst_168 = arith.constant 0.000000e+00 : f32
    %304 = vector.broadcast %cst_168 : f32 to vector<96x128xf32>
    %305 = arith.maximumf %303, %304 : vector<96x128xf32>
    %c96_169 = arith.constant 96 : index
    %c0_170 = arith.constant 0 : index
    %306 = vector.load %arg10[%c96_169, %c0_170] : memref<384x128xf32, #tpu.memory_space<vmem>>, vector<96x128xf32>
    tpu.vector_store %arg10[%c96_169, %c0_170], %305 {strides = array<i32>} : memref<384x128xf32, #tpu.memory_space<vmem>>, vector<96x128xf32>,
    %c0_171 = arith.constant 0 : index
    %c0_172 = arith.constant 0 : index
    %307 = tpu.strided_load %arg10[%c0_171, %c0_172] {strides = array<i32: 2, 1>} : memref<384x128xf32, #tpu.memory_space<vmem>>, vector<96x128xf32>
    %c1_173 = arith.constant 1 : index
    %c0_174 = arith.constant 0 : index
    %308 = tpu.strided_load %arg10[%c1_173, %c0_174] {strides = array<i32: 2, 1>} : memref<384x128xf32, #tpu.memory_space<vmem>>, vector<96x128xf32>
    %309 = arith.maximumf %307, %308 : vector<96x128xf32>
    %310 = vector.extract_strided_slice %309 {offsets = [0, 0], sizes = [8, 128], strides = [1, 1]} : vector<96x128xf32> to vector<8x128xf32>
    %311 = vector.extract_strided_slice %309 {offsets = [8, 0], sizes = [8, 128], strides = [1, 1]} : vector<96x128xf32> to vector<8x128xf32>
    %312 = arith.maximumf %310, %311 : vector<8x128xf32>
    %313 = vector.extract_strided_slice %309 {offsets = [16, 0], sizes = [8, 128], strides = [1, 1]} : vector<96x128xf32> to vector<8x128xf32>
    %314 = vector.extract_strided_slice %309 {offsets = [24, 0], sizes = [8, 128], strides = [1, 1]} : vector<96x128xf32> to vector<8x128xf32>
    %315 = arith.maximumf %313, %314 : vector<8x128xf32>
    %316 = vector.extract_strided_slice %309 {offsets = [32, 0], sizes = [8, 128], strides = [1, 1]} : vector<96x128xf32> to vector<8x128xf32>
    %317 = vector.extract_strided_slice %309 {offsets = [40, 0], sizes = [8, 128], strides = [1, 1]} : vector<96x128xf32> to vector<8x128xf32>
    %318 = arith.maximumf %316, %317 : vector<8x128xf32>
    %319 = vector.extract_strided_slice %309 {offsets = [48, 0], sizes = [8, 128], strides = [1, 1]} : vector<96x128xf32> to vector<8x128xf32>
    %320 = vector.extract_strided_slice %309 {offsets = [56, 0], sizes = [8, 128], strides = [1, 1]} : vector<96x128xf32> to vector<8x128xf32>
    %321 = arith.maximumf %319, %320 : vector<8x128xf32>
    %322 = vector.extract_strided_slice %309 {offsets = [64, 0], sizes = [8, 128], strides = [1, 1]} : vector<96x128xf32> to vector<8x128xf32>
    %323 = vector.extract_strided_slice %309 {offsets = [72, 0], sizes = [8, 128], strides = [1, 1]} : vector<96x128xf32> to vector<8x128xf32>
    %324 = arith.maximumf %322, %323 : vector<8x128xf32>
    %325 = vector.extract_strided_slice %309 {offsets = [80, 0], sizes = [8, 128], strides = [1, 1]} : vector<96x128xf32> to vector<8x128xf32>
    %326 = vector.extract_strided_slice %309 {offsets = [88, 0], sizes = [8, 128], strides = [1, 1]} : vector<96x128xf32> to vector<8x128xf32>
    %327 = arith.maximumf %325, %326 : vector<8x128xf32>
    %328 = tpu.concatenate %312, %315, %318, %321, %324, %327 in 0 : vector<8x128xf32>, vector<8x128xf32>, vector<8x128xf32>, vector<8x128xf32>, vector<8x128xf32>, vector<8x128xf32> -> vector<48x128xf32>
    %c0_175 = arith.constant 0 : index
    %c0_176 = arith.constant 0 : index
    %c0_177 = arith.constant 0 : index
    %329 = vector.load %arg7[%c0_175, %c0_176, %c0_177] : memref<2x48x128xf32, #tpu.memory_space<vmem>>, vector<1x48x128xf32>
    %330 = vector.shape_cast %329 : vector<1x48x128xf32> to vector<48x128xf32>
    %331 = vector.shape_cast %328 : vector<48x128xf32> to vector<1x48x128xf32>
    tpu.vector_store %arg7[%c0_175, %c0_176, %c0_177], %331 {strides = array<i32>} : memref<2x48x128xf32, #tpu.memory_space<vmem>>, vector<1x48x128xf32>,
    %c256_178 = arith.constant 256 : index
    %c0_179 = arith.constant 0 : index
    %332 = vector.load %arg9[%c256_178, %c0_179] : memref<512x128xf32, #tpu.memory_space<vmem>>, vector<96x128xf32>
    %c0_180 = arith.constant 0 : index
    %c0_181 = arith.constant 0 : index
    %c0_182 = arith.constant 0 : index
    %333 = vector.load %arg5[%c0_180, %c0_181, %c0_182] : memref<9x128x128xf32, #tpu.memory_space<vmem>>, vector<1x128x128xf32>
    %334 = vector.shape_cast %333 : vector<1x128x128xf32> to vector<128x128xf32>
    %cst_183 = arith.constant dense<0.000000e+00> : vector<96x128xf32>
    %335 = tpu.matmul %332, %334, %cst_183 {dimension_numbers = #tpu.dot_dimension_numbers<[1], [0], [0], [1], [0, 0, 1, 1], [], []>} : vector<96x128xf32>, vector<128x128xf32>, vector<96x128xf32> -> vector<96x128xf32>
    %c257_184 = arith.constant 257 : index
    %c0_185 = arith.constant 0 : index
    %336 = vector.load %arg9[%c257_184, %c0_185] : memref<512x128xf32, #tpu.memory_space<vmem>>, vector<96x128xf32>
    %c1_186 = arith.constant 1 : index
    %c0_187 = arith.constant 0 : index
    %c0_188 = arith.constant 0 : index
    %337 = vector.load %arg5[%c1_186, %c0_187, %c0_188] : memref<9x128x128xf32, #tpu.memory_space<vmem>>, vector<1x128x128xf32>
    %338 = vector.shape_cast %337 : vector<1x128x128xf32> to vector<128x128xf32>
    %cst_189 = arith.constant dense<0.000000e+00> : vector<96x128xf32>
    %339 = tpu.matmul %336, %338, %cst_189 {dimension_numbers = #tpu.dot_dimension_numbers<[1], [0], [0], [1], [0, 0, 1, 1], [], []>} : vector<96x128xf32>, vector<128x128xf32>, vector<96x128xf32> -> vector<96x128xf32>
    %340 = arith.addf %335, %339 : vector<96x128xf32>
    %c258_190 = arith.constant 258 : index
    %c0_191 = arith.constant 0 : index
    %341 = vector.load %arg9[%c258_190, %c0_191] : memref<512x128xf32, #tpu.memory_space<vmem>>, vector<96x128xf32>
    %c2_192 = arith.constant 2 : index
    %c0_193 = arith.constant 0 : index
    %c0_194 = arith.constant 0 : index
    %342 = vector.load %arg5[%c2_192, %c0_193, %c0_194] : memref<9x128x128xf32, #tpu.memory_space<vmem>>, vector<1x128x128xf32>
    %343 = vector.shape_cast %342 : vector<1x128x128xf32> to vector<128x128xf32>
    %cst_195 = arith.constant dense<0.000000e+00> : vector<96x128xf32>
    %344 = tpu.matmul %341, %343, %cst_195 {dimension_numbers = #tpu.dot_dimension_numbers<[1], [0], [0], [1], [0, 0, 1, 1], [], []>} : vector<96x128xf32>, vector<128x128xf32>, vector<96x128xf32> -> vector<96x128xf32>
    %345 = arith.addf %340, %344 : vector<96x128xf32>
    %c272_196 = arith.constant 272 : index
    %c0_197 = arith.constant 0 : index
    %346 = vector.load %arg9[%c272_196, %c0_197] : memref<512x128xf32, #tpu.memory_space<vmem>>, vector<96x128xf32>
    %c3_198 = arith.constant 3 : index
    %c0_199 = arith.constant 0 : index
    %c0_200 = arith.constant 0 : index
    %347 = vector.load %arg5[%c3_198, %c0_199, %c0_200] : memref<9x128x128xf32, #tpu.memory_space<vmem>>, vector<1x128x128xf32>
    %348 = vector.shape_cast %347 : vector<1x128x128xf32> to vector<128x128xf32>
    %cst_201 = arith.constant dense<0.000000e+00> : vector<96x128xf32>
    %349 = tpu.matmul %346, %348, %cst_201 {dimension_numbers = #tpu.dot_dimension_numbers<[1], [0], [0], [1], [0, 0, 1, 1], [], []>} : vector<96x128xf32>, vector<128x128xf32>, vector<96x128xf32> -> vector<96x128xf32>
    %350 = arith.addf %345, %349 : vector<96x128xf32>
    %c273_202 = arith.constant 273 : index
    %c0_203 = arith.constant 0 : index
    %351 = vector.load %arg9[%c273_202, %c0_203] : memref<512x128xf32, #tpu.memory_space<vmem>>, vector<96x128xf32>
    %c4_204 = arith.constant 4 : index
    %c0_205 = arith.constant 0 : index
    %c0_206 = arith.constant 0 : index
    %352 = vector.load %arg5[%c4_204, %c0_205, %c0_206] : memref<9x128x128xf32, #tpu.memory_space<vmem>>, vector<1x128x128xf32>
    %353 = vector.shape_cast %352 : vector<1x128x128xf32> to vector<128x128xf32>
    %cst_207 = arith.constant dense<0.000000e+00> : vector<96x128xf32>
    %354 = tpu.matmul %351, %353, %cst_207 {dimension_numbers = #tpu.dot_dimension_numbers<[1], [0], [0], [1], [0, 0, 1, 1], [], []>} : vector<96x128xf32>, vector<128x128xf32>, vector<96x128xf32> -> vector<96x128xf32>
    %355 = arith.addf %350, %354 : vector<96x128xf32>
    %c274_208 = arith.constant 274 : index
    %c0_209 = arith.constant 0 : index
    %356 = vector.load %arg9[%c274_208, %c0_209] : memref<512x128xf32, #tpu.memory_space<vmem>>, vector<96x128xf32>
    %c5_210 = arith.constant 5 : index
    %c0_211 = arith.constant 0 : index
    %c0_212 = arith.constant 0 : index
    %357 = vector.load %arg5[%c5_210, %c0_211, %c0_212] : memref<9x128x128xf32, #tpu.memory_space<vmem>>, vector<1x128x128xf32>
    %358 = vector.shape_cast %357 : vector<1x128x128xf32> to vector<128x128xf32>
    %cst_213 = arith.constant dense<0.000000e+00> : vector<96x128xf32>
    %359 = tpu.matmul %356, %358, %cst_213 {dimension_numbers = #tpu.dot_dimension_numbers<[1], [0], [0], [1], [0, 0, 1, 1], [], []>} : vector<96x128xf32>, vector<128x128xf32>, vector<96x128xf32> -> vector<96x128xf32>
    %360 = arith.addf %355, %359 : vector<96x128xf32>
    %c288_214 = arith.constant 288 : index
    %c0_215 = arith.constant 0 : index
    %361 = vector.load %arg9[%c288_214, %c0_215] : memref<512x128xf32, #tpu.memory_space<vmem>>, vector<96x128xf32>
    %c6_216 = arith.constant 6 : index
    %c0_217 = arith.constant 0 : index
    %c0_218 = arith.constant 0 : index
    %362 = vector.load %arg5[%c6_216, %c0_217, %c0_218] : memref<9x128x128xf32, #tpu.memory_space<vmem>>, vector<1x128x128xf32>
    %363 = vector.shape_cast %362 : vector<1x128x128xf32> to vector<128x128xf32>
    %cst_219 = arith.constant dense<0.000000e+00> : vector<96x128xf32>
    %364 = tpu.matmul %361, %363, %cst_219 {dimension_numbers = #tpu.dot_dimension_numbers<[1], [0], [0], [1], [0, 0, 1, 1], [], []>} : vector<96x128xf32>, vector<128x128xf32>, vector<96x128xf32> -> vector<96x128xf32>
    %365 = arith.addf %360, %364 : vector<96x128xf32>
    %c289_220 = arith.constant 289 : index
    %c0_221 = arith.constant 0 : index
    %366 = vector.load %arg9[%c289_220, %c0_221] : memref<512x128xf32, #tpu.memory_space<vmem>>, vector<96x128xf32>
    %c7_222 = arith.constant 7 : index
    %c0_223 = arith.constant 0 : index
    %c0_224 = arith.constant 0 : index
    %367 = vector.load %arg5[%c7_222, %c0_223, %c0_224] : memref<9x128x128xf32, #tpu.memory_space<vmem>>, vector<1x128x128xf32>
    %368 = vector.shape_cast %367 : vector<1x128x128xf32> to vector<128x128xf32>
    %cst_225 = arith.constant dense<0.000000e+00> : vector<96x128xf32>
    %369 = tpu.matmul %366, %368, %cst_225 {dimension_numbers = #tpu.dot_dimension_numbers<[1], [0], [0], [1], [0, 0, 1, 1], [], []>} : vector<96x128xf32>, vector<128x128xf32>, vector<96x128xf32> -> vector<96x128xf32>
    %370 = arith.addf %365, %369 : vector<96x128xf32>
    %c290_226 = arith.constant 290 : index
    %c0_227 = arith.constant 0 : index
    %371 = vector.load %arg9[%c290_226, %c0_227] : memref<512x128xf32, #tpu.memory_space<vmem>>, vector<96x128xf32>
    %c8_228 = arith.constant 8 : index
    %c0_229 = arith.constant 0 : index
    %c0_230 = arith.constant 0 : index
    %372 = vector.load %arg5[%c8_228, %c0_229, %c0_230] : memref<9x128x128xf32, #tpu.memory_space<vmem>>, vector<1x128x128xf32>
    %373 = vector.shape_cast %372 : vector<1x128x128xf32> to vector<128x128xf32>
    %cst_231 = arith.constant dense<0.000000e+00> : vector<96x128xf32>
    %374 = tpu.matmul %371, %373, %cst_231 {dimension_numbers = #tpu.dot_dimension_numbers<[1], [0], [0], [1], [0, 0, 1, 1], [], []>} : vector<96x128xf32>, vector<128x128xf32>, vector<96x128xf32> -> vector<96x128xf32>
    %375 = arith.addf %370, %374 : vector<96x128xf32>
    %376 = vector.broadcast %2 : vector<1x128xf32> to vector<96x128xf32>
    %377 = arith.addf %375, %376 : vector<96x128xf32>
    %cst_232 = arith.constant 0.000000e+00 : f32
    %378 = vector.broadcast %cst_232 : f32 to vector<96x128xf32>
    %379 = arith.maximumf %377, %378 : vector<96x128xf32>
    %c192 = arith.constant 192 : index
    %c0_233 = arith.constant 0 : index
    %380 = vector.load %arg10[%c192, %c0_233] : memref<384x128xf32, #tpu.memory_space<vmem>>, vector<96x128xf32>
    tpu.vector_store %arg10[%c192, %c0_233], %379 {strides = array<i32>} : memref<384x128xf32, #tpu.memory_space<vmem>>, vector<96x128xf32>,
    %c352 = arith.constant 352 : index
    %c0_234 = arith.constant 0 : index
    %381 = vector.load %arg9[%c352, %c0_234] : memref<512x128xf32, #tpu.memory_space<vmem>>, vector<96x128xf32>
    %c0_235 = arith.constant 0 : index
    %c0_236 = arith.constant 0 : index
    %c0_237 = arith.constant 0 : index
    %382 = vector.load %arg5[%c0_235, %c0_236, %c0_237] : memref<9x128x128xf32, #tpu.memory_space<vmem>>, vector<1x128x128xf32>
    %383 = vector.shape_cast %382 : vector<1x128x128xf32> to vector<128x128xf32>
    %cst_238 = arith.constant dense<0.000000e+00> : vector<96x128xf32>
    %384 = tpu.matmul %381, %383, %cst_238 {dimension_numbers = #tpu.dot_dimension_numbers<[1], [0], [0], [1], [0, 0, 1, 1], [], []>} : vector<96x128xf32>, vector<128x128xf32>, vector<96x128xf32> -> vector<96x128xf32>
    %c353 = arith.constant 353 : index
    %c0_239 = arith.constant 0 : index
    %385 = vector.load %arg9[%c353, %c0_239] : memref<512x128xf32, #tpu.memory_space<vmem>>, vector<96x128xf32>
    %c1_240 = arith.constant 1 : index
    %c0_241 = arith.constant 0 : index
    %c0_242 = arith.constant 0 : index
    %386 = vector.load %arg5[%c1_240, %c0_241, %c0_242] : memref<9x128x128xf32, #tpu.memory_space<vmem>>, vector<1x128x128xf32>
    %387 = vector.shape_cast %386 : vector<1x128x128xf32> to vector<128x128xf32>
    %cst_243 = arith.constant dense<0.000000e+00> : vector<96x128xf32>
    %388 = tpu.matmul %385, %387, %cst_243 {dimension_numbers = #tpu.dot_dimension_numbers<[1], [0], [0], [1], [0, 0, 1, 1], [], []>} : vector<96x128xf32>, vector<128x128xf32>, vector<96x128xf32> -> vector<96x128xf32>
    %389 = arith.addf %384, %388 : vector<96x128xf32>
    %c354 = arith.constant 354 : index
    %c0_244 = arith.constant 0 : index
    %390 = vector.load %arg9[%c354, %c0_244] : memref<512x128xf32, #tpu.memory_space<vmem>>, vector<96x128xf32>
    %c2_245 = arith.constant 2 : index
    %c0_246 = arith.constant 0 : index
    %c0_247 = arith.constant 0 : index
    %391 = vector.load %arg5[%c2_245, %c0_246, %c0_247] : memref<9x128x128xf32, #tpu.memory_space<vmem>>, vector<1x128x128xf32>
    %392 = vector.shape_cast %391 : vector<1x128x128xf32> to vector<128x128xf32>
    %cst_248 = arith.constant dense<0.000000e+00> : vector<96x128xf32>
    %393 = tpu.matmul %390, %392, %cst_248 {dimension_numbers = #tpu.dot_dimension_numbers<[1], [0], [0], [1], [0, 0, 1, 1], [], []>} : vector<96x128xf32>, vector<128x128xf32>, vector<96x128xf32> -> vector<96x128xf32>
    %394 = arith.addf %389, %393 : vector<96x128xf32>
    %c368 = arith.constant 368 : index
    %c0_249 = arith.constant 0 : index
    %395 = vector.load %arg9[%c368, %c0_249] : memref<512x128xf32, #tpu.memory_space<vmem>>, vector<96x128xf32>
    %c3_250 = arith.constant 3 : index
    %c0_251 = arith.constant 0 : index
    %c0_252 = arith.constant 0 : index
    %396 = vector.load %arg5[%c3_250, %c0_251, %c0_252] : memref<9x128x128xf32, #tpu.memory_space<vmem>>, vector<1x128x128xf32>
    %397 = vector.shape_cast %396 : vector<1x128x128xf32> to vector<128x128xf32>
    %cst_253 = arith.constant dense<0.000000e+00> : vector<96x128xf32>
    %398 = tpu.matmul %395, %397, %cst_253 {dimension_numbers = #tpu.dot_dimension_numbers<[1], [0], [0], [1], [0, 0, 1, 1], [], []>} : vector<96x128xf32>, vector<128x128xf32>, vector<96x128xf32> -> vector<96x128xf32>
    %399 = arith.addf %394, %398 : vector<96x128xf32>
    %c369 = arith.constant 369 : index
    %c0_254 = arith.constant 0 : index
    %400 = vector.load %arg9[%c369, %c0_254] : memref<512x128xf32, #tpu.memory_space<vmem>>, vector<96x128xf32>
    %c4_255 = arith.constant 4 : index
    %c0_256 = arith.constant 0 : index
    %c0_257 = arith.constant 0 : index
    %401 = vector.load %arg5[%c4_255, %c0_256, %c0_257] : memref<9x128x128xf32, #tpu.memory_space<vmem>>, vector<1x128x128xf32>
    %402 = vector.shape_cast %401 : vector<1x128x128xf32> to vector<128x128xf32>
    %cst_258 = arith.constant dense<0.000000e+00> : vector<96x128xf32>
    %403 = tpu.matmul %400, %402, %cst_258 {dimension_numbers = #tpu.dot_dimension_numbers<[1], [0], [0], [1], [0, 0, 1, 1], [], []>} : vector<96x128xf32>, vector<128x128xf32>, vector<96x128xf32> -> vector<96x128xf32>
    %404 = arith.addf %399, %403 : vector<96x128xf32>
    %c370 = arith.constant 370 : index
    %c0_259 = arith.constant 0 : index
    %405 = vector.load %arg9[%c370, %c0_259] : memref<512x128xf32, #tpu.memory_space<vmem>>, vector<96x128xf32>
    %c5_260 = arith.constant 5 : index
    %c0_261 = arith.constant 0 : index
    %c0_262 = arith.constant 0 : index
    %406 = vector.load %arg5[%c5_260, %c0_261, %c0_262] : memref<9x128x128xf32, #tpu.memory_space<vmem>>, vector<1x128x128xf32>
    %407 = vector.shape_cast %406 : vector<1x128x128xf32> to vector<128x128xf32>
    %cst_263 = arith.constant dense<0.000000e+00> : vector<96x128xf32>
    %408 = tpu.matmul %405, %407, %cst_263 {dimension_numbers = #tpu.dot_dimension_numbers<[1], [0], [0], [1], [0, 0, 1, 1], [], []>} : vector<96x128xf32>, vector<128x128xf32>, vector<96x128xf32> -> vector<96x128xf32>
    %409 = arith.addf %404, %408 : vector<96x128xf32>
    %c384_264 = arith.constant 384 : index
    %c0_265 = arith.constant 0 : index
    %410 = vector.load %arg9[%c384_264, %c0_265] : memref<512x128xf32, #tpu.memory_space<vmem>>, vector<96x128xf32>
    %c6_266 = arith.constant 6 : index
    %c0_267 = arith.constant 0 : index
    %c0_268 = arith.constant 0 : index
    %411 = vector.load %arg5[%c6_266, %c0_267, %c0_268] : memref<9x128x128xf32, #tpu.memory_space<vmem>>, vector<1x128x128xf32>
    %412 = vector.shape_cast %411 : vector<1x128x128xf32> to vector<128x128xf32>
    %cst_269 = arith.constant dense<0.000000e+00> : vector<96x128xf32>
    %413 = tpu.matmul %410, %412, %cst_269 {dimension_numbers = #tpu.dot_dimension_numbers<[1], [0], [0], [1], [0, 0, 1, 1], [], []>} : vector<96x128xf32>, vector<128x128xf32>, vector<96x128xf32> -> vector<96x128xf32>
    %414 = arith.addf %409, %413 : vector<96x128xf32>
    %c385_270 = arith.constant 385 : index
    %c0_271 = arith.constant 0 : index
    %415 = vector.load %arg9[%c385_270, %c0_271] : memref<512x128xf32, #tpu.memory_space<vmem>>, vector<96x128xf32>
    %c7_272 = arith.constant 7 : index
    %c0_273 = arith.constant 0 : index
    %c0_274 = arith.constant 0 : index
    %416 = vector.load %arg5[%c7_272, %c0_273, %c0_274] : memref<9x128x128xf32, #tpu.memory_space<vmem>>, vector<1x128x128xf32>
    %417 = vector.shape_cast %416 : vector<1x128x128xf32> to vector<128x128xf32>
    %cst_275 = arith.constant dense<0.000000e+00> : vector<96x128xf32>
    %418 = tpu.matmul %415, %417, %cst_275 {dimension_numbers = #tpu.dot_dimension_numbers<[1], [0], [0], [1], [0, 0, 1, 1], [], []>} : vector<96x128xf32>, vector<128x128xf32>, vector<96x128xf32> -> vector<96x128xf32>
    %419 = arith.addf %414, %418 : vector<96x128xf32>
    %c386_276 = arith.constant 386 : index
    %c0_277 = arith.constant 0 : index
    %420 = vector.load %arg9[%c386_276, %c0_277] : memref<512x128xf32, #tpu.memory_space<vmem>>, vector<96x128xf32>
    %c8_278 = arith.constant 8 : index
    %c0_279 = arith.constant 0 : index
    %c0_280 = arith.constant 0 : index
    %421 = vector.load %arg5[%c8_278, %c0_279, %c0_280] : memref<9x128x128xf32, #tpu.memory_space<vmem>>, vector<1x128x128xf32>
    %422 = vector.shape_cast %421 : vector<1x128x128xf32> to vector<128x128xf32>
    %cst_281 = arith.constant dense<0.000000e+00> : vector<96x128xf32>
    %423 = tpu.matmul %420, %422, %cst_281 {dimension_numbers = #tpu.dot_dimension_numbers<[1], [0], [0], [1], [0, 0, 1, 1], [], []>} : vector<96x128xf32>, vector<128x128xf32>, vector<96x128xf32> -> vector<96x128xf32>
    %424 = arith.addf %419, %423 : vector<96x128xf32>
    %425 = vector.broadcast %2 : vector<1x128xf32> to vector<96x128xf32>
    %426 = arith.addf %424, %425 : vector<96x128xf32>
    %cst_282 = arith.constant 0.000000e+00 : f32
    %427 = vector.broadcast %cst_282 : f32 to vector<96x128xf32>
    %428 = arith.maximumf %426, %427 : vector<96x128xf32>
    %c288_283 = arith.constant 288 : index
    %c0_284 = arith.constant 0 : index
    %429 = vector.load %arg10[%c288_283, %c0_284] : memref<384x128xf32, #tpu.memory_space<vmem>>, vector<96x128xf32>
    tpu.vector_store %arg10[%c288_283, %c0_284], %428 {strides = array<i32>} : memref<384x128xf32, #tpu.memory_space<vmem>>, vector<96x128xf32>,
    %c192_285 = arith.constant 192 : index
    %c0_286 = arith.constant 0 : index
    %430 = tpu.strided_load %arg10[%c192_285, %c0_286] {strides = array<i32: 2, 1>} : memref<384x128xf32, #tpu.memory_space<vmem>>, vector<96x128xf32>
    %c193 = arith.constant 193 : index
    %c0_287 = arith.constant 0 : index
    %431 = tpu.strided_load %arg10[%c193, %c0_287] {strides = array<i32: 2, 1>} : memref<384x128xf32, #tpu.memory_space<vmem>>, vector<96x128xf32>
    %432 = arith.maximumf %430, %431 : vector<96x128xf32>
    %433 = vector.extract_strided_slice %432 {offsets = [0, 0], sizes = [8, 128], strides = [1, 1]} : vector<96x128xf32> to vector<8x128xf32>
    %434 = vector.extract_strided_slice %432 {offsets = [8, 0], sizes = [8, 128], strides = [1, 1]} : vector<96x128xf32> to vector<8x128xf32>
    %435 = arith.maximumf %433, %434 : vector<8x128xf32>
    %436 = vector.extract_strided_slice %432 {offsets = [16, 0], sizes = [8, 128], strides = [1, 1]} : vector<96x128xf32> to vector<8x128xf32>
    %437 = vector.extract_strided_slice %432 {offsets = [24, 0], sizes = [8, 128], strides = [1, 1]} : vector<96x128xf32> to vector<8x128xf32>
    %438 = arith.maximumf %436, %437 : vector<8x128xf32>
    %439 = vector.extract_strided_slice %432 {offsets = [32, 0], sizes = [8, 128], strides = [1, 1]} : vector<96x128xf32> to vector<8x128xf32>
    %440 = vector.extract_strided_slice %432 {offsets = [40, 0], sizes = [8, 128], strides = [1, 1]} : vector<96x128xf32> to vector<8x128xf32>
    %441 = arith.maximumf %439, %440 : vector<8x128xf32>
    %442 = vector.extract_strided_slice %432 {offsets = [48, 0], sizes = [8, 128], strides = [1, 1]} : vector<96x128xf32> to vector<8x128xf32>
    %443 = vector.extract_strided_slice %432 {offsets = [56, 0], sizes = [8, 128], strides = [1, 1]} : vector<96x128xf32> to vector<8x128xf32>
    %444 = arith.maximumf %442, %443 : vector<8x128xf32>
    %445 = vector.extract_strided_slice %432 {offsets = [64, 0], sizes = [8, 128], strides = [1, 1]} : vector<96x128xf32> to vector<8x128xf32>
    %446 = vector.extract_strided_slice %432 {offsets = [72, 0], sizes = [8, 128], strides = [1, 1]} : vector<96x128xf32> to vector<8x128xf32>
    %447 = arith.maximumf %445, %446 : vector<8x128xf32>
    %448 = vector.extract_strided_slice %432 {offsets = [80, 0], sizes = [8, 128], strides = [1, 1]} : vector<96x128xf32> to vector<8x128xf32>
    %449 = vector.extract_strided_slice %432 {offsets = [88, 0], sizes = [8, 128], strides = [1, 1]} : vector<96x128xf32> to vector<8x128xf32>
    %450 = arith.maximumf %448, %449 : vector<8x128xf32>
    %451 = tpu.concatenate %435, %438, %441, %444, %447, %450 in 0 : vector<8x128xf32>, vector<8x128xf32>, vector<8x128xf32>, vector<8x128xf32>, vector<8x128xf32>, vector<8x128xf32> -> vector<48x128xf32>
    %c1_288 = arith.constant 1 : index
    %c0_289 = arith.constant 0 : index
    %c0_290 = arith.constant 0 : index
    %452 = vector.load %arg7[%c1_288, %c0_289, %c0_290] : memref<2x48x128xf32, #tpu.memory_space<vmem>>, vector<1x48x128xf32>
    %453 = vector.shape_cast %452 : vector<1x48x128xf32> to vector<48x128xf32>
    %454 = vector.shape_cast %451 : vector<48x128xf32> to vector<1x48x128xf32>
    tpu.vector_store %arg7[%c1_288, %c0_289, %c0_290], %454 {strides = array<i32>} : memref<2x48x128xf32, #tpu.memory_space<vmem>>, vector<1x48x128xf32>,
    return
  }
  func.func @transform_0(%arg0: i32) -> (i32, i32) {
    %c0_i32 = arith.constant 0 : i32
    %c0_i32_0 = arith.constant 0 : i32
    return %arg0, %c0_i32 : i32, i32
  }
  func.func @transform_1(%arg0: i32) -> (i32, i32) {
    %c0_i32 = arith.constant 0 : i32
    %c0_i32_0 = arith.constant 0 : i32
    %c0_i32_1 = arith.constant 0 : i32
    return %c0_i32, %c0_i32_0 : i32, i32
  }
  func.func @transform_2(%arg0: i32) -> (i32, i32) {
    %c0_i32 = arith.constant 0 : i32
    %c0_i32_0 = arith.constant 0 : i32
    %c0_i32_1 = arith.constant 0 : i32
    return %c0_i32, %c0_i32_0 : i32, i32
  }
  func.func @transform_3(%arg0: i32) -> (i32, i32) {
    %c0_i32 = arith.constant 0 : i32
    %c0_i32_0 = arith.constant 0 : i32
    %c0_i32_1 = arith.constant 0 : i32
    return %c0_i32, %c0_i32_0 : i32, i32
  }
  func.func @transform_4(%arg0: i32) -> (i32, i32, i32) {
    %c0_i32 = arith.constant 0 : i32
    %c0_i32_0 = arith.constant 0 : i32
    %c0_i32_1 = arith.constant 0 : i32
    %c0_i32_2 = arith.constant 0 : i32
    return %c0_i32, %c0_i32_0, %c0_i32_1 : i32, i32, i32
  }
  func.func @transform_5(%arg0: i32) -> (i32, i32) {
    %c0_i32 = arith.constant 0 : i32
    %c0_i32_0 = arith.constant 0 : i32
    %c0_i32_1 = arith.constant 0 : i32
    return %c0_i32, %c0_i32_0 : i32, i32
  }
  func.func @transform_6(%arg0: i32) -> (i32, i32, i32) {
    %c0_i32 = arith.constant 0 : i32
    %c0_i32_0 = arith.constant 0 : i32
    %c0_i32_1 = arith.constant 0 : i32
    return %arg0, %c0_i32, %c0_i32_0 : i32, i32, i32
  }
}

module attributes {stable_mosaic.version = 11 : i64} {
  func.func @_mlp_kernel(%arg0: i32, %arg1: memref<8x1536xf32, #tpu.memory_space<vmem>>, %arg2: memref<1536x128xf32, #tpu.memory_space<vmem>>, %arg3: memref<1x128xf32, #tpu.memory_space<vmem>>, %arg4: memref<128x128xf32, #tpu.memory_space<vmem>>, %arg5: memref<1x128xf32, #tpu.memory_space<vmem>>, %arg6: memref<128x128xf32, #tpu.memory_space<vmem>>, %arg7: memref<1x128xf32, #tpu.memory_space<vmem>>, %arg8: memref<8x128xf32, #tpu.memory_space<vmem>>, %arg9: memref<8x128xf32, #tpu.memory_space<vmem>>) attributes {dimension_semantics = [#tpu.dimension_semantics<parallel>], iteration_bounds = array<i64: 1>, scalar_prefetch = 0 : i64, scratch_operands = 0 : i64, tpu.core_type = #tpu.core_type<tc>, window_params = [{transform_indices = @transform_0, window_bounds = array<i64: 8, 1536>}, {pipeline_mode = #tpu.pipeline_mode<synchronous>, transform_indices = @transform_1, window_bounds = array<i64: 1536, 128>}, {pipeline_mode = #tpu.pipeline_mode<synchronous>, transform_indices = @transform_2, window_bounds = array<i64: 1, 128>}, {pipeline_mode = #tpu.pipeline_mode<synchronous>, transform_indices = @transform_3, window_bounds = array<i64: 128, 128>}, {pipeline_mode = #tpu.pipeline_mode<synchronous>, transform_indices = @transform_4, window_bounds = array<i64: 1, 128>}, {pipeline_mode = #tpu.pipeline_mode<synchronous>, transform_indices = @transform_5, window_bounds = array<i64: 128, 128>}, {pipeline_mode = #tpu.pipeline_mode<synchronous>, transform_indices = @transform_6, window_bounds = array<i64: 1, 128>}, {transform_indices = @transform_7, window_bounds = array<i64: 8, 128>}, {transform_indices = @transform_8, window_bounds = array<i64: 8, 128>}]} {
    %c0 = arith.constant 0 : index
    %c0_0 = arith.constant 0 : index
    %0 = vector.load %arg1[%c0, %c0_0] : memref<8x1536xf32, #tpu.memory_space<vmem>>, vector<8x1536xf32>
    %c0_1 = arith.constant 0 : index
    %c0_2 = arith.constant 0 : index
    %1 = vector.load %arg2[%c0_1, %c0_2] : memref<1536x128xf32, #tpu.memory_space<vmem>>, vector<1536x128xf32>
    %cst = arith.constant dense<0.000000e+00> : vector<8x128xf32>
    %2 = tpu.matmul %0, %1, %cst {dimension_numbers = #tpu.dot_dimension_numbers<[1], [0], [0], [1], [0, 0, 1, 1], [], []>} : vector<8x1536xf32>, vector<1536x128xf32>, vector<8x128xf32> -> vector<8x128xf32>
    %c0_3 = arith.constant 0 : index
    %c0_4 = arith.constant 0 : index
    %3 = vector.load %arg3[%c0_3, %c0_4] : memref<1x128xf32, #tpu.memory_space<vmem>>, vector<1x128xf32>
    %4 = vector.broadcast %3 : vector<1x128xf32> to vector<8x128xf32>
    %5 = arith.addf %2, %4 : vector<8x128xf32>
    %cst_5 = arith.constant 0.000000e+00 : f32
    %6 = vector.broadcast %cst_5 : f32 to vector<8x128xf32>
    %7 = arith.maximumf %5, %6 : vector<8x128xf32>
    %c0_6 = arith.constant 0 : index
    %c0_7 = arith.constant 0 : index
    %8 = vector.load %arg4[%c0_6, %c0_7] : memref<128x128xf32, #tpu.memory_space<vmem>>, vector<128x128xf32>
    %cst_8 = arith.constant dense<0.000000e+00> : vector<8x128xf32>
    %9 = tpu.matmul %7, %8, %cst_8 {dimension_numbers = #tpu.dot_dimension_numbers<[1], [0], [0], [1], [0, 0, 1, 1], [], []>} : vector<8x128xf32>, vector<128x128xf32>, vector<8x128xf32> -> vector<8x128xf32>
    %c0_9 = arith.constant 0 : index
    %c0_10 = arith.constant 0 : index
    %10 = vector.load %arg5[%c0_9, %c0_10] : memref<1x128xf32, #tpu.memory_space<vmem>>, vector<1x128xf32>
    %11 = vector.broadcast %10 : vector<1x128xf32> to vector<8x128xf32>
    %12 = arith.addf %9, %11 : vector<8x128xf32>
    %cst_11 = arith.constant 0.000000e+00 : f32
    %13 = vector.broadcast %cst_11 : f32 to vector<8x128xf32>
    %14 = arith.maximumf %12, %13 : vector<8x128xf32>
    %c0_12 = arith.constant 0 : index
    %c0_13 = arith.constant 0 : index
    %15 = vector.load %arg6[%c0_12, %c0_13] : memref<128x128xf32, #tpu.memory_space<vmem>>, vector<128x128xf32>
    %cst_14 = arith.constant dense<0.000000e+00> : vector<8x128xf32>
    %16 = tpu.matmul %14, %15, %cst_14 {dimension_numbers = #tpu.dot_dimension_numbers<[1], [0], [0], [1], [0, 0, 1, 1], [], []>} : vector<8x128xf32>, vector<128x128xf32>, vector<8x128xf32> -> vector<8x128xf32>
    %c0_15 = arith.constant 0 : index
    %c0_16 = arith.constant 0 : index
    %17 = vector.load %arg7[%c0_15, %c0_16] : memref<1x128xf32, #tpu.memory_space<vmem>>, vector<1x128xf32>
    %18 = vector.broadcast %17 : vector<1x128xf32> to vector<8x128xf32>
    %19 = arith.addf %16, %18 : vector<8x128xf32>
    %c0_17 = arith.constant 0 : index
    %c0_18 = arith.constant 0 : index
    %20 = vector.load %arg9[%c0_17, %c0_18] : memref<8x128xf32, #tpu.memory_space<vmem>>, vector<8x128xf32>
    tpu.vector_store %arg9[%c0_17, %c0_18], %14 {strides = array<i32>} : memref<8x128xf32, #tpu.memory_space<vmem>>, vector<8x128xf32>,
    %c0_19 = arith.constant 0 : index
    %c0_20 = arith.constant 0 : index
    %21 = vector.load %arg8[%c0_19, %c0_20] : memref<8x128xf32, #tpu.memory_space<vmem>>, vector<8x128xf32>
    tpu.vector_store %arg8[%c0_19, %c0_20], %19 {strides = array<i32>} : memref<8x128xf32, #tpu.memory_space<vmem>>, vector<8x128xf32>,
    return
  }
  func.func @transform_0(%arg0: i32) -> (i32, i32) {
    %c0_i32 = arith.constant 0 : i32
    %c0_i32_0 = arith.constant 0 : i32
    return %arg0, %c0_i32 : i32, i32
  }
  func.func @transform_1(%arg0: i32) -> (i32, i32) {
    %c0_i32 = arith.constant 0 : i32
    %c0_i32_0 = arith.constant 0 : i32
    %c0_i32_1 = arith.constant 0 : i32
    return %c0_i32, %c0_i32_0 : i32, i32
  }
  func.func @transform_2(%arg0: i32) -> (i32, i32) {
    %c0_i32 = arith.constant 0 : i32
    %c0_i32_0 = arith.constant 0 : i32
    %c0_i32_1 = arith.constant 0 : i32
    return %c0_i32, %c0_i32_0 : i32, i32
  }
  func.func @transform_3(%arg0: i32) -> (i32, i32) {
    %c0_i32 = arith.constant 0 : i32
    %c0_i32_0 = arith.constant 0 : i32
    %c0_i32_1 = arith.constant 0 : i32
    return %c0_i32, %c0_i32_0 : i32, i32
  }
  func.func @transform_4(%arg0: i32) -> (i32, i32) {
    %c0_i32 = arith.constant 0 : i32
    %c0_i32_0 = arith.constant 0 : i32
    %c0_i32_1 = arith.constant 0 : i32
    return %c0_i32, %c0_i32_0 : i32, i32
  }
  func.func @transform_5(%arg0: i32) -> (i32, i32) {
    %c0_i32 = arith.constant 0 : i32
    %c0_i32_0 = arith.constant 0 : i32
    %c0_i32_1 = arith.constant 0 : i32
    return %c0_i32, %c0_i32_0 : i32, i32
  }
  func.func @transform_6(%arg0: i32) -> (i32, i32) {
    %c0_i32 = arith.constant 0 : i32
    %c0_i32_0 = arith.constant 0 : i32
    %c0_i32_1 = arith.constant 0 : i32
    return %c0_i32, %c0_i32_0 : i32, i32
  }
  func.func @transform_7(%arg0: i32) -> (i32, i32) {
    %c0_i32 = arith.constant 0 : i32
    %c0_i32_0 = arith.constant 0 : i32
    return %arg0, %c0_i32 : i32, i32
  }
  func.func @transform_8(%arg0: i32) -> (i32, i32) {
    %c0_i32 = arith.constant 0 : i32
    %c0_i32_0 = arith.constant 0 : i32
    return %arg0, %c0_i32 : i32, i32
  }
}

</mosaic_0001>

<bundles_post_ra>
// kernel: digits_backbone_forward.3
= control target key start
LH: loop header
LB: loop body
LE: loop exit
PB: predicated region body
PF: predicated region fallthrough
CT: control target
= control target key end

     0   :  { %14 = vsyncpa [#allocation3], 0  ;;  %s2296_s0 = inlined_call_operand.vmem [shape: f32[8,1536], index: 0, kind: input, shape index: {}]   ;;  %s2297_s1 = inlined_call_operand.vmem [shape: f32[1536,128], index: 1, kind: input, shape index: {}]   ;;  %s2298_s2 = inlined_call_operand.vmem [shape: f32[1,128], index: 2, kind: input, shape index: {}]   ;;  %s2299_s3 = inlined_call_operand.vmem [shape: f32[128,128], index: 3, kind: input, shape index: {}]   ;;  %s2300_s4 = inlined_call_operand.vmem [shape: f32[1,128], index: 4, kind: input, shape index: {}]   ;;  %s2301_s5 = inlined_call_operand.vmem [shape: f32[128,128], index: 5, kind: input, shape index: {}]   ;;  %s2302_s6 = inlined_call_operand.vmem [shape: f32[1,128], index: 6, kind: input, shape index: {}]   ;;  %s2303_s7 = inlined_call_operand.hbm [shape: f32[8,128], index: 7, kind: output, shape index: {0}]   ;;  %s2304_s8 = inlined_call_operand.hbm [shape: f32[8,128], index: 8, kind: output, shape index: {1}]  }
   0x1   :  { %v58_v0 = vld [vmem:[%s2297_s1 + $0x80] sm:$0xff]  ;;  %v59_v1 = vld [vmem:[%s2297_s1 + $0x88] sm:$0xff]  ;;  %v60_v11 = vld [vmem:[%s2297_s1 + $0x90] sm:$0xff] }
   0x2   :  { %v42_v2 = vld [vmem:[%s2297_s1] sm:$0xff]  ;;  %v1196_v3 = vpack.c.bf16 %v59_v1, %v58_v0  ;;  %v43_v4 = vld [vmem:[%s2297_s1 + $0x8] sm:$0xff]  ;;  %v61_v13 = vld [vmem:[%s2297_s1 + $0x98] sm:$0xff] }
   0x3   :  { %v90_v5 = vld [vmem:[%s2297_s1 + $0x180] sm:$0xff]  ;;  %v91_v6 = vld [vmem:[%s2297_s1 + $0x188] sm:$0xff]  ;;  %v1198_v7 = vpack.c.bf16 %v43_v4, %v42_v2  ;;  %v44_v14 = vld [vmem:[%s2297_s1 + $0x10] sm:$0xff]  ;;  %v1200_v16 = vpack.c.bf16 %v61_v13, %v60_v11 }
   0x4   :  { %v1228_v8 = vpack.c.bf16 %v91_v6, %v90_v5  ;;  %v74_v9 = vld [vmem:[%s2297_s1 + $0x100] sm:$0xff]  ;;  %v75_v10 = vld [vmem:[%s2297_s1 + $0x108] sm:$0xff]  ;;  %1197 = vmatprep.subr.bf16.mxu0 %v1196_v3  ;;  %v45_v15 = vld [vmem:[%s2297_s1 + $0x18] sm:$0xff] }
   0x5   :  { %v1230_v12 = vpack.c.bf16 %v75_v10, %v74_v9  ;;  %1199 = vmatpush3.bf16.msra.mxu0 %v1198_v7  ;;  %v1202_v17 = vpack.c.bf16 %v45_v15, %v44_v14  ;;  %v92_v18 = vld [vmem:[%s2297_s1 + $0x190] sm:$0xff]  ;;  %v93_v19 = vld [vmem:[%s2297_s1 + $0x198] sm:$0xff]  ;;  %v62_v23 = vld [vmem:[%s2297_s1 + $0xa0] sm:$0xff] }
   0x6   :  { %1229 = vmatprep.subr.bf16.mxu1 %v1228_v8  ;;  %v76_v20 = vld [vmem:[%s2297_s1 + $0x110] sm:$0xff]  ;;  %v1232_v21 = vpack.c.bf16 %v93_v19, %v92_v18  ;;  %v77_v22 = vld [vmem:[%s2297_s1 + $0x118] sm:$0xff]  ;;  %v63_v24 = vld [vmem:[%s2297_s1 + $0xa8] sm:$0xff]  ;;  %1201 = vmatprep.subr.bf16.mxu0 %v1200_v16 }
   0x7   :  { %1231 = vmatpush3.bf16.msra.mxu1 %v1230_v12  ;;  %v1234_v25 = vpack.c.bf16 %v77_v22, %v76_v20  ;;  %v1204_v26 = vpack.c.bf16 %v63_v24, %v62_v23  ;;  %v46_v27 = vld [vmem:[%s2297_s1 + $0x20] sm:$0xff]  ;;  %v47_v28 = vld [vmem:[%s2297_s1 + $0x28] sm:$0xff]  ;;  %v64_v35 = vld [vmem:[%s2297_s1 + $0xb0] sm:$0xff] }
   0x8   :  { %v94_v29 = vld [vmem:[%s2297_s1 + $0x1a0] sm:$0xff]  ;;  %1233 = vmatprep.subr.bf16.mxu1 %v1232_v21  ;;  %v95_v30 = vld [vmem:[%s2297_s1 + $0x1a8] sm:$0xff]  ;;  %v1206_v33 = vpack.c.bf16 %v47_v28, %v46_v27  ;;  %v65_v36 = vld [vmem:[%s2297_s1 + $0xb8] sm:$0xff] }
   0x9   :  { %v78_v31 = vld [vmem:[%s2297_s1 + $0x120] sm:$0xff]  ;;  %v79_v32 = vld [vmem:[%s2297_s1 + $0x128] sm:$0xff]  ;;  %1203 = vmatpush3.bf16.msra.mxu0 %v1202_v17  ;;  %v1236_v34 = vpack.c.bf16 %v95_v30, %v94_v29  ;;  %v48_v37 = vld [vmem:[%s2297_s1 + $0x30] sm:$0xff]  ;;  %v1208_v39 = vpack.c.bf16 %v65_v36, %v64_v35 }
   0xa   :  { %1205 = vmatprep.subr.bf16.mxu0 %v1204_v26  ;;  %v1238_v38 = vpack.c.bf16 %v79_v32, %v78_v31  ;;  %v49_v40 = vld [vmem:[%s2297_s1 + $0x38] sm:$0xff]  ;;  %v96_v41 = vld [vmem:[%s2297_s1 + $0x1b0] sm:$0xff]  ;;  %v66_v46 = vld [vmem:[%s2297_s1 + $0xc0] sm:$0xff] }
   0xb   :  { %1235 = vmatpush3.bf16.msra.mxu1 %v1234_v25  ;;  %v97_v42 = vld [vmem:[%s2297_s1 + $0x1b8] sm:$0xff]  ;;  %v80_v44 = vld [vmem:[%s2297_s1 + $0x130] sm:$0xff]  ;;  %v67_v47 = vld [vmem:[%s2297_s1 + $0xc8] sm:$0xff]  ;;  %v1210_v48 = vpack.c.bf16 %v49_v40, %v48_v37 }
   0xc   :  { %1237 = vmatprep.subr.bf16.mxu1 %v1236_v34  ;;  %v1240_v43 = vpack.c.bf16 %v97_v42, %v96_v41  ;;  %v81_v45 = vld [vmem:[%s2297_s1 + $0x138] sm:$0xff]  ;;  %v98_v49 = vld [vmem:[%s2297_s1 + $0x1c0] sm:$0xff]  ;;  %v99_v50 = vld [vmem:[%s2297_s1 + $0x1c8] sm:$0xff]  ;;  %v1212_v52 = vpack.c.bf16 %v67_v47, %v66_v46 }
   0xd   :  { %1207 = vmatpush3.bf16.msra.mxu0 %v1206_v33  ;;  %v1242_v51 = vpack.c.bf16 %v81_v45, %v80_v44  ;;  %v50_v53 = vld [vmem:[%s2297_s1 + $0x40] sm:$0xff]  ;;  %v51_v54 = vld [vmem:[%s2297_s1 + $0x48] sm:$0xff]  ;;  %v1244_v56 = vpack.c.bf16 %v99_v50, %v98_v49  ;;  %v68_v58 = vld [vmem:[%s2297_s1 + $0xd0] sm:$0xff] }
   0xe   :  { %1209 = vmatprep.subr.bf16.mxu0 %v1208_v39  ;;  %v82_v55 = vld [vmem:[%s2297_s1 + $0x140] sm:$0xff]  ;;  %v83_v57 = vld [vmem:[%s2297_s1 + $0x148] sm:$0xff]  ;;  %v69_v59 = vld [vmem:[%s2297_s1 + $0xd8] sm:$0xff]  ;;  %v1214_v62 = vpack.c.bf16 %v51_v54, %v50_v53 }
   0xf   :  { %1239 = vmatpush3.bf16.msra.mxu1 %v1238_v38  ;;  %v100_v60 = vld [vmem:[%s2297_s1 + $0x1d0] sm:$0xff]  ;;  %v101_v61 = vld [vmem:[%s2297_s1 + $0x1d8] sm:$0xff]  ;;  %v1246_v63 = vpack.c.bf16 %v83_v57, %v82_v55  ;;  %v1216_v0 = vpack.c.bf16 %v69_v59, %v68_v58  ;;  %v70_v6 = vld [vmem:[%s2297_s1 + $0xe0] sm:$0xff] }
  0x10   :  { %1241 = vmatprep.subr.bf16.mxu1 %v1240_v43  ;;  %v52_v1 = vld [vmem:[%s2297_s1 + $0x50] sm:$0xff]  ;;  %v53_v2 = vld [vmem:[%s2297_s1 + $0x58] sm:$0xff]  ;;  %v1248_v4 = vpack.c.bf16 %v101_v61, %v100_v60  ;;  %v71_v7 = vld [vmem:[%s2297_s1 + $0xe8] sm:$0xff] }
  0x11   :  { %1211 = vmatpush3.bf16.msra.mxu0 %v1210_v48  ;;  %v84_v3 = vld [vmem:[%s2297_s1 + $0x150] sm:$0xff]  ;;  %v85_v5 = vld [vmem:[%s2297_s1 + $0x158] sm:$0xff]  ;;  %v102_v8 = vld [vmem:[%s2297_s1 + $0x1e0] sm:$0xff]  ;;  %v1218_v10 = vpack.c.bf16 %v53_v2, %v52_v1  ;;  %v1220_v14 = vpack.c.bf16 %v71_v7, %v70_v6 }
  0x12   :  { %1213 = vmatprep.subr.bf16.mxu0 %v1212_v52  ;;  %v103_v9 = vld [vmem:[%s2297_s1 + $0x1e8] sm:$0xff]  ;;  %v54_v11 = vld [vmem:[%s2297_s1 + $0x60] sm:$0xff]  ;;  %v1250_v13 = vpack.c.bf16 %v85_v5, %v84_v3  ;;  %v72_v19 = vld [vmem:[%s2297_s1 + $0xf0] sm:$0xff] }
  0x13   :  { %1243 = vmatpush3.bf16.msra.mxu1 %v1242_v51  ;;  %v55_v12 = vld [vmem:[%s2297_s1 + $0x68] sm:$0xff]  ;;  %v86_v15 = vld [vmem:[%s2297_s1 + $0x160] sm:$0xff]  ;;  %v1252_v18 = vpack.c.bf16 %v103_v9, %v102_v8  ;;  %v73_v20 = vld [vmem:[%s2297_s1 + $0xf8] sm:$0xff] }
  0x14   :  { %1245 = vmatprep.subr.bf16.mxu1 %v1244_v56  ;;  %v87_v16 = vld [vmem:[%s2297_s1 + $0x168] sm:$0xff]  ;;  %v33_v21 = vld [vmem:[%s2296_s0 + $0x18] sm:$0xff]  ;;  %v104_v22 = vld [vmem:[%s2297_s1 + $0x1f0] sm:$0xff]  ;;  %v1222_v24 = vpack.c.bf16 %v55_v12, %v54_v11  ;;  %v1224_v26 = vpack.c.bf16 %v73_v20, %v72_v19 }
  0x15   :  { %1215 = vmatpush3.bf16.msra.mxu0 %v1214_v62  ;;  %v31_v17 = vld [vmem:[%s2296_s0 + $0x8] sm:$0xff]  ;;  %v105_v23 = vld [vmem:[%s2297_s1 + $0x1f8] sm:$0xff]  ;;  %375 = vmatprep.mubr.f32.mxu1 %v33_v21  ;;  %v1254_v25 = vpack.c.bf16 %v87_v16, %v86_v15  ;;  %v56_v27 = vld [vmem:[%s2297_s1 + $0x70] sm:$0xff] }
  0x16   :  { %1217 = vmatprep.subr.bf16.mxu0 %v1216_v0  ;;  %305 = vmatprep.mubr.f32.mxu0 %v31_v17  ;;  %v57_v28 = vld [vmem:[%s2297_s1 + $0x78] sm:$0xff]  ;;  %v88_v29 = vld [vmem:[%s2297_s1 + $0x170] sm:$0xff]  ;;  %v1256_v30 = vpack.c.bf16 %v105_v23, %v104_v22  ;;  %v122_v32 = vld [vmem:[%s2297_s1 + $0x280] sm:$0xff] }
  0x17   :  { %1247 = vmatpush3.bf16.msra.mxu1 %v1246_v63  ;;  %v89_v31 = vld [vmem:[%s2297_s1 + $0x178] sm:$0xff]  ;;  %v123_v33 = vld [vmem:[%s2297_s1 + $0x288] sm:$0xff]  ;;  %v154_v34 = vld [vmem:[%s2297_s1 + $0x380] sm:$0xff]  ;;  %v1226_v36 = vpack.c.bf16 %v57_v28, %v56_v27 }
  0x18   :  { %1249 = vmatprep.subr.bf16.mxu1 %v1248_v4  ;;  %v155_v35 = vld [vmem:[%s2297_s1 + $0x388] sm:$0xff]  ;;  %v1258_v37 = vpack.c.bf16 %v89_v31, %v88_v29  ;;  %v1260_v38 = vpack.c.bf16 %v123_v33, %v122_v32  ;;  %v106_v39 = vld [vmem:[%s2297_s1 + $0x200] sm:$0xff]  ;;  %v124_v44 = vld [vmem:[%s2297_s1 + $0x290] sm:$0xff] }
  0x19   :  { %1219 = vmatpush3.bf16.msra.mxu0 %v1218_v10  ;;  %v107_v40 = vld [vmem:[%s2297_s1 + $0x208] sm:$0xff]  ;;  %v138_v41 = vld [vmem:[%s2297_s1 + $0x300] sm:$0xff]  ;;  %v1292_v42 = vpack.c.bf16 %v155_v35, %v154_v34  ;;  %v125_v45 = vld [vmem:[%s2297_s1 + $0x298] sm:$0xff] }
  0x1a   :  { %1221 = vmatprep.subr.bf16.mxu0 %v1220_v14  ;;  %v139_v43 = vld [vmem:[%s2297_s1 + $0x308] sm:$0xff]  ;;  %v156_v46 = vld [vmem:[%s2297_s1 + $0x390] sm:$0xff]  ;;  %v157_v47 = vld [vmem:[%s2297_s1 + $0x398] sm:$0xff]  ;;  %v1262_v49 = vpack.c.bf16 %v107_v40, %v106_v39  ;;  %v1264_v52 = vpack.c.bf16 %v125_v45, %v124_v44 }
  0x1b   :  { %1251 = vmatpush3.bf16.msra.mxu1 %v1250_v13  ;;  %v30_v48 = vld [vmem:[%s2296_s0] sm:$0xff]  ;;  %v32_v50 = vld [vmem:[%s2296_s0 + $0x10] sm:$0xff]  ;;  %v1294_v51 = vpack.c.bf16 %v139_v43, %v138_v41  ;;  %v109_v54 = vld [vmem:[%s2297_s1 + $0x218] sm:$0xff]  ;;  %v1296_v56 = vpack.c.bf16 %v157_v47, %v156_v46 }
  0x1c   :  { %1253 = vmatprep.subr.bf16.mxu1 %v1252_v18  ;;  %v108_v53 = vld [vmem:[%s2297_s1 + $0x210] sm:$0xff]  ;;  %v141_v57 = vld [vmem:[%s2297_s1 + $0x318] sm:$0xff]  ;;  %v126_v58 = vld [vmem:[%s2297_s1 + $0x2a0] sm:$0xff] }
  0x1d   :  { %1223 = vmatpush3.bf16.msra.mxu0 %v1222_v24  ;;  %v140_v55 = vld [vmem:[%s2297_s1 + $0x310] sm:$0xff]  ;;  %v127_v59 = vld [vmem:[%s2297_s1 + $0x2a8] sm:$0xff]  ;;  %v158_v60 = vld [vmem:[%s2297_s1 + $0x3a0] sm:$0xff]  ;;  %v1266_v62 = vpack.c.bf16 %v109_v54, %v108_v53 }
  0x1e   :  { %1225 = vmatprep.subr.bf16.mxu0 %v1224_v26  ;;  %v159_v61 = vld [vmem:[%s2297_s1 + $0x3a8] sm:$0xff]  ;;  %v1298_v63 = vpack.c.bf16 %v141_v57, %v140_v55  ;;  %v1268_v0 = vpack.c.bf16 %v127_v59, %v126_v58  ;;  %v110_v1 = vld [vmem:[%s2297_s1 + $0x220] sm:$0xff]  ;;  %v128_v6 = vld [vmem:[%s2297_s1 + $0x2b0] sm:$0xff] }
  0x1f   :  { %1255 = vmatpush3.bf16.msra.mxu1 %v1254_v25  ;;  %v111_v2 = vld [vmem:[%s2297_s1 + $0x228] sm:$0xff]  ;;  %v142_v3 = vld [vmem:[%s2297_s1 + $0x320] sm:$0xff]  ;;  %v1300_v4 = vpack.c.bf16 %v159_v61, %v158_v60  ;;  %v129_v7 = vld [vmem:[%s2297_s1 + $0x2b8] sm:$0xff] }
  0x20   :  { %1257 = vmatprep.subr.bf16.mxu1 %v1256_v30  ;;  %v143_v5 = vld [vmem:[%s2297_s1 + $0x328] sm:$0xff]  ;;  %v160_v8 = vld [vmem:[%s2297_s1 + $0x3b0] sm:$0xff]  ;;  %v161_v9 = vld [vmem:[%s2297_s1 + $0x3b8] sm:$0xff]  ;;  %v1270_v10 = vpack.c.bf16 %v111_v2, %v110_v1  ;;  %v1272_v12 = vpack.c.bf16 %v129_v7, %v128_v6 }
  0x21   :  { %1227 = vmatpush3.bf16.msra.mxu0 %v1226_v36  ;;  %v1302_v11 = vpack.c.bf16 %v143_v5, %v142_v3  ;;  %v112_v13 = vld [vmem:[%s2297_s1 + $0x230] sm:$0xff]  ;;  %v113_v14 = vld [vmem:[%s2297_s1 + $0x238] sm:$0xff]  ;;  %v1304_v16 = vpack.c.bf16 %v161_v9, %v160_v8  ;;  %v130_v18 = vld [vmem:[%s2297_s1 + $0x2c0] sm:$0xff] }
  0x22   :  { %1261 = vmatprep.subr.bf16.mxu0 %v1260_v38  ;;  %v144_v15 = vld [vmem:[%s2297_s1 + $0x330] sm:$0xff]  ;;  %v145_v17 = vld [vmem:[%s2297_s1 + $0x338] sm:$0xff]  ;;  %v131_v19 = vld [vmem:[%s2297_s1 + $0x2c8] sm:$0xff]  ;;  %v1274_v22 = vpack.c.bf16 %v113_v14, %v112_v13 }
  0x23   :  { %1259 = vmatpush3.bf16.msra.mxu1 %v1258_v37  ;;  %v162_v20 = vld [vmem:[%s2297_s1 + $0x3c0] sm:$0xff]  ;;  %v163_v21 = vld [vmem:[%s2297_s1 + $0x3c8] sm:$0xff]  ;;  %v1306_v25 = vpack.c.bf16 %v145_v17, %v144_v15  ;;  %v1276_v26 = vpack.c.bf16 %v131_v19, %v130_v18  ;;  %v37_v29 = vld [vmem:[%s2296_s0 + $0x38] sm:$0xff] }
  0x24   :  { %1293 = vmatprep.subr.bf16.mxu1 %v1292_v42  ;;  %306 = vmatmul.mubr.f32.vlgmr.msra.gmra.mrb[0].mxu0 %v30_v48  ;;  %v114_v23 = vld [vmem:[%s2297_s1 + $0x240] sm:$0xff]  ;;  %v35_v24 = vld [vmem:[%s2296_s0 + $0x28] sm:$0xff]  ;;  %v1308_v30 = vpack.c.bf16 %v163_v21, %v162_v20  ;;  %v132_v32 = vld [vmem:[%s2297_s1 + $0x2d0] sm:$0xff] }
  0x25   :  { %1263 = vmatpush3.bf16.msra.mxu0 %v1262_v49  ;;  %v115_v27 = vld [vmem:[%s2297_s1 + $0x248] sm:$0xff]  ;;  %v146_v28 = vld [vmem:[%s2297_s1 + $0x340] sm:$0xff]  ;;  %v133_v33 = vld [vmem:[%s2297_s1 + $0x2d8] sm:$0xff]  ;;  %445 = vmatprep.mubr.f32.mxu0 %v35_v24 }
  0x26   :  { %376 = vmatmul.mubr.f32.vlgmr.msra.gmra.mrb[0].mxu1 %v32_v50  ;;  %1265 = vmatprep.subr.bf16.mxu0 %v1264_v52  ;;  %v147_v31 = vld [vmem:[%s2297_s1 + $0x348] sm:$0xff]  ;;  %v164_v34 = vld [vmem:[%s2297_s1 + $0x3d0] sm:$0xff]  ;;  %v165_v35 = vld [vmem:[%s2297_s1 + $0x3d8] sm:$0xff]  ;;  %v1278_v36 = vpack.c.bf16 %v115_v27, %v114_v23  ;;  %v1280_v38 = vpack.c.bf16 %v133_v33, %v132_v32 }
  0x27   :  { %1295 = vmatpush3.bf16.msra.mxu1 %v1294_v51  ;;  %515 = vmatprep.mubr.f32.mxu1 %v37_v29  ;;  %v1310_v37 = vpack.c.bf16 %v147_v31, %v146_v28  ;;  %v116_v39 = vld [vmem:[%s2297_s1 + $0x250] sm:$0xff]  ;;  %v117_v40 = vld [vmem:[%s2297_s1 + $0x258] sm:$0xff]  ;;  %v1312_v42 = vpack.c.bf16 %v165_v35, %v164_v34  ;;  %v134_v44 = vld [vmem:[%s2297_s1 + $0x2e0] sm:$0xff] }
  0x28   :  { %1297 = vmatprep.subr.bf16.mxu1 %v1296_v56  ;;  %v148_v41 = vld [vmem:[%s2297_s1 + $0x350] sm:$0xff]  ;;  %v149_v43 = vld [vmem:[%s2297_s1 + $0x358] sm:$0xff]  ;;  %v135_v45 = vld [vmem:[%s2297_s1 + $0x2e8] sm:$0xff]  ;;  %v1282_v48 = vpack.c.bf16 %v117_v40, %v116_v39 }
  0x29   :  { %1267 = vmatpush3.bf16.msra.mxu0 %v1266_v62  ;;  %v166_v46 = vld [vmem:[%s2297_s1 + $0x3e0] sm:$0xff]  ;;  %v167_v47 = vld [vmem:[%s2297_s1 + $0x3e8] sm:$0xff]  ;;  %v1314_v49 = vpack.c.bf16 %v149_v43, %v148_v41  ;;  %v1284_v50 = vpack.c.bf16 %v135_v45, %v134_v44  ;;  %v136_v56 = vld [vmem:[%s2297_s1 + $0x2f0] sm:$0xff] }
  0x2a   :  { %1269 = vmatprep.subr.bf16.mxu0 %v1268_v0  ;;  %v118_v51 = vld [vmem:[%s2297_s1 + $0x260] sm:$0xff]  ;;  %v119_v52 = vld [vmem:[%s2297_s1 + $0x268] sm:$0xff]  ;;  %v1316_v54 = vpack.c.bf16 %v167_v47, %v166_v46  ;;  %v137_v57 = vld [vmem:[%s2297_s1 + $0x2f8] sm:$0xff] }
  0x2b   :  { %1299 = vmatpush3.bf16.msra.mxu1 %v1298_v63  ;;  %v150_v53 = vld [vmem:[%s2297_s1 + $0x360] sm:$0xff]  ;;  %v151_v55 = vld [vmem:[%s2297_s1 + $0x368] sm:$0xff]  ;;  %v168_v58 = vld [vmem:[%s2297_s1 + $0x3f0] sm:$0xff]  ;;  %v1286_v60 = vpack.c.bf16 %v119_v52, %v118_v51  ;;  %v1288_v62 = vpack.c.bf16 %v137_v57, %v136_v56 }
  0x2c   :  { %1301 = vmatprep.subr.bf16.mxu1 %v1300_v4  ;;  %v169_v59 = vld [vmem:[%s2297_s1 + $0x3f8] sm:$0xff]  ;;  %v1318_v61 = vpack.c.bf16 %v151_v55, %v150_v53  ;;  %v120_v63 = vld [vmem:[%s2297_s1 + $0x270] sm:$0xff]  ;;  %v186_v4 = vld [vmem:[%s2297_s1 + $0x480] sm:$0xff] }
  0x2d   :  { %1271 = vmatpush3.bf16.msra.mxu0 %v1270_v10  ;;  %v121_v0 = vld [vmem:[%s2297_s1 + $0x278] sm:$0xff]  ;;  %v152_v1 = vld [vmem:[%s2297_s1 + $0x370] sm:$0xff]  ;;  %v1320_v2 = vpack.c.bf16 %v169_v59, %v168_v58  ;;  %v187_v5 = vld [vmem:[%s2297_s1 + $0x488] sm:$0xff] }
  0x2e   :  { %1273 = vmatprep.subr.bf16.mxu0 %v1272_v12  ;;  %v153_v3 = vld [vmem:[%s2297_s1 + $0x378] sm:$0xff]  ;;  %v218_v6 = vld [vmem:[%s2297_s1 + $0x580] sm:$0xff]  ;;  %v219_v7 = vld [vmem:[%s2297_s1 + $0x588] sm:$0xff]  ;;  %v1290_v8 = vpack.c.bf16 %v121_v0, %v120_v63  ;;  %v1324_v10 = vpack.c.bf16 %v187_v5, %v186_v4 }
  0x2f   :  { %1303 = vmatpush3.bf16.msra.mxu1 %v1302_v11  ;;  %v1322_v9 = vpack.c.bf16 %v153_v3, %v152_v1  ;;  %v170_v11 = vld [vmem:[%s2297_s1 + $0x400] sm:$0xff]  ;;  %v171_v12 = vld [vmem:[%s2297_s1 + $0x408] sm:$0xff]  ;;  %v1356_v14 = vpack.c.bf16 %v219_v7, %v218_v6  ;;  %v189_v17 = vld [vmem:[%s2297_s1 + $0x498] sm:$0xff] }
  0x30   :  { %1305 = vmatprep.subr.bf16.mxu1 %v1304_v16  ;;  %v202_v13 = vld [vmem:[%s2297_s1 + $0x500] sm:$0xff]  ;;  %v203_v15 = vld [vmem:[%s2297_s1 + $0x508] sm:$0xff]  ;;  %v188_v16 = vld [vmem:[%s2297_s1 + $0x490] sm:$0xff]  ;;  %v1326_v21 = vpack.c.bf16 %v171_v12, %v170_v11 }
  0x31   :  { %1275 = vmatpush3.bf16.msra.mxu0 %v1274_v22  ;;  %v220_v18 = vld [vmem:[%s2297_s1 + $0x590] sm:$0xff]  ;;  %v221_v19 = vld [vmem:[%s2297_s1 + $0x598] sm:$0xff]  ;;  %v34_v20 = vld [vmem:[%s2296_s0 + $0x20] sm:$0xff]  ;;  %v1358_v23 = vpack.c.bf16 %v203_v15, %v202_v13  ;;  %v1328_v24 = vpack.c.bf16 %v189_v17, %v188_v16 }
  0x32   :  { %1277 = vmatprep.subr.bf16.mxu0 %v1276_v26  ;;  %v36_v22 = vld [vmem:[%s2296_s0 + $0x30] sm:$0xff]  ;;  %v173_v26 = vld [vmem:[%s2297_s1 + $0x418] sm:$0xff]  ;;  %v1360_v28 = vpack.c.bf16 %v221_v19, %v220_v18  ;;  %v191_v31 = vld [vmem:[%s2297_s1 + $0x4a8] sm:$0xff] }
  0x33   :  { %1307 = vmatpush3.bf16.msra.mxu1 %v1306_v25  ;;  %v172_v25 = vld [vmem:[%s2297_s1 + $0x410] sm:$0xff]  ;;  %v205_v29 = vld [vmem:[%s2297_s1 + $0x518] sm:$0xff]  ;;  %v222_v32 = vld [vmem:[%s2297_s1 + $0x5a0] sm:$0xff] }
  0x34   :  { %1309 = vmatprep.subr.bf16.mxu1 %v1308_v30  ;;  %v204_v27 = vld [vmem:[%s2297_s1 + $0x510] sm:$0xff]  ;;  %v190_v30 = vld [vmem:[%s2297_s1 + $0x4a0] sm:$0xff]  ;;  %v223_v33 = vld [vmem:[%s2297_s1 + $0x5a8] sm:$0xff]  ;;  %v1330_v35 = vpack.c.bf16 %v173_v26, %v172_v25 }
  0x35   :  { %1279 = vmatpush3.bf16.msra.mxu0 %v1278_v36  ;;  %v39_v34 = vld [vmem:[%s2296_s0 + $0x48] sm:$0xff]  ;;  %v41_v36 = vld [vmem:[%s2296_s0 + $0x58] sm:$0xff] }
  0x36   :  { %1281 = vmatprep.subr.bf16.mxu0 %v1280_v38 }
  0x37   :  { %1311 = vmatpush3.bf16.msra.mxu1 %v1310_v37 }
  0x38   :  { %1313 = vmatprep.subr.bf16.mxu1 %v1312_v42 }
  0x39   :  { %1283 = vmatpush3.bf16.msra.mxu0 %v1282_v48 }
  0x3a   :  { %1285 = vmatprep.subr.bf16.mxu0 %v1284_v50 }
  0x3b   :  { %1315 = vmatpush3.bf16.msra.mxu1 %v1314_v49 }
  0x3c   :  { %1317 = vmatprep.subr.bf16.mxu1 %v1316_v54 }
  0x3d   :  { %1287 = vmatpush3.bf16.msra.mxu0 %v1286_v60 }
  0x3e   :  { %1289 = vmatprep.subr.bf16.mxu0 %v1288_v62 }
  0x3f   :  { %1319 = vmatpush3.bf16.msra.mxu1 %v1318_v61 }
  0x40   :  { %1321 = vmatprep.subr.bf16.mxu1 %v1320_v2 }
  0x41   :  { %1291 = vmatpush3.bf16.msra.mxu0 %v1290_v8 }
  0x42   :  { %1325 = vmatprep.subr.bf16.mxu0 %v1324_v10 }
  0x43   :  { %1323 = vmatpush3.bf16.msra.mxu1 %v1322_v9 }
  0x44   :  { %1357 = vmatprep.subr.bf16.mxu1 %v1356_v14  ;;  %446 = vmatmul.mubr.f32.vlgmr.msra.gmra.mrb[2].mxu0 %v34_v20 }
  0x45   :  { %1327 = vmatpush3.bf16.msra.mxu0 %v1326_v21 }
  0x46   :  { %516 = vmatmul.mubr.f32.vlgmr.msra.gmra.mrb[2].mxu1 %v36_v22 }
  0x47   :  { %15 = vsyncpa [#allocation5], 0  ;;  %1359 = vmatpush3.bf16.msra.mxu1 %v1358_v23  ;;  %1329 = vmatprep.subr.bf16.mxu0 %v1328_v24  ;;  %v1362_v37 = vpack.c.bf16 %v205_v29, %v204_v27  ;;  %v1332_v38 = vpack.c.bf16 %v191_v31, %v190_v30  ;;  %v174_v39 = vld [vmem:[%s2297_s1 + $0x420] sm:$0xff]  ;;  %v175_v40 = vld [vmem:[%s2297_s1 + $0x428] sm:$0xff]  ;;  %v1364_v42 = vpack.c.bf16 %v223_v33, %v222_v32  ;;  %vm1490_vm0 = vmmov 0   ;;  %s1492_s10 = smov [#allocation4]  }
  0x48   :  { %v206_v41 = vld [vmem:[%s2297_s1 + $0x520] sm:$0xff]  ;;  %1361 = vmatprep.subr.bf16.mxu1 %v1360_v28  ;;  %v207_v43 = vld [vmem:[%s2297_s1 + $0x528] sm:$0xff]  ;;  %v192_v44 = vld [vmem:[%s2297_s1 + $0x4b0] sm:$0xff]  ;;  %585 = vmatprep.mubr.f32.mxu0 %v39_v34  ;;  %v1334_v48 = vpack.c.bf16 %v175_v40, %v174_v39  ;;  %s867_s11 = sshll.u32 %s1492_s10, 4  ;;  %s868_s11 = int_to_ptr.vmem [resolvable:$true] %s867_s11 }
  0x49   :  { %v193_v45 = vld [vmem:[%s2297_s1 + $0x4b8] sm:$0xff]  ;;  %v224_v46 = vld [vmem:[%s2297_s1 + $0x5b0] sm:$0xff]  ;;  %655 = vmatprep.mubr.f32.mxu1 %v41_v36  ;;  %1331 = vmatpush3.bf16.msra.mxu0 %v1330_v35  ;;  %v1366_v49 = vpack.c.bf16 %v207_v43, %v206_v41  ;;  %v194_v56 = vld [vmem:[%s2297_s1 + $0x4c0] sm:$0xff]  ;;  %s1441_s12 = scalar_lea.vmem %s868_s11, 128  ;;  %p1446_p1 = scmp.lt.s32.totalorder %s868_s11, %s868_s11 }
  0x4a   :  { %v225_v47 = vld [vmem:[%s2297_s1 + $0x5b8] sm:$0xff]  ;;  %1333 = vmatprep.subr.bf16.mxu0 %v1332_v38  ;;  %v1336_v50 = vpack.c.bf16 %v193_v45, %v192_v44  ;;  %v176_v51 = vld [vmem:[%s2297_s1 + $0x430] sm:$0xff]  ;;  %v195_v57 = vld [vmem:[%s2297_s1 + $0x4c8] sm:$0xff]  ;;  %p1442_p0 = scmp.ne.s32.totalorder %s868_s11, %s1441_s12  ;;  %p1447_p2 = scmp.lt.s32.totalorder %s1441_s12, %s1441_s12 }
  0x4b   :  { %1363 = vmatpush3.bf16.msra.mxu1 %v1362_v37  ;;  %v177_v52 = vld [vmem:[%s2297_s1 + $0x438] sm:$0xff]  ;;  %v208_v53 = vld [vmem:[%s2297_s1 + $0x530] sm:$0xff]  ;;  %v1368_v54 = vpack.c.bf16 %v225_v47, %v224_v46  ;;  %v226_v58 = vld [vmem:[%s2297_s1 + $0x5c0] sm:$0xff]  ;;  %v1340_v62 = vpack.c.bf16 %v195_v57, %v194_v56  ;;  %v1489_v47 = vmov 0.0|0.0  }
  0x4c   :  { %1365 = vmatprep.subr.bf16.mxu1 %v1364_v42  ;;  %v209_v55 = vld [vmem:[%s2297_s1 + $0x538] sm:$0xff]  ;;  %v227_v59 = vld [vmem:[%s2297_s1 + $0x5c8] sm:$0xff]  ;;  %v1338_v60 = vpack.c.bf16 %v177_v52, %v176_v51  ;;  %v178_v63 = vld [vmem:[%s2297_s1 + $0x440] sm:$0xff]  ;;  %p1448_p3 = por %p1447_p2, %p1446_p1 }
  0x4d   :  { %1335 = vmatpush3.bf16.msra.mxu0 %v1334_v48  ;;  %v1370_v61 = vpack.c.bf16 %v209_v55, %v208_v53  ;;  %v179_v0 = vld [vmem:[%s2297_s1 + $0x448] sm:$0xff]  ;;  %v210_v1 = vld [vmem:[%s2297_s1 + $0x540] sm:$0xff]  ;;  %v1372_v2 = vpack.c.bf16 %v227_v59, %v226_v58  ;;  %v196_v4 = vld [vmem:[%s2297_s1 + $0x4d0] sm:$0xff] }
  0x4e   :  { %1337 = vmatprep.subr.bf16.mxu0 %v1336_v50  ;;  %v211_v3 = vld [vmem:[%s2297_s1 + $0x548] sm:$0xff]  ;;  %v197_v5 = vld [vmem:[%s2297_s1 + $0x4d8] sm:$0xff]  ;;  %v228_v6 = vld [vmem:[%s2297_s1 + $0x5d0] sm:$0xff]  ;;  %v1342_v8 = vpack.c.bf16 %v179_v0, %v178_v63  ;;  %p1449_p4 = pnand %p1448_p3, %p1442_p0 }
  0x4f   :  { %1367 = vmatpush3.bf16.msra.mxu1 %v1366_v49  ;;  %v229_v7 = vld [vmem:[%s2297_s1 + $0x5d8] sm:$0xff]  ;;  %v1374_v9 = vpack.c.bf16 %v211_v3, %v210_v1  ;;  %v1344_v10 = vpack.c.bf16 %v197_v5, %v196_v4  ;;  %v180_v11 = vld [vmem:[%s2297_s1 + $0x450] sm:$0xff]  ;;  %v198_v16 = vld [vmem:[%s2297_s1 + $0x4e0] sm:$0xff]  ;;  %v1491_v5 = vmov 0.0  }
  0x50   :  { %1369 = vmatprep.subr.bf16.mxu1 %v1368_v54  ;;  %v181_v12 = vld [vmem:[%s2297_s1 + $0x458] sm:$0xff]  ;;  %v212_v13 = vld [vmem:[%s2297_s1 + $0x550] sm:$0xff]  ;;  %v1376_v14 = vpack.c.bf16 %v229_v7, %v228_v6  ;;  %v199_v17 = vld [vmem:[%s2297_s1 + $0x4e8] sm:$0xff] }
  0x51   :  { %1339 = vmatpush3.bf16.msra.mxu0 %v1338_v60  ;;  %v213_v15 = vld [vmem:[%s2297_s1 + $0x558] sm:$0xff]  ;;  %v230_v18 = vld [vmem:[%s2297_s1 + $0x5e0] sm:$0xff]  ;;  %v231_v19 = vld [vmem:[%s2297_s1 + $0x5e8] sm:$0xff]  ;;  %v1346_v20 = vpack.c.bf16 %v181_v12, %v180_v11  ;;  %v1348_v22 = vpack.c.bf16 %v199_v17, %v198_v16 }
  0x52   :  { %1341 = vmatprep.subr.bf16.mxu0 %v1340_v62  ;;  %v1378_v21 = vpack.c.bf16 %v213_v15, %v212_v13  ;;  %v182_v23 = vld [vmem:[%s2297_s1 + $0x460] sm:$0xff]  ;;  %v183_v24 = vld [vmem:[%s2297_s1 + $0x468] sm:$0xff]  ;;  %v1380_v26 = vpack.c.bf16 %v231_v19, %v230_v18  ;;  %v200_v28 = vld [vmem:[%s2297_s1 + $0x4f0] sm:$0xff] }
  0x53   :  { %1371 = vmatpush3.bf16.msra.mxu1 %v1370_v61  ;;  %v214_v25 = vld [vmem:[%s2297_s1 + $0x560] sm:$0xff]  ;;  %v215_v27 = vld [vmem:[%s2297_s1 + $0x568] sm:$0xff]  ;;  %v201_v29 = vld [vmem:[%s2297_s1 + $0x4f8] sm:$0xff]  ;;  %v1350_v32 = vpack.c.bf16 %v183_v24, %v182_v23 }
  0x54   :  { %1373 = vmatprep.subr.bf16.mxu1 %v1372_v2  ;;  %v232_v30 = vld [vmem:[%s2297_s1 + $0x5f0] sm:$0xff]  ;;  %v233_v31 = vld [vmem:[%s2297_s1 + $0x5f8] sm:$0xff]  ;;  %v1382_v33 = vpack.c.bf16 %v215_v27, %v214_v25  ;;  %v1352_v34 = vpack.c.bf16 %v201_v29, %v200_v28  ;;  %v38_v42 = vld [vmem:[%s2296_s0 + $0x40] sm:$0xff] }
  0x55   :  { %1343 = vmatpush3.bf16.msra.mxu0 %v1342_v8  ;;  %v184_v35 = vld [vmem:[%s2297_s1 + $0x470] sm:$0xff]  ;;  %v185_v36 = vld [vmem:[%s2297_s1 + $0x478] sm:$0xff]  ;;  %v1384_v37 = vpack.c.bf16 %v233_v31, %v232_v30  ;;  %v662_v44 = vld [vmem:[%s2299_s3] sm:$0xff] }
  0x56   :  { %1345 = vmatprep.subr.bf16.mxu0 %v1344_v10  ;;  %v216_v38 = vld [vmem:[%s2297_s1 + $0x570] sm:$0xff]  ;;  %v217_v39 = vld [vmem:[%s2297_s1 + $0x578] sm:$0xff]  ;;  %v1354_v40 = vpack.c.bf16 %v185_v36, %v184_v35  ;;  %v663_v45 = vld [vmem:[%s2299_s3 + $0x8] sm:$0xff] }
  0x57   :  { %1375 = vmatpush3.bf16.msra.mxu1 %v1374_v9  ;;  %v1386_v41 = vpack.c.bf16 %v217_v39, %v216_v38  ;;  %v40_v43 = vld [vmem:[%s2296_s0 + $0x50] sm:$0xff]  ;;  %v1389_v48 = vpack.c.bf16 %v663_v45, %v662_v44  ;;  %v665_v49 = vld [vmem:[%s2299_s3 + $0x18] sm:$0xff]  ;;  %v666_v51 = vld [vmem:[%s2299_s3 + $0x20] sm:$0xff] }
  0x58   :  { %1377 = vmatprep.subr.bf16.mxu1 %v1376_v14  ;;  %v664_v46 = vld [vmem:[%s2299_s3 + $0x10] sm:$0xff]  ;;  %v667_v52 = vld [vmem:[%s2299_s3 + $0x28] sm:$0xff]  ;;  %v669_v55 = vld [vmem:[%s2299_s3 + $0x38] sm:$0xff] }
  0x59   :  { %1347 = vmatpush3.bf16.msra.mxu0 %v1346_v20  ;;  %v1392_v50 = vpack.c.bf16 %v665_v49, %v664_v46  ;;  %v1395_v53 = vpack.c.bf16 %v667_v52, %v666_v51  ;;  %v668_v54 = vld [vmem:[%s2299_s3 + $0x30] sm:$0xff]  ;;  %v670_v57 = vld [vmem:[%s2299_s3 + $0x40] sm:$0xff]  ;;  %v671_v58 = vld [vmem:[%s2299_s3 + $0x48] sm:$0xff] }
  0x5a   :  { %1349 = vmatprep.subr.bf16.mxu0 %v1348_v22  ;;  %v1398_v56 = vpack.c.bf16 %v669_v55, %v668_v54  ;;  %v1401_v59 = vpack.c.bf16 %v671_v58, %v670_v57  ;;  %v672_v60 = vld [vmem:[%s2299_s3 + $0x50] sm:$0xff]  ;;  %v673_v61 = vld [vmem:[%s2299_s3 + $0x58] sm:$0xff]  ;;  %v674_v63 = vld [vmem:[%s2299_s3 + $0x60] sm:$0xff] }
  0x5b   :  { %1379 = vmatpush3.bf16.msra.mxu1 %v1378_v21  ;;  %v1404_v62 = vpack.c.bf16 %v673_v61, %v672_v60  ;;  %v675_v0 = vld [vmem:[%s2299_s3 + $0x68] sm:$0xff]  ;;  %v676_v2 = vld [vmem:[%s2299_s3 + $0x70] sm:$0xff]  ;;  %v677_v3 = vld [vmem:[%s2299_s3 + $0x78] sm:$0xff] }
  0x5c   :  { %1381 = vmatprep.subr.bf16.mxu1 %v1380_v26  ;;  %v1407_v1 = vpack.c.bf16 %v675_v0, %v674_v63  ;;  %v1410_v4 = vpack.c.bf16 %v677_v3, %v676_v2  ;;  %v756_v6 = vld [vmem:[%s2301_s5] sm:$0xff]  ;;  %v757_v7 = vld [vmem:[%s2301_s5 + $0x8] sm:$0xff]  ;;  %v758_v8 = vld [vmem:[%s2301_s5 + $0x10] sm:$0xff] }
  0x5d   :  { %1351 = vmatpush3.bf16.msra.mxu0 %v1350_v32  ;;  %v1413_v9 = vpack.c.bf16 %v757_v7, %v756_v6  ;;  %v759_v10 = vld [vmem:[%s2301_s5 + $0x18] sm:$0xff]  ;;  %v760_v12 = vld [vmem:[%s2301_s5 + $0x20] sm:$0xff]  ;;  %v761_v13 = vld [vmem:[%s2301_s5 + $0x28] sm:$0xff] }
  0x5e   :  { %1353 = vmatprep.subr.bf16.mxu0 %v1352_v34  ;;  %v1416_v11 = vpack.c.bf16 %v759_v10, %v758_v8  ;;  %v1419_v14 = vpack.c.bf16 %v761_v13, %v760_v12  ;;  %v762_v15 = vld [vmem:[%s2301_s5 + $0x30] sm:$0xff]  ;;  %v763_v16 = vld [vmem:[%s2301_s5 + $0x38] sm:$0xff]  ;;  %v764_v18 = vld [vmem:[%s2301_s5 + $0x40] sm:$0xff] }
  0x5f   :  { %1383 = vmatpush3.bf16.msra.mxu1 %v1382_v33  ;;  %v1422_v17 = vpack.c.bf16 %v763_v16, %v762_v15  ;;  %v765_v19 = vld [vmem:[%s2301_s5 + $0x48] sm:$0xff]  ;;  %v766_v21 = vld [vmem:[%s2301_s5 + $0x50] sm:$0xff]  ;;  %v767_v22 = vld [vmem:[%s2301_s5 + $0x58] sm:$0xff] }
  0x60   :  { %1385 = vmatprep.subr.bf16.mxu1 %v1384_v37  ;;  %v1425_v20 = vpack.c.bf16 %v765_v19, %v764_v18  ;;  %v1428_v23 = vpack.c.bf16 %v767_v22, %v766_v21  ;;  %v768_v24 = vld [vmem:[%s2301_s5 + $0x60] sm:$0xff]  ;;  %v769_v25 = vld [vmem:[%s2301_s5 + $0x68] sm:$0xff]  ;;  %v771_v54 = vld [vmem:[%s2301_s5 + $0x78] sm:$0xff] }
  0x61   :  { %1355 = vmatpush3.bf16.msra.mxu0 %v1354_v40  ;;  %v1431_v26 = vpack.c.bf16 %v769_v25, %v768_v24  ;;  %v879_v28 = vld [vmem:[%s2298_s2] ss:$0 sm:$0xff] }
  0x62   :  { %1388 = vmatprep.subr.bf16.mxu0 %v1489_v47 }
  0x63   :  { %1387 = vmatpush3.bf16.msra.mxu1 %v1386_v41 }
  0x64   :  { %586 = vmatmul.mubr.f32.vlgmr.msra.gmra.mrb[4].mxu0 %v38_v42  ;;  %1412 = vmatprep.subr.bf16.mxu1 %v1489_v47 }
  0x65   :  { %1390 = vmatpush3.bf16.msra.mxu0 %v1389_v48  ;;  %1158 = vmatprep.mubr.msk.f32.mxu0 %vm1490_vm0, %v1491_v5 }
  0x66   :  { %656 = vmatmul.mubr.f32.vlgmr.msra.gmra.mrb[4].mxu1 %v40_v43  ;;  %1391 = vmatprep.subr.bf16.mxu0 %v1489_v47 }
  0x67   :  { %1193 = vmatprep.mubr.msk.f32.mxu1 %vm1490_vm0, %v1491_v5  ;;  %1414 = vmatpush3.bf16.msra.mxu1 %v1413_v9 }
  0x68   :  { %1415 = vmatprep.subr.bf16.mxu1 %v1489_v47 }
  0x69   :  { %1393 = vmatpush3.bf16.msra.mxu0 %v1392_v50 }
  0x6a   :  { %1394 = vmatprep.subr.bf16.mxu0 %v1489_v47 }
  0x6b   :  { %1417 = vmatpush3.bf16.msra.mxu1 %v1416_v11 }
  0x6c   :  { %1418 = vmatprep.subr.bf16.mxu1 %v1489_v47 }
  0x6d   :  { %1396 = vmatpush3.bf16.msra.mxu0 %v1395_v53  ;;  %v770_v53 = vld [vmem:[%s2301_s5 + $0x70] sm:$0xff] }
  0x6e   :  { %1397 = vmatprep.subr.bf16.mxu0 %v1489_v47  ;;  %v1434_v55 = vpack.c.bf16 %v771_v54, %v770_v53 }
  0x6f   :  { %1420 = vmatpush3.bf16.msra.mxu1 %v1419_v14 }
  0x70   :  { %1421 = vmatprep.subr.bf16.mxu1 %v1489_v47 }
  0x71   :  { %1399 = vmatpush3.bf16.msra.mxu0 %v1398_v56  ;;  %v880_v56 = vld [vmem:[%s2300_s4] ss:$0 sm:$0xff] }
  0x72   :  { %1400 = vmatprep.subr.bf16.mxu0 %v1489_v47 }
  0x73   :  { %1423 = vmatpush3.bf16.msra.mxu1 %v1422_v17 }
  0x74   :  { %1424 = vmatprep.subr.bf16.mxu1 %v1489_v47 }
  0x75   :  { %1402 = vmatpush3.bf16.msra.mxu0 %v1401_v59 }
  0x76   :  { %1403 = vmatprep.subr.bf16.mxu0 %v1489_v47 }
  0x77   :  { %1426 = vmatpush3.bf16.msra.mxu1 %v1425_v20 }
  0x78   :  { %1427 = vmatprep.subr.bf16.mxu1 %v1489_v47 }
  0x79   :  { %1405 = vmatpush3.bf16.msra.mxu0 %v1404_v62 }
  0x7a   :  { %1406 = vmatprep.subr.bf16.mxu0 %v1489_v47 }
  0x7b   :  { %1429 = vmatpush3.bf16.msra.mxu1 %v1428_v23 }
  0x7c   :  { %1430 = vmatprep.subr.bf16.mxu1 %v1489_v47 }
  0x7d   :  { %1408 = vmatpush3.bf16.msra.mxu0 %v1407_v1 }
  0x7e   :  { %1409 = vmatprep.subr.bf16.mxu0 %v1489_v47 }
  0x7f   :  { %1432 = vmatpush3.bf16.msra.mxu1 %v1431_v26 }
  0x80   :  { %1433 = vmatprep.subr.bf16.mxu1 %v1489_v47 }
  0x81   :  { %1411 = vmatpush3.bf16.msra.mxu0 %v1410_v4 }
  0x83   :  { %1435 = vmatpush3.bf16.msra.mxu1 %v1434_v55 }
  0xf7   :  { %v914_v27 = vpop.f32.mrb[0].mxu0 }
  0xf8   :  { %v915_v29 = vpop.f32.mrb[1].mxu0 }
  0xf9   :  { %v949_v30 = vpop.f32.mrb[0].mxu1  ;;  %v916_v31 = vadd.f32 %v915_v29, %v914_v27 }
  0xfa   :  { %v950_v32 = vpop.f32.mrb[1].mxu1 }
  0xfb   :  { %v951_v33 = vadd.f32 %v950_v32, %v949_v30  ;;  %v308_v34 = vadd.f32 %v916_v31, %v879_v28 }
  0xfd   :  { %v378_v35 = vadd.f32 %v951_v33, %v308_v34 }
 0x117   :  { %v984_v36 = vpop.f32.mrb[2].mxu0 }
 0x118   :  { %v985_v37 = vpop.f32.mrb[3].mxu0 }
 0x119   :  { %v1019_v38 = vpop.f32.mrb[2].mxu1  ;;  %v986_v39 = vadd.f32 %v985_v37, %v984_v36 }
 0x11a   :  { %v1020_v40 = vpop.f32.mrb[3].mxu1 }
 0x11b   :  { %v1021_v41 = vadd.f32 %v1020_v40, %v1019_v38  ;;  %v448_v42 = vadd.f32 %v986_v39, %v378_v35 }
 0x11d   :  { %v518_v43 = vadd.f32 %v1021_v41, %v448_v42 }
 0x137   :  { %v1054_v44 = vpop.f32.mrb[4].mxu0 }
 0x138   :  { %v1055_v45 = vpop.f32.mrb[5].mxu0 }
 0x139   :  { %v1089_v46 = vpop.f32.mrb[4].mxu1  ;;  %v1056_v47 = vadd.f32 %v1055_v45, %v1054_v44 }
 0x13a   :  { %v1090_v48 = vpop.f32.mrb[5].mxu1 }
 0x13b   :  { %v1091_v49 = vadd.f32 %v1090_v48, %v1089_v46  ;;  %v588_v50 = vadd.f32 %v1056_v47, %v518_v43 }
 0x13d   :  { %v658_v51 = vadd.f32 %v1091_v49, %v588_v50 }
 0x13f   :  { %v661_v52 = vmax.f32 %v658_v51, 0.0 }
 0x141   :  { %1159 = vmatmul.mubr.f32.vlgmr.msra.gmra.mrb[6].mxu0 %v661_v52 }
 0x214   :  { %v751_v57 = vpop.f32.mrb[6].mxu0 }
 0x215   :  { %v752_v58 = vadd.f32 %v880_v56, %v751_v57  ;;  %v1160_v59 = vpop.f32.mrb[7].mxu0 }
 0x217   :  { %v755_v60 = vmax.f32 %v752_v58, 0.0 }
 0x219   :  { %849 = vst [vmem:[#allocation4] sm:$0xff] %v755_v60  ;;  %1194 = vmatmul.mubr.f32.vlgmr.msra.gmra.mrb[6].mxu1 %v755_v60 }
 0x21a   :  { %1452 = shalt.err (!%p1449_p4)
}
 0x21b   :  { %s1453_s4 = scalar_lea.hbm %s2304_s8, 128 }
 0x21c   :  { %p1454_p5 = scmp.ne.s32.totalorder %s2304_s8, %s1453_s4  ;;  %p1457_p6 = scmp.lt.u32.totalorder %s1453_s4, %s2304_s8 }
 0x21e   :  { %p1459_p7 = pnand %p1457_p6, %p1454_p5 }
 0x220   :  { %1462 = shalt.err (!%p1459_p7)
}
 0x221   :  { %870 = dma.vmem_to_hbm [thread:$0]  %s868_s11, 128, %s2304_s8, [#allocation5]   ;;  %v881_v61 = vld [vmem:[%s2302_s6] ss:$0 sm:$0xff] }
 0x222   :  { %s1493_s21 = smov [#allocation2]  }
 0x223   :  { %s857_s22 = sshll.u32 %s1493_s21, 4  ;;  %s858_s22 = int_to_ptr.vmem [resolvable:$true] %s857_s22 }
 0x224   :  { %s1463_s0 = scalar_lea.vmem %s858_s22, 128  ;;  %p1468_p9 = scmp.lt.s32.totalorder %s858_s22, %s858_s22 }
 0x225   :  { %p1464_p8 = scmp.ne.s32.totalorder %s858_s22, %s1463_s0  ;;  %p1469_p10 = scmp.lt.s32.totalorder %s1463_s0, %s1463_s0 }
 0x227   :  { %p1470_p11 = por %p1469_p10, %p1468_p9 }
 0x229   :  { %p1471_p12 = pnand %p1470_p11, %p1464_p8 }
 0x2ec   :  { %v845_v62 = vpop.f32.mrb[6].mxu1 }
 0x2ed   :  { %v846_v63 = vadd.f32 %v881_v61, %v845_v62  ;;  %v1195_v0 = vpop.f32.mrb[7].mxu1 }
 0x2ef   :  { %850 = vst [vmem:[#allocation2] sm:$0xff] %v846_v63 }
 0x2f0   :  { %1474 = shalt.err (!%p1471_p12)
}
 0x2f1   :  { %s1475_s24 = scalar_lea.hbm %s2303_s7, 128 }
 0x2f2   :  { %p1476_p13 = scmp.ne.s32.totalorder %s2303_s7, %s1475_s24  ;;  %p1479_p0 = scmp.lt.u32.totalorder %s1475_s24, %s2303_s7 }
 0x2f4   :  { %p1481_p1 = pnand %p1479_p0, %p1476_p13 }
 0x2f6   :  { %1484 = shalt.err (!%p1481_p1)
}
 0x2f7   :  { %860 = dma.vmem_to_hbm [thread:$0]  %s858_s22, 128, %s2303_s7, [#allocation3]  }
 0x2f8   :  { %1485 = dma.done.wait [#allocation3], 128  }
 0x2f9   :  { %1486 = vsyncadd [#allocation3], 4294967168 }
 0x2fa   :  { %1487 = dma.done.wait [#allocation5], 128  }
 0x2fb   :  { %1488 = vsyncadd [#allocation5], 4294967168 }
 0x2fc   :  { %877 = vsyncpa [#allocation3], 1 }
 0x2fd   :  { %878 = vsyncpa [#allocation5], 1 }

// kernel: digits_backbone_forward.2
= control target key start
LH: loop header
LB: loop body
LE: loop exit
PB: predicated region body
PF: predicated region fallthrough
CT: control target
= control target key end

     0   :  { %vm60_vm0 = vcmask 64512   ;;  %s17876_s1 = inlined_call_operand.vmem [shape: f32[8,128], index: 1, kind: input, shape index: {}]   ;;  %s17877_s0 = inlined_call_operand.vmem [shape: f32[512,8], index: 0, kind: input, shape index: {}]   ;;  %s17878_s4 = inlined_call_operand.vmem [shape: f32[9,128,128], index: 4, kind: input, shape index: {}]   ;;  %s17879_s2 = inlined_call_operand.vmem [shape: f32[9,128], index: 2, kind: input, shape index: {}]   ;;  %s17880_s3 = inlined_call_operand.vmem [shape: f32[1,128], index: 3, kind: input, shape index: {}]   ;;  %s17881_s5 = inlined_call_operand.vmem [shape: f32[1,128], index: 5, kind: input, shape index: {}]   ;;  %s17882_s6 = inlined_call_operand.vmem [shape: f32[2,48,128], index: 6, kind: output, shape index: {}]  }
   0x1   :  { %v59_v0 = vld [vmem:[%s17876_s1] sm:$0xff]  ;;  %v28_v2 = vld [vmem:[%s17877_s0 + $0x8] sm:$0xff]  ;;  %v29_v3 = vld [vmem:[%s17877_s0 + $0x10] sm:$0xff] }
   0x2   :  { %v27_v1 = vld [vmem:[%s17877_s0] sm:$0xff]  ;;  %10100 = vmatprep.subr.mxu0 %v59_v0  ;;  %10150 = vmatprep.subr.mxu1 %v59_v0  ;;  %v30_v4 = vld [vmem:[%s17877_s0 + $0x18] sm:$0xff]  ;;  %v32_v6 = vld [vmem:[%s17877_s0 + $0x28] sm:$0xff] }
   0x3   :  { %10102 = vmatprep.mubr.msk.f32.mxu0 %vm60_vm0, %v27_v1  ;;  %10101 = vmatpush3.msra.mxu0 %v59_v0  ;;  %v31_v5 = vld [vmem:[%s17877_s0 + $0x20] sm:$0xff]  ;;  %v33_v7 = vld [vmem:[%s17877_s0 + $0x30] sm:$0xff]  ;;  %v415_v9 = vld [vmem:[%s17877_s0 + $0x108] sm:$0xff] }
   0x4   :  { %10103 = vmatmul.mubr.msk.f32.vlgmr.msra.gmra.mrb[0].mxu0 %vm60_vm0, %v28_v2  ;;  %10151 = vmatpush3.msra.mxu1 %v59_v0  ;;  %v414_v8 = vld [vmem:[%s17877_s0 + $0x100] sm:$0xff]  ;;  %v416_v10 = vld [vmem:[%s17877_s0 + $0x110] sm:$0xff]  ;;  %v34_v11 = vld [vmem:[%s17877_s0 + $0x38] sm:$0xff] }
   0x5   :  { %10105 = vmatprep.mubr.msk.f32.mxu0 %vm60_vm0, %v29_v3  ;;  %10152 = vmatprep.mubr.msk.f32.mxu1 %vm60_vm0, %v414_v8  ;;  %v35_v12 = vld [vmem:[%s17877_s0 + $0x40] sm:$0xff]  ;;  %v417_v13 = vld [vmem:[%s17877_s0 + $0x118] sm:$0xff]  ;;  %v36_v15 = vld [vmem:[%s17877_s0 + $0x48] sm:$0xff] }
   0x6   :  { %10153 = vmatmul.mubr.msk.f32.vlgmr.msra.gmra.mrb[0].mxu1 %vm60_vm0, %v415_v9  ;;  %v418_v14 = vld [vmem:[%s17877_s0 + $0x120] sm:$0xff]  ;;  %v37_v16 = vld [vmem:[%s17877_s0 + $0x50] sm:$0xff]  ;;  %v419_v17 = vld [vmem:[%s17877_s0 + $0x128] sm:$0xff] }
   0x7   :  { %10155 = vmatprep.mubr.msk.f32.mxu1 %vm60_vm0, %v416_v10  ;;  %v38_v18 = vld [vmem:[%s17877_s0 + $0x58] sm:$0xff]  ;;  %v39_v19 = vld [vmem:[%s17877_s0 + $0x60] sm:$0xff]  ;;  %v40_v20 = vld [vmem:[%s17877_s0 + $0x68] sm:$0xff] }
   0x8   :  { %10106 = vmatmul.mubr.msk.f32.gmra.mrb[2].mxu0 %vm60_vm0, %v30_v4  ;;  %v41_v21 = vld [vmem:[%s17877_s0 + $0x70] sm:$0xff]  ;;  %v42_v22 = vld [vmem:[%s17877_s0 + $0x78] sm:$0xff]  ;;  %v43_v23 = vld [vmem:[%s17877_s0 + $0x80] sm:$0xff] }
   0x9   :  { %10108 = vmatprep.mubr.msk.f32.mxu0 %vm60_vm0, %v31_v5  ;;  %v44_v24 = vld [vmem:[%s17877_s0 + $0x88] sm:$0xff]  ;;  %v45_v25 = vld [vmem:[%s17877_s0 + $0x90] sm:$0xff]  ;;  %v46_v26 = vld [vmem:[%s17877_s0 + $0x98] sm:$0xff] }
   0xa   :  { %10156 = vmatmul.mubr.msk.f32.gmra.mrb[2].mxu1 %vm60_vm0, %v417_v13  ;;  %v47_v27 = vld [vmem:[%s17877_s0 + $0xa0] sm:$0xff]  ;;  %v48_v28 = vld [vmem:[%s17877_s0 + $0xa8] sm:$0xff]  ;;  %v49_v29 = vld [vmem:[%s17877_s0 + $0xb0] sm:$0xff] }
   0xb   :  { %10158 = vmatprep.mubr.msk.f32.mxu1 %vm60_vm0, %v418_v14  ;;  %v50_v30 = vld [vmem:[%s17877_s0 + $0xb8] sm:$0xff]  ;;  %v51_v31 = vld [vmem:[%s17877_s0 + $0xc0] sm:$0xff]  ;;  %v52_v32 = vld [vmem:[%s17877_s0 + $0xc8] sm:$0xff] }
   0xc   :  { %10109 = vmatmul.mubr.msk.f32.gmra.mrb[4].mxu0 %vm60_vm0, %v32_v6  ;;  %v53_v33 = vld [vmem:[%s17877_s0 + $0xd0] sm:$0xff]  ;;  %v54_v34 = vld [vmem:[%s17877_s0 + $0xd8] sm:$0xff]  ;;  %v55_v35 = vld [vmem:[%s17877_s0 + $0xe0] sm:$0xff] }
   0xd   :  { %10111 = vmatprep.mubr.msk.f32.mxu0 %vm60_vm0, %v33_v7  ;;  %v56_v36 = vld [vmem:[%s17877_s0 + $0xe8] sm:$0xff]  ;;  %v57_v37 = vld [vmem:[%s17877_s0 + $0xf0] sm:$0xff]  ;;  %v58_v38 = vld [vmem:[%s17877_s0 + $0xf8] sm:$0xff] }
   0xe   :  { %10159 = vmatmul.mubr.msk.f32.gmra.mrb[4].mxu1 %vm60_vm0, %v419_v17  ;;  %v420_v39 = vld [vmem:[%s17877_s0 + $0x130] sm:$0xff]  ;;  %v421_v40 = vld [vmem:[%s17877_s0 + $0x138] sm:$0xff]  ;;  %v8507_v41 = vld [vmem:[%s17878_s4 + $0x80] sm:$0xff] }
   0xf   :  { %10161 = vmatprep.mubr.msk.f32.mxu1 %vm60_vm0, %v420_v39  ;;  %v8508_v42 = vld [vmem:[%s17878_s4 + $0x88] sm:$0xff]  ;;  %v422_v43 = vld [vmem:[%s17877_s0 + $0x140] sm:$0xff]  ;;  %v424_v46 = vld [vmem:[%s17877_s0 + $0x150] sm:$0xff] }
  0x10   :  { %10112 = vmatmul.mubr.msk.f32.gmra.mrb[6].mxu0 %vm60_vm0, %v34_v11  ;;  %v12000_v44 = vpack.c.bf16 %v8508_v42, %v8507_v41  ;;  %v423_v45 = vld [vmem:[%s17877_s0 + $0x148] sm:$0xff]  ;;  %v425_v47 = vld [vmem:[%s17877_s0 + $0x158] sm:$0xff]  ;;  %v8509_v48 = vld [vmem:[%s17878_s4 + $0x90] sm:$0xff] }
  0x11   :  { %10114 = vmatprep.mubr.msk.f32.mxu0 %vm60_vm0, %v35_v12  ;;  %v8510_v49 = vld [vmem:[%s17878_s4 + $0x98] sm:$0xff]  ;;  %v426_v51 = vld [vmem:[%s17877_s0 + $0x160] sm:$0xff]  ;;  %v427_v52 = vld [vmem:[%s17877_s0 + $0x168] sm:$0xff] }
  0x12   :  { %10162 = vmatmul.mubr.msk.f32.gmra.mrb[6].mxu1 %vm60_vm0, %v421_v40  ;;  %12001 = vmatprep.subr.bf16.mxu0 %v12000_v44  ;;  %v12004_v50 = vpack.c.bf16 %v8510_v49, %v8509_v48  ;;  %v8511_v53 = vld [vmem:[%s17878_s4 + $0xa0] sm:$0xff]  ;;  %v8512_v54 = vld [vmem:[%s17878_s4 + $0xa8] sm:$0xff]  ;;  %v428_v56 = vld [vmem:[%s17877_s0 + $0x170] sm:$0xff] }
  0x13   :  { %10164 = vmatprep.mubr.msk.f32.mxu1 %vm60_vm0, %v422_v43  ;;  %12289 = vmatprep.subr.bf16.mxu1 %v12000_v44  ;;  %v12008_v55 = vpack.c.bf16 %v8512_v54, %v8511_v53  ;;  %v429_v57 = vld [vmem:[%s17877_s0 + $0x178] sm:$0xff]  ;;  %v8513_v58 = vld [vmem:[%s17878_s4 + $0xb0] sm:$0xff]  ;;  %v430_v61 = vld [vmem:[%s17877_s0 + $0x180] sm:$0xff] }
  0x14   :  { %10115 = vmatmul.mubr.msk.f32.gmra.mrb[8].mxu0 %vm60_vm0, %v36_v15  ;;  %12291 = vmatpush3.bf16.msra.mxu1 %v12000_v44  ;;  %v8514_v59 = vld [vmem:[%s17878_s4 + $0xb8] sm:$0xff]  ;;  %v431_v62 = vld [vmem:[%s17877_s0 + $0x188] sm:$0xff]  ;;  %v8515_v63 = vld [vmem:[%s17878_s4 + $0xc0] sm:$0xff] }
  0x15   :  { %10117 = vmatprep.mubr.msk.f32.mxu0 %vm60_vm0, %v37_v16  ;;  %12003 = vmatpush3.bf16.msra.mxu0 %v12000_v44  ;;  %v12012_v60 = vpack.c.bf16 %v8514_v59, %v8513_v58  ;;  %v8516_v0 = vld [vmem:[%s17878_s4 + $0xc8] sm:$0xff]  ;;  %v432_v2 = vld [vmem:[%s17877_s0 + $0x190] sm:$0xff]  ;;  %v433_v3 = vld [vmem:[%s17877_s0 + $0x198] sm:$0xff] }
  0x16   :  { %10165 = vmatmul.mubr.msk.f32.gmra.mrb[8].mxu1 %vm60_vm0, %v423_v45  ;;  %12005 = vmatprep.subr.bf16.mxu0 %v12004_v50  ;;  %v12016_v1 = vpack.c.bf16 %v8516_v0, %v8515_v63  ;;  %v8517_v4 = vld [vmem:[%s17878_s4 + $0xd0] sm:$0xff]  ;;  %v8518_v5 = vld [vmem:[%s17878_s4 + $0xd8] sm:$0xff]  ;;  %v434_v7 = vld [vmem:[%s17877_s0 + $0x1a0] sm:$0xff] }
  0x17   :  { %10167 = vmatprep.mubr.msk.f32.mxu1 %vm60_vm0, %v424_v46  ;;  %12293 = vmatprep.subr.bf16.mxu1 %v12004_v50  ;;  %v12020_v6 = vpack.c.bf16 %v8518_v5, %v8517_v4  ;;  %v435_v8 = vld [vmem:[%s17877_s0 + $0x1a8] sm:$0xff]  ;;  %v8519_v9 = vld [vmem:[%s17878_s4 + $0xe0] sm:$0xff]  ;;  %v436_v12 = vld [vmem:[%s17877_s0 + $0x1b0] sm:$0xff] }
  0x18   :  { %10118 = vmatmul.mubr.msk.f32.gmra.mrb[10].mxu0 %vm60_vm0, %v38_v18  ;;  %12295 = vmatpush3.bf16.msra.mxu1 %v12004_v50  ;;  %v8520_v10 = vld [vmem:[%s17878_s4 + $0xe8] sm:$0xff]  ;;  %v437_v13 = vld [vmem:[%s17877_s0 + $0x1b8] sm:$0xff]  ;;  %v8521_v14 = vld [vmem:[%s17878_s4 + $0xf0] sm:$0xff] }
  0x19   :  { %10120 = vmatprep.mubr.msk.f32.mxu0 %vm60_vm0, %v39_v19  ;;  %12007 = vmatpush3.bf16.msra.mxu0 %v12004_v50  ;;  %v12024_v11 = vpack.c.bf16 %v8520_v10, %v8519_v9  ;;  %v8522_v15 = vld [vmem:[%s17878_s4 + $0xf8] sm:$0xff]  ;;  %v438_v16 = vld [vmem:[%s17877_s0 + $0x1c0] sm:$0xff]  ;;  %v439_v18 = vld [vmem:[%s17877_s0 + $0x1c8] sm:$0xff] }
  0x1a   :  { %10168 = vmatmul.mubr.msk.f32.gmra.mrb[10].mxu1 %vm60_vm0, %v425_v47  ;;  %12009 = vmatprep.subr.bf16.mxu0 %v12008_v55  ;;  %v12028_v17 = vpack.c.bf16 %v8522_v15, %v8521_v14  ;;  %v440_v19 = vld [vmem:[%s17877_s0 + $0x1d0] sm:$0xff] }
  0x1b   :  { %10170 = vmatprep.mubr.msk.f32.mxu1 %vm60_vm0, %v426_v51  ;;  %12297 = vmatprep.subr.bf16.mxu1 %v12008_v55  ;;  %v2305_v47 = vld [vmem:[%s17878_s4 + $0x10] sm:$0xff] }
  0x1c   :  { %10121 = vmatmul.mubr.msk.f32.gmra.mrb[12].mxu0 %vm60_vm0, %v40_v20  ;;  %12299 = vmatpush3.bf16.msra.mxu1 %v12008_v55  ;;  %v2303_v20 = vld [vmem:[%s17878_s4] sm:$0xff] }
  0x1d   :  { %10123 = vmatprep.mubr.msk.f32.mxu0 %vm60_vm0, %v41_v21  ;;  %12011 = vmatpush3.bf16.msra.mxu0 %v12008_v55  ;;  %v2304_v21 = vld [vmem:[%s17878_s4 + $0x8] sm:$0xff] }
  0x1e   :  { %10171 = vmatmul.mubr.msk.f32.gmra.mrb[12].mxu1 %vm60_vm0, %v427_v52  ;;  %12013 = vmatprep.subr.bf16.mxu0 %v12012_v60  ;;  %v2306_v52 = vld [vmem:[%s17878_s4 + $0x18] sm:$0xff] }
  0x1f   :  { %10173 = vmatprep.mubr.msk.f32.mxu1 %vm60_vm0, %v428_v56  ;;  %12301 = vmatprep.subr.bf16.mxu1 %v12012_v60 }
  0x20   :  { %10124 = vmatmul.mubr.msk.f32.gmra.mrb[14].mxu0 %vm60_vm0, %v42_v22  ;;  %12303 = vmatpush3.bf16.msra.mxu1 %v12012_v60  ;;  %v13944_v22 = vpack.c.bf16 %v2304_v21, %v2303_v20 }
  0x21   :  { %10126 = vmatprep.mubr.msk.f32.mxu0 %vm60_vm0, %v43_v23  ;;  %12015 = vmatpush3.bf16.msra.mxu0 %v12012_v60  ;;  %v441_v23 = vld [vmem:[%s17877_s0 + $0x1d8] sm:$0xff] }
  0x22   :  { %10174 = vmatmul.mubr.msk.f32.gmra.mrb[14].mxu1 %vm60_vm0, %v429_v57  ;;  %12017 = vmatprep.subr.bf16.mxu0 %v12016_v1  ;;  %17968 = vst [vmem:[#allocation5_spill] sm:$0xff] %v13944_v22 }
  0x23   :  { %10176 = vmatprep.mubr.msk.f32.mxu1 %vm60_vm0, %v430_v61  ;;  %12305 = vmatprep.subr.bf16.mxu1 %v12016_v1 }
  0x24   :  { %10127 = vmatmul.mubr.msk.f32.gmra.mrb[16].mxu0 %vm60_vm0, %v44_v24  ;;  %12307 = vmatpush3.bf16.msra.mxu1 %v12016_v1  ;;  %v442_v24 = vld [vmem:[%s17877_s0 + $0x1e0] sm:$0xff] }
  0x25   :  { %10129 = vmatprep.mubr.msk.f32.mxu0 %vm60_vm0, %v45_v25  ;;  %12019 = vmatpush3.bf16.msra.mxu0 %v12016_v1  ;;  %v443_v25 = vld [vmem:[%s17877_s0 + $0x1e8] sm:$0xff] }
  0x26   :  { %10177 = vmatmul.mubr.msk.f32.gmra.mrb[16].mxu1 %vm60_vm0, %v431_v62  ;;  %12021 = vmatprep.subr.bf16.mxu0 %v12020_v6  ;;  %v13998_v62 = vpack.c.bf16 %v2306_v52, %v2305_v47 }
  0x27   :  { %10179 = vmatprep.mubr.msk.f32.mxu1 %vm60_vm0, %v432_v2  ;;  %12309 = vmatprep.subr.bf16.mxu1 %v12020_v6 }
  0x28   :  { %10130 = vmatmul.mubr.msk.f32.gmra.mrb[18].mxu0 %vm60_vm0, %v46_v26  ;;  %12311 = vmatpush3.bf16.msra.mxu1 %v12020_v6  ;;  %v822_v26 = vlaneseq  ;;  %17975 = vst [vmem:[#allocation12_spill] sm:$0xff] %v13998_v62 }
  0x29   :  { %10132 = vmatprep.mubr.msk.f32.mxu0 %vm60_vm0, %v47_v27  ;;  %12023 = vmatpush3.bf16.msra.mxu0 %v12020_v6 }
  0x2a   :  { %10180 = vmatmul.mubr.msk.f32.gmra.mrb[18].mxu1 %vm60_vm0, %v433_v3  ;;  %12025 = vmatprep.subr.bf16.mxu0 %v12024_v11  ;;  %v823_v27 = vshrl.u32 %v822_v26, 7 }
  0x2b   :  { %10182 = vmatprep.mubr.msk.f32.mxu1 %vm60_vm0, %v434_v7  ;;  %12313 = vmatprep.subr.bf16.mxu1 %v12024_v11 }
  0x2c   :  { %10133 = vmatmul.mubr.msk.f32.gmra.mrb[20].mxu0 %vm60_vm0, %v48_v28  ;;  %12315 = vmatpush3.bf16.msra.mxu1 %v12024_v11  ;;  %v988_v41 = vsub.s32 4, %v823_v27  ;;  %v1026_v42 = vsub.s32 5, %v823_v27  ;;  %v1064_v43 = vsub.s32 6, %v823_v27  ;;  %v1102_v46 = vsub.s32 7, %v823_v27 }
  0x2d   :  { %10135 = vmatprep.mubr.msk.f32.mxu0 %vm60_vm0, %v49_v29  ;;  %12027 = vmatpush3.bf16.msra.mxu0 %v12024_v11 }
  0x2e   :  { %10183 = vmatmul.mubr.msk.f32.gmra.mrb[20].mxu1 %vm60_vm0, %v435_v8  ;;  %12029 = vmatprep.subr.bf16.mxu0 %v12028_v17 }
  0x2f   :  { %10185 = vmatprep.mubr.msk.f32.mxu1 %vm60_vm0, %v436_v12  ;;  %12317 = vmatprep.subr.bf16.mxu1 %v12028_v17 }
  0x30   :  { %10136 = vmatmul.mubr.msk.f32.gmra.mrb[22].mxu0 %vm60_vm0, %v50_v30  ;;  %12319 = vmatpush3.bf16.msra.mxu1 %v12028_v17  ;;  %v444_v30 = vld [vmem:[%s17877_s0 + $0x1f0] sm:$0xff] }
  0x31   :  { %10138 = vmatprep.mubr.msk.f32.mxu0 %vm60_vm0, %v51_v31  ;;  %12031 = vmatpush3.bf16.msra.mxu0 %v12028_v17  ;;  %v445_v31 = vld [vmem:[%s17877_s0 + $0x1f8] sm:$0xff] }
  0x32   :  { %10186 = vmatmul.mubr.msk.f32.gmra.mrb[22].mxu1 %vm60_vm0, %v437_v13  ;;  %12033 = vmatprep.subr.bf16.mxu0 %v13944_v22 }
  0x33   :  { %10188 = vmatprep.mubr.msk.f32.mxu1 %vm60_vm0, %v438_v16  ;;  %12321 = vmatprep.subr.bf16.mxu1 %v13944_v22 }
  0x34   :  { %10139 = vmatmul.mubr.msk.f32.gmra.mrb[24].mxu0 %vm60_vm0, %v52_v32  ;;  %v824_v32 = vsub.s32 0, %v823_v27 }
  0x35   :  { %10141 = vmatprep.mubr.msk.f32.mxu0 %vm60_vm0, %v53_v33  ;;  %v860_v33 = vsub.s32 1, %v823_v27 }
  0x36   :  { %10189 = vmatmul.mubr.msk.f32.gmra.mrb[24].mxu1 %vm60_vm0, %v439_v18 }
  0x37   :  { %10191 = vmatprep.mubr.msk.f32.mxu1 %vm60_vm0, %v440_v19 }
  0x38   :  { %10142 = vmatmul.mubr.msk.f32.gmra.mrb[26].mxu0 %vm60_vm0, %v54_v34  ;;  %v23_v34 = vld [vmem:[%s17879_s2] sm:$0xff] }
  0x39   :  { %10144 = vmatprep.mubr.msk.f32.mxu0 %vm60_vm0, %v55_v35  ;;  %v912_v35 = vsub.s32 2, %v823_v27  ;;  %v13971_v39 = vrot.slane %v23_v34, %v824_v32  ;;  %v13973_v40 = vrot.slane %v23_v34, %v860_v33  ;;  %v13987_v55 = vrot.slane %v23_v34, %v988_v41 }
  0x3a   :  { %10192 = vmatmul.mubr.msk.f32.gmra.mrb[26].mxu1 %vm60_vm0, %v441_v23  ;;  %v13989_v56 = vrot.slane %v23_v34, %v1026_v42  ;;  %v13991_v57 = vrot.slane %v23_v34, %v1064_v43  ;;  %v13994_v60 = vrot.slane %v23_v34, %v1102_v46 }
  0x3b   :  { %10194 = vmatprep.mubr.msk.f32.mxu1 %vm60_vm0, %v442_v24  ;;  %17969 = vst [vmem:[#allocation6_spill] sm:$0xff] %v13971_v39  ;;  %17970 = vst [vmem:[#allocation7_spill] sm:$0xff] %v13973_v40  ;;  %v13975_v44 = vrot.slane %v23_v34, %v912_v35 }
  0x3c   :  { %10145 = vmatmul.mubr.msk.f32.gmra.mrb[28].mxu0 %vm60_vm0, %v56_v36  ;;  %17973 = vst [vmem:[#allocation10_spill] sm:$0xff] %v13987_v55  ;;  %17974 = vst [vmem:[#allocation11_spill] sm:$0xff] %v13989_v56 }
  0x3d   :  { %10147 = vmatprep.mubr.msk.f32.mxu0 %vm60_vm0, %v57_v37  ;;  %v950_v37 = vsub.s32 3, %v823_v27  ;;  %17971 = vst [vmem:[#allocation8_spill] sm:$0xff] %v13975_v44 }
  0x3e   :  { %10195 = vmatmul.mubr.msk.f32.gmra.mrb[28].mxu1 %vm60_vm0, %v443_v25 }
  0x3f   :  { %10197 = vmatprep.mubr.msk.f32.mxu1 %vm60_vm0, %v444_v30  ;;  %v13980_v50 = vrot.slane %v23_v34, %v950_v37 }
  0x40   :  { %10148 = vmatmul.mubr.msk.f32.gmra.mrb[30].mxu0 %vm60_vm0, %v58_v38 }
  0x41   :  { %17972 = vst [vmem:[#allocation9_spill] sm:$0xff] %v13980_v50 }
  0x42   :  { %10198 = vmatmul.mubr.msk.f32.gmra.mrb[30].mxu1 %vm60_vm0, %v445_v31 }
  0xd7   :  { %v10104_v28 = vpop.f32.mrb[0].mxu0 }
  0xd8   :  { %383 = vst [vmem:[#allocation2 + $0x8] sm:$0xff] %v10104_v28  ;;  %v223_v29 = vpop.f32.mrb[1].mxu0  ;;  %v827_v63 = vmul.f32 %v10104_v28, %v13971_v39 }
  0xd9   :  { %382 = vst [vmem:[#allocation2] sm:$0xff] %v223_v29  ;;  %v826_v53 = vmul.f32 %v13971_v39, %v223_v29 }
  0xdb   :  { %v10107_v36 = vpop.f32.mrb[2].mxu0 }
  0xdc   :  { %385 = vst [vmem:[#allocation2 + $0x18] sm:$0xff] %v10107_v36  ;;  %v233_v38 = vpop.f32.mrb[3].mxu0  ;;  %v829_v0 = vmul.f32 %v10107_v36, %v13971_v39  ;;  %v953_v1 = vmul.f32 %v10107_v36, %v13980_v50 }
  0xdd   :  { %384 = vst [vmem:[#allocation2 + $0x10] sm:$0xff] %v233_v38  ;;  %v828_v2 = vmul.f32 %v13971_v39, %v233_v38  ;;  %v952_v11 = vmul.f32 %v13980_v50, %v233_v38 }
  0xdf   :  { %v10110_v45 = vpop.f32.mrb[4].mxu0 }
  0xe0   :  { %v842_v48 = vld [vmem:[#allocation2 + $0x1] sm:$0xff]  ;;  %387 = vst [vmem:[#allocation2 + $0x28] sm:$0xff] %v10110_v45  ;;  %v243_v51 = vpop.f32.mrb[5].mxu0  ;;  %v831_v14 = vmul.f32 %v10110_v45, %v13971_v39  ;;  %v955_v15 = vmul.f32 %v10110_v45, %v13980_v50  ;;  %v1067_v23 = vmul.f32 %v10110_v45, %v13991_v57 }
  0xe1   :  { %v894_v49 = vld [vmem:[#allocation2 + $0x2] sm:$0xff]  ;;  %v862_v54 = vmul.f32 %v13973_v40, %v842_v48  ;;  %386 = vst [vmem:[#allocation2 + $0x20] sm:$0xff] %v243_v51  ;;  %v830_v24 = vmul.f32 %v13971_v39, %v243_v51  ;;  %v954_v28 = vmul.f32 %v13980_v50, %v243_v51  ;;  %v1066_v38 = vmul.f32 %v13991_v57, %v243_v51 }
  0xe2   :  { %v914_v59 = vmul.f32 %v13975_v44, %v894_v49 }
  0xe3   :  { %v878_v58 = vadd.f32 %v862_v54, %v826_v53  ;;  %v13996_v61 = vpop.f32.mrb[6].mxu0 }
  0xe4   :  { %v843_v3 = vld [vmem:[#allocation2 + $0x9] sm:$0xff]  ;;  %v844_v4 = vld [vmem:[#allocation2 + $0x11] sm:$0xff]  ;;  %389 = vst [vmem:[#allocation2 + $0x38] sm:$0xff] %v13996_v61  ;;  %v14005_v6 = vpop.f32.mrb[7].mxu0 }
  0xe5   :  { %v895_v5 = vld [vmem:[#allocation2 + $0xa] sm:$0xff]  ;;  %v930_v7 = vadd.f32 %v914_v59, %v878_v58  ;;  %v863_v8 = vmul.f32 %v13973_v40, %v843_v3  ;;  %v864_v9 = vmul.f32 %v13973_v40, %v844_v4  ;;  %v896_v10 = vld [vmem:[#allocation2 + $0x12] sm:$0xff]  ;;  %388 = vst [vmem:[#allocation2 + $0x30] sm:$0xff] %v14005_v6  ;;  %v990_v19 = vmul.f32 %v13987_v55, %v844_v4 }
  0xe6   :  { %v915_v12 = vmul.f32 %v13975_v44, %v895_v5  ;;  %v916_v13 = vmul.f32 %v13975_v44, %v896_v10  ;;  %v1028_v21 = vmul.f32 %v13989_v56, %v896_v10  ;;  %v832_v52 = vmul.f32 %v13971_v39, %v14005_v6 }
  0xe7   :  { %v879_v16 = vadd.f32 %v863_v8, %v827_v63  ;;  %v880_v17 = vadd.f32 %v864_v9, %v828_v2  ;;  %v968_v18 = vadd.f32 %v952_v11, %v930_v7  ;;  %v14016_v20 = vpop.f32.mrb[8].mxu0  ;;  %v2307_v7 = vld [vmem:[%s17878_s4 + $0x20] sm:$0xff]  ;;  %v10154_v8 = vpop.f32.mrb[0].mxu1 }
  0xe8   :  { %v845_v25 = vld [vmem:[#allocation2 + $0x19] sm:$0xff]  ;;  %v14021_v26 = vld [vmem:[#allocation2 + $0x21] sm:$0xff]  ;;  %391 = vst [vmem:[#allocation2 + $0x48] sm:$0xff] %v14016_v20  ;;  %v14025_v29 = vpop.f32.mrb[9].mxu0  ;;  %769 = vst [vmem:[#allocation2 + $0x108] sm:$0xff] %v10154_v8  ;;  %v959_v8 = vmul.f32 %v14016_v20, %v13980_v50 }
  0xe9   :  { %v897_v27 = vld [vmem:[#allocation2 + $0x1a] sm:$0xff]  ;;  %v931_v30 = vadd.f32 %v915_v12, %v879_v16  ;;  %v932_v31 = vadd.f32 %v916_v13, %v880_v17  ;;  %v1006_v32 = vadd.f32 %v990_v19, %v968_v18  ;;  %v865_v33 = vmul.f32 %v13973_v40, %v845_v25  ;;  %v14028_v34 = vld [vmem:[#allocation2 + $0x22] sm:$0xff]  ;;  %390 = vst [vmem:[#allocation2 + $0x40] sm:$0xff] %v14025_v29  ;;  %v2309_v17 = vld [vmem:[%s17878_s4 + $0x30] sm:$0xff]  ;;  %v609_v18 = vpop.f32.mrb[1].mxu1 }
  0xea   :  { %v866_v35 = vmul.f32 %v13973_v40, %v14021_v26  ;;  %v917_v36 = vmul.f32 %v13975_v44, %v897_v27  ;;  %v991_v37 = vmul.f32 %v13987_v55, %v845_v25  ;;  %v918_v48 = vmul.f32 %v13975_v44, %v14028_v34  ;;  %v2308_v16 = vld [vmem:[%s17878_s4 + $0x28] sm:$0xff]  ;;  %768 = vst [vmem:[#allocation2 + $0x100] sm:$0xff] %v609_v18 }
  0xeb   :  { %v1044_v41 = vadd.f32 %v1028_v21, %v1006_v32  ;;  %v881_v42 = vadd.f32 %v865_v33, %v829_v0  ;;  %v969_v43 = vadd.f32 %v953_v1, %v931_v30  ;;  %v970_v45 = vadd.f32 %v954_v28, %v932_v31  ;;  %v14036_v46 = vpop.f32.mrb[10].mxu0 }
  0xec   :  { %v882_v47 = vadd.f32 %v866_v35, %v830_v24  ;;  %v992_v49 = vmul.f32 %v13987_v55, %v14021_v26  ;;  %v14044_v53 = vld [vmem:[#allocation2 + $0x29] sm:$0xff]  ;;  %v14046_v54 = vld [vmem:[#allocation2 + $0x31] sm:$0xff]  ;;  %393 = vst [vmem:[#allocation2 + $0x58] sm:$0xff] %v14036_v46  ;;  %v14049_v51 = vpop.f32.mrb[11].mxu0  ;;  %v1029_v63 = vmul.f32 %v13989_v56, %v897_v27  ;;  %v1030_v4 = vmul.f32 %v13989_v56, %v14028_v34 }
  0xed   :  { %v933_v58 = vadd.f32 %v917_v36, %v881_v42  ;;  %v1007_v59 = vadd.f32 %v991_v37, %v969_v43  ;;  %v14052_v0 = vadd.f32 %v1066_v38, %v1044_v41  ;;  %v14054_v1 = vld [vmem:[#allocation2 + $0x2a] sm:$0xff]  ;;  %392 = vst [vmem:[#allocation2 + $0x50] sm:$0xff] %v14049_v51  ;;  %v867_v5 = vmul.f32 %v13973_v40, %v14044_v53  ;;  %v14079_v24 = vld [vmem:[#allocation2 + $0x32] sm:$0xff] }
  0xee   :  { %v934_v2 = vadd.f32 %v918_v48, %v882_v47  ;;  %v1008_v3 = vadd.f32 %v992_v49, %v970_v45  ;;  %v868_v11 = vmul.f32 %v13973_v40, %v14046_v54  ;;  %v956_v12 = vmul.f32 %v13980_v50, %v14005_v6  ;;  %v2312_v38 = vld [vmem:[%s17878_s4 + $0x48] sm:$0xff] }
  0xef   :  { %v971_v9 = vadd.f32 %v955_v15, %v933_v58  ;;  %v1045_v10 = vadd.f32 %v1029_v63, %v1007_v59  ;;  %v14068_v13 = vpop.f32.mrb[12].mxu0  ;;  %v2310_v15 = vld [vmem:[%s17878_s4 + $0x38] sm:$0xff]  ;;  %v883_v21 = vadd.f32 %v867_v5, %v831_v14  ;;  %v919_v25 = vmul.f32 %v13975_v44, %v14054_v1 }
  0xf0   :  { %v1046_v19 = vadd.f32 %v1030_v4, %v1008_v3  ;;  %v1068_v27 = vmul.f32 %v13991_v57, %v14005_v6  ;;  %395 = vst [vmem:[#allocation2 + $0x68] sm:$0xff] %v14068_v13  ;;  %v14086_v28 = vpop.f32.mrb[13].mxu0  ;;  %v884_v31 = vadd.f32 %v868_v11, %v832_v52  ;;  %v972_v32 = vadd.f32 %v956_v12, %v934_v2  ;;  %v14097_v35 = vld [vmem:[#allocation2 + $0x39] sm:$0xff]  ;;  %v14113_v47 = vld [vmem:[#allocation2 + $0x41] sm:$0xff] }
  0xf1   :  { %v14088_v30 = vadd.f32 %v1067_v23, %v1045_v10  ;;  %v993_v14 = vmul.f32 %v13987_v55, %v14044_v53  ;;  %394 = vst [vmem:[#allocation2 + $0x60] sm:$0xff] %v14086_v28  ;;  %v833_v33 = vmul.f32 %v13996_v61, %v13971_v39  ;;  %v994_v6 = vmul.f32 %v13987_v55, %v14046_v54  ;;  %v2311_v23 = vld [vmem:[%s17878_s4 + $0x40] sm:$0xff]  ;;  %v14146_v11 = vld [vmem:[%s17879_s2 + $0x8] ss:$0 sm:$0xff] }
  0xf2   :  { %v14099_v36 = vpack.c.bf16 %v2308_v16, %v2307_v7  ;;  %v14101_v37 = vpack.c.bf16 %v2310_v15, %v2309_v17  ;;  %v920_v41 = vmul.f32 %v13975_v44, %v14079_v24  ;;  %v935_v42 = vadd.f32 %v919_v25, %v883_v21  ;;  %v14141_v10 = vld [vmem:[#allocation2 + $0x3a] sm:$0xff] }
  0xf3   :  { %v1009_v43 = vadd.f32 %v993_v14, %v971_v9  ;;  %v14111_v45 = vadd.f32 %v1068_v27, %v1046_v19  ;;  %v14115_v48 = vpop.f32.mrb[14].mxu0  ;;  %v957_v49 = vmul.f32 %v13996_v61, %v13980_v50  ;;  %v1069_v52 = vmul.f32 %v13996_v61, %v13991_v57  ;;  %v10157_v19 = vpop.f32.mrb[2].mxu1 }
  0xf4   :  { %17976 = vst [vmem:[#allocation13_spill] sm:$0xff] %v14099_v36  ;;  %17977 = vst [vmem:[#allocation14_spill] sm:$0xff] %v14101_v37  ;;  %v1010_v58 = vadd.f32 %v994_v6, %v972_v32  ;;  %v1031_v59 = vmul.f32 %v13989_v56, %v14054_v1  ;;  %v14124_v63 = vpop.f32.mrb[15].mxu0  ;;  %v936_v2 = vadd.f32 %v920_v41, %v884_v31  ;;  %v14158_v31 = vld [vmem:[#allocation2 + $0x42] sm:$0xff] }
  0xf5   :  { %397 = vst [vmem:[#allocation2 + $0x78] sm:$0xff] %v14115_v48  ;;  %v14128_v3 = vmul.f32 %v14016_v20, %v13971_v39  ;;  %v869_v4 = vmul.f32 %v13973_v40, %v14097_v35  ;;  %396 = vst [vmem:[#allocation2 + $0x70] sm:$0xff] %v14124_v63  ;;  %v14133_v5 = vpack.c.bf16 %v2312_v38, %v2311_v23 }
  0xf6   :  { %v1032_v61 = vmul.f32 %v13989_v56, %v14079_v24  ;;  %v1047_v7 = vadd.f32 %v1031_v59, %v1009_v43  ;;  %v870_v9 = vmul.f32 %v13973_v40, %v14113_v47  ;;  %v834_v12 = vmul.f32 %v13971_v39, %v14025_v29  ;;  %771 = vst [vmem:[#allocation2 + $0x118] sm:$0xff] %v10157_v19 }
  0xf7   :  { %17978 = vst [vmem:[#allocation15_spill] sm:$0xff] %v14133_v5  ;;  %v885_v16 = vadd.f32 %v869_v4, %v833_v33  ;;  %v958_v17 = vmul.f32 %v13980_v50, %v14025_v29  ;;  %v973_v15 = vadd.f32 %v957_v49, %v935_v42  ;;  %v14152_v18 = vpop.f32.mrb[16].mxu0  ;;  %v1104_v21 = vmul.f32 %v13994_v60, %v14021_v26  ;;  %v619_v33 = vpop.f32.mrb[3].mxu1  ;;  %v14183_v4 = vld [vmem:[#allocation2 + $0x49] sm:$0xff] }
  0xf8   :  { %v1048_v25 = vadd.f32 %v1032_v61, %v1010_v58  ;;  %v1071_v27 = vmul.f32 %v14016_v20, %v13991_v57  ;;  %v995_v32 = vmul.f32 %v13987_v55, %v14097_v35  ;;  %399 = vst [vmem:[#allocation2 + $0x88] sm:$0xff] %v14152_v18  ;;  %v14163_v14 = vpop.f32.mrb[17].mxu0  ;;  %v886_v6 = vadd.f32 %v870_v9, %v834_v12  ;;  %v14185_v61 = vld [vmem:[#allocation2 + $0x51] sm:$0xff] }
  0xf9   :  { %v921_v23 = vmul.f32 %v13975_v44, %v14141_v10  ;;  %v974_v26 = vadd.f32 %v958_v17, %v936_v2  ;;  %v996_v38 = vmul.f32 %v13987_v55, %v14113_v47  ;;  %398 = vst [vmem:[#allocation2 + $0x80] sm:$0xff] %v14163_v14  ;;  %770 = vst [vmem:[#allocation2 + $0x110] sm:$0xff] %v619_v33  ;;  %v14208_v17 = vld [vmem:[#allocation2 + $0x4a] sm:$0xff] }
  0xfa   :  { %v14172_v20 = vmul.f32 %v14146_v11, %v14028_v34  ;;  %v1011_v41 = vadd.f32 %v995_v32, %v973_v15  ;;  %v1070_v42 = vmul.f32 %v13991_v57, %v14025_v29  ;;  %v14176_v43 = vadd.f32 %v1069_v52, %v1047_v7 }
  0xfb   :  { %v14179_v49 = vadd.f32 %v1104_v21, %v14052_v0  ;;  %v922_v58 = vmul.f32 %v13975_v44, %v14158_v31  ;;  %v937_v59 = vadd.f32 %v921_v23, %v885_v16  ;;  %v1012_v2 = vadd.f32 %v996_v38, %v974_v26  ;;  %v14187_v34 = vpop.f32.mrb[18].mxu0  ;;  %v14226_v26 = vld [vmem:[#allocation2 + $0x52] sm:$0xff] }
  0xfc   :  { %v1105_v9 = vmul.f32 %v13994_v60, %v14044_v53  ;;  %v1106_v29 = vmul.f32 %v13994_v60, %v14046_v54  ;;  %v1033_v0 = vmul.f32 %v13989_v56, %v14141_v10  ;;  %v14195_v52 = vadd.f32 %v1070_v42, %v1048_v25  ;;  %401 = vst [vmem:[#allocation2 + $0x98] sm:$0xff] %v14187_v34  ;;  %v14198_v7 = vpop.f32.mrb[19].mxu0  ;;  %v14320_v62 = vld [vmem:[#allocation2 + $0x69] sm:$0xff] }
  0xfd   :  { %v14202_v12 = vmul.f32 %v14146_v11, %v14054_v1  ;;  %v1144_v16 = vmul.f32 %v14146_v11, %v14079_v24  ;;  %v938_v53 = vadd.f32 %v922_v58, %v886_v6  ;;  %v1034_v54 = vmul.f32 %v13989_v56, %v14158_v31  ;;  %400 = vst [vmem:[#allocation2 + $0x90] sm:$0xff] %v14198_v7 }
  0xfe   :  { %v1122_v15 = vadd.f32 %v1106_v29, %v14111_v45  ;;  %v1049_v19 = vadd.f32 %v1033_v0, %v1011_v41  ;;  %v871_v21 = vmul.f32 %v13973_v40, %v14183_v4  ;;  %v872_v1 = vmul.f32 %v13973_v40, %v14185_v61 }
  0xff   :  { %v1050_v25 = vadd.f32 %v1034_v54, %v1012_v2  ;;  %v836_v24 = vmul.f32 %v13971_v39, %v14049_v51  ;;  %v960_v32 = vmul.f32 %v13980_v50, %v14049_v51  ;;  %v975_v33 = vadd.f32 %v959_v8, %v937_v59  ;;  %v14220_v6 = vpop.f32.mrb[20].mxu0 }
 0x100   :  { %v14223_v23 = vadd.f32 %v1105_v9, %v14088_v30  ;;  %v887_v45 = vadd.f32 %v871_v21, %v14128_v3  ;;  %v923_v38 = vmul.f32 %v13975_v44, %v14208_v17  ;;  %v997_v41 = vmul.f32 %v13987_v55, %v14183_v4  ;;  %403 = vst [vmem:[#allocation2 + $0xa8] sm:$0xff] %v14220_v6  ;;  %v14233_v42 = vpop.f32.mrb[21].mxu0 }
 0x101   :  { %v888_v8 = vadd.f32 %v872_v1, %v836_v24  ;;  %v976_v58 = vadd.f32 %v960_v32, %v938_v53  ;;  %v998_v30 = vmul.f32 %v13987_v55, %v14185_v61  ;;  %v1072_v3 = vmul.f32 %v13991_v57, %v14049_v51  ;;  %402 = vst [vmem:[#allocation2 + $0xa0] sm:$0xff] %v14233_v42  ;;  %v14250_v1 = vld [vmem:[#allocation2 + $0x59] sm:$0xff]  ;;  %v14252_v51 = vld [vmem:[#allocation2 + $0x61] sm:$0xff] }
 0x102   :  { %v14240_v59 = vadd.f32 %v1144_v16, %v1122_v15  ;;  %v1107_v2 = vmul.f32 %v13994_v60, %v14097_v35  ;;  %v1013_v9 = vadd.f32 %v997_v41, %v975_v33  ;;  %v14244_v29 = vadd.f32 %v1071_v27, %v1049_v19  ;;  %v14277_v33 = vld [vmem:[#allocation2 + $0x5a] sm:$0xff] }
 0x103   :  { %v924_v0 = vmul.f32 %v13975_v44, %v14226_v26  ;;  %v939_v53 = vadd.f32 %v923_v38, %v887_v45  ;;  %v1014_v54 = vadd.f32 %v998_v30, %v976_v58  ;;  %v14248_v21 = vadd.f32 %v1072_v3, %v1050_v25  ;;  %v14254_v24 = vpop.f32.mrb[22].mxu0 }
 0x104   :  { %v1108_v16 = vmul.f32 %v13994_v60, %v14113_v47  ;;  %v14260_v35 = vmul.f32 %v14146_v11, %v14141_v10  ;;  %v14264_v27 = vmul.f32 %v14146_v11, %v14158_v31  ;;  %v1035_v15 = vmul.f32 %v13989_v56, %v14208_v17  ;;  %405 = vst [vmem:[#allocation2 + $0xb8] sm:$0xff] %v14254_v24  ;;  %v14269_v19 = vpop.f32.mrb[23].mxu0 }
 0x105   :  { %v837_v25 = vmul.f32 %v14036_v46, %v13971_v39  ;;  %v961_v47 = vmul.f32 %v14036_v46, %v13980_v50  ;;  %v940_v32 = vadd.f32 %v924_v0, %v888_v8  ;;  %v1036_v10 = vmul.f32 %v13989_v56, %v14226_v26  ;;  %404 = vst [vmem:[#allocation2 + $0xb0] sm:$0xff] %v14269_v19 }
 0x106   :  { %v14281_v31 = vadd.f32 %v1107_v2, %v14176_v43  ;;  %v1051_v45 = vadd.f32 %v1035_v15, %v1013_v9  ;;  %v873_v38 = vmul.f32 %v13973_v40, %v14250_v1  ;;  %v874_v41 = vmul.f32 %v13973_v40, %v14252_v51  ;;  %v14295_v9 = vld [vmem:[#allocation2 + $0x62] sm:$0xff] }
 0x107   :  { %v1052_v58 = vadd.f32 %v1036_v10, %v1014_v54  ;;  %v838_v8 = vmul.f32 %v13971_v39, %v14086_v28  ;;  %v962_v30 = vmul.f32 %v13980_v50, %v14086_v28  ;;  %v977_v3 = vadd.f32 %v961_v47, %v939_v53  ;;  %v14291_v0 = vpop.f32.mrb[24].mxu0 }
 0x108   :  { %v1073_v43 = vmul.f32 %v14036_v46, %v13991_v57  ;;  %v889_v2 = vadd.f32 %v873_v38, %v837_v25  ;;  %v925_v15 = vmul.f32 %v13975_v44, %v14277_v33  ;;  %v999_v54 = vmul.f32 %v13987_v55, %v14250_v1  ;;  %407 = vst [vmem:[#allocation2 + $0xc8] sm:$0xff] %v14291_v0  ;;  %v14302_v10 = vpop.f32.mrb[25].mxu0 }
 0x109   :  { %v890_v5 = vadd.f32 %v874_v41, %v838_v8  ;;  %v978_v53 = vadd.f32 %v962_v30, %v940_v32  ;;  %v1000_v47 = vmul.f32 %v13987_v55, %v14252_v51  ;;  %v1074_v46 = vmul.f32 %v13991_v57, %v14086_v28  ;;  %406 = vst [vmem:[#allocation2 + $0xc0] sm:$0xff] %v14302_v10  ;;  %v14322_v28 = vld [vmem:[#allocation2 + $0x71] sm:$0xff] }
 0x10a   :  { %v14310_v25 = vadd.f32 %v1108_v16, %v14195_v52  ;;  %v1109_v38 = vmul.f32 %v13994_v60, %v14183_v4  ;;  %v1015_v37 = vadd.f32 %v999_v54, %v977_v3  ;;  %v14314_v36 = vadd.f32 %v1073_v43, %v1051_v45 }
 0x10b   :  { %v926_v32 = vmul.f32 %v13975_v44, %v14295_v9  ;;  %v941_v41 = vadd.f32 %v925_v15, %v889_v2  ;;  %v1016_v8 = vadd.f32 %v1000_v47, %v978_v53  ;;  %v14318_v30 = vadd.f32 %v1074_v46, %v1052_v58  ;;  %v14324_v22 = vpop.f32.mrb[26].mxu0  ;;  %v14354_v53 = vld [vmem:[#allocation2 + $0x6a] sm:$0xff]  ;;  %v14359_v46 = vld [vmem:[#allocation2 + $0x72] sm:$0xff] }
 0x10c   :  { %17979 = vst [vmem:[#allocation16_spill] sm:$0xff] %v14324_v22  ;;  %v1110_v52 = vmul.f32 %v13994_v60, %v14185_v61  ;;  %v14330_v4 = vmul.f32 %v14146_v11, %v14208_v17  ;;  %v14334_v16 = vmul.f32 %v14146_v11, %v14226_v26  ;;  %v1037_v45 = vmul.f32 %v13989_v56, %v14277_v33  ;;  %v14339_v58 = vpop.f32.mrb[27].mxu0 }
 0x10d   :  { %409 = vst [vmem:[#allocation2 + $0xd8] sm:$0xff] %v14324_v22  ;;  %17982 = vst [vmem:[#allocation19_spill] sm:$0xff] %v14339_v58  ;;  %v839_v3 = vmul.f32 %v14068_v13, %v13971_v39  ;;  %v963_v61 = vmul.f32 %v14068_v13, %v13980_v50  ;;  %v942_v43 = vadd.f32 %v926_v32, %v890_v5 }
 0x10e   :  { %17980 = vst [vmem:[#allocation17_spill] sm:$0xff] %v14330_v4  ;;  %17981 = vst [vmem:[#allocation18_spill] sm:$0xff] %v14334_v16  ;;  %v1038_v17 = vmul.f32 %v13989_v56, %v14295_v9  ;;  %v1053_v26 = vadd.f32 %v1037_v45, %v1015_v37  ;;  %v840_v2 = vmul.f32 %v13971_v39, %v14124_v63 }
 0x10f   :  { %408 = vst [vmem:[#allocation2 + $0xd0] sm:$0xff] %v14339_v58  ;;  %v875_v15 = vmul.f32 %v13973_v40, %v14320_v62  ;;  %v876_v54 = vmul.f32 %v13973_v40, %v14322_v28  ;;  %v14357_v47 = vadd.f32 %v1109_v38, %v14244_v29  ;;  %v964_v37 = vmul.f32 %v13980_v50, %v14124_v63  ;;  %v14363_v45 = vpop.f32.mrb[28].mxu0 }
 0x110   :  { %v1054_v5 = vadd.f32 %v1038_v17, %v1016_v8  ;;  %v979_v32 = vadd.f32 %v963_v61, %v941_v41  ;;  %17984 = vst [vmem:[#allocation21_spill] sm:$0xff] %v14363_v45  ;;  %v1075_v22 = vmul.f32 %v14068_v13, %v13991_v57  ;;  %v1001_v4 = vmul.f32 %v13987_v55, %v14320_v62  ;;  %v14370_v29 = vpop.f32.mrb[29].mxu0 }
 0x111   :  { %17983 = vst [vmem:[#allocation20_spill] sm:$0xff] %v14357_v47  ;;  %v891_v16 = vadd.f32 %v875_v15, %v839_v3  ;;  %v892_v58 = vadd.f32 %v876_v54, %v840_v2  ;;  %411 = vst [vmem:[#allocation2 + $0xe8] sm:$0xff] %v14363_v45  ;;  %v927_v38 = vmul.f32 %v13975_v44, %v14354_v53  ;;  %v857_v45 = vld [vmem:[#allocation2 + $0x79] sm:$0xff] }
 0x112   :  { %17985 = vst [vmem:[#allocation22_spill] sm:$0xff] %v14370_v29  ;;  %v980_v8 = vadd.f32 %v964_v37, %v942_v43  ;;  %v1002_v41 = vmul.f32 %v13987_v55, %v14322_v28  ;;  %v1076_v61 = vmul.f32 %v13991_v57, %v14124_v63  ;;  %410 = vst [vmem:[#allocation2 + $0xe0] sm:$0xff] %v14370_v29 }
 0x113   :  { %v14380_v13 = vadd.f32 %v1110_v52, %v14248_v21  ;;  %v928_v3 = vmul.f32 %v13975_v44, %v14359_v46  ;;  %v1017_v17 = vadd.f32 %v1001_v4, %v979_v32  ;;  %v1091_v2 = vadd.f32 %v1075_v22, %v1053_v26  ;;  %v14386_v47 = vpop.f32.mrb[30].mxu0  ;;  %v984_v22 = vld [vmem:[#allocation2 + $0x81] sm:$0xff] }
 0x114   :  { %v943_v15 = vadd.f32 %v927_v38, %v891_v16  ;;  %v1018_v54 = vadd.f32 %v1002_v41, %v980_v8  ;;  %v1039_v43 = vmul.f32 %v13989_v56, %v14354_v53  ;;  %v1092_v37 = vadd.f32 %v1076_v61, %v1054_v5  ;;  %17986 = vst [vmem:[#allocation23_spill] sm:$0xff] %v14386_v47  ;;  %v14395_v16 = vpop.f32.mrb[31].mxu0 }
 0x115   :  { %v1111_v63 = vmul.f32 %v13994_v60, %v14250_v1  ;;  %v1112_v21 = vmul.f32 %v13994_v60, %v14252_v51  ;;  %v944_v52 = vadd.f32 %v928_v3, %v892_v58  ;;  %v1040_v4 = vmul.f32 %v13989_v56, %v14359_v46  ;;  %413 = vst [vmem:[#allocation2 + $0xf8] sm:$0xff] %v14386_v47  ;;  %v14407_v58 = vld [vmem:[#allocation2 + $0x7a] sm:$0xff] }
 0x116   :  { %17987 = vst [vmem:[#allocation24_spill] sm:$0xff] %v14395_v16  ;;  %v14399_v26 = vmul.f32 %v14146_v11, %v14277_v33  ;;  %v14403_v5 = vmul.f32 %v14146_v11, %v14295_v9  ;;  %v965_v1 = vmul.f32 %v14115_v48, %v13980_v50  ;;  %v1055_v51 = vadd.f32 %v1039_v43, %v1017_v17 }
 0x117   :  { %412 = vst [vmem:[#allocation2 + $0xf0] sm:$0xff] %v14395_v16  ;;  %v841_v32 = vmul.f32 %v14115_v48, %v13971_v39  ;;  %v1056_v38 = vadd.f32 %v1040_v4, %v1018_v54  ;;  %v877_v8 = vmul.f32 %v13973_v40, %v857_v45  ;;  %v966_v33 = vmul.f32 %v13980_v50, %v14163_v14  ;;  %v14421_v16 = vld [vmem:[#allocation2 + $0x82] sm:$0xff] }
 0x118   :  { %17988 = vst [vmem:[#allocation25_spill] sm:$0xff] %v14403_v5  ;;  %v1077_v9 = vmul.f32 %v14115_v48, %v13991_v57  ;;  %v981_v41 = vadd.f32 %v965_v1, %v943_v15  ;;  %v1003_v61 = vmul.f32 %v13987_v55, %v857_v45  ;;  %v1004_v3 = vmul.f32 %v13987_v55, %v984_v22 }
 0x119   :  { %v893_v17 = vadd.f32 %v877_v8, %v841_v32  ;;  %v929_v43 = vmul.f32 %v13975_v44, %v14407_v58  ;;  %v982_v47 = vadd.f32 %v966_v33, %v944_v52  ;;  %v1078_v54 = vmul.f32 %v13991_v57, %v14163_v14 }
 0x11a   :  { %v14426_v4 = vadd.f32 %v1111_v63, %v14314_v36  ;;  %v1019_v5 = vadd.f32 %v1003_v61, %v981_v41  ;;  %v1041_v48 = vmul.f32 %v13989_v56, %v14407_v58  ;;  %v1093_v15 = vadd.f32 %v1077_v9, %v1055_v51  ;;  %v985_v41 = vld [vmem:[#allocation2 + $0x89] sm:$0xff] }
 0x11b   :  { %v14431_v1 = vadd.f32 %v1112_v21, %v14318_v30  ;;  %v945_v32 = vadd.f32 %v929_v43, %v893_v17  ;;  %v1020_v8 = vadd.f32 %v1004_v3, %v982_v47  ;;  %v14433_v29 = vadd.f32 %v1078_v54, %v1056_v38  ;;  %v14454_v61 = vld [vmem:[#allocation2 + $0x8a] sm:$0xff] }
 0x11c   :  { %v1113_v52 = vmul.f32 %v13994_v60, %v14320_v62  ;;  %v967_v33 = vmul.f32 %v14152_v18, %v13980_v50  ;;  %v1042_v36 = vmul.f32 %v13989_v56, %v14421_v16  ;;  %v1057_v63 = vadd.f32 %v1041_v48, %v1019_v5  ;;  %v1098_v17 = vld [vmem:[#allocation2 + $0x91] sm:$0xff] }
 0x11d   :  { %v1114_v51 = vmul.f32 %v13994_v60, %v14322_v28  ;;  %v14445_v30 = vmul.f32 %v14146_v11, %v14354_v53  ;;  %v1244_v47 = vmul.f32 %v13971_v39, %v14163_v14  ;;  %v1276_v62 = vmul.f32 %v984_v22, %v13973_v40 }
 0x11e   :  { %v1079_v21 = vmul.f32 %v14152_v18, %v13991_v57  ;;  %v1058_v38 = vadd.f32 %v1042_v36, %v1020_v8  ;;  %v1324_v5 = vmul.f32 %v14421_v16, %v13975_v44  ;;  %v983_v9 = vadd.f32 %v967_v33, %v945_v32  ;;  %v1136_v8 = vld [vmem:[#allocation2 + $0x92] sm:$0xff] }
 0x11f   :  { %v14456_v28 = vadd.f32 %v1113_v52, %v1091_v2  ;;  %v14460_v53 = vmul.f32 %v14146_v11, %v14359_v46  ;;  %v1292_v3 = vadd.f32 %v1276_v62, %v1244_v47  ;;  %v1005_v14 = vmul.f32 %v13987_v55, %v985_v41 }
 0x120   :  { %v14463_v43 = vadd.f32 %v1114_v51, %v1092_v37  ;;  %v1080_v54 = vmul.f32 %v13991_v57, %v14198_v7  ;;  %v1095_v48 = vadd.f32 %v1079_v21, %v1057_v63  ;;  %v1118_v32 = vmul.f32 %v13994_v60, %v1098_v17 }
 0x121   :  { %17989 = vst [vmem:[#allocation26_spill] sm:$0xff] %v14460_v53  ;;  %v1245_v2 = vmul.f32 %v14152_v18, %v13971_v39  ;;  %v1115_v52 = vmul.f32 %v13994_v60, %v857_v45  ;;  %v1021_v46 = vadd.f32 %v1005_v14, %v983_v9  ;;  %v1043_v33 = vmul.f32 %v13989_v56, %v14454_v61 }
 0x122   :  { %v1116_v36 = vmul.f32 %v13994_v60, %v984_v22  ;;  %v1340_v37 = vadd.f32 %v1324_v5, %v1292_v3  ;;  %v1096_v51 = vadd.f32 %v1080_v54, %v1058_v38  ;;  %v1277_v47 = vmul.f32 %v985_v41, %v13973_v40 }
 0x123   :  { %v1059_v62 = vadd.f32 %v1043_v33, %v1021_v46  ;;  %v1246_v63 = vmul.f32 %v13971_v39, %v14198_v7  ;;  %v1278_v21 = vmul.f32 %v1098_v17, %v13973_v40  ;;  %v1326_v18 = vmul.f32 %v1136_v8, %v13975_v44  ;;  %v1099_v33 = vld [vmem:[#allocation2 + $0x99] sm:$0xff] }
 0x124   :  { %v1134_v53 = vadd.f32 %v1118_v32, %v1096_v51  ;;  %v1156_v45 = vmul.f32 %v14146_v11, %v1136_v8  ;;  %v1293_v9 = vadd.f32 %v1277_v47, %v1245_v2  ;;  %v1358_v14 = vmul.f32 %v13980_v50, %v14198_v7  ;;  %v14493_v51 = vld [vmem:[#allocation2 + $0xa1] sm:$0xff]  ;;  %v14498_v7 = vld [vmem:[%s17880_s3] ss:$0 sm:$0xff] }
 0x125   :  { %v1081_v22 = vmul.f32 %v14187_v34, %v13991_v57  ;;  %v1294_v38 = vadd.f32 %v1278_v21, %v1246_v63  ;;  %v1325_v5 = vmul.f32 %v14454_v61, %v13975_v44  ;;  %v1392_v3 = vmul.f32 %v1098_v17, %v13987_v55  ;;  %v1137_v21 = vld [vmem:[#allocation2 + $0x9a] sm:$0xff] }
 0x126   :  { %v14487_v54 = vadd.f32 %v1115_v52, %v1093_v15  ;;  %v14491_v32 = vmul.f32 %v14146_v11, %v14407_v58  ;;  %v1172_v46 = vadd.f32 %v1156_v45, %v1134_v53  ;;  %v1374_v2 = vadd.f32 %v1358_v14, %v1340_v37 }
 0x127   :  { %v1341_v47 = vadd.f32 %v1325_v5, %v1293_v9  ;;  %v1342_v63 = vadd.f32 %v1326_v18, %v1294_v38  ;;  %v1426_v17 = vmul.f32 %v1136_v8, %v13989_v56  ;;  %v1097_v15 = vadd.f32 %v1081_v22, %v1059_v62  ;;  %v14517_v22 = vld [vmem:[#allocation2 + $0xa2] sm:$0xff] }
 0x128   :  { %17990 = vst [vmem:[#allocation27_spill] sm:$0xff] %v14487_v54  ;;  %17991 = vst [vmem:[#allocation28_spill] sm:$0xff] %v14491_v32  ;;  %v14503_v52 = vmul.f32 %v14146_v11, %v14421_v16  ;;  %v1247_v58 = vmul.f32 %v14187_v34, %v13971_v39  ;;  %v1194_v53 = vadd.f32 %v14498_v7, %v1172_v46 }
 0x129   :  { %v1408_v37 = vadd.f32 %v1392_v3, %v1374_v2  ;;  %v1359_v45 = vmul.f32 %v14187_v34, %v13980_v50  ;;  %v1248_v18 = vmul.f32 %v13971_v39, %v14233_v42  ;;  %v1279_v8 = vmul.f32 %v1099_v33, %v13973_v40 }
 0x12a   :  { %v1280_v62 = vmul.f32 %v14493_v51, %v13973_v40  ;;  %v1132_v16 = vadd.f32 %v1116_v36, %v14433_v29  ;;  %v1117_v9 = vmul.f32 %v13994_v60, %v985_v41  ;;  %v1210_v14 = vmax.f32 %v1194_v53, 0.0 }
 0x12b   :  { %v1360_v38 = vmul.f32 %v13980_v50, %v14233_v42  ;;  %v1442_v5 = vadd.f32 %v1426_v17, %v1408_v37  ;;  %v1295_v34 = vadd.f32 %v1279_v8, %v1247_v58  ;;  %v1327_v3 = vmul.f32 %v1137_v21, %v13975_v44 }
 0x12c   :  { %v1375_v46 = vadd.f32 %v1359_v45, %v1341_v47  ;;  %1226 = vst [vmem:[#allocation3 + $0x70] sm:$0xff] %v1210_v14  ;;  %v1361_v2 = vmul.f32 %v14220_v6, %v13980_v50  ;;  %v1393_v29 = vmul.f32 %v1099_v33, %v13987_v55  ;;  %v1394_v41 = vmul.f32 %v14493_v51, %v13987_v55  ;;  %v14534_v45 = vld [vmem:[#allocation2 + $0xa9] sm:$0xff] }
 0x12d   :  { %v1376_v32 = vadd.f32 %v1360_v38, %v1342_v63  ;;  %v1296_v36 = vadd.f32 %v1280_v62, %v1248_v18  ;;  %v1328_v53 = vmul.f32 %v14517_v22, %v13975_v44  ;;  %v1343_v54 = vadd.f32 %v1327_v3, %v1295_v34  ;;  %v14541_v38 = vld [vmem:[#allocation2 + $0xb1] sm:$0xff] }
 0x12e   :  { %v1460_v17 = vmul.f32 %v13991_v57, %v14233_v42  ;;  %v1133_v58 = vadd.f32 %v1117_v9, %v1095_v48  ;;  %v1249_v47 = vmul.f32 %v14220_v6, %v13971_v39  ;;  %v1409_v37 = vadd.f32 %v1393_v29, %v1375_v46  ;;  %v14547_v3 = vld [vmem:[#allocation2 + $0xaa] sm:$0xff] }
 0x12f   :  { %v1427_v63 = vmul.f32 %v1137_v21, %v13989_v56  ;;  %v1461_v8 = vmul.f32 %v14220_v6, %v13991_v57  ;;  %v1119_v18 = vmul.f32 %v13994_v60, %v1099_v33  ;;  %v1377_v62 = vadd.f32 %v1361_v2, %v1343_v54  ;;  %v14565_v2 = vld [vmem:[#allocation2 + $0xb2] sm:$0xff] }
 0x130   :  { %v14539_v14 = vadd.f32 %v1460_v17, %v1442_v5  ;;  %v1410_v42 = vadd.f32 %v1394_v41, %v1376_v32  ;;  %v1428_v48 = vmul.f32 %v14517_v22, %v13989_v56  ;;  %v1158_v34 = vadd.f32 %v14172_v20, %v14179_v49 }
 0x131   :  { %v1443_v9 = vadd.f32 %v1427_v63, %v1409_v37  ;;  %v1135_v46 = vadd.f32 %v1119_v18, %v1097_v15  ;;  %v1344_v29 = vadd.f32 %v1328_v53, %v1296_v36  ;;  %v1159_v6 = vadd.f32 %v14202_v12, %v14223_v23 }
 0x132   :  { %v1281_v54 = vmul.f32 %v14534_v45, %v13973_v40  ;;  %v14556_v32 = vadd.f32 %v14498_v7, %v1158_v34  ;;  %v1250_v5 = vmul.f32 %v13971_v39, %v14269_v19  ;;  %v1282_v20 = vmul.f32 %v14541_v38, %v13973_v40 }
 0x133   :  { %v14553_v33 = vadd.f32 %v1461_v8, %v1443_v9  ;;  %v14563_v49 = vadd.f32 %v14498_v7, %v1159_v6  ;;  %v1329_v12 = vmul.f32 %v14547_v3, %v13975_v44  ;;  %v1362_v23 = vmul.f32 %v13980_v50, %v14269_v19 }
 0x134   :  { %v1297_v15 = vadd.f32 %v1281_v54, %v1249_v47  ;;  %v1155_v41 = vmul.f32 %v14146_v11, %v14454_v61  ;;  %v1444_v36 = vadd.f32 %v1428_v48, %v1410_v42  ;;  %v17903_v53 = vmax.f32 %v14556_v32, 0.0 }
 0x135   :  { %17992 = vst [vmem:[#allocation29_spill] sm:$0xff] %v14563_v49  ;;  %v1395_v17 = vmul.f32 %v14534_v45, %v13987_v55  ;;  %v1157_v37 = vmul.f32 %v14146_v11, %v1137_v21  ;;  %v17901_v47 = vmax.f32 %v14563_v49, 0.0  ;;  %v1378_v63 = vadd.f32 %v1362_v23, %v1344_v29 }
 0x136   :  { %v1396_v8 = vmul.f32 %v14541_v38, %v13987_v55  ;;  %v14581_v18 = vadd.f32 %v14503_v52, %v1132_v16  ;;  %1212 = vst [vmem:[#allocation3] sm:$0xff] %v17903_v53  ;;  %v1298_v61 = vadd.f32 %v1282_v20, %v1250_v5  ;;  %v1330_v42 = vmul.f32 %v14565_v2, %v13975_v44 }
 0x137   :  { %v1462_v48 = vmul.f32 %v13991_v57, %v14269_v19  ;;  %v14589_v21 = vadd.f32 %v1155_v41, %v1133_v58  ;;  %v14591_v9 = vadd.f32 %v1157_v37, %v1135_v46  ;;  %v1494_v34 = vmul.f32 %v14493_v51, %v13994_v60  ;;  %1213 = vst [vmem:[#allocation3 + $0x8] sm:$0xff] %v17901_v47  ;;  %v14605_v58 = vld [vmem:[#allocation2 + $0xb9] sm:$0xff]  ;;  %v14607_v46 = vld [vmem:[#allocation2 + $0xc1] sm:$0xff] }
 0x138   :  { %v1345_v52 = vadd.f32 %v1329_v12, %v1297_v15  ;;  %v1411_v16 = vadd.f32 %v1395_v17, %v1377_v62  ;;  %v1429_v29 = vmul.f32 %v14547_v3, %v13989_v56  ;;  %v14603_v19 = vadd.f32 %v14498_v7, %v14240_v59  ;;  %v14630_v17 = vld [vmem:[#allocation2 + $0xba] sm:$0xff] }
 0x139   :  { %v14599_v6 = vadd.f32 %v1462_v48, %v1444_v36  ;;  %v14611_v51 = vmul.f32 %v14146_v11, %v14517_v22  ;;  %v1251_v62 = vmul.f32 %v14254_v24, %v13971_v39  ;;  %v1412_v54 = vadd.f32 %v1396_v8, %v1378_v63 }
 0x13a   :  { %17993 = vst [vmem:[#allocation30_spill] sm:$0xff] %v14603_v19  ;;  %v1430_v5 = vmul.f32 %v14565_v2, %v13989_v56  ;;  %v1363_v20 = vmul.f32 %v14254_v24, %v13980_v50  ;;  %v1346_v59 = vadd.f32 %v1330_v42, %v1298_v61  ;;  %v17900_v15 = vmax.f32 %v14603_v19, 0.0 }
 0x13b   :  { %v1161_v12 = vadd.f32 %v14260_v35, %v14281_v31  ;;  %v1463_v22 = vmul.f32 %v14254_v24, %v13991_v57  ;;  %v1252_v23 = vmul.f32 %v13971_v39, %v14302_v10  ;;  %v1283_v41 = vmul.f32 %v14605_v58, %v13973_v40  ;;  %v14637_v31 = vld [vmem:[#allocation2 + $0xc2] sm:$0xff] }
 0x13c   :  { %v1284_v36 = vmul.f32 %v14607_v46, %v13973_v40  ;;  %v1445_v37 = vadd.f32 %v1429_v29, %v1411_v16  ;;  %1214 = vst [vmem:[#allocation3 + $0x10] sm:$0xff] %v17900_v15  ;;  %v1364_v24 = vmul.f32 %v13980_v50, %v14302_v10  ;;  %v1379_v63 = vadd.f32 %v1363_v20, %v1345_v52 }
 0x13d   :  { %v14635_v35 = vadd.f32 %v14498_v7, %v1161_v12  ;;  %v14642_v8 = vadd.f32 %v1494_v34, %v14539_v14  ;;  %v1446_v61 = vadd.f32 %v1430_v5, %v1412_v54  ;;  %v1397_v42 = vmul.f32 %v14605_v58, %v13987_v55 }
 0x13e   :  { %v1398_v48 = vmul.f32 %v14607_v46, %v13987_v55  ;;  %v2319_v16 = vld [vmem:[#allocation3 + $0x1] sm:$0xff]  ;;  %v1299_v12 = vadd.f32 %v1283_v41, %v1251_v62  ;;  %v1331_v15 = vmul.f32 %v14630_v17, %v13975_v44  ;;  %v1380_v47 = vadd.f32 %v1364_v24, %v1346_v59 }
 0x13f   :  { %17994 = vst [vmem:[#allocation31_spill] sm:$0xff] %v14635_v35  ;;  %v17902_v29 = vmax.f32 %v14635_v35, 0.0  ;;  %10232 = vmatprep.mubr.f32.mxu0 %v2319_v16  ;;  %v1495_v14 = vmul.f32 %v14534_v45, %v13994_v60  ;;  %v1300_v34 = vadd.f32 %v1284_v36, %v1252_v23  ;;  %v1332_v52 = vmul.f32 %v14637_v31, %v13975_v44  ;;  %v14675_v36 = vld [vmem:[#allocation2 + $0xd1] sm:$0xff]  ;;  %v17997_v16 = vld [vmem:[#allocation17_spill] sm:$0xff] }
 0x140   :  { %v1464_v54 = vmul.f32 %v13991_v57, %v14302_v10  ;;  %v1496_v5 = vmul.f32 %v14541_v38, %v13994_v60  ;;  %v14661_v62 = vmul.f32 %v14146_v11, %v14547_v3  ;;  %v1431_v45 = vmul.f32 %v14630_v17, %v13989_v56  ;;  %v14673_v38 = vld [vmem:[#allocation2 + $0xc9] sm:$0xff] }
 0x141   :  { %1215 = vst [vmem:[#allocation3 + $0x18] sm:$0xff] %v17902_v29  ;;  %v14667_v20 = vadd.f32 %v1463_v22, %v1445_v37  ;;  %v1413_v59 = vadd.f32 %v1397_v42, %v1379_v63  ;;  %v1414_v23 = vadd.f32 %v1398_v48, %v1380_v47  ;;  %v1432_v10 = vmul.f32 %v14637_v31, %v13989_v56  ;;  %v17996_v48 = vld [vmem:[#allocation20_spill] sm:$0xff] }
 0x142   :  { %v14671_v41 = vadd.f32 %v1464_v54, %v1446_v61  ;;  %v14679_v3 = vmul.f32 %v14146_v11, %v14565_v2  ;;  %v1253_v24 = vmul.f32 %v14291_v0, %v13971_v39  ;;  %v1347_v22 = vadd.f32 %v1331_v15, %v1299_v12  ;;  %v14691_v2 = vld [vmem:[#allocation2 + $0xca] sm:$0xff] }
 0x143   :  { %v1162_v47 = vadd.f32 %v14264_v27, %v14310_v25  ;;  %v2320_v37 = vld [vmem:[#allocation3 + $0x9] sm:$0xff]  ;;  %v1365_v63 = vmul.f32 %v14291_v0, %v13980_v50  ;;  %v1465_v61 = vmul.f32 %v14291_v0, %v13991_v57  ;;  %v1348_v42 = vadd.f32 %v1332_v52, %v1300_v34  ;;  %v18000_v0 = vld [vmem:[#allocation5_spill] sm:$0xff] }
 0x144   :  { %17995 = vst [vmem:[#allocation32_spill] sm:$0xff] %v14679_v3  ;;  %v1163_v54 = vadd.f32 %v17997_v16, %v17996_v48  ;;  %10233 = vmatmul.mubr.f32.vlgmr.msra.gmra.mrb[32].mxu0 %v2320_v37  ;;  %v17999_v15 = vld [vmem:[#allocation19_spill] sm:$0xff]  ;;  %v1285_v25 = vmul.f32 %v14673_v38, %v13973_v40  ;;  %v1286_v12 = vmul.f32 %v14675_v36, %v13973_v40  ;;  %v18002_v16 = vld [vmem:[#allocation12_spill] sm:$0xff] }
 0x145   :  { %v14694_v29 = vadd.f32 %v14498_v7, %v1162_v47  ;;  %v1254_v27 = vmul.f32 %v13971_v39, %v17999_v15  ;;  %12035 = vmatpush3.bf16.msra.mxu0 %v18000_v0  ;;  %v1447_v34 = vadd.f32 %v1431_v45, %v1413_v59  ;;  %v1448_v52 = vadd.f32 %v1432_v10, %v1414_v23  ;;  %v14706_v37 = vld [vmem:[#allocation2 + $0xd2] sm:$0xff] }
 0x146   :  { %v14704_v48 = vadd.f32 %v14498_v7, %v1163_v54  ;;  %v1366_v47 = vmul.f32 %v13980_v50, %v17999_v15  ;;  %12037 = vmatprep.subr.bf16.mxu0 %v18002_v16  ;;  %v1301_v35 = vadd.f32 %v1285_v25, %v1253_v24  ;;  %v1333_v3 = vmul.f32 %v14691_v2, %v13975_v44 }
 0x147   :  { %17998 = vst [vmem:[#allocation20_spill] sm:$0xff] %v14694_v29  ;;  %v17907_v53 = vmax.f32 %v14694_v29, 0.0  ;;  %v1381_v19 = vadd.f32 %v1365_v63, %v1347_v22  ;;  %v1399_v23 = vmul.f32 %v14673_v38, %v13987_v55  ;;  %v1400_v10 = vmul.f32 %v14675_v36, %v13987_v55 }
 0x148   :  { %18001 = vst [vmem:[#allocation17_spill] sm:$0xff] %v14704_v48  ;;  %v2321_v49 = vld [vmem:[#allocation3 + $0x11] sm:$0xff]  ;;  %v17909_v45 = vmax.f32 %v14704_v48, 0.0  ;;  %v1382_v59 = vadd.f32 %v1366_v47, %v1348_v42  ;;  %v1302_v54 = vadd.f32 %v1286_v12, %v1254_v27  ;;  %v1334_v24 = vmul.f32 %v14706_v37, %v13975_v44 }
 0x149   :  { %10235 = vmatprep.mubr.f32.mxu0 %v2321_v49  ;;  %1216 = vst [vmem:[#allocation3 + $0x20] sm:$0xff] %v17907_v53  ;;  %v1433_v22 = vmul.f32 %v14691_v2, %v13989_v56  ;;  %v1434_v63 = vmul.f32 %v14706_v37, %v13989_v56  ;;  %12039 = vmatpush3.bf16.msra.mxu0 %v18002_v16 }
 0x14a   :  { %1217 = vst [vmem:[#allocation3 + $0x28] sm:$0xff] %v17909_v45  ;;  %v1415_v42 = vadd.f32 %v1399_v23, %v1381_v19  ;;  %v1416_v49 = vadd.f32 %v1400_v10, %v1382_v59  ;;  %v1466_v25 = vmul.f32 %v13991_v57, %v17999_v15  ;;  %v14732_v27 = vadd.f32 %v1465_v61, %v1447_v34  ;;  %v18004_v45 = vld [vmem:[#allocation13_spill] sm:$0xff] }
 0x14b   :  { %v14735_v12 = vadd.f32 %v1495_v14, %v14553_v33  ;;  %v14738_v47 = vadd.f32 %v1496_v5, %v14599_v6  ;;  %v1497_v53 = vmul.f32 %v14605_v58, %v13994_v60  ;;  %v1498_v48 = vmul.f32 %v14607_v46, %v13994_v60  ;;  %12041 = vmatprep.subr.bf16.mxu0 %v18004_v45  ;;  %v14745_v19 = vld [vmem:[#allocation2 + $0xd9] sm:$0xff]  ;;  %v18006_v6 = vld [vmem:[#allocation18_spill] sm:$0xff] }
 0x14c   :  { %v14749_v61 = vmul.f32 %v14146_v11, %v14630_v17  ;;  %v1349_v15 = vadd.f32 %v1333_v3, %v1301_v35  ;;  %v14751_v33 = vadd.f32 %v1466_v25, %v1448_v52  ;;  %v1164_v14 = vadd.f32 %v18006_v6, %v14380_v13  ;;  %v14755_v5 = vld [vmem:[#allocation2 + $0xe1] sm:$0xff]  ;;  %v18007_v46 = vld [vmem:[#allocation16_spill] sm:$0xff] }
 0x14d   :  { %18003 = vst [vmem:[#allocation19_spill] sm:$0xff] %v14738_v47  ;;  %v14757_v58 = vld [vmem:[#allocation2 + $0xda] sm:$0xff]  ;;  %v14759_v34 = vld [vmem:[#allocation2 + $0xe2] sm:$0xff]  ;;  %v1255_v59 = vmul.f32 %v18007_v46, %v13971_v39  ;;  %v1367_v23 = vmul.f32 %v18007_v46, %v13980_v50  ;;  %v1350_v17 = vadd.f32 %v1334_v24, %v1302_v54  ;;  %v1449_v10 = vadd.f32 %v1433_v22, %v1415_v42 }
 0x14e   :  { %18005 = vst [vmem:[#allocation5_spill] sm:$0xff] %v14749_v61  ;;  %v1450_v35 = vadd.f32 %v1434_v63, %v1416_v49  ;;  %v14766_v3 = vadd.f32 %v14498_v7, %v1164_v14  ;;  %12043 = vmatpush3.bf16.msra.mxu0 %v18004_v45  ;;  %v1165_v13 = vadd.f32 %v14399_v26, %v14426_v4  ;;  %v18008_v52 = vld [vmem:[#allocation22_spill] sm:$0xff] }
 0x14f   :  { %v1256_v25 = vmul.f32 %v13971_v39, %v18008_v52  ;;  %v18009_v6 = vld [vmem:[#allocation14_spill] sm:$0xff]  ;;  %v1287_v29 = vmul.f32 %v14745_v19, %v13973_v40  ;;  %v1288_v54 = vmul.f32 %v14755_v5, %v13973_v40  ;;  %v1335_v24 = vmul.f32 %v14757_v58, %v13975_v44 }
 0x150   :  { %12045 = vmatprep.subr.bf16.mxu0 %v18009_v6  ;;  %v1336_v22 = vmul.f32 %v14759_v34, %v13975_v44  ;;  %v2322_v63 = vld [vmem:[#allocation3 + $0x19] sm:$0xff]  ;;  %v14784_v4 = vadd.f32 %v14498_v7, %v1165_v13  ;;  %v1368_v42 = vmul.f32 %v13980_v50, %v18008_v52  ;;  %v1383_v49 = vadd.f32 %v1367_v23, %v1349_v15 }
 0x151   :  { %10236 = vmatmul.mubr.f32.gmra.mrb[34].mxu0 %v2322_v63  ;;  %v2323_v14 = vld [vmem:[#allocation3 + $0x21] sm:$0xff]  ;;  %v1303_v61 = vadd.f32 %v1287_v29, %v1255_v59  ;;  %v1304_v47 = vadd.f32 %v1288_v54, %v1256_v25  ;;  %v1401_v45 = vmul.f32 %v14745_v19, %v13987_v55  ;;  %v1402_v16 = vmul.f32 %v14755_v5, %v13987_v55  ;;  %v18011_v63 = vld [vmem:[#allocation15_spill] sm:$0xff] }
 0x152   :  { %v14794_v26 = vmul.f32 %v14146_v11, %v14637_v31  ;;  %v1467_v13 = vmul.f32 %v18007_v46, %v13991_v57  ;;  %10238 = vmatprep.mubr.f32.mxu0 %v2323_v14  ;;  %v18010_v15 = vmax.f32 %v14766_v3, 0.0  ;;  %v17916_v29 = vmax.f32 %v14784_v4, 0.0  ;;  %12047 = vmatpush3.bf16.msra.mxu0 %v18009_v6 }
 0x153   :  { %v1384_v59 = vadd.f32 %v1368_v42, %v1350_v17  ;;  %v14803_v23 = vadd.f32 %v1497_v53, %v14667_v20  ;;  %v1351_v25 = vadd.f32 %v1335_v24, %v1303_v61  ;;  %v1352_v54 = vadd.f32 %v1336_v22, %v1304_v47  ;;  %12049 = vmatprep.subr.bf16.mxu0 %v18011_v63 }
 0x154   :  { %1218 = vst [vmem:[#allocation3 + $0x30] sm:$0xff] %v18010_v15  ;;  %v1468_v31 = vmul.f32 %v13991_v57, %v18008_v52  ;;  %v14809_v46 = vadd.f32 %v1498_v48, %v14671_v41  ;;  %1219 = vst [vmem:[#allocation3 + $0x38] sm:$0xff] %v17916_v29  ;;  %v1417_v14 = vadd.f32 %v1401_v45, %v1383_v49  ;;  %v18012_v45 = vld [vmem:[#allocation25_spill] sm:$0xff]  ;;  %v14852_v49 = vld [vmem:[#allocation2 + $0xea] sm:$0xff] }
 0x155   :  { %v1435_v17 = vmul.f32 %v14757_v58, %v13989_v56  ;;  %v14815_v42 = vadd.f32 %v1467_v13, %v1449_v10  ;;  %v1499_v53 = vmul.f32 %v14673_v38, %v13994_v60  ;;  %v1418_v20 = vadd.f32 %v1402_v16, %v1384_v59  ;;  %v14834_v38 = vld [vmem:[#allocation2 + $0xe9] sm:$0xff]  ;;  %v14857_v15 = vld [vmem:[#allocation2 + $0xf1] sm:$0xff] }
 0x156   :  { %v1436_v47 = vmul.f32 %v14759_v34, %v13989_v56  ;;  %v14821_v61 = vadd.f32 %v1468_v31, %v1450_v35  ;;  %v1500_v41 = vmul.f32 %v14675_v36, %v13994_v60  ;;  %v14827_v48 = vmul.f32 %v14146_v11, %v14691_v2  ;;  %12051 = vmatpush3.bf16.msra.mxu0 %v18011_v63  ;;  %v18013_v36 = vld [vmem:[#allocation21_spill] sm:$0xff]  ;;  %v18014_v2 = vld [vmem:[#allocation26_spill] sm:$0xff]  ;;  %v14861_v31 = vld [vmem:[#allocation2 + $0xf2] sm:$0xff] }
 0x157   :  { %v1166_v10 = vadd.f32 %v18012_v45, %v14431_v1  ;;  %v1167_v52 = vadd.f32 %v14445_v30, %v14456_v28  ;;  %v14838_v16 = vmul.f32 %v14146_v11, %v14706_v37  ;;  %v1369_v35 = vmul.f32 %v18013_v36, %v13980_v50  ;;  %18015 = vst [vmem:[#allocation18_spill] sm:$0xff] %v14861_v31 }
 0x158   :  { %v1168_v24 = vadd.f32 %v18014_v2, %v14463_v43  ;;  %v1469_v1 = vmul.f32 %v18013_v36, %v13991_v57  ;;  %v1451_v22 = vadd.f32 %v1435_v17, %v1417_v14  ;;  %v1452_v37 = vadd.f32 %v1436_v47, %v1418_v20  ;;  %v18016_v14 = vld [vmem:[#allocation24_spill] sm:$0xff] }
 0x159   :  { %v14847_v30 = vadd.f32 %v14498_v7, %v1166_v10  ;;  %v14850_v28 = vadd.f32 %v14498_v7, %v1167_v52  ;;  %v1370_v17 = vmul.f32 %v13980_v50, %v18016_v14  ;;  %v1385_v52 = vadd.f32 %v1369_v35, %v1351_v25  ;;  %v14885_v35 = vpop.f32.mrb[4].mxu1 }
 0x15a   :  { %v14855_v13 = vadd.f32 %v14498_v7, %v1168_v24  ;;  %v1403_v47 = vmul.f32 %v14834_v38, %v13987_v55  ;;  %v1404_v36 = vmul.f32 %v14857_v15, %v13987_v55  ;;  %v1437_v2 = vmul.f32 %v14852_v49, %v13989_v56  ;;  %18017 = vst [vmem:[#allocation16_spill] sm:$0xff] %v14885_v35 }
 0x15b   :  { %v2324_v11 = vld [vmem:[#allocation3 + $0x29] sm:$0xff]  ;;  %v17915_v43 = vmax.f32 %v14847_v30, 0.0  ;;  %v17914_v59 = vmax.f32 %v14850_v28, 0.0  ;;  %v2325_v45 = vld [vmem:[#allocation3 + $0x31] sm:$0xff]  ;;  %v1386_v20 = vadd.f32 %v1370_v17, %v1352_v54  ;;  %v14877_v24 = vadd.f32 %v1499_v53, %v14732_v27  ;;  %773 = vst [vmem:[#allocation2 + $0x128] sm:$0xff] %v14885_v35 }
 0x15c   :  { %10239 = vmatmul.mubr.f32.gmra.mrb[36].mxu0 %v2324_v11  ;;  %v17913_v10 = vmax.f32 %v14855_v13, 0.0  ;;  %v1438_v25 = vmul.f32 %v14861_v31, %v13989_v56  ;;  %v1470_v54 = vmul.f32 %v13991_v57, %v18016_v14  ;;  %v1419_v11 = vadd.f32 %v1403_v47, %v1385_v52  ;;  %v2313_v27 = vld [vmem:[%s17878_s4 + $0x50] sm:$0xff]  ;;  %v2314_v53 = vld [vmem:[%s17878_s4 + $0x58] sm:$0xff] }
 0x15d   :  { %10241 = vmatprep.mubr.f32.mxu0 %v2325_v45  ;;  %1220 = vst [vmem:[#allocation3 + $0x40] sm:$0xff] %v17915_v43  ;;  %1221 = vst [vmem:[#allocation3 + $0x48] sm:$0xff] %v17914_v59  ;;  %v1420_v17 = vadd.f32 %v1404_v36, %v1386_v20  ;;  %v14887_v45 = vadd.f32 %v1469_v1, %v1451_v22  ;;  %v14899_v14 = vadd.f32 %v1500_v41, %v14751_v33  ;;  %v2315_v22 = vld [vmem:[%s17878_s4 + $0x60] sm:$0xff]  ;;  %v2316_v20 = vld [vmem:[%s17878_s4 + $0x68] sm:$0xff] }
 0x15e   :  { %1222 = vst [vmem:[#allocation3 + $0x50] sm:$0xff] %v17913_v10  ;;  %v14896_v10 = vpop.f32.mrb[5].mxu1  ;;  %v14903_v52 = vmul.f32 %v14745_v19, %v13994_v60  ;;  %v14905_v1 = vadd.f32 %v1470_v54, %v1452_v37  ;;  %v1453_v47 = vadd.f32 %v1437_v2, %v1419_v11  ;;  %v18019_v33 = vld [vmem:[#allocation27_spill] sm:$0xff]  ;;  %v18020_v41 = vld [vmem:[#allocation28_spill] sm:$0xff]  ;;  %v14918_v19 = vmul.f32 %v14755_v5, %v13994_v60  ;;  %v14923_v37 = vld [vmem:[%s17879_s2 + $0x8] ss:$0 sm:$0xff] }
 0x15f   :  { %772 = vst [vmem:[#allocation2 + $0x120] sm:$0xff] %v14896_v10  ;;  %v1454_v36 = vadd.f32 %v1438_v25, %v1420_v17  ;;  %v1169_v59 = vadd.f32 %v18020_v41, %v18019_v33  ;;  %v14927_v54 = vmul.f32 %v14923_v37, %v14757_v58  ;;  %v14929_v43 = vpack.c.bf16 %v2314_v53, %v2313_v27  ;;  %v1275_v25 = vld [vmem:[#allocation2 + $0xf9] sm:$0xff]  ;;  %v18022_v41 = vld [vmem:[#allocation23_spill] sm:$0xff]  ;;  %v1390_v53 = vld [vmem:[#allocation2 + $0x101] sm:$0xff] }
 0x160   :  { %18018 = vst [vmem:[#allocation22_spill] sm:$0xff] %v14905_v1  ;;  %v14933_v2 = vadd.f32 %v14498_v7, %v14581_v18  ;;  %v14938_v5 = vpack.c.bf16 %v2316_v20, %v2315_v22  ;;  %v1471_v29 = vmul.f32 %v18022_v41, %v13991_v57  ;;  %v14946_v27 = vadd.f32 %v14498_v7, %v14589_v21  ;;  %v13539_v20 = vld [vmem:[#allocation2 + $0x108] sm:$0xff]  ;;  %v2317_v31 = vld [vmem:[%s17878_s4 + $0x70] sm:$0xff] }
 0x161   :  { %v14936_v11 = vadd.f32 %v14498_v7, %v1169_v59  ;;  %12053 = vmatprep.subr.bf16.mxu0 %v14929_v43  ;;  %v13538_v59 = vld [vmem:[#allocation2 + $0x100] sm:$0xff] }
 0x162   :  { %18021 = vst [vmem:[#allocation14_spill] sm:$0xff] %v14933_v2  ;;  %v17918_v58 = vmax.f32 %v14933_v2, 0.0  ;;  %18023 = vst [vmem:[#allocation15_spill] sm:$0xff] %v14946_v27  ;;  %12055 = vmatpush3.bf16.msra.mxu0 %v14929_v43  ;;  %v17924_v41 = vmax.f32 %v14946_v27, 0.0  ;;  %v1424_v21 = vld [vmem:[#allocation2 + $0x102] sm:$0xff]  ;;  %v1505_v2 = vmul.f32 %v1275_v25, %v13994_v60 }
 0x163   :  { %v17920_v18 = vmax.f32 %v14936_v11, 0.0  ;;  %12057 = vmatprep.subr.bf16.mxu0 %v14938_v5  ;;  %v1540_v27 = vmul.f32 %v14923_v37, %v1424_v21  ;;  %v8523_v25 = vld [vmem:[%s17878_s4 + $0x100] sm:$0xff] }
 0x164   :  { %v2326_v17 = vld [vmem:[#allocation3 + $0x39] sm:$0xff]  ;;  %v2327_v33 = vld [vmem:[#allocation3 + $0x41] sm:$0xff]  ;;  %1224 = vst [vmem:[#allocation3 + $0x60] sm:$0xff] %v17918_v58  ;;  %1225 = vst [vmem:[#allocation3 + $0x68] sm:$0xff] %v17924_v41  ;;  %v1506_v58 = vmul.f32 %v1390_v53, %v13994_v60 }
 0x165   :  { %10242 = vmatmul.mubr.f32.gmra.mrb[38].mxu0 %v2326_v17  ;;  %v2328_v22 = vld [vmem:[#allocation3 + $0x49] sm:$0xff]  ;;  %1223 = vst [vmem:[#allocation3 + $0x58] sm:$0xff] %v17920_v18  ;;  %v1472_v17 = vmul.f32 %v13538_v59, %v13991_v57  ;;  %v2318_v18 = vld [vmem:[%s17878_s4 + $0x78] sm:$0xff] }
 0x166   :  { %10244 = vmatprep.mubr.f32.mxu0 %v2327_v33  ;;  %v1487_v33 = vadd.f32 %v1471_v29, %v1453_v47  ;;  %v1624_v29 = vmul.f32 %v13538_v59, %v13971_v39  ;;  %v1656_v47 = vmul.f32 %v1390_v53, %v13973_v40  ;;  %12059 = vmatpush3.bf16.msra.mxu0 %v14938_v5  ;;  %v8524_v41 = vld [vmem:[%s17878_s4 + $0x108] sm:$0xff] }
 0x167   :  { %v1488_v1 = vadd.f32 %v1472_v17, %v1454_v36  ;;  %v1704_v36 = vmul.f32 %v1424_v21, %v13975_v44  ;;  %v14984_v59 = vadd.f32 %v14498_v7, %v14591_v9  ;;  %v1544_v53 = vadd.f32 %v14611_v51, %v14642_v8 }
 0x168   :  { %v14967_v35 = vadd.f32 %v1505_v2, %v1487_v33  ;;  %v14980_v2 = vpack.c.bf16 %v2318_v18, %v2317_v31  ;;  %v1672_v17 = vadd.f32 %v1656_v47, %v1624_v29  ;;  %v14990_v33 = vmul.f32 %v14923_v37, %v14759_v34  ;;  %v1391_v31 = vld [vmem:[#allocation2 + $0x109] sm:$0xff]  ;;  %v1492_v34 = vld [vmem:[#allocation2 + $0x111] sm:$0xff] }
 0x169   :  { %10245 = vmatmul.mubr.f32.gmra.mrb[40].mxu0 %v2328_v22  ;;  %v1522_v22 = vadd.f32 %v1506_v58, %v1488_v1  ;;  %v14995_v1 = vpack.c.bf16 %v8524_v41, %v8523_v25  ;;  %v1425_v58 = vld [vmem:[#allocation2 + $0x10a] sm:$0xff]  ;;  %v17927_v9 = vmax.f32 %v14984_v59, 0.0  ;;  %v15000_v51 = vadd.f32 %v14498_v7, %v1544_v53 }
 0x16a   :  { %18024 = vst [vmem:[#allocation25_spill] sm:$0xff] %v14967_v35  ;;  %12061 = vmatprep.subr.bf16.mxu0 %v14980_v2  ;;  %v1720_v29 = vadd.f32 %v1704_v36, %v1672_v17  ;;  %v1545_v8 = vadd.f32 %v14661_v62, %v14735_v12  ;;  %v15010_v41 = vadd.f32 %v14918_v19, %v14821_v61  ;;  %v18027_v61 = vmax.f32 %v14556_v32, 0.0  ;;  %v18028_v36 = vld [vmem:[#allocation12_spill] sm:$0xff] }
 0x16b   :  { %v14992_v35 = vadd.f32 %v1540_v27, %v1522_v22  ;;  %12063 = vmatpush3.bf16.msra.mxu0 %v14980_v2  ;;  %v15006_v27 = vadd.f32 %v14903_v52, %v14815_v42  ;;  %v3830_v47 = vld [vmem:[#allocation3 + $0x61] sm:$0xff]  ;;  %v3831_v25 = vld [vmem:[#allocation3 + $0x69] sm:$0xff]  ;;  %v1526_v22 = vld [vmem:[#allocation2 + $0x112] sm:$0xff]  ;;  %1227 = vst [vmem:[#allocation3 + $0x78] sm:$0xff] %v17927_v9  ;;  %v17925_v62 = vmax.f32 %v15000_v51, 0.0  ;;  %v1625_v52 = vmul.f32 %v13539_v20, %v13971_v39 }
 0x16c   :  { %v2329_v18 = vld [vmem:[#allocation3 + $0x51] sm:$0xff]  ;;  %v2330_v21 = vld [vmem:[#allocation3 + $0x59] sm:$0xff]  ;;  %12065 = vmatprep.subr.bf16.mxu0 %v14995_v1  ;;  %10682 = vmatprep.mubr.f32.mxu1 %v3830_v47  ;;  %v15017_v12 = vadd.f32 %v14498_v7, %v1545_v8  ;;  %v1657_v53 = vmul.f32 %v1391_v31, %v13973_v40  ;;  %v1658_v32 = vmul.f32 %v1492_v34, %v13973_v40 }
 0x16d   :  { %18025 = vst [vmem:[#allocation21_spill] sm:$0xff] %v14992_v35  ;;  %10247 = vmatprep.mubr.f32.mxu0 %v2329_v18  ;;  %v13540_v42 = vld [vmem:[#allocation2 + $0x110] sm:$0xff]  ;;  %10683 = vmatmul.mubr.f32.vlgmr.msra.gmra.mrb[32].mxu1 %v3831_v25  ;;  %1592 = vst [vmem:[#allocation3 + $0x80] sm:$0xff] %v17925_v62  ;;  %v18029_v18 = vld [vmem:[#allocation29_spill] sm:$0xff]  ;;  %v1706_v20 = vmul.f32 %v1526_v22, %v13975_v44  ;;  %v1772_v25 = vmul.f32 %v1492_v34, %v13987_v55 }
 0x16e   :  { %10248 = vmatmul.mubr.f32.gmra.mrb[42].mxu0 %v2330_v21  ;;  %18026 = vst [vmem:[#allocation26_spill] sm:$0xff] %v15017_v12  ;;  %12323 = vmatpush3.bf16.msra.mxu1 %v18000_v0  ;;  %v17926_v19 = vmax.f32 %v15017_v12, 0.0  ;;  %v1626_v17 = vmul.f32 %v13540_v42, %v13971_v39  ;;  %v18030_v21 = vmax.f32 %v18029_v18, 0.0  ;;  %v1705_v0 = vmul.f32 %v1425_v58, %v13975_v44  ;;  %v8525_v31 = vld [vmem:[%s17878_s4 + $0x110] sm:$0xff]  ;;  %v8526_v18 = vld [vmem:[%s17878_s4 + $0x118] sm:$0xff]  ;;  %v18033_v34 = vld [vmem:[#allocation13_spill] sm:$0xff] }
 0x16f   :  { %10282 = vmatprep.mubr.f32.mxu0 %v18027_v61  ;;  %12325 = vmatprep.subr.bf16.mxu1 %v18028_v36  ;;  %v1673_v8 = vadd.f32 %v1657_v53, %v1625_v52  ;;  %v1738_v47 = vmul.f32 %v13540_v42, %v13980_v50  ;;  %v18031_v61 = vld [vmem:[#allocation30_spill] sm:$0xff]  ;;  %v1806_v52 = vmul.f32 %v1526_v22, %v13989_v56  ;;  %v8527_v9 = vld [vmem:[%s17878_s4 + $0x120] sm:$0xff]  ;;  %v18039_v35 = vld [vmem:[#allocation20_spill] sm:$0xff] }
 0x170   :  { %1593 = vst [vmem:[#allocation3 + $0x88] sm:$0xff] %v17926_v19  ;;  %v18032_v62 = vmax.f32 %v18031_v61, 0.0  ;;  %v1674_v58 = vadd.f32 %v1658_v32, %v1626_v17  ;;  %v18035_v61 = vld [vmem:[#allocation32_spill] sm:$0xff]  ;;  %v18036_v17 = vld [vmem:[#allocation31_spill] sm:$0xff]  ;;  %v18040_v12 = vmax.f32 %v18039_v35, 0.0 }
 0x171   :  { %v15050_v53 = vadd.f32 %v1705_v0, %v1673_v8  ;;  %v18037_v32 = vmax.f32 %v18036_v17, 0.0  ;;  %v15064_v0 = vpack.c.bf16 %v8526_v18, %v8525_v31  ;;  %v8530_v31 = vld [vmem:[%s17878_s4 + $0x138] sm:$0xff] }
 0x172   :  { %10283 = vmatmul.mubr.f32.vlgmr.msra.gmra.mrb[32].mxu0 %v18030_v21  ;;  %12327 = vmatpush3.bf16.msra.mxu1 %v18028_v36  ;;  %v3832_v42 = vld [vmem:[#allocation3 + $0x71] sm:$0xff]  ;;  %v8528_v36 = vld [vmem:[%s17878_s4 + $0x128] sm:$0xff]  ;;  %v15060_v22 = vadd.f32 %v1706_v20, %v1674_v58 }
 0x173   :  { %10285 = vmatprep.mubr.f32.mxu0 %v18032_v62  ;;  %12067 = vmatpush3.bf16.msra.mxu0 %v14995_v1  ;;  %v1754_v62 = vadd.f32 %v1738_v47, %v1720_v29  ;;  %v18034_v21 = vld [vmem:[#allocation19_spill] sm:$0xff] }
 0x174   :  { %12329 = vmatprep.subr.bf16.mxu1 %v18033_v34  ;;  %v1546_v19 = vadd.f32 %v18035_v61, %v18034_v21  ;;  %10685 = vmatprep.mubr.f32.mxu1 %v3832_v42  ;;  %v3833_v29 = vld [vmem:[#allocation3 + $0x79] sm:$0xff]  ;;  %v8529_v20 = vld [vmem:[%s17878_s4 + $0x130] sm:$0xff] }
 0x175   :  { %v1788_v8 = vadd.f32 %v1772_v25, %v1754_v62  ;;  %v18038_v21 = vld [vmem:[#allocation5_spill] sm:$0xff]  ;;  %10686 = vmatmul.mubr.f32.gmra.mrb[34].mxu1 %v3833_v29  ;;  %12069 = vmatprep.subr.bf16.mxu0 %v15064_v0  ;;  %v15082_v25 = vpack.c.bf16 %v8528_v36, %v8527_v9  ;;  %v8532_v36 = vld [vmem:[%s17878_s4 + $0x148] sm:$0xff]  ;;  %v18043_v29 = vmax.f32 %v14766_v3, 0.0 }
 0x176   :  { %10286 = vmatmul.mubr.f32.gmra.mrb[34].mxu0 %v18037_v32  ;;  %v15067_v47 = vadd.f32 %v14498_v7, %v1546_v19  ;;  %v1547_v61 = vadd.f32 %v18038_v21, %v14803_v23  ;;  %v1548_v19 = vadd.f32 %v14794_v26, %v14809_v46  ;;  %v1549_v23 = vadd.f32 %v14827_v48, %v14877_v24  ;;  %v8531_v62 = vld [vmem:[%s17878_s4 + $0x140] sm:$0xff] }
 0x177   :  { %10288 = vmatprep.mubr.f32.mxu0 %v18040_v12  ;;  %v3834_v35 = vld [vmem:[#allocation3 + $0x81] sm:$0xff]  ;;  %v15086_v12 = vadd.f32 %v1806_v52, %v1788_v8  ;;  %12331 = vmatpush3.bf16.msra.mxu1 %v18033_v34  ;;  %v1550_v26 = vadd.f32 %v14838_v16, %v14899_v14  ;;  %v15103_v24 = vpack.c.bf16 %v8530_v31, %v8529_v20  ;;  %v13541_v8 = vld [vmem:[#allocation2 + $0x118] sm:$0xff]  ;;  %v18045_v21 = vmax.f32 %v14847_v30, 0.0 }
 0x178   :  { %v1578_v18 = vmax.f32 %v15067_v47, 0.0  ;;  %v15091_v58 = vadd.f32 %v14498_v7, %v1547_v61  ;;  %12071 = vmatpush3.bf16.msra.mxu0 %v15064_v0  ;;  %10688 = vmatprep.mubr.f32.mxu1 %v3834_v35  ;;  %v15098_v46 = vadd.f32 %v14498_v7, %v1548_v19  ;;  %v15101_v48 = vadd.f32 %v14498_v7, %v1549_v23  ;;  %v18041_v52 = vld [vmem:[#allocation17_spill] sm:$0xff]  ;;  %v8534_v61 = vld [vmem:[%s17878_s4 + $0x158] sm:$0xff] }
 0x179   :  { %12333 = vmatprep.subr.bf16.mxu1 %v18009_v6  ;;  %v18042_v42 = vmax.f32 %v18041_v52, 0.0  ;;  %12073 = vmatprep.subr.bf16.mxu0 %v15082_v25  ;;  %v15112_v16 = vadd.f32 %v14498_v7, %v1550_v26  ;;  %v1551_v14 = vadd.f32 %v14927_v54, %v15006_v27  ;;  %v1552_v34 = vadd.f32 %v14990_v33, %v15010_v41  ;;  %v1527_v31 = vld [vmem:[#allocation2 + $0x11a] sm:$0xff] }
 0x17a   :  { %1594 = vst [vmem:[#allocation3 + $0x90] sm:$0xff] %v1578_v18  ;;  %v17933_v9 = vmax.f32 %v15091_v58, 0.0  ;;  %v17932_v17 = vmax.f32 %v15098_v46, 0.0  ;;  %v17931_v32 = vmax.f32 %v15101_v48, 0.0  ;;  %v15143_v3 = vpack.c.bf16 %v8532_v36, %v8531_v62 }
 0x17b   :  { %10289 = vmatmul.mubr.f32.gmra.mrb[36].mxu0 %v18042_v42  ;;  %12335 = vmatpush3.bf16.msra.mxu1 %v18009_v6  ;;  %v17930_v54 = vmax.f32 %v15112_v16, 0.0  ;;  %v15134_v33 = vadd.f32 %v14498_v7, %v1551_v14  ;;  %v1568_v27 = vadd.f32 %v14498_v7, %v1552_v34  ;;  %v18044_v6 = vmax.f32 %v14784_v4, 0.0  ;;  %v8533_v4 = vld [vmem:[%s17878_s4 + $0x150] sm:$0xff]  ;;  %v8535_v14 = vld [vmem:[%s17878_s4 + $0x160] sm:$0xff] }
 0x17c   :  { %10291 = vmatprep.mubr.f32.mxu0 %v18043_v29  ;;  %1595 = vst [vmem:[#allocation3 + $0x98] sm:$0xff] %v17933_v9  ;;  %12075 = vmatpush3.bf16.msra.mxu0 %v15082_v25  ;;  %1596 = vst [vmem:[#allocation3 + $0xa0] sm:$0xff] %v17932_v17  ;;  %v1503_v30 = vmul.f32 %v14834_v38, %v13994_v60  ;;  %v15168_v19 = vmul.f32 %v14857_v15, %v13994_v60  ;;  %v18046_v23 = vmax.f32 %v14850_v28, 0.0  ;;  %v8536_v15 = vld [vmem:[%s17878_s4 + $0x168] sm:$0xff] }
 0x17d   :  { %1597 = vst [vmem:[#allocation3 + $0xa8] sm:$0xff] %v17931_v32  ;;  %12337 = vmatprep.subr.bf16.mxu1 %v18011_v63  ;;  %12077 = vmatprep.subr.bf16.mxu0 %v15103_v24  ;;  %1598 = vst [vmem:[#allocation3 + $0xb0] sm:$0xff] %v17930_v54  ;;  %v17929_v7 = vmax.f32 %v15134_v33, 0.0  ;;  %v1584_v41 = vmax.f32 %v1568_v27, 0.0  ;;  %v1627_v35 = vmul.f32 %v13541_v8, %v13971_v39  ;;  %v18047_v52 = vmax.f32 %v14855_v13, 0.0  ;;  %v8545_v32 = vld [vmem:[%s17878_s4 + $0x1b0] sm:$0xff] }
 0x17e   :  { %v1739_v26 = vmul.f32 %v13541_v8, %v13980_v50  ;;  %v15176_v42 = vpack.c.bf16 %v8534_v61, %v8533_v4  ;;  %v15186_v28 = vmul.f32 %v14923_v37, %v14852_v49  ;;  %v15190_v13 = vadd.f32 %v1503_v30, %v14887_v45  ;;  %v8538_v45 = vld [vmem:[%s17878_s4 + $0x178] sm:$0xff] }
 0x17f   :  { %10292 = vmatmul.mubr.f32.gmra.mrb[38].mxu0 %v18044_v6  ;;  %12339 = vmatpush3.bf16.msra.mxu1 %v18011_v63  ;;  %1599 = vst [vmem:[#allocation3 + $0xb8] sm:$0xff] %v17929_v7  ;;  %1600 = vst [vmem:[#allocation3 + $0xc0] sm:$0xff] %v1584_v41  ;;  %v1493_v63 = vld [vmem:[#allocation2 + $0x119] sm:$0xff]  ;;  %v1707_v29 = vmul.f32 %v1527_v31, %v13975_v44  ;;  %v18048_v49 = vmax.f32 %v14936_v11, 0.0  ;;  %v15198_v27 = vpack.c.bf16 %v8536_v15, %v8535_v14  ;;  %v15208_v41 = vpop.f32.mrb[6].mxu1  ;;  %v2598_v11 = vld [vmem:[#allocation3 + $0x2] sm:$0xff] }
 0x180   :  { %10294 = vmatprep.mubr.f32.mxu0 %v18045_v21  ;;  %12079 = vmatpush3.bf16.msra.mxu0 %v15103_v24  ;;  %v1659_v36 = vmul.f32 %v1493_v63, %v13973_v40  ;;  %v1740_v6 = vmul.f32 %v13980_v50, %v14896_v10  ;;  %v18049_v21 = vld [vmem:[#allocation16_spill] sm:$0xff]  ;;  %v1755_v30 = vadd.f32 %v1739_v26, %v15050_v53 }
 0x181   :  { %v3835_v20 = vld [vmem:[#allocation3 + $0x89] sm:$0xff]  ;;  %12341 = vmatprep.subr.bf16.mxu1 %v14929_v43  ;;  %12081 = vmatprep.subr.bf16.mxu0 %v15143_v3  ;;  %v1741_v4 = vmul.f32 %v18049_v21, %v13980_v50  ;;  %775 = vst [vmem:[#allocation2 + $0x138] sm:$0xff] %v15208_v41  ;;  %v1773_v14 = vmul.f32 %v1493_v63, %v13987_v55 }
 0x182   :  { %10689 = vmatmul.mubr.f32.gmra.mrb[36].mxu1 %v3835_v20  ;;  %v1675_v61 = vadd.f32 %v1659_v36, %v1627_v35  ;;  %v15215_v20 = vpop.f32.mrb[7].mxu1  ;;  %v1807_v26 = vmul.f32 %v1527_v31, %v13989_v56  ;;  %v8540_v36 = vld [vmem:[%s17878_s4 + $0x188] sm:$0xff]  ;;  %v1840_v31 = vmul.f32 %v13991_v57, %v14896_v10 }
 0x183   :  { %10295 = vmatmul.mubr.f32.gmra.mrb[40].mxu0 %v18046_v23  ;;  %v3836_v38 = vld [vmem:[#allocation3 + $0x91] sm:$0xff]  ;;  %v3837_v34 = vld [vmem:[#allocation3 + $0x99] sm:$0xff]  ;;  %12343 = vmatpush3.bf16.msra.mxu1 %v14929_v43  ;;  %774 = vst [vmem:[#allocation2 + $0x130] sm:$0xff] %v15215_v20  ;;  %v15223_v15 = vpop.f32.mrb[8].mxu1  ;;  %v1789_v63 = vadd.f32 %v1773_v14, %v1755_v30 }
 0x184   :  { %10297 = vmatprep.mubr.f32.mxu0 %v18047_v52  ;;  %10691 = vmatprep.mubr.f32.mxu1 %v3836_v38  ;;  %v3838_v62 = vld [vmem:[#allocation3 + $0xa1] sm:$0xff]  ;;  %v8537_v43 = vld [vmem:[%s17878_s4 + $0x170] sm:$0xff]  ;;  %v1756_v52 = vadd.f32 %v1740_v6, %v15060_v22  ;;  %v1723_v35 = vadd.f32 %v1707_v29, %v1675_v61  ;;  %777 = vst [vmem:[#allocation2 + $0x148] sm:$0xff] %v15223_v15  ;;  %v13542_v22 = vld [vmem:[%s17880_s3] ss:$0 sm:$0xff] }
 0x185   :  { %12345 = vmatprep.subr.bf16.mxu1 %v14938_v5  ;;  %12083 = vmatpush3.bf16.msra.mxu0 %v15143_v3  ;;  %v3839_v8 = vld [vmem:[#allocation3 + $0xa9] sm:$0xff]  ;;  %v15218_v38 = vld [vmem:[#allocation2 + $0x121] sm:$0xff]  ;;  %v15227_v53 = vpack.c.bf16 %v8538_v45, %v8537_v43  ;;  %v1628_v29 = vmul.f32 %v13971_v39, %v14896_v10  ;;  %v15251_v45 = vpop.f32.mrb[9].mxu1  ;;  %v15266_v10 = vadd.f32 %v1840_v31, %v15086_v12 }
 0x186   :  { %10692 = vmatmul.mubr.f32.gmra.mrb[38].mxu1 %v3837_v34  ;;  %12085 = vmatprep.subr.bf16.mxu0 %v15176_v42  ;;  %v3840_v23 = vld [vmem:[#allocation3 + $0xb1] sm:$0xff]  ;;  %v3841_v34 = vld [vmem:[#allocation3 + $0xb9] sm:$0xff]  ;;  %v15247_v43 = vadd.f32 %v1741_v4, %v1723_v35  ;;  %v15254_v6 = vld [vmem:[#allocation2 + $0x122] sm:$0xff]  ;;  %776 = vst [vmem:[#allocation2 + $0x140] sm:$0xff] %v15251_v45 }
 0x187   :  { %10298 = vmatmul.mubr.f32.gmra.mrb[42].mxu0 %v18048_v49  ;;  %10694 = vmatprep.mubr.f32.mxu1 %v3838_v62  ;;  %v8539_v62 = vld [vmem:[%s17878_s4 + $0x180] sm:$0xff]  ;;  %v1660_v49 = vmul.f32 %v15218_v38, %v13973_v40  ;;  %v18050_v61 = vld [vmem:[#allocation22_spill] sm:$0xff]  ;;  %v8541_v12 = vld [vmem:[%s17878_s4 + $0x190] sm:$0xff] }
 0x188   :  { %12347 = vmatpush3.bf16.msra.mxu1 %v14938_v5  ;;  %10332 = vmatprep.mubr.f32.mxu0 %v2598_v11  ;;  %v1841_v5 = vmul.f32 %v18049_v21, %v13991_v57  ;;  %v15257_v11 = vpop.f32.mrb[10].mxu1  ;;  %v1520_v30 = vadd.f32 %v15168_v19, %v18050_v61  ;;  %v1774_v19 = vmul.f32 %v15218_v38, %v13987_v55  ;;  %v18055_v61 = vld [vmem:[#allocation15_spill] sm:$0xff] }
 0x189   :  { %12349 = vmatprep.subr.bf16.mxu1 %v14980_v2  ;;  %12087 = vmatpush3.bf16.msra.mxu0 %v15176_v42  ;;  %779 = vst [vmem:[#allocation2 + $0x158] sm:$0xff] %v15257_v11 }
 0x18a   :  { %10695 = vmatmul.mubr.f32.gmra.mrb[40].mxu1 %v3839_v8  ;;  %12089 = vmatprep.subr.bf16.mxu0 %v15198_v27  ;;  %v1823_v8 = vadd.f32 %v1807_v26, %v1789_v63  ;;  %v8542_v63 = vld [vmem:[%s17878_s4 + $0x198] sm:$0xff]  ;;  %v1676_v26 = vadd.f32 %v1660_v49, %v1628_v29  ;;  %v1790_v49 = vadd.f32 %v1774_v19, %v1756_v52  ;;  %v1693_v7 = vld [vmem:[#allocation2 + $0x12a] sm:$0xff] }
 0x18b   :  { %10697 = vmatprep.mubr.f32.mxu1 %v3840_v23  ;;  %v18051_v23 = vld [vmem:[#allocation18_spill] sm:$0xff]  ;;  %v15297_v29 = vpack.c.bf16 %v8542_v63, %v8541_v12 }
 0x18c   :  { %12351 = vmatpush3.bf16.msra.mxu1 %v14980_v2  ;;  %v1538_v4 = vmul.f32 %v14923_v37, %v18051_v23  ;;  %v15270_v2 = vpack.c.bf16 %v8540_v36, %v8539_v62  ;;  %v15274_v14 = vadd.f32 %v1841_v5, %v1823_v8  ;;  %v18053_v37 = vld [vmem:[#allocation14_spill] sm:$0xff]  ;;  %v1553_v62 = vadd.f32 %v15186_v28, %v15190_v13  ;;  %v15288_v5 = vpop.f32.mrb[11].mxu1  ;;  %v1646_v13 = vld [vmem:[#allocation2 + $0x131] sm:$0xff] }
 0x18d   :  { %12353 = vmatprep.subr.bf16.mxu1 %v14995_v1  ;;  %12091 = vmatpush3.bf16.msra.mxu0 %v15198_v27  ;;  %v18054_v35 = vmax.f32 %v18053_v37, 0.0  ;;  %778 = vst [vmem:[#allocation2 + $0x150] sm:$0xff] %v15288_v5  ;;  %v1645_v8 = vld [vmem:[#allocation2 + $0x129] sm:$0xff]  ;;  %v18056_v23 = vmax.f32 %v18055_v61, 0.0  ;;  %v1808_v28 = vmul.f32 %v15254_v6, %v13989_v56  ;;  %v1629_v61 = vmul.f32 %v18049_v21, %v13971_v39 }
 0x18e   :  { %10698 = vmatmul.mubr.f32.gmra.mrb[42].mxu1 %v3841_v34  ;;  %12093 = vmatprep.subr.bf16.mxu0 %v15227_v53  ;;  %18052 = vst [vmem:[#allocation24_spill] sm:$0xff] %v15274_v14  ;;  %v1708_v34 = vmul.f32 %v15254_v6, %v13975_v44  ;;  %v1569_v36 = vadd.f32 %v13542_v22, %v1553_v62  ;;  %v15294_v37 = vld [vmem:[#allocation3 + $0x70] sm:$0xff]  ;;  %v8544_v12 = vld [vmem:[%s17878_s4 + $0x1a8] sm:$0xff]  ;;  %v18057_v21 = vmax.f32 %v14984_v59, 0.0  ;;  %v8546_v59 = vld [vmem:[%s17878_s4 + $0x1b8] sm:$0xff] }
 0x18f   :  { %10732 = vmatprep.mubr.f32.mxu1 %v18054_v35  ;;  %v1554_v31 = vadd.f32 %v1538_v4, %v1520_v30  ;;  %v15301_v35 = vpop.f32.mrb[12].mxu1  ;;  %v2599_v30 = vld [vmem:[#allocation3 + $0xa] sm:$0xff]  ;;  %v8543_v4 = vld [vmem:[%s17878_s4 + $0x1a0] sm:$0xff]  ;;  %v15361_v9 = vpack.c.bf16 %v8546_v59, %v8545_v32  ;;  %v1631_v59 = vmul.f32 %v15208_v41, %v13971_v39 }
 0x190   :  { %v1724_v52 = vadd.f32 %v1708_v34, %v1676_v26  ;;  %v1585_v19 = vmax.f32 %v1569_v36, 0.0  ;;  %781 = vst [vmem:[#allocation2 + $0x168] sm:$0xff] %v15301_v35  ;;  %v15312_v62 = vpop.f32.mrb[13].mxu1  ;;  %v1630_v26 = vmul.f32 %v13971_v39, %v15215_v20  ;;  %v1662_v34 = vmul.f32 %v1646_v13, %v13973_v40 }
 0x191   :  { %12095 = vmatpush3.bf16.msra.mxu0 %v15227_v53  ;;  %v1570_v63 = vadd.f32 %v13542_v22, %v1554_v31  ;;  %780 = vst [vmem:[#allocation2 + $0x160] sm:$0xff] %v15312_v62  ;;  %v1742_v36 = vmul.f32 %v13980_v50, %v15215_v20  ;;  %v15328_v31 = vpack.c.bf16 %v8544_v12, %v8543_v4  ;;  %v15330_v54 = vpop.f32.mrb[14].mxu1  ;;  %v8548_v12 = vld [vmem:[%s17878_s4 + $0x1c8] sm:$0xff] }
 0x192   :  { %10733 = vmatmul.mubr.f32.vlgmr.msra.gmra.mrb[32].mxu1 %v18056_v23  ;;  %12097 = vmatprep.subr.bf16.mxu0 %v15270_v2  ;;  %v1661_v23 = vmul.f32 %v1645_v8, %v13973_v40  ;;  %1601 = vst [vmem:[#allocation3 + $0xc8] sm:$0xff] %v1585_v19  ;;  %v18058_v19 = vmax.f32 %v15000_v51, 0.0  ;;  %783 = vst [vmem:[#allocation2 + $0x178] sm:$0xff] %v15330_v54  ;;  %v15343_v4 = vpop.f32.mrb[15].mxu1  ;;  %v2602_v51 = vld [vmem:[#allocation3 + $0x22] sm:$0xff] }
 0x193   :  { %10735 = vmatprep.mubr.f32.mxu1 %v15294_v37  ;;  %12355 = vmatpush3.bf16.msra.mxu1 %v14995_v1  ;;  %v2600_v1 = vld [vmem:[#allocation3 + $0x12] sm:$0xff]  ;;  %v1586_v22 = vmax.f32 %v1570_v63, 0.0  ;;  %v2601_v63 = vld [vmem:[#allocation3 + $0x1a] sm:$0xff]  ;;  %782 = vst [vmem:[#allocation2 + $0x170] sm:$0xff] %v15343_v4 }
 0x194   :  { %12357 = vmatprep.subr.bf16.mxu1 %v15064_v0  ;;  %10333 = vmatmul.mubr.f32.vlgmr.msra.gmra.mrb[32].mxu0 %v2599_v30  ;;  %v1824_v30 = vadd.f32 %v1808_v28, %v1790_v49  ;;  %v1709_v49 = vmul.f32 %v1693_v7, %v13975_v44  ;;  %v1758_v28 = vadd.f32 %v1742_v36, %v1724_v52 }
 0x195   :  { %10335 = vmatprep.mubr.f32.mxu0 %v2600_v1  ;;  %12099 = vmatpush3.bf16.msra.mxu0 %v15270_v2  ;;  %v1694_v1 = vld [vmem:[#allocation2 + $0x132] sm:$0xff]  ;;  %1602 = vst [vmem:[#allocation3 + $0xd0] sm:$0xff] %v1586_v22  ;;  %v1677_v22 = vadd.f32 %v1661_v23, %v1629_v61  ;;  %v1842_v52 = vmul.f32 %v13991_v57, %v15215_v20  ;;  %v15366_v20 = vpop.f32.mrb[16].mxu1  ;;  %v2603_v23 = vld [vmem:[#allocation3 + $0x2a] sm:$0xff] }
 0x196   :  { %10736 = vmatmul.mubr.f32.gmra.mrb[34].mxu1 %v18057_v21  ;;  %12101 = vmatprep.subr.bf16.mxu0 %v15297_v29  ;;  %v1775_v21 = vmul.f32 %v1645_v8, %v13987_v55  ;;  %v1678_v36 = vadd.f32 %v1662_v34, %v1630_v26  ;;  %v1776_v8 = vmul.f32 %v1646_v13, %v13987_v55  ;;  %v1647_v34 = vld [vmem:[#allocation2 + $0x139] sm:$0xff]  ;;  %v15376_v32 = vpop.f32.mrb[17].mxu1 }
 0x197   :  { %10738 = vmatprep.mubr.f32.mxu1 %v18058_v19  ;;  %12359 = vmatpush3.bf16.msra.mxu1 %v15064_v0  ;;  %v8547_v0 = vld [vmem:[%s17878_s4 + $0x1c0] sm:$0xff]  ;;  %v1710_v19 = vmul.f32 %v1694_v1, %v13975_v44  ;;  %v15364_v61 = vadd.f32 %v1842_v52, %v1824_v30  ;;  %785 = vst [vmem:[#allocation2 + $0x188] sm:$0xff] %v15366_v20  ;;  %v2604_v13 = vld [vmem:[#allocation3 + $0x32] sm:$0xff]  ;;  %784 = vst [vmem:[#allocation2 + $0x180] sm:$0xff] %v15376_v32  ;;  %v18063_v52 = vmax.f32 %v15098_v46, 0.0 }
 0x198   :  { %12361 = vmatprep.subr.bf16.mxu1 %v15082_v25  ;;  %10336 = vmatmul.mubr.f32.gmra.mrb[34].mxu0 %v2601_v63  ;;  %v18059_v63 = vld [vmem:[#allocation26_spill] sm:$0xff]  ;;  %v15371_v26 = vpack.c.bf16 %v8548_v12, %v8547_v0  ;;  %v1725_v30 = vadd.f32 %v1709_v49, %v1677_v22  ;;  %v1791_v47 = vadd.f32 %v1775_v21, %v15247_v43  ;;  %v1695_v12 = vld [vmem:[#allocation2 + $0x13a] sm:$0xff]  ;;  %v18062_v49 = vmax.f32 %v15091_v58, 0.0  ;;  %v15392_v21 = vpop.f32.mrb[18].mxu1  ;;  %v8549_v58 = vld [vmem:[%s17878_s4 + $0x1d0] sm:$0xff] }
 0x199   :  { %10338 = vmatprep.mubr.f32.mxu0 %v2602_v51  ;;  %12103 = vmatpush3.bf16.msra.mxu0 %v15297_v29  ;;  %v18060_v17 = vmax.f32 %v18059_v63, 0.0  ;;  %18061 = vst [vmem:[#allocation27_spill] sm:$0xff] %v15364_v61  ;;  %v1843_v51 = vmul.f32 %v15208_v41, %v13991_v57  ;;  %v1726_v0 = vadd.f32 %v1710_v19, %v1678_v36  ;;  %787 = vst [vmem:[#allocation2 + $0x198] sm:$0xff] %v15392_v21  ;;  %v2606_v19 = vld [vmem:[#allocation3 + $0x42] sm:$0xff] }
 0x19a   :  { %12105 = vmatprep.subr.bf16.mxu0 %v15328_v31  ;;  %v1810_v43 = vmul.f32 %v1694_v1, %v13989_v56  ;;  %v1663_v22 = vmul.f32 %v1647_v34, %v13973_v40  ;;  %v1632_v1 = vmul.f32 %v13971_v39, %v15251_v45  ;;  %v1744_v46 = vmul.f32 %v13980_v50, %v15251_v45 }
 0x19b   :  { %10739 = vmatmul.mubr.f32.gmra.mrb[36].mxu1 %v18060_v17  ;;  %v1743_v17 = vmul.f32 %v15208_v41, %v13980_v50  ;;  %v2605_v41 = vld [vmem:[#allocation3 + $0x3a] sm:$0xff]  ;;  %v1777_v14 = vmul.f32 %v1647_v34, %v13987_v55  ;;  %v18064_v61 = vmax.f32 %v15101_v48, 0.0  ;;  %v18065_v48 = vmax.f32 %v15112_v16, 0.0 }
 0x19c   :  { %10741 = vmatprep.mubr.f32.mxu1 %v1578_v18  ;;  %12363 = vmatpush3.bf16.msra.mxu1 %v15082_v25  ;;  %v1809_v25 = vmul.f32 %v1693_v7, %v13989_v56  ;;  %v1648_v18 = vld [vmem:[#allocation2 + $0x141] sm:$0xff]  ;;  %v1792_v7 = vadd.f32 %v1776_v8, %v1758_v28  ;;  %v8550_v28 = vld [vmem:[%s17878_s4 + $0x1d8] sm:$0xff]  ;;  %v1844_v16 = vmul.f32 %v13991_v57, %v15251_v45 }
 0x19d   :  { %12365 = vmatprep.subr.bf16.mxu1 %v15103_v24  ;;  %10339 = vmatmul.mubr.f32.gmra.mrb[36].mxu0 %v2603_v23  ;;  %v1664_v36 = vmul.f32 %v1648_v18, %v13973_v40  ;;  %v1696_v8 = vld [vmem:[#allocation2 + $0x142] sm:$0xff]  ;;  %v1711_v23 = vmul.f32 %v1695_v12, %v13975_v44 }
 0x19e   :  { %10341 = vmatprep.mubr.f32.mxu0 %v2604_v13  ;;  %12107 = vmatpush3.bf16.msra.mxu0 %v15328_v31  ;;  %v1825_v63 = vadd.f32 %v1809_v25, %v1791_v47  ;;  %v1759_v13 = vadd.f32 %v1743_v17, %v1725_v30  ;;  %v8551_v17 = vld [vmem:[%s17878_s4 + $0x1e0] sm:$0xff]  ;;  %v8552_v30 = vld [vmem:[%s17878_s4 + $0x1e8] sm:$0xff]  ;;  %v1826_v47 = vadd.f32 %v1810_v43, %v1792_v7 }
 0x19f   :  { %10742 = vmatmul.mubr.f32.gmra.mrb[38].mxu1 %v18062_v49  ;;  %12109 = vmatprep.subr.bf16.mxu0 %v15361_v9  ;;  %v1679_v49 = vadd.f32 %v1663_v22, %v1631_v59  ;;  %v1778_v25 = vmul.f32 %v1648_v18, %v13987_v55  ;;  %v1680_v34 = vadd.f32 %v1664_v36, %v1632_v1  ;;  %v2608_v18 = vld [vmem:[#allocation3 + $0x52] sm:$0xff]  ;;  %v18066_v1 = vmax.f32 %v15134_v33, 0.0 }
 0x1a0   :  { %10744 = vmatprep.mubr.f32.mxu1 %v18063_v52  ;;  %12367 = vmatpush3.bf16.msra.mxu1 %v15103_v24  ;;  %v15409_v24 = vpop.f32.mrb[19].mxu1  ;;  %v1760_v52 = vadd.f32 %v1744_v46, %v1726_v0  ;;  %v1712_v0 = vmul.f32 %v1696_v8, %v13975_v44  ;;  %v1811_v22 = vmul.f32 %v1695_v12, %v13989_v56  ;;  %v15455_v46 = vld [vmem:[#allocation2 + $0x149] sm:$0xff] }
 0x1a1   :  { %12369 = vmatprep.subr.bf16.mxu1 %v15143_v3  ;;  %10342 = vmatmul.mubr.f32.gmra.mrb[38].mxu0 %v2605_v41  ;;  %786 = vst [vmem:[#allocation2 + $0x190] sm:$0xff] %v15409_v24  ;;  %v15419_v41 = vpack.c.bf16 %v8550_v28, %v8549_v58  ;;  %v15428_v59 = vpop.f32.mrb[20].mxu1  ;;  %v1793_v7 = vadd.f32 %v1777_v14, %v1759_v13  ;;  %v4108_v14 = vld [vmem:[#allocation3 + $0x62] sm:$0xff]  ;;  %18068 = vst [vmem:[#allocation23_spill] sm:$0xff] %v15455_v46  ;;  %v8553_v33 = vld [vmem:[%s17878_s4 + $0x1f0] sm:$0xff] }
 0x1a2   :  { %10344 = vmatprep.mubr.f32.mxu0 %v2606_v19  ;;  %12111 = vmatpush3.bf16.msra.mxu0 %v15361_v9  ;;  %789 = vst [vmem:[#allocation2 + $0x1a8] sm:$0xff] %v15428_v59  ;;  %v15436_v58 = vpop.f32.mrb[21].mxu1  ;;  %v15441_v43 = vadd.f32 %v1843_v51, %v1825_v63  ;;  %v1745_v12 = vmul.f32 %v15223_v15, %v13980_v50  ;;  %v1650_v19 = vld [vmem:[#allocation2 + $0x151] sm:$0xff] }
 0x1a3   :  { %10745 = vmatmul.mubr.f32.gmra.mrb[40].mxu1 %v18064_v61  ;;  %12113 = vmatprep.subr.bf16.mxu0 %v15371_v26  ;;  %v2607_v61 = vld [vmem:[#allocation3 + $0x4a] sm:$0xff]  ;;  %788 = vst [vmem:[#allocation2 + $0x1a0] sm:$0xff] %v15436_v58  ;;  %v1727_v28 = vadd.f32 %v1711_v23, %v1679_v49  ;;  %v1794_v45 = vadd.f32 %v1778_v25, %v1760_v52  ;;  %v15457_v63 = vpop.f32.mrb[22].mxu1  ;;  %v2609_v23 = vld [vmem:[#allocation3 + $0x5a] sm:$0xff] }
 0x1a4   :  { %10747 = vmatprep.mubr.f32.mxu1 %v18065_v48  ;;  %12371 = vmatpush3.bf16.msra.mxu1 %v15143_v3  ;;  %v15445_v3 = vpack.c.bf16 %v8552_v30, %v8551_v17  ;;  %v1812_v51 = vmul.f32 %v1696_v8, %v13989_v56  ;;  %v15453_v36 = vadd.f32 %v1844_v16, %v1826_v47  ;;  %v8554_v13 = vld [vmem:[%s17878_s4 + $0x1f8] sm:$0xff]  ;;  %v15469_v49 = vpop.f32.mrb[23].mxu1  ;;  %v1697_v47 = vld [vmem:[#allocation2 + $0x14a] sm:$0xff]  ;;  %v8555_v16 = vld [vmem:[%s17878_s4 + $0x200] sm:$0xff] }
 0x1a5   :  { %12373 = vmatprep.subr.bf16.mxu1 %v15176_v42  ;;  %10345 = vmatmul.mubr.f32.gmra.mrb[40].mxu0 %v2607_v61  ;;  %v1633_v8 = vmul.f32 %v15223_v15, %v13971_v39  ;;  %791 = vst [vmem:[#allocation2 + $0x1b8] sm:$0xff] %v15457_v63  ;;  %v1845_v52 = vmul.f32 %v15223_v15, %v13991_v57  ;;  %790 = vst [vmem:[#allocation2 + $0x1b0] sm:$0xff] %v15469_v49  ;;  %v15475_v25 = vpop.f32.mrb[24].mxu1 }
 0x1a6   :  { %10347 = vmatprep.mubr.f32.mxu0 %v2608_v18  ;;  %12115 = vmatpush3.bf16.msra.mxu0 %v15371_v26  ;;  %18067 = vst [vmem:[#allocation28_spill] sm:$0xff] %v15453_v36  ;;  %v1728_v17 = vadd.f32 %v1712_v0, %v1680_v34  ;;  %v1827_v30 = vadd.f32 %v1811_v22, %v1793_v7  ;;  %18069 = vst [vmem:[#allocation12_spill] sm:$0xff] %v15475_v25  ;;  %v1698_v0 = vld [vmem:[#allocation2 + $0x152] sm:$0xff] }
 0x1a7   :  { %10748 = vmatmul.mubr.f32.gmra.mrb[42].mxu1 %v18066_v1  ;;  %12117 = vmatprep.subr.bf16.mxu0 %v15419_v41  ;;  %v1634_v48 = vmul.f32 %v13971_v39, %v15288_v5  ;;  %v1665_v61 = vmul.f32 %v15455_v46, %v13973_v40  ;;  %v1666_v18 = vmul.f32 %v1650_v19, %v13973_v40  ;;  %v8556_v1 = vld [vmem:[%s17878_s4 + $0x208] sm:$0xff]  ;;  %v1654_v36 = vld [vmem:[#allocation2 + $0x171] sm:$0xff] }
 0x1a8   :  { %12375 = vmatpush3.bf16.msra.mxu1 %v15176_v42  ;;  %10782 = vmatprep.mubr.f32.mxu1 %v4108_v14  ;;  %v2764_v42 = vld [vmem:[#allocation3 + $0x10] sm:$0xff]  ;;  %793 = vst [vmem:[#allocation2 + $0x1c8] sm:$0xff] %v15475_v25  ;;  %v15485_v15 = vpack.c.bf16 %v8554_v13, %v8553_v33  ;;  %v1828_v34 = vadd.f32 %v1812_v51, %v1794_v45  ;;  %v15499_v51 = vpop.f32.mrb[25].mxu1  ;;  %v8558_v13 = vld [vmem:[%s17878_s4 + $0x218] sm:$0xff] }
 0x1a9   :  { %12377 = vmatprep.subr.bf16.mxu1 %v15198_v27  ;;  %10348 = vmatmul.mubr.f32.gmra.mrb[42].mxu0 %v2609_v23  ;;  %v1746_v22 = vmul.f32 %v13980_v50, %v15288_v5  ;;  %v1761_v7 = vadd.f32 %v1745_v12, %v1727_v28  ;;  %v1681_v14 = vadd.f32 %v1665_v61, %v1633_v8  ;;  %v10193_v28 = vpop.f32.mrb[26].mxu1  ;;  %v8557_v33 = vld [vmem:[%s17878_s4 + $0x210] sm:$0xff] }
 0x1aa   :  { %12119 = vmatpush3.bf16.msra.mxu0 %v15419_v41  ;;  %10382 = vmatprep.mubr.f32.mxu0 %v2764_v42  ;;  %v1713_v23 = vmul.f32 %v1697_v47, %v13975_v44  ;;  %v1779_v45 = vmul.f32 %v15455_v46, %v13987_v55  ;;  %18070 = vst [vmem:[#allocation29_spill] sm:$0xff] %v15499_v51  ;;  %792 = vst [vmem:[#allocation2 + $0x1c0] sm:$0xff] %v15499_v51  ;;  %v8560_v51 = vld [vmem:[%s17878_s4 + $0x228] sm:$0xff] }
 0x1ab   :  { %12121 = vmatprep.subr.bf16.mxu0 %v15445_v3  ;;  %v1762_v12 = vadd.f32 %v1746_v22, %v1728_v17  ;;  %v1682_v8 = vadd.f32 %v1666_v18, %v1634_v48  ;;  %v1714_v42 = vmul.f32 %v1698_v0, %v13975_v44  ;;  %v1780_v17 = vmul.f32 %v1650_v19, %v13987_v55  ;;  %v8559_v22 = vld [vmem:[%s17878_s4 + $0x220] sm:$0xff] }
 0x1ac   :  { %12379 = vmatpush3.bf16.msra.mxu1 %v15198_v27  ;;  %v1846_v27 = vmul.f32 %v13991_v57, %v15288_v5  ;;  %v15514_v61 = vadd.f32 %v1845_v52, %v1827_v30  ;;  %795 = vst [vmem:[#allocation2 + $0x1d8] sm:$0xff] %v10193_v28  ;;  %v15517_v5 = vpack.c.bf16 %v8556_v1, %v8555_v16  ;;  %v15531_v16 = vld [vmem:[#allocation2 + $0x159] sm:$0xff]  ;;  %v739_v1 = vpop.f32.mrb[27].mxu1  ;;  %v15536_v28 = vld [vmem:[%s17879_s2 + $0x8] ss:$0 sm:$0xff] }
 0x1ad   :  { %12381 = vmatprep.subr.bf16.mxu1 %v15227_v53  ;;  %v1747_v19 = vmul.f32 %v15257_v11, %v13980_v50  ;;  %v1729_v52 = vadd.f32 %v1713_v23, %v1681_v14  ;;  %v1795_v30 = vadd.f32 %v1779_v45, %v1761_v7  ;;  %v1813_v18 = vmul.f32 %v1697_v47, %v13989_v56  ;;  %v8561_v47 = vld [vmem:[%s17878_s4 + $0x230] sm:$0xff]  ;;  %v8562_v23 = vld [vmem:[%s17878_s4 + $0x238] sm:$0xff] }
 0x1ae   :  { %12123 = vmatpush3.bf16.msra.mxu0 %v15445_v3  ;;  %18071 = vst [vmem:[#allocation30_spill] sm:$0xff] %v15514_v61  ;;  %v15525_v48 = vadd.f32 %v1846_v27, %v1828_v34  ;;  %18073 = vst [vmem:[#allocation19_spill] sm:$0xff] %v15531_v16  ;;  %v13544_v61 = vld [vmem:[#allocation2 + $0xfa] sm:$0xff]  ;;  %v4109_v7 = vld [vmem:[#allocation3 + $0x6a] sm:$0xff]  ;;  %v15548_v14 = vpack.c.bf16 %v8560_v51, %v8559_v22  ;;  %v1730_v45 = vadd.f32 %v1714_v42, %v1682_v8 }
 0x1af   :  { %12125 = vmatprep.subr.bf16.mxu0 %v15485_v15  ;;  %v15539_v34 = vmul.f32 %v13544_v61, %v15536_v28  ;;  %794 = vst [vmem:[#allocation2 + $0x1d0] sm:$0xff] %v739_v1  ;;  %v1796_v27 = vadd.f32 %v1780_v17, %v1762_v12  ;;  %v1814_v61 = vmul.f32 %v1698_v0, %v13989_v56  ;;  %v2765_v0 = vld [vmem:[#allocation3 + $0x18] sm:$0xff] }
 0x1b0   :  { %18072 = vst [vmem:[#allocation13_spill] sm:$0xff] %v15525_v48  ;;  %12383 = vmatpush3.bf16.msra.mxu1 %v15227_v53  ;;  %v15542_v53 = vpack.c.bf16 %v8558_v13, %v8557_v33  ;;  %v15554_v33 = vld [vmem:[#allocation2 + $0x161] sm:$0xff]  ;;  %v4110_v13 = vld [vmem:[#allocation3 + $0x72] sm:$0xff]  ;;  %v1635_v1 = vmul.f32 %v15257_v11, %v13971_v39  ;;  %v1847_v51 = vmul.f32 %v15257_v11, %v13991_v57 }
 0x1b1   :  { %18074 = vst [vmem:[#allocation32_spill] sm:$0xff] %v15539_v34  ;;  %12385 = vmatprep.subr.bf16.mxu1 %v15270_v2  ;;  %18075 = vst [vmem:[#allocation31_spill] sm:$0xff] %v15554_v33  ;;  %v1667_v22 = vmul.f32 %v15531_v16, %v13973_v40  ;;  %v10196_v34 = vpop.f32.mrb[28].mxu1  ;;  %v1829_v12 = vadd.f32 %v1813_v18, %v1795_v30  ;;  %v15564_v8 = vld [vmem:[#allocation2 + $0x15a] sm:$0xff]  ;;  %v1748_v42 = vmul.f32 %v13980_v50, %v15312_v62  ;;  %v8564_v30 = vld [vmem:[%s17878_s4 + $0x248] sm:$0xff] }
 0x1b2   :  { %12127 = vmatpush3.bf16.msra.mxu0 %v15485_v15  ;;  %18076 = vst [vmem:[#allocation5_spill] sm:$0xff] %v15564_v8  ;;  %v1763_v17 = vadd.f32 %v1747_v19, %v1729_v52  ;;  %797 = vst [vmem:[#allocation2 + $0x1e8] sm:$0xff] %v10196_v34  ;;  %v2766_v11 = vld [vmem:[#allocation3 + $0x20] sm:$0xff]  ;;  %v15569_v48 = vpack.c.bf16 %v8562_v23, %v8561_v47  ;;  %v1636_v18 = vmul.f32 %v13971_v39, %v15312_v62 }
 0x1b3   :  { %10783 = vmatmul.mubr.f32.vlgmr.msra.gmra.mrb[32].mxu1 %v4109_v7  ;;  %12129 = vmatprep.subr.bf16.mxu0 %v15517_v5  ;;  %v749_v7 = vpop.f32.mrb[29].mxu1  ;;  %v1668_v19 = vmul.f32 %v15554_v33, %v13973_v40  ;;  %v4111_v52 = vld [vmem:[#allocation3 + $0x7a] sm:$0xff]  ;;  %v1830_v34 = vadd.f32 %v1814_v61, %v1796_v27  ;;  %v15582_v47 = vld [vmem:[#allocation2 + $0x162] sm:$0xff]  ;;  %v1764_v23 = vadd.f32 %v1748_v42, %v1730_v45  ;;  %v8565_v45 = vld [vmem:[%s17878_s4 + $0x250] sm:$0xff] }
 0x1b4   :  { %10785 = vmatprep.mubr.f32.mxu1 %v4110_v13  ;;  %12387 = vmatpush3.bf16.msra.mxu1 %v15270_v2  ;;  %v8563_v2 = vld [vmem:[%s17878_s4 + $0x240] sm:$0xff]  ;;  %796 = vst [vmem:[#allocation2 + $0x1e0] sm:$0xff] %v749_v7  ;;  %18077 = vst [vmem:[#allocation20_spill] sm:$0xff] %v15582_v47  ;;  %v1781_v13 = vmul.f32 %v15531_v16, %v13987_v55  ;;  %v1683_v25 = vadd.f32 %v1667_v22, %v1635_v1  ;;  %v2767_v27 = vld [vmem:[#allocation3 + $0x28] sm:$0xff] }
 0x1b5   :  { %12389 = vmatprep.subr.bf16.mxu1 %v15297_v29  ;;  %10383 = vmatmul.mubr.f32.vlgmr.msra.gmra.mrb[32].mxu0 %v2765_v0  ;;  %v4112_v0 = vld [vmem:[#allocation3 + $0x82] sm:$0xff]  ;;  %v1715_v46 = vmul.f32 %v15564_v8, %v13975_v44  ;;  %v1782_v7 = vmul.f32 %v15554_v33, %v13987_v55  ;;  %v15592_v61 = vpack.c.bf16 %v8564_v30, %v8563_v2  ;;  %v8566_v1 = vld [vmem:[%s17878_s4 + $0x258] sm:$0xff] }
 0x1b6   :  { %10385 = vmatprep.mubr.f32.mxu0 %v2766_v11  ;;  %12131 = vmatpush3.bf16.msra.mxu0 %v15517_v5  ;;  %v1848_v22 = vmul.f32 %v13991_v57, %v15312_v62  ;;  %v15602_v42 = vadd.f32 %v1847_v51, %v1829_v12  ;;  %v10199_v11 = vpop.f32.mrb[30].mxu1  ;;  %v8567_v2 = vld [vmem:[%s17878_s4 + $0x260] sm:$0xff]  ;;  %v8568_v30 = vld [vmem:[%s17878_s4 + $0x268] sm:$0xff]  ;;  %v1716_v62 = vmul.f32 %v15582_v47, %v13975_v44 }
 0x1b7   :  { %10786 = vmatmul.mubr.f32.gmra.mrb[34].mxu1 %v4111_v52  ;;  %12133 = vmatprep.subr.bf16.mxu0 %v15542_v53  ;;  %v1749_v52 = vmul.f32 %v15301_v35, %v13980_v50  ;;  %799 = vst [vmem:[#allocation2 + $0x1f8] sm:$0xff] %v10199_v11  ;;  %v759_v51 = vpop.f32.mrb[31].mxu1  ;;  %v4113_v12 = vld [vmem:[#allocation3 + $0x8a] sm:$0xff]  ;;  %v1798_v11 = vadd.f32 %v1782_v7, %v1764_v23 }
 0x1b8   :  { %10788 = vmatprep.mubr.f32.mxu1 %v4112_v0  ;;  %12391 = vmatpush3.bf16.msra.mxu1 %v15297_v29  ;;  %18078 = vst [vmem:[#allocation17_spill] sm:$0xff] %v15602_v42  ;;  %v2768_v29 = vld [vmem:[#allocation3 + $0x30] sm:$0xff]  ;;  %v1684_v0 = vadd.f32 %v1668_v19, %v1636_v18  ;;  %v1815_v42 = vmul.f32 %v15564_v8, %v13989_v56  ;;  %798 = vst [vmem:[#allocation2 + $0x1f0] sm:$0xff] %v759_v51  ;;  %v4116_v51 = vld [vmem:[#allocation3 + $0xa2] sm:$0xff] }
 0x1b9   :  { %12393 = vmatprep.subr.bf16.mxu1 %v15328_v31  ;;  %10386 = vmatmul.mubr.f32.gmra.mrb[34].mxu0 %v2767_v27  ;;  %v1797_v27 = vadd.f32 %v1781_v13, %v1763_v17  ;;  %v15618_v33 = vadd.f32 %v1848_v22, %v1830_v34  ;;  %v15620_v16 = vld [vmem:[#allocation2 + $0x169] sm:$0xff]  ;;  %v4114_v18 = vld [vmem:[#allocation3 + $0x92] sm:$0xff]  ;;  %v1731_v19 = vadd.f32 %v1715_v46, %v1683_v25  ;;  %v2770_v46 = vld [vmem:[#allocation3 + $0x40] sm:$0xff] }
 0x1ba   :  { %10388 = vmatprep.mubr.f32.mxu0 %v2768_v29  ;;  %12135 = vmatpush3.bf16.msra.mxu0 %v15542_v53  ;;  %18080 = vst [vmem:[#allocation22_spill] sm:$0xff] %v15620_v16  ;;  %v1816_v29 = vmul.f32 %v15582_v47, %v13989_v56  ;;  %v2769_v17 = vld [vmem:[#allocation3 + $0x38] sm:$0xff]  ;;  %v15626_v13 = vpack.c.bf16 %v8566_v1, %v8565_v45  ;;  %v2774_v47 = vld [vmem:[#allocation3 + $0x60] sm:$0xff] }
 0x1bb   :  { %18079 = vst [vmem:[#allocation16_spill] sm:$0xff] %v15618_v33  ;;  %10789 = vmatmul.mubr.f32.gmra.mrb[36].mxu1 %v4113_v12  ;;  %12137 = vmatprep.subr.bf16.mxu0 %v15548_v14  ;;  %v15628_v34 = vpack.c.bf16 %v8568_v30, %v8567_v2  ;;  %v1637_v22 = vmul.f32 %v15301_v35, %v13971_v39  ;;  %v15641_v30 = vld [vmem:[#allocation2 + $0x16a] sm:$0xff] }
 0x1bc   :  { %10791 = vmatprep.mubr.f32.mxu1 %v4114_v18  ;;  %12395 = vmatpush3.bf16.msra.mxu1 %v15328_v31  ;;  %v1849_v25 = vmul.f32 %v15301_v35, %v13991_v57  ;;  %v1732_v23 = vadd.f32 %v1716_v62, %v1684_v0  ;;  %v1669_v7 = vmul.f32 %v15620_v16, %v13973_v40  ;;  %v4115_v31 = vld [vmem:[#allocation3 + $0x9a] sm:$0xff]  ;;  %v15644_v0 = vld [vmem:[#allocation2 + $0x172] sm:$0xff] }
 0x1bd   :  { %12397 = vmatprep.subr.bf16.mxu1 %v15361_v9  ;;  %10389 = vmatmul.mubr.f32.gmra.mrb[36].mxu0 %v2769_v17  ;;  %v1831_v45 = vadd.f32 %v1815_v42, %v1797_v27  ;;  %v1638_v1 = vmul.f32 %v13971_v39, %v15343_v4  ;;  %v1670_v2 = vmul.f32 %v1654_v36, %v13973_v40  ;;  %v2771_v42 = vld [vmem:[#allocation3 + $0x48] sm:$0xff] }
 0x1be   :  { %10391 = vmatprep.mubr.f32.mxu0 %v2770_v46  ;;  %12139 = vmatpush3.bf16.msra.mxu0 %v15548_v14  ;;  %v1832_v35 = vadd.f32 %v1816_v29, %v1798_v11  ;;  %18081 = vst [vmem:[#allocation18_spill] sm:$0xff] %v15644_v0  ;;  %v1750_v62 = vmul.f32 %v13980_v50, %v15343_v4  ;;  %v2772_v11 = vld [vmem:[#allocation3 + $0x50] sm:$0xff] }
 0x1bf   :  { %10792 = vmatmul.mubr.f32.gmra.mrb[38].mxu1 %v4115_v31  ;;  %12141 = vmatprep.subr.bf16.mxu0 %v15569_v48  ;;  %v1765_v12 = vadd.f32 %v1749_v52, %v1731_v19  ;;  %v1751_v27 = vmul.f32 %v15330_v54, %v13980_v50  ;;  %v1783_v18 = vmul.f32 %v15620_v16, %v13987_v55  ;;  %v4117_v46 = vld [vmem:[#allocation3 + $0xaa] sm:$0xff]  ;;  %v8570_v31 = vld [vmem:[%s17878_s4 + $0x278] sm:$0xff] }
 0x1c0   :  { %10794 = vmatprep.mubr.f32.mxu1 %v4116_v51  ;;  %12399 = vmatpush3.bf16.msra.mxu1 %v15361_v9  ;;  %v1784_v17 = vmul.f32 %v1654_v36, %v13987_v55  ;;  %v1685_v29 = vadd.f32 %v1669_v7, %v1637_v22  ;;  %v1717_v52 = vmul.f32 %v15641_v30, %v13975_v44  ;;  %v8569_v9 = vld [vmem:[%s17878_s4 + $0x270] sm:$0xff] }
 0x1c1   :  { %12401 = vmatprep.subr.bf16.mxu1 %v15371_v26  ;;  %10392 = vmatmul.mubr.f32.gmra.mrb[38].mxu0 %v2771_v42  ;;  %v1766_v19 = vadd.f32 %v1750_v62, %v1732_v23  ;;  %v1686_v51 = vadd.f32 %v1670_v2, %v1638_v1  ;;  %v1718_v22 = vmul.f32 %v15644_v0, %v13975_v44  ;;  %v4118_v23 = vld [vmem:[#allocation3 + $0xb2] sm:$0xff]  ;;  %v8571_v62 = vld [vmem:[%s17878_s4 + $0x280] sm:$0xff]  ;;  %v8572_v42 = vld [vmem:[%s17878_s4 + $0x288] sm:$0xff] }
 0x1c2   :  { %10394 = vmatprep.mubr.f32.mxu0 %v2772_v11  ;;  %12143 = vmatpush3.bf16.msra.mxu0 %v15569_v48  ;;  %v1818_v7 = vmul.f32 %v15644_v0, %v13989_v56  ;;  %v1850_v1 = vmul.f32 %v13991_v57, %v15343_v4  ;;  %v15677_v2 = vadd.f32 %v1849_v25, %v1831_v45  ;;  %v15684_v4 = vld [vmem:[#allocation2 + $0x179] sm:$0xff] }
 0x1c3   :  { %10795 = vmatmul.mubr.f32.gmra.mrb[40].mxu1 %v4117_v46  ;;  %12145 = vmatprep.subr.bf16.mxu0 %v15592_v61  ;;  %v1800_v11 = vadd.f32 %v1784_v17, %v1766_v19  ;;  %v2773_v46 = vld [vmem:[#allocation3 + $0x58] sm:$0xff]  ;;  %v1799_v0 = vadd.f32 %v1783_v18, %v1765_v12  ;;  %v1817_v16 = vmul.f32 %v15641_v30, %v13989_v56 }
 0x1c4   :  { %10797 = vmatprep.mubr.f32.mxu1 %v4118_v23  ;;  %12403 = vmatpush3.bf16.msra.mxu1 %v15371_v26  ;;  %v1884_v33 = vmul.f32 %v1654_v36, %v13994_v60  ;;  %v1733_v17 = vadd.f32 %v1717_v52, %v1685_v29  ;;  %v1866_v8 = vadd.f32 %v1850_v1, %v1832_v35  ;;  %v15686_v25 = vld [vmem:[#allocation2 + $0x17a] sm:$0xff]  ;;  %v1804_v23 = vld [vmem:[#allocation2 + $0x182] sm:$0xff] }
 0x1c5   :  { %12405 = vmatprep.subr.bf16.mxu1 %v15419_v41  ;;  %10395 = vmatmul.mubr.f32.gmra.mrb[40].mxu0 %v2773_v46  ;;  %v1834_v19 = vadd.f32 %v1818_v7, %v1800_v11  ;;  %v4119_v45 = vld [vmem:[#allocation3 + $0xba] sm:$0xff]  ;;  %v15689_v26 = vpack.c.bf16 %v8570_v31, %v8569_v9  ;;  %v15691_v12 = vpack.c.bf16 %v8572_v42, %v8571_v62  ;;  %v13545_v31 = vld [vmem:[#allocation3 + $0x68] sm:$0xff]  ;;  %v2930_v7 = vld [vmem:[#allocation3 + $0x11] sm:$0xff] }
 0x1c6   :  { %10397 = vmatprep.mubr.f32.mxu0 %v2774_v47  ;;  %12147 = vmatpush3.bf16.msra.mxu0 %v15592_v61  ;;  %v1639_v36 = vmul.f32 %v15330_v54, %v13971_v39  ;;  %v1851_v35 = vmul.f32 %v15330_v54, %v13991_v57  ;;  %v1734_v18 = vadd.f32 %v1718_v22, %v1686_v51  ;;  %v8573_v42 = vld [vmem:[%s17878_s4 + $0x290] sm:$0xff]  ;;  %v8574_v11 = vld [vmem:[%s17878_s4 + $0x298] sm:$0xff] }
 0x1c7   :  { %10798 = vmatmul.mubr.f32.gmra.mrb[42].mxu1 %v4119_v45  ;;  %12149 = vmatprep.subr.bf16.mxu0 %v15626_v13  ;;  %v15698_v29 = vadd.f32 %v1884_v33, %v1866_v8  ;;  %v1833_v47 = vadd.f32 %v1817_v16, %v1799_v0  ;;  %v1671_v52 = vmul.f32 %v15684_v4, %v13973_v40  ;;  %v1770_v8 = vld [vmem:[#allocation2 + $0x181] sm:$0xff] }
 0x1c8   :  { %12407 = vmatpush3.bf16.msra.mxu1 %v15419_v41  ;;  %10832 = vmatprep.mubr.f32.mxu1 %v15294_v37  ;;  %v1719_v9 = vmul.f32 %v15686_v25, %v13975_v44  ;;  %v1752_v54 = vmul.f32 %v13980_v50, %v15376_v32  ;;  %v1767_v33 = vadd.f32 %v1751_v27, %v1733_v17  ;;  %v8576_v45 = vld [vmem:[%s17878_s4 + $0x2a8] sm:$0xff] }
 0x1c9   :  { %18082 = vst [vmem:[#allocation14_spill] sm:$0xff] %v15698_v29  ;;  %12409 = vmatprep.subr.bf16.mxu1 %v15445_v3  ;;  %10398 = vmatmul.mubr.f32.gmra.mrb[42].mxu0 %v13545_v31  ;;  %v1785_v37 = vmul.f32 %v15684_v4, %v13987_v55  ;;  %v1687_v41 = vadd.f32 %v1671_v52, %v1639_v36  ;;  %v8577_v36 = vld [vmem:[%s17878_s4 + $0x2b0] sm:$0xff] }
 0x1ca   :  { %12151 = vmatpush3.bf16.msra.mxu0 %v15626_v13  ;;  %10432 = vmatprep.mubr.f32.mxu0 %v2930_v7  ;;  %v1786_v16 = vmul.f32 %v1770_v8, %v13987_v55  ;;  %v1819_v0 = vmul.f32 %v15686_v25, %v13989_v56  ;;  %v1874_v51 = vmul.f32 %v15218_v38, %v13994_v60  ;;  %v8575_v38 = vld [vmem:[%s17878_s4 + $0x2a0] sm:$0xff] }
 0x1cb   :  { %12153 = vmatprep.subr.bf16.mxu0 %v15628_v34  ;;  %v1768_v22 = vadd.f32 %v1752_v54, %v1734_v18  ;;  %v1801_v27 = vadd.f32 %v1785_v37, %v1767_v33  ;;  %v1852_v62 = vmul.f32 %v13991_v57, %v15376_v32  ;;  %v1753_v1 = vmul.f32 %v15366_v20, %v13980_v50  ;;  %v8578_v18 = vld [vmem:[%s17878_s4 + $0x2b8] sm:$0xff] }
 0x1cc   :  { %12411 = vmatpush3.bf16.msra.mxu1 %v15445_v3  ;;  %v1820_v46 = vmul.f32 %v1804_v23, %v13989_v56  ;;  %v15733_v17 = vadd.f32 %v1851_v35, %v1833_v47  ;;  %v1886_v3 = vmul.f32 %v1770_v8, %v13994_v60  ;;  %v1853_v35 = vmul.f32 %v15366_v20, %v13991_v57 }
 0x1cd   :  { %12413 = vmatprep.subr.bf16.mxu1 %v15485_v15  ;;  %v1735_v47 = vadd.f32 %v1719_v9, %v1687_v41  ;;  %v1802_v52 = vadd.f32 %v1786_v16, %v1768_v22  ;;  %v1868_v31 = vadd.f32 %v1852_v62, %v1834_v19  ;;  %v1835_v7 = vadd.f32 %v1819_v0, %v1801_v27  ;;  %v8579_v22 = vld [vmem:[%s17878_s4 + $0x2c0] sm:$0xff]  ;;  %v8581_v27 = vld [vmem:[%s17878_s4 + $0x2d0] sm:$0xff] }
 0x1ce   :  { %18083 = vst [vmem:[#allocation15_spill] sm:$0xff] %v15733_v17  ;;  %12155 = vmatpush3.bf16.msra.mxu0 %v15628_v34  ;;  %v1920_v54 = vmul.f32 %v15536_v28, %v1804_v23  ;;  %v2000_v33 = vmul.f32 %v13971_v39, %v15376_v32  ;;  %v2024_v37 = vmul.f32 %v1770_v8, %v13973_v40  ;;  %v15766_v8 = vld [vmem:[#allocation2 + $0x189] sm:$0xff] }
 0x1cf   :  { %12157 = vmatprep.subr.bf16.mxu0 %v15689_v26  ;;  %v15756_v29 = vmul.f32 %v15536_v28, %v15254_v6  ;;  %v15758_v17 = vpack.c.bf16 %v8574_v11, %v8573_v42  ;;  %v1902_v9 = vadd.f32 %v1886_v3, %v1868_v31  ;;  %v2060_v19 = vmul.f32 %v1804_v23, %v13975_v44  ;;  %v2931_v31 = vld [vmem:[#allocation3 + $0x19] sm:$0xff] }
 0x1d0   :  { %12415 = vmatpush3.bf16.msra.mxu1 %v15485_v15  ;;  %v15762_v41 = vpack.c.bf16 %v8576_v45, %v8575_v38  ;;  %v15764_v16 = vpack.c.bf16 %v8578_v18, %v8577_v36  ;;  %v1836_v32 = vadd.f32 %v1820_v46, %v1802_v52  ;;  %v2036_v0 = vadd.f32 %v2024_v37, %v2000_v33  ;;  %v8580_v15 = vld [vmem:[%s17878_s4 + $0x2c8] sm:$0xff]  ;;  %v13546_v45 = vld [vmem:[#allocation3 + $0x78] sm:$0xff]  ;;  %v13547_v52 = vld [vmem:[#allocation3 + $0x80] sm:$0xff] }
 0x1d1   :  { %18084 = vst [vmem:[#allocation26_spill] sm:$0xff] %v15756_v29  ;;  %12417 = vmatprep.subr.bf16.mxu1 %v15517_v5  ;;  %v15770_v6 = vadd.f32 %v1874_v51, %v15266_v10  ;;  %v15781_v23 = vadd.f32 %v1920_v54, %v1902_v9  ;;  %v1769_v62 = vadd.f32 %v1753_v1, %v1735_v47  ;;  %v8582_v10 = vld [vmem:[%s17878_s4 + $0x2d8] sm:$0xff]  ;;  %v15791_v38 = vld [vmem:[#allocation2 + $0x18a] sm:$0xff]  ;;  %v2932_v33 = vld [vmem:[#allocation3 + $0x21] sm:$0xff] }
 0x1d2   :  { %v1787_v42 = vmul.f32 %v15766_v8, %v13987_v55  ;;  %12159 = vmatpush3.bf16.msra.mxu0 %v15689_v26  ;;  %v2001_v51 = vmul.f32 %v15366_v20, %v13971_v39  ;;  %v2072_v11 = vadd.f32 %v2060_v19, %v2036_v0  ;;  %v1854_v46 = vmul.f32 %v13991_v57, %v15409_v24  ;;  %v1872_v1 = vld [vmem:[#allocation2 + $0x191] sm:$0xff]  ;;  %v13552_v29 = vld [vmem:[#allocation3 + $0xa0] sm:$0xff] }
 0x1d3   :  { %18085 = vst [vmem:[#allocation33_spill] sm:$0xff] %v15770_v6  ;;  %18086 = vst [vmem:[#allocation34_spill] sm:$0xff] %v15781_v23  ;;  %v15795_v3 = vadd.f32 %v1853_v35, %v1835_v7  ;;  %10833 = vmatmul.mubr.f32.vlgmr.msra.gmra.mrb[32].mxu1 %v13546_v45  ;;  %12161 = vmatprep.subr.bf16.mxu0 %v15691_v12  ;;  %v1821_v18 = vmul.f32 %v15791_v38, %v13989_v56  ;;  %v1906_v20 = vld [vmem:[#allocation2 + $0x192] sm:$0xff] }
 0x1d4   :  { %v1803_v36 = vadd.f32 %v1787_v42, %v1769_v62  ;;  %v1888_v47 = vmul.f32 %v1872_v1, %v13994_v60  ;;  %10835 = vmatprep.mubr.f32.mxu1 %v13547_v52  ;;  %12419 = vmatpush3.bf16.msra.mxu1 %v15517_v5  ;;  %v15802_v54 = vpack.c.bf16 %v8580_v15, %v8579_v22  ;;  %v2933_v5 = vld [vmem:[#allocation3 + $0x29] sm:$0xff]  ;;  %v8586_v52 = vld [vmem:[%s17878_s4 + $0x2f8] sm:$0xff] }
 0x1d5   :  { %v1870_v35 = vadd.f32 %v1854_v46, %v1836_v32  ;;  %v1922_v7 = vmul.f32 %v15536_v28, %v1906_v20  ;;  %12421 = vmatprep.subr.bf16.mxu1 %v15542_v53  ;;  %10433 = vmatmul.mubr.f32.vlgmr.msra.gmra.mrb[32].mxu0 %v2931_v31  ;;  %v15806_v37 = vpack.c.bf16 %v8582_v10, %v8581_v27  ;;  %v13548_v15 = vld [vmem:[#allocation3 + $0x88] sm:$0xff]  ;;  %v8583_v27 = vld [vmem:[%s17878_s4 + $0x2e0] sm:$0xff]  ;;  %v8585_v42 = vld [vmem:[%s17878_s4 + $0x2f0] sm:$0xff] }
 0x1d6   :  { %v2002_v9 = vmul.f32 %v13971_v39, %v15409_v24  ;;  %v2025_v19 = vmul.f32 %v15766_v8, %v13973_v40  ;;  %10435 = vmatprep.mubr.f32.mxu0 %v2932_v33  ;;  %12163 = vmatpush3.bf16.msra.mxu0 %v15691_v12  ;;  %v1855_v32 = vmul.f32 %v15392_v21, %v13991_v57  ;;  %v8584_v62 = vld [vmem:[%s17878_s4 + $0x2e8] sm:$0xff]  ;;  %v8587_v31 = vld [vmem:[%s17878_s4 + $0x300] sm:$0xff] }
 0x1d7   :  { %v1904_v0 = vadd.f32 %v1888_v47, %v1870_v35  ;;  %v2026_v22 = vmul.f32 %v1872_v1, %v13973_v40  ;;  %10836 = vmatmul.mubr.f32.gmra.mrb[34].mxu1 %v13548_v15  ;;  %12165 = vmatprep.subr.bf16.mxu0 %v15758_v17  ;;  %v1837_v10 = vadd.f32 %v1821_v18, %v1803_v36  ;;  %v13549_v47 = vld [vmem:[#allocation3 + $0x90] sm:$0xff]  ;;  %v8588_v35 = vld [vmem:[%s17878_s4 + $0x308] sm:$0xff]  ;;  %v15864_v23 = vld [vmem:[#allocation2 + $0x199] sm:$0xff] }
 0x1d8   :  { %v2037_v46 = vadd.f32 %v2025_v19, %v2001_v51  ;;  %v2062_v45 = vmul.f32 %v1906_v20, %v13975_v44  ;;  %10838 = vmatprep.mubr.f32.mxu1 %v13549_v47  ;;  %12423 = vmatpush3.bf16.msra.mxu1 %v15542_v53  ;;  %v2087_v18 = vmul.f32 %v13980_v50, %v15409_v24  ;;  %v2934_v53 = vld [vmem:[#allocation3 + $0x31] sm:$0xff]  ;;  %v2935_v6 = vld [vmem:[#allocation3 + $0x39] sm:$0xff] }
 0x1d9   :  { %v1938_v36 = vadd.f32 %v1922_v7, %v1904_v0  ;;  %v2038_v51 = vadd.f32 %v2026_v22, %v2002_v9  ;;  %12425 = vmatprep.subr.bf16.mxu1 %v15548_v14  ;;  %10436 = vmatmul.mubr.f32.gmra.mrb[34].mxu0 %v2933_v5  ;;  %v2061_v33 = vmul.f32 %v15791_v38, %v13975_v44  ;;  %v8589_v7 = vld [vmem:[%s17878_s4 + $0x310] sm:$0xff]  ;;  %v8590_v24 = vld [vmem:[%s17878_s4 + $0x318] sm:$0xff]  ;;  %v15854_v9 = vld [vmem:[%s17880_s3] ss:$0 sm:$0xff] }
 0x1da   :  { %v2114_v19 = vmul.f32 %v1872_v1, %v13987_v55  ;;  %v2141_v15 = vmul.f32 %v1906_v20, %v13989_v56  ;;  %10438 = vmatprep.mubr.f32.mxu0 %v2934_v53  ;;  %12167 = vmatpush3.bf16.msra.mxu0 %v15758_v17  ;;  %18087 = vst [vmem:[#allocation35_spill] sm:$0xff] %v15854_v9  ;;  %v13551_v0 = vld [vmem:[#allocation3 + $0x98] sm:$0xff] }
 0x1db   :  { %v1954_v1 = vadd.f32 %v15854_v9, %v1938_v36  ;;  %v2074_v5 = vadd.f32 %v2062_v45, %v2038_v51  ;;  %v2099_v20 = vadd.f32 %v2087_v18, %v2072_v11  ;;  %10839 = vmatmul.mubr.f32.gmra.mrb[36].mxu1 %v13551_v0  ;;  %12169 = vmatprep.subr.bf16.mxu0 %v15762_v41  ;;  %v15891_v18 = vld [vmem:[#allocation2 + $0x1a2] sm:$0xff] }
 0x1dc   :  { %v15858_v22 = vpack.c.bf16 %v8584_v62, %v8583_v27  ;;  %v15860_v47 = vpack.c.bf16 %v8586_v52, %v8585_v42  ;;  %v15862_v53 = vpack.c.bf16 %v8588_v35, %v8587_v31  ;;  %10841 = vmatprep.mubr.f32.mxu1 %v13552_v29  ;;  %12427 = vmatpush3.bf16.msra.mxu1 %v15548_v14  ;;  %v15871_v27 = vld [vmem:[#allocation2 + $0x19a] sm:$0xff]  ;;  %v13553_v31 = vld [vmem:[#allocation2 + $0x131] sm:$0xff]  ;;  %v13554_v35 = vld [vmem:[#allocation3 + $0xa8] sm:$0xff] }
 0x1dd   :  { %v2003_v11 = vmul.f32 %v15392_v21, %v13971_v39  ;;  %v1970_v45 = vmax.f32 %v1954_v1, 0.0  ;;  %v2126_v36 = vadd.f32 %v2114_v19, %v2099_v20  ;;  %v15869_v51 = vadd.f32 %v1855_v32, %v1837_v10  ;;  %18089 = vst [vmem:[#allocation37_spill] sm:$0xff] %v15871_v27  ;;  %12429 = vmatprep.subr.bf16.mxu1 %v15569_v48  ;;  %v2936_v62 = vld [vmem:[#allocation3 + $0x41] sm:$0xff]  ;;  %v13555_v19 = vld [vmem:[#allocation3 + $0xb0] sm:$0xff] }
 0x1de   :  { %10439 = vmatmul.mubr.f32.gmra.mrb[36].mxu0 %v2935_v6  ;;  %v15874_v42 = vpack.c.bf16 %v8590_v24, %v8589_v7  ;;  %v2088_v29 = vmul.f32 %v15392_v21, %v13980_v50  ;;  %v2073_v14 = vadd.f32 %v2061_v33, %v2037_v46  ;;  %v15878_v52 = vld [vmem:[#allocation2 + $0x1a1] sm:$0xff]  ;;  %v15882_v32 = vmul.f32 %v13553_v31, %v13994_v60  ;;  %v2938_v20 = vld [vmem:[#allocation3 + $0x51] sm:$0xff] }
 0x1df   :  { %18088 = vst [vmem:[#allocation36_spill] sm:$0xff] %v15869_v51  ;;  %10441 = vmatprep.mubr.f32.mxu0 %v2936_v62  ;;  %12171 = vmatpush3.bf16.msra.mxu0 %v15762_v41  ;;  %v2153_v10 = vadd.f32 %v2141_v15, %v2126_v36  ;;  %1986 = vst [vmem:[#allocation3 + $0x170] sm:$0xff] %v1970_v45  ;;  %v2027_v6 = vmul.f32 %v15864_v23, %v13973_v40  ;;  %v2937_v15 = vld [vmem:[#allocation3 + $0x49] sm:$0xff]  ;;  %v2940_v9 = vld [vmem:[#allocation3 + $0x61] sm:$0xff] }
 0x1e0   :  { %10842 = vmatmul.mubr.f32.gmra.mrb[38].mxu1 %v13554_v35  ;;  %12173 = vmatprep.subr.bf16.mxu0 %v15764_v16  ;;  %v2090_v21 = vmul.f32 %v15428_v59, %v13980_v50  ;;  %v2004_v46 = vmul.f32 %v13971_v39, %v15436_v58  ;;  %18090 = vst [vmem:[#allocation38_spill] sm:$0xff] %v15891_v18  ;;  %v8594_v35 = vld [vmem:[%s17878_s4 + $0x338] sm:$0xff] }
 0x1e1   :  { %v2063_v33 = vmul.f32 %v15871_v27, %v13975_v44  ;;  %10844 = vmatprep.mubr.f32.mxu1 %v13555_v19  ;;  %12431 = vmatpush3.bf16.msra.mxu1 %v15569_v48  ;;  %v2028_v7 = vmul.f32 %v15878_v52, %v13973_v40  ;;  %v2039_v24 = vadd.f32 %v2027_v6, %v2003_v11  ;;  %v8591_v48 = vld [vmem:[%s17878_s4 + $0x320] sm:$0xff]  ;;  %v13556_v6 = vld [vmem:[#allocation3 + $0xb8] sm:$0xff] }
 0x1e2   :  { %v2089_v1 = vmul.f32 %v13980_v50, %v15436_v58  ;;  %12433 = vmatprep.subr.bf16.mxu1 %v15592_v61  ;;  %10442 = vmatmul.mubr.f32.gmra.mrb[38].mxu0 %v2937_v15  ;;  %v2169_v0 = vmul.f32 %v15428_v59, %v13991_v57  ;;  %v2100_v45 = vadd.f32 %v2088_v29, %v2073_v14  ;;  %v8592_v29 = vld [vmem:[%s17878_s4 + $0x328] sm:$0xff]  ;;  %v8593_v14 = vld [vmem:[%s17878_s4 + $0x330] sm:$0xff]  ;;  %v13557_v15 = vld [vmem:[#allocation3 + $0xc0] sm:$0xff] }
 0x1e3   :  { %v2115_v36 = vmul.f32 %v15864_v23, %v13987_v55  ;;  %10444 = vmatprep.mubr.f32.mxu0 %v2938_v20  ;;  %12175 = vmatpush3.bf16.msra.mxu0 %v15764_v16  ;;  %v2064_v11 = vmul.f32 %v15891_v18, %v13975_v44  ;;  %v2075_v62 = vadd.f32 %v2063_v33, %v2039_v24  ;;  %v2939_v24 = vld [vmem:[#allocation3 + $0x59] sm:$0xff] }
 0x1e4   :  { %v2101_v31 = vadd.f32 %v2089_v1, %v2074_v5  ;;  %10845 = vmatmul.mubr.f32.gmra.mrb[40].mxu1 %v13556_v6  ;;  %12177 = vmatprep.subr.bf16.mxu0 %v15802_v54  ;;  %v2116_v33 = vmul.f32 %v15878_v52, %v13987_v55  ;;  %v2142_v19 = vmul.f32 %v15871_v27, %v13989_v56 }
 0x1e5   :  { %v2127_v5 = vadd.f32 %v2115_v36, %v2100_v45  ;;  %10847 = vmatprep.mubr.f32.mxu1 %v13557_v15  ;;  %12435 = vmatpush3.bf16.msra.mxu1 %v15592_v61  ;;  %v2040_v1 = vadd.f32 %v2028_v7, %v2004_v46  ;;  %v2102_v20 = vadd.f32 %v2090_v21, %v2075_v62  ;;  %v15938_v46 = vld [vmem:[#allocation2 + $0x1a9] sm:$0xff]  ;;  %v4438_v7 = vld [vmem:[#allocation3 + $0x71] sm:$0xff] }
 0x1e6   :  { %v2168_v6 = vmul.f32 %v13991_v57, %v15436_v58  ;;  %12437 = vmatprep.subr.bf16.mxu1 %v15626_v13  ;;  %10445 = vmatmul.mubr.f32.gmra.mrb[40].mxu0 %v2939_v24  ;;  %v2128_v51 = vadd.f32 %v2116_v33, %v2101_v31  ;;  %v2143_v45 = vmul.f32 %v15891_v18, %v13989_v56  ;;  %v13558_v58 = vld [vmem:[#allocation3 + $0xc8] sm:$0xff]  ;;  %v13561_v24 = vld [vmem:[#allocation2 + $0x132] sm:$0xff] }
 0x1e7   :  { %v2154_v36 = vadd.f32 %v2142_v19, %v2127_v5  ;;  %10447 = vmatprep.mubr.f32.mxu0 %v2940_v9  ;;  %12179 = vmatpush3.bf16.msra.mxu0 %v15802_v54  ;;  %v15932_v15 = vpack.c.bf16 %v8592_v29, %v8591_v48  ;;  %v15934_v61 = vpack.c.bf16 %v8594_v35, %v8593_v14  ;;  %v13559_v62 = vld [vmem:[#allocation2 + $0x129] sm:$0xff]  ;;  %v15946_v48 = vld [vmem:[#allocation2 + $0x1b1] sm:$0xff] }
 0x1e8   :  { %v15936_v21 = vadd.f32 %v2168_v6, %v2153_v10  ;;  %18092 = vst [vmem:[#allocation40_spill] sm:$0xff] %v15938_v46  ;;  %10848 = vmatmul.mubr.f32.gmra.mrb[42].mxu1 %v13558_v58  ;;  %12181 = vmatprep.subr.bf16.mxu0 %v15806_v37  ;;  %v1875_v31 = vmul.f32 %v13559_v62, %v13994_v60  ;;  %v15948_v29 = vld [vmem:[#allocation2 + $0x1aa] sm:$0xff] }
 0x1e9   :  { %v2005_v9 = vmul.f32 %v15428_v59, %v13971_v39  ;;  %v15944_v33 = vadd.f32 %v2169_v0, %v2154_v36  ;;  %18094 = vst [vmem:[#allocation42_spill] sm:$0xff] %v15948_v29  ;;  %12439 = vmatpush3.bf16.msra.mxu1 %v15626_v13  ;;  %10882 = vmatprep.mubr.f32.mxu1 %v4438_v7  ;;  %v2941_v10 = vld [vmem:[#allocation3 + $0x69] sm:$0xff]  ;;  %v13562_v36 = vld [vmem:[#allocation3 + $0x12] sm:$0xff] }
 0x1ea   :  { %18091 = vst [vmem:[#allocation39_spill] sm:$0xff] %v15936_v21  ;;  %v18095_v14 = vld [vmem:[#allocation27_spill] sm:$0xff]  ;;  %v1910_v59 = vmul.f32 %v13561_v24, %v15536_v28  ;;  %12441 = vmatprep.subr.bf16.mxu1 %v15628_v34  ;;  %10448 = vmatmul.mubr.f32.gmra.mrb[42].mxu0 %v2941_v10  ;;  %v2076_v0 = vadd.f32 %v2064_v11, %v2040_v1  ;;  %v8595_v10 = vld [vmem:[%s17878_s4 + $0x340] sm:$0xff] }
 0x1eb   :  { %18093 = vst [vmem:[#allocation41_spill] sm:$0xff] %v15944_v33  ;;  %v1892_v35 = vadd.f32 %v15882_v32, %v18095_v14  ;;  %v13560_v5 = vld [vmem:[#allocation2 + $0x12a] sm:$0xff]  ;;  %v2155_v6 = vadd.f32 %v2143_v45, %v2128_v51  ;;  %v2029_v13 = vmul.f32 %v15938_v46, %v13973_v40  ;;  %12183 = vmatpush3.bf16.msra.mxu0 %v15806_v37  ;;  %v15970_v1 = vld [vmem:[#allocation2 + $0x1b2] sm:$0xff] }
 0x1ec   :  { %v15954_v19 = vmul.f32 %v13560_v5, %v15536_v28  ;;  %10482 = vmatprep.mubr.f32.mxu0 %v13562_v36  ;;  %v2006_v32 = vmul.f32 %v13971_v39, %v15469_v49  ;;  %v2030_v58 = vmul.f32 %v15946_v48, %v13973_v40  ;;  %v2065_v7 = vmul.f32 %v15948_v29, %v13975_v44  ;;  %v8596_v14 = vld [vmem:[%s17878_s4 + $0x348] sm:$0xff]  ;;  %v13563_v5 = vld [vmem:[#allocation2 + $0x139] sm:$0xff] }
 0x1ed   :  { %12185 = vmatprep.subr.bf16.mxu0 %v15858_v22  ;;  %v2092_v51 = vmul.f32 %v15457_v63, %v13980_v50  ;;  %v2041_v11 = vadd.f32 %v2029_v13, %v2005_v9  ;;  %v2091_v45 = vmul.f32 %v13980_v50, %v15469_v49  ;;  %v2117_v62 = vmul.f32 %v15938_v46, %v13987_v55 }
 0x1ee   :  { %18096 = vst [vmem:[#allocation27_spill] sm:$0xff] %v15954_v19  ;;  %12443 = vmatpush3.bf16.msra.mxu1 %v15628_v34  ;;  %v1877_v9 = vmul.f32 %v13563_v5, %v13994_v60  ;;  %v2171_v24 = vmul.f32 %v15457_v63, %v13991_v57  ;;  %v2144_v13 = vmul.f32 %v15948_v29, %v13989_v56  ;;  %v13564_v5 = vld [vmem:[#allocation2 + $0x141] sm:$0xff] }
 0x1ef   :  { %v2170_v34 = vmul.f32 %v13991_v57, %v15469_v49  ;;  %12445 = vmatprep.subr.bf16.mxu1 %v15689_v26  ;;  %v2077_v36 = vadd.f32 %v2065_v7, %v2041_v11  ;;  %v2103_v19 = vadd.f32 %v2091_v45, %v2076_v0  ;;  %v2118_v33 = vmul.f32 %v15946_v48, %v13987_v55  ;;  %v18097_v49 = vld [vmem:[#allocation24_spill] sm:$0xff] }
 0x1f0   :  { %v2129_v18 = vadd.f32 %v2117_v62, %v2102_v20  ;;  %12187 = vmatpush3.bf16.msra.mxu0 %v15858_v22  ;;  %v1878_v21 = vmul.f32 %v13564_v5, %v13994_v60  ;;  %v2042_v46 = vadd.f32 %v2030_v58, %v2006_v32  ;;  %v2066_v29 = vmul.f32 %v15970_v1, %v13975_v44  ;;  %v8597_v20 = vld [vmem:[%s17878_s4 + $0x350] sm:$0xff]  ;;  %v8598_v32 = vld [vmem:[%s17878_s4 + $0x358] sm:$0xff] }
 0x1f1   :  { %v15997_v27 = vadd.f32 %v2170_v34, %v2155_v6  ;;  %12189 = vmatprep.subr.bf16.mxu0 %v15860_v47  ;;  %v16001_v7 = vadd.f32 %v1875_v31, %v18097_v49  ;;  %v16003_v0 = vpack.c.bf16 %v8596_v14, %v8595_v10  ;;  %v2104_v58 = vadd.f32 %v2092_v51, %v2077_v36  ;;  %v16011_v45 = vld [vmem:[#allocation2 + $0x1b9] sm:$0xff]  ;;  %v4440_v49 = vld [vmem:[#allocation3 + $0x81] sm:$0xff] }
 0x1f2   :  { %v2156_v11 = vadd.f32 %v2144_v13, %v2129_v18  ;;  %12447 = vmatpush3.bf16.msra.mxu1 %v15689_v26  ;;  %v16014_v6 = vadd.f32 %v1910_v59, %v1892_v35  ;;  %v16017_v31 = vadd.f32 %v1877_v9, %v15441_v43  ;;  %v13565_v62 = vld [vmem:[#allocation2 + $0x13a] sm:$0xff]  ;;  %v2007_v14 = vmul.f32 %v15457_v63, %v13971_v39  ;;  %v13566_v18 = vld [vmem:[#allocation2 + $0x142] sm:$0xff] }
 0x1f3   :  { %v16020_v10 = vmul.f32 %v13565_v62, %v15536_v28  ;;  %v16024_v34 = vld [vmem:[#allocation2 + $0x1ba] sm:$0xff]  ;;  %12449 = vmatprep.subr.bf16.mxu1 %v15691_v12  ;;  %v16028_v51 = vmul.f32 %v13566_v18, %v15536_v28  ;;  %v2130_v26 = vadd.f32 %v2118_v33, %v2103_v19  ;;  %v2145_v43 = vmul.f32 %v15970_v1, %v13989_v56  ;;  %v18103_v33 = vld [vmem:[#allocation23_spill] sm:$0xff] }
 0x1f4   :  { %18098 = vst [vmem:[#allocation24_spill] sm:$0xff] %v16017_v31  ;;  %v16032_v35 = vadd.f32 %v2171_v24, %v2156_v11  ;;  %v4439_v59 = vld [vmem:[#allocation3 + $0x79] sm:$0xff]  ;;  %12191 = vmatpush3.bf16.msra.mxu0 %v15860_v47  ;;  %v16038_v63 = vpack.c.bf16 %v8598_v32, %v8597_v20  ;;  %v2078_v36 = vadd.f32 %v2066_v29, %v2042_v46  ;;  %v16050_v46 = vld [vmem:[#allocation2 + $0x1c1] sm:$0xff] }
 0x1f5   :  { %18099 = vst [vmem:[#allocation43_spill] sm:$0xff] %v16020_v10  ;;  %18100 = vst [vmem:[#allocation44_spill] sm:$0xff] %v16028_v51  ;;  %v18101_v9 = vld [vmem:[#allocation28_spill] sm:$0xff]  ;;  %v2031_v5 = vmul.f32 %v16011_v45, %v13973_v40  ;;  %10883 = vmatmul.mubr.f32.vlgmr.msra.gmra.mrb[32].mxu1 %v4439_v59  ;;  %12193 = vmatprep.subr.bf16.mxu0 %v15862_v53  ;;  %v1879_v19 = vmul.f32 %v18103_v33, %v13994_v60  ;;  %v18105_v20 = vld [vmem:[#allocation29_spill] sm:$0xff] }
 0x1f6   :  { %v16036_v13 = vadd.f32 %v1878_v21, %v18101_v9  ;;  %v18104_v24 = vld [vmem:[#allocation12_spill] sm:$0xff]  ;;  %v2067_v21 = vmul.f32 %v16024_v34, %v13975_v44  ;;  %10885 = vmatprep.mubr.f32.mxu1 %v4440_v49  ;;  %12451 = vmatpush3.bf16.msra.mxu1 %v15691_v12  ;;  %v2093_v32 = vmul.f32 %v13980_v50, %v18105_v20  ;;  %v4441_v49 = vld [vmem:[#allocation3 + $0x89] sm:$0xff] }
 0x1f7   :  { %v2094_v11 = vmul.f32 %v18104_v24, %v13980_v50  ;;  %v2043_v29 = vadd.f32 %v2031_v5, %v2007_v14  ;;  %v2119_v62 = vmul.f32 %v16011_v45, %v13987_v55  ;;  %12453 = vmatprep.subr.bf16.mxu1 %v15758_v17  ;;  %v13567_v18 = vld [vmem:[#allocation3 + $0x1a] sm:$0xff]  ;;  %v2157_v59 = vadd.f32 %v2145_v43, %v2130_v26  ;;  %v13568_v33 = vld [vmem:[#allocation3 + $0x22] sm:$0xff]  ;;  %v13572_v31 = vld [vmem:[#allocation3 + $0x32] sm:$0xff] }
 0x1f8   :  { %18102 = vst [vmem:[#allocation28_spill] sm:$0xff] %v16036_v13  ;;  %10483 = vmatmul.mubr.f32.vlgmr.msra.gmra.mrb[32].mxu0 %v13567_v18  ;;  %v2173_v9 = vmul.f32 %v18104_v24, %v13991_v57  ;;  %v2146_v12 = vmul.f32 %v16024_v34, %v13989_v56  ;;  %v2105_v5 = vadd.f32 %v2093_v32, %v2078_v36  ;;  %v4442_v13 = vld [vmem:[#allocation3 + $0x91] sm:$0xff]  ;;  %v4443_v10 = vld [vmem:[#allocation3 + $0x99] sm:$0xff] }
 0x1f9   :  { %10485 = vmatprep.mubr.f32.mxu0 %v13568_v33  ;;  %12195 = vmatpush3.bf16.msra.mxu0 %v15862_v53  ;;  %v2079_v14 = vadd.f32 %v2067_v21, %v2043_v29  ;;  %v2131_v51 = vadd.f32 %v2119_v62, %v2104_v58  ;;  %v2008_v26 = vmul.f32 %v13971_v39, %v18105_v20  ;;  %v13569_v18 = vld [vmem:[#allocation2 + $0x151] sm:$0xff]  ;;  %v8599_v58 = vld [vmem:[%s17878_s4 + $0x360] sm:$0xff]  ;;  %v8600_v21 = vld [vmem:[%s17878_s4 + $0x368] sm:$0xff] }
 0x1fa   :  { %10886 = vmatmul.mubr.f32.gmra.mrb[34].mxu1 %v4441_v49  ;;  %12197 = vmatprep.subr.bf16.mxu0 %v15874_v42  ;;  %v2032_v43 = vmul.f32 %v16050_v46, %v13973_v40  ;;  %v2172_v24 = vmul.f32 %v13991_v57, %v18105_v20  ;;  %v1880_v36 = vmul.f32 %v13569_v18, %v13994_v60  ;;  %v16077_v29 = vld [vmem:[#allocation2 + $0x1c2] sm:$0xff]  ;;  %v18107_v49 = vld [vmem:[#allocation19_spill] sm:$0xff] }
 0x1fb   :  { %10888 = vmatprep.mubr.f32.mxu1 %v4442_v13  ;;  %12455 = vmatpush3.bf16.msra.mxu1 %v15758_v17  ;;  %v16079_v32 = vadd.f32 %v2094_v11, %v2079_v14  ;;  %v2158_v62 = vadd.f32 %v2146_v12, %v2131_v51  ;;  %v13570_v13 = vld [vmem:[#allocation3 + $0x2a] sm:$0xff]  ;;  %v1881_v33 = vmul.f32 %v18107_v49, %v13994_v60  ;;  %v13573_v11 = vld [vmem:[#allocation2 + $0x152] sm:$0xff] }
 0x1fc   :  { %12457 = vmatprep.subr.bf16.mxu1 %v15762_v41  ;;  %10486 = vmatmul.mubr.f32.gmra.mrb[34].mxu0 %v13570_v13  ;;  %v13571_v17 = vld [vmem:[#allocation2 + $0x14a] sm:$0xff]  ;;  %v16087_v18 = vadd.f32 %v2172_v24, %v2157_v59  ;;  %v16091_v51 = vmul.f32 %v13573_v11, %v15536_v28  ;;  %v2120_v12 = vmul.f32 %v16050_v46, %v13987_v55  ;;  %v4444_v13 = vld [vmem:[#allocation3 + $0xa1] sm:$0xff]  ;;  %v8602_v24 = vld [vmem:[%s17878_s4 + $0x378] sm:$0xff] }
 0x1fd   :  { %v16083_v20 = vmul.f32 %v13571_v17, %v15536_v28  ;;  %10488 = vmatprep.mubr.f32.mxu0 %v13572_v31  ;;  %12199 = vmatpush3.bf16.msra.mxu0 %v15874_v42  ;;  %v16095_v14 = vadd.f32 %v2173_v9, %v2158_v62  ;;  %v16098_v59 = vpack.c.bf16 %v8600_v21, %v8599_v58  ;;  %v8601_v31 = vld [vmem:[%s17878_s4 + $0x370] sm:$0xff]  ;;  %v18111_v58 = vld [vmem:[#allocation13_spill] sm:$0xff] }
 0x1fe   :  { %18108 = vst [vmem:[#allocation12_spill] sm:$0xff] %v16091_v51  ;;  %10889 = vmatmul.mubr.f32.gmra.mrb[36].mxu1 %v4443_v10  ;;  %12201 = vmatprep.subr.bf16.mxu0 %v15932_v15  ;;  %v2044_v17 = vadd.f32 %v2032_v43, %v2008_v26  ;;  %v2068_v49 = vmul.f32 %v16077_v29, %v13975_v44  ;;  %v18110_v10 = vld [vmem:[#allocation30_spill] sm:$0xff]  ;;  %v18113_v62 = vld [vmem:[#allocation31_spill] sm:$0xff]  ;;  %v13574_v26 = vld [vmem:[#allocation3 + $0x3a] sm:$0xff] }
 0x1ff   :  { %18106 = vst [vmem:[#allocation23_spill] sm:$0xff] %v16083_v20  ;;  %18109 = vst [vmem:[#allocation29_spill] sm:$0xff] %v16098_v59  ;;  %10891 = vmatprep.mubr.f32.mxu1 %v4444_v13  ;;  %12459 = vmatpush3.bf16.msra.mxu1 %v15762_v41  ;;  %v16110_v9 = vadd.f32 %v1879_v19, %v18110_v10  ;;  %v16113_v21 = vadd.f32 %v1880_v36, %v18111_v58  ;;  %v16117_v51 = vld [vmem:[#allocation2 + $0x1c9] sm:$0xff]  ;;  %v18114_v43 = vld [vmem:[#allocation17_spill] sm:$0xff] }
 0x200   :  { %v1882_v11 = vmul.f32 %v18113_v62, %v13994_v60  ;;  %12461 = vmatprep.subr.bf16.mxu1 %v15764_v16  ;;  %10489 = vmatmul.mubr.f32.gmra.mrb[36].mxu0 %v13574_v26  ;;  %v16121_v20 = vadd.f32 %v1881_v33, %v18114_v43  ;;  %v18116_v13 = vld [vmem:[#allocation5_spill] sm:$0xff]  ;;  %v18118_v19 = vld [vmem:[#allocation20_spill] sm:$0xff]  ;;  %v4445_v10 = vld [vmem:[#allocation3 + $0xa9] sm:$0xff]  ;;  %v16132_v62 = vpack.c.bf16 %v8602_v24, %v8601_v31 }
 0x201   :  { %18112 = vst [vmem:[#allocation19_spill] sm:$0xff] %v16113_v21  ;;  %v16125_v41 = vmul.f32 %v15536_v28, %v18116_v13  ;;  %v16129_v36 = vmul.f32 %v15536_v28, %v18118_v19  ;;  %v13575_v58 = vld [vmem:[#allocation3 + $0x42] sm:$0xff]  ;;  %12203 = vmatpush3.bf16.msra.mxu0 %v15932_v15  ;;  %v2132_v21 = vadd.f32 %v2120_v12, %v2105_v5  ;;  %v16136_v26 = vld [vmem:[#allocation2 + $0x1d1] sm:$0xff] }
 0x202   :  { %18115 = vst [vmem:[#allocation30_spill] sm:$0xff] %v16121_v20  ;;  %10491 = vmatprep.mubr.f32.mxu0 %v13575_v58  ;;  %v2147_v33 = vmul.f32 %v16077_v29, %v13989_v56  ;;  %10892 = vmatmul.mubr.f32.gmra.mrb[38].mxu1 %v4445_v10  ;;  %v4446_v43 = vld [vmem:[#allocation3 + $0xb1] sm:$0xff]  ;;  %v13576_v13 = vld [vmem:[#allocation2 + $0x1c8] sm:$0xff]  ;;  %v2080_v19 = vadd.f32 %v2068_v49, %v2044_v17 }
 0x203   :  { %18117 = vst [vmem:[#allocation13_spill] sm:$0xff] %v16125_v41  ;;  %18119 = vst [vmem:[#allocation31_spill] sm:$0xff] %v16129_v36  ;;  %12205 = vmatprep.subr.bf16.mxu0 %v15934_v61  ;;  %v2009_v28 = vmul.f32 %v13576_v13, %v13971_v39  ;;  %v2033_v58 = vmul.f32 %v16117_v51, %v13973_v40  ;;  %10894 = vmatprep.mubr.f32.mxu1 %v4446_v43  ;;  %v18120_v5 = vld [vmem:[#allocation16_spill] sm:$0xff]  ;;  %v18122_v31 = vld [vmem:[#allocation22_spill] sm:$0xff] }
 0x204   :  { %12463 = vmatpush3.bf16.msra.mxu1 %v15764_v16  ;;  %v16144_v12 = vadd.f32 %v1882_v11, %v18120_v5  ;;  %v1883_v24 = vmul.f32 %v18122_v31, %v13994_v60  ;;  %v16151_v10 = vld [vmem:[%s17879_s2 + $0x8] ss:$0 sm:$0xff]  ;;  %v16157_v49 = vld [vmem:[#allocation2 + $0x1ca] sm:$0xff]  ;;  %v2034_v13 = vmul.f32 %v16136_v26, %v13973_v40  ;;  %v16163_v5 = vld [vmem:[#allocation2 + $0x1d2] sm:$0xff] }
 0x205   :  { %v16155_v17 = vmul.f32 %v16151_v10, %v15641_v30  ;;  %12465 = vmatprep.subr.bf16.mxu1 %v15802_v54  ;;  %v13578_v16 = vld [vmem:[#allocation3 + $0x4a] sm:$0xff]  ;;  %v4447_v36 = vld [vmem:[#allocation3 + $0xb9] sm:$0xff]  ;;  %12207 = vmatpush3.bf16.msra.mxu0 %v15934_v61  ;;  %v2159_v30 = vadd.f32 %v2147_v33, %v2132_v21  ;;  %v2045_v40 = vadd.f32 %v2033_v58, %v2009_v28 }
 0x206   :  { %18121 = vst [vmem:[#allocation17_spill] sm:$0xff] %v16144_v12  ;;  %10492 = vmatmul.mubr.f32.gmra.mrb[38].mxu0 %v13578_v16  ;;  %v13579_v11 = vld [vmem:[#allocation2 + $0x1d0] sm:$0xff]  ;;  %v2122_v16 = vmul.f32 %v16136_v26, %v13987_v55  ;;  %10895 = vmatmul.mubr.f32.gmra.mrb[40].mxu1 %v4447_v36  ;;  %v2069_v41 = vmul.f32 %v16157_v49, %v13975_v44  ;;  %v13581_v36 = vld [vmem:[#allocation3 + $0x5a] sm:$0xff] }
 0x207   :  { %18123 = vst [vmem:[#allocation5_spill] sm:$0xff] %v16155_v17  ;;  %v2010_v43 = vmul.f32 %v13579_v11, %v13971_v39  ;;  %v2095_v31 = vmul.f32 %v13579_v11, %v13980_v50  ;;  %v13580_v12 = vld [vmem:[#allocation3 + $0x52] sm:$0xff]  ;;  %v2121_v17 = vmul.f32 %v16117_v51, %v13987_v55  ;;  %v4448_v39 = vld [vmem:[#allocation3 + $0xc1] sm:$0xff]  ;;  %12209 = vmatprep.subr.bf16.mxu0 %v16003_v0  ;;  %v4449_v58 = vld [vmem:[#allocation3 + $0xc9] sm:$0xff] }
 0x208   :  { %10494 = vmatprep.mubr.f32.mxu0 %v13580_v12  ;;  %10897 = vmatprep.mubr.f32.mxu1 %v4448_v39  ;;  %v16176_v21 = vadd.f32 %v1883_v24, %v15677_v2  ;;  %v2070_v33 = vmul.f32 %v16163_v5, %v13975_v44  ;;  %v2174_v12 = vmul.f32 %v13579_v11, %v13991_v57  ;;  %v8603_v28 = vld [vmem:[%s17878_s4 + $0x380] sm:$0xff]  ;;  %v8604_v39 = vld [vmem:[%s17878_s4 + $0x388] sm:$0xff] }
 0x209   :  { %v2107_v20 = vadd.f32 %v2095_v31, %v2080_v19  ;;  %12467 = vmatpush3.bf16.msra.mxu1 %v15802_v54  ;;  %v2046_v54 = vadd.f32 %v2034_v13, %v2010_v43  ;;  %v2133_v2 = vadd.f32 %v2121_v17, %v16079_v32  ;;  %v2148_v19 = vmul.f32 %v16157_v49, %v13989_v56  ;;  %v13582_v24 = vld [vmem:[#allocation3 + $0x62] sm:$0xff]  ;;  %v13583_v17 = vld [vmem:[#allocation2 + $0x1d8] sm:$0xff] }
 0x20a   :  { %12469 = vmatprep.subr.bf16.mxu1 %v15806_v37  ;;  %10495 = vmatmul.mubr.f32.gmra.mrb[40].mxu0 %v13581_v36  ;;  %v2149_v31 = vmul.f32 %v16163_v5, %v13989_v56  ;;  %v16194_v36 = vadd.f32 %v2174_v12, %v2159_v30  ;;  %v18124_v43 = vld [vmem:[#allocation18_spill] sm:$0xff]  ;;  %v2096_v13 = vmul.f32 %v13583_v17, %v13980_v50  ;;  %v16209_v12 = vld [vmem:[#allocation2 + $0x1d9] sm:$0xff] }
 0x20b   :  { %10497 = vmatprep.mubr.f32.mxu0 %v13582_v24  ;;  %12211 = vmatpush3.bf16.msra.mxu0 %v16003_v0  ;;  %v2134_v11 = vadd.f32 %v2122_v16, %v2107_v20  ;;  %v16199_v32 = vmul.f32 %v16151_v10, %v18124_v43  ;;  %v2081_v44 = vadd.f32 %v2069_v41, %v2045_v40  ;;  %v13584_v24 = vld [vmem:[#allocation3 + $0x72] sm:$0xff]  ;;  %v13585_v43 = vld [vmem:[#allocation3 + $0x6a] sm:$0xff] }
 0x20c   :  { %10898 = vmatmul.mubr.f32.gmra.mrb[42].mxu1 %v4449_v58  ;;  %12213 = vmatprep.subr.bf16.mxu0 %v16038_v63  ;;  %v16203_v20 = vpack.c.bf16 %v8604_v39, %v8603_v28  ;;  %v1885_v30 = vmul.f32 %v15684_v4, %v13994_v60  ;;  %v1887_v16 = vmul.f32 %v15766_v8, %v13994_v60  ;;  %v16211_v58 = vld [vmem:[#allocation2 + $0x1e1] sm:$0xff] }
 0x20d   :  { %18125 = vst [vmem:[#allocation20_spill] sm:$0xff] %v16199_v32  ;;  %12471 = vmatpush3.bf16.msra.mxu1 %v15806_v37  ;;  %10932 = vmatprep.mubr.f32.mxu1 %v13584_v24  ;;  %v2175_v40 = vmul.f32 %v13583_v17, %v13991_v57  ;;  %v2082_v37 = vadd.f32 %v2070_v33, %v2046_v54  ;;  %v16215_v28 = vld [vmem:[#allocation2 + $0x1da] sm:$0xff]  ;;  %v16224_v32 = vld [vmem:[#allocation2 + $0x1e2] sm:$0xff] }
 0x20e   :  { %12473 = vmatprep.subr.bf16.mxu1 %v15858_v22  ;;  %10498 = vmatmul.mubr.f32.gmra.mrb[42].mxu0 %v13585_v43  ;;  %v2160_v41 = vadd.f32 %v2148_v19, %v2133_v2  ;;  %v13586_v4 = vld [vmem:[#allocation3 + $0x20] sm:$0xff]  ;;  %v16220_v8 = vmul.f32 %v16151_v10, %v15686_v25  ;;  %v1889_v39 = vmul.f32 %v15864_v23, %v13994_v60  ;;  %v18127_v43 = vld [vmem:[#allocation15_spill] sm:$0xff] }
 0x20f   :  { %12215 = vmatpush3.bf16.msra.mxu0 %v16038_v63  ;;  %10532 = vmatprep.mubr.f32.mxu0 %v13586_v4  ;;  %v2161_v24 = vadd.f32 %v2149_v31, %v2134_v11  ;;  %v13587_v33 = vld [vmem:[#allocation2 + $0x1e0] sm:$0xff]  ;;  %v2108_v2 = vadd.f32 %v2096_v13, %v2081_v44  ;;  %v2123_v19 = vmul.f32 %v16209_v12, %v13987_v55  ;;  %v8605_v44 = vld [vmem:[%s17878_s4 + $0x390] sm:$0xff] }
 0x210   :  { %18126 = vst [vmem:[#allocation16_spill] sm:$0xff] %v16220_v8  ;;  %12217 = vmatprep.subr.bf16.mxu0 %v16098_v59  ;;  %v2097_v54 = vmul.f32 %v13587_v33, %v13980_v50  ;;  %v2124_v17 = vmul.f32 %v16211_v58, %v13987_v55  ;;  %v1903_v25 = vadd.f32 %v1887_v16, %v15795_v3  ;;  %v8608_v55 = vld [vmem:[%s17878_s4 + $0x3a8] sm:$0xff] }
 0x211   :  { %12475 = vmatpush3.bf16.msra.mxu1 %v15858_v22  ;;  %v1921_v23 = vmul.f32 %v16151_v10, %v15791_v38  ;;  %v2150_v11 = vmul.f32 %v16215_v28, %v13989_v56  ;;  %v2176_v31 = vmul.f32 %v13587_v33, %v13991_v57  ;;  %v8606_v22 = vld [vmem:[%s17878_s4 + $0x398] sm:$0xff]  ;;  %v2135_v3 = vadd.f32 %v2123_v19, %v2108_v2  ;;  %v8607_v33 = vld [vmem:[%s17878_s4 + $0x3a0] sm:$0xff] }
 0x212   :  { %12477 = vmatprep.subr.bf16.mxu1 %v15860_v47  ;;  %v2109_v13 = vadd.f32 %v2097_v54, %v2082_v37  ;;  %v2151_v38 = vmul.f32 %v16224_v32, %v13989_v56  ;;  %v16248_v16 = vadd.f32 %v2175_v40, %v2160_v41  ;;  %v16252_v4 = vadd.f32 %v1885_v30, %v18127_v43  ;;  %v13588_v54 = vld [vmem:[#allocation2 + $0x1e8] sm:$0xff]  ;;  %v18128_v30 = vld [vmem:[#allocation36_spill] sm:$0xff]  ;;  %v18129_v19 = vld [vmem:[#allocation37_spill] sm:$0xff] }
 0x213   :  { %12219 = vmatpush3.bf16.msra.mxu0 %v16098_v59  ;;  %v2195_v37 = vmul.f32 %v15878_v52, %v13994_v60  ;;  %v2177_v40 = vmul.f32 %v13588_v54, %v13991_v57  ;;  %v16263_v41 = vadd.f32 %v2176_v31, %v2161_v24  ;;  %v1905_v2 = vadd.f32 %v1889_v39, %v18128_v30  ;;  %v18130_v52 = vld [vmem:[#allocation40_spill] sm:$0xff]  ;;  %v13589_v31 = vld [vmem:[#allocation2 + $0x1f0] sm:$0xff] }
 0x214   :  { %12221 = vmatprep.subr.bf16.mxu0 %v16132_v62  ;;  %v1923_v43 = vmul.f32 %v16151_v10, %v18129_v19  ;;  %v2136_v56 = vadd.f32 %v2124_v17, %v2109_v13  ;;  %v2162_v50 = vadd.f32 %v2150_v11, %v2135_v3  ;;  %v16270_v59 = vpack.c.bf16 %v8606_v22, %v8605_v44  ;;  %v4604_v44 = vld [vmem:[#allocation3 + $0x7a] sm:$0xff]  ;;  %v18132_v22 = vld [vmem:[#allocation38_spill] sm:$0xff] }
 0x215   :  { %12479 = vmatpush3.bf16.msra.mxu1 %v15860_v47  ;;  %v16272_v8 = vadd.f32 %v1921_v23, %v1903_v25  ;;  %v2196_v54 = vmul.f32 %v18130_v52, %v13994_v60  ;;  %v2197_v24 = vmul.f32 %v15946_v48, %v13994_v60  ;;  %v16279_v39 = vpack.c.bf16 %v8608_v55, %v8607_v33  ;;  %v18131_v25 = vld [vmem:[#allocation39_spill] sm:$0xff]  ;;  %v8610_v48 = vld [vmem:[%s17878_s4 + $0x3b8] sm:$0xff]  ;;  %v4605_v3 = vld [vmem:[#allocation3 + $0x82] sm:$0xff] }
 0x216   :  { %12481 = vmatprep.subr.bf16.mxu1 %v15862_v53  ;;  %v2198_v17 = vmul.f32 %v16011_v45, %v13994_v60  ;;  %v2163_v11 = vadd.f32 %v2151_v38, %v2136_v56  ;;  %v2178_v47 = vmul.f32 %v13589_v31, %v13991_v57  ;;  %v2207_v23 = vadd.f32 %v2195_v37, %v18131_v25  ;;  %v8609_v55 = vld [vmem:[%s17878_s4 + $0x3b0] sm:$0xff]  ;;  %v18133_v33 = vld [vmem:[#allocation42_spill] sm:$0xff]  ;;  %v18134_v52 = vld [vmem:[#allocation41_spill] sm:$0xff] }
 0x217   :  { %12223 = vmatpush3.bf16.msra.mxu0 %v16132_v62  ;;  %v2231_v13 = vmul.f32 %v16151_v10, %v18132_v22  ;;  %v2199_v56 = vmul.f32 %v16050_v46, %v13994_v60  ;;  %v16296_v45 = vadd.f32 %v2177_v40, %v2162_v50  ;;  %v16299_v38 = vadd.f32 %v1923_v43, %v1905_v2  ;;  %v3263_v19 = vld [vmem:[#allocation3 + $0x28] sm:$0xff]  ;;  %v3264_v40 = vld [vmem:[#allocation3 + $0x30] sm:$0xff]  ;;  %v8611_v43 = vld [vmem:[%s17878_s4 + $0x3c0] sm:$0xff] }
 0x218   :  { %10933 = vmatmul.mubr.f32.vlgmr.msra.gmra.mrb[32].mxu1 %v4604_v44  ;;  %12225 = vmatprep.subr.bf16.mxu0 %v16203_v20  ;;  %v2232_v37 = vmul.f32 %v16151_v10, %v18133_v33  ;;  %v16303_v30 = vadd.f32 %v2178_v47, %v2163_v11  ;;  %v2208_v31 = vadd.f32 %v2196_v54, %v18134_v52  ;;  %v8613_v44 = vld [vmem:[%s17878_s4 + $0x3d0] sm:$0xff]  ;;  %v18135_v25 = vld [vmem:[#allocation25_spill] sm:$0xff]  ;;  %v3265_v22 = vld [vmem:[#allocation3 + $0x38] sm:$0xff] }
 0x219   :  { %10935 = vmatprep.mubr.f32.mxu1 %v4605_v3  ;;  %12483 = vmatpush3.bf16.msra.mxu1 %v15862_v53  ;;  %v2209_v50 = vadd.f32 %v2197_v24, %v15997_v27  ;;  %v2233_v46 = vmul.f32 %v16151_v10, %v15970_v1  ;;  %v16311_v2 = vpack.c.bf16 %v8610_v48, %v8609_v55  ;;  %v8612_v53 = vld [vmem:[%s17878_s4 + $0x3c8] sm:$0xff]  ;;  %v8615_v3 = vld [vmem:[%s17878_s4 + $0x3e0] sm:$0xff]  ;;  %v18137_v33 = vld [vmem:[#allocation35_spill] sm:$0xff] }
 0x21a   :  { %12485 = vmatprep.subr.bf16.mxu1 %v15874_v42  ;;  %10533 = vmatmul.mubr.f32.vlgmr.msra.gmra.mrb[32].mxu0 %v3263_v19  ;;  %v2210_v54 = vadd.f32 %v2198_v17, %v16032_v35  ;;  %v2234_v27 = vmul.f32 %v16151_v10, %v16024_v34  ;;  %v4606_v1 = vld [vmem:[#allocation3 + $0x8a] sm:$0xff]  ;;  %v16323_v24 = vadd.f32 %v2231_v13, %v2207_v23  ;;  %v8614_v35 = vld [vmem:[%s17878_s4 + $0x3d8] sm:$0xff] }
 0x21b   :  { %10535 = vmatprep.mubr.f32.mxu0 %v3264_v40  ;;  %12227 = vmatpush3.bf16.msra.mxu0 %v16203_v20  ;;  %v2211_v11 = vadd.f32 %v2199_v56, %v16087_v18  ;;  %v2235_v47 = vmul.f32 %v16151_v10, %v16077_v29  ;;  %v4607_v34 = vld [vmem:[#allocation3 + $0x92] sm:$0xff]  ;;  %v2200_v17 = vmul.f32 %v16117_v51, %v13994_v60  ;;  %v3266_v51 = vld [vmem:[#allocation3 + $0x40] sm:$0xff] }
 0x21c   :  { %10936 = vmatmul.mubr.f32.gmra.mrb[34].mxu1 %v4606_v1  ;;  %12229 = vmatprep.subr.bf16.mxu0 %v16270_v59  ;;  %v2201_v18 = vmul.f32 %v16136_v26, %v13994_v60  ;;  %v18136_v29 = vld [vmem:[#allocation32_spill] sm:$0xff]  ;;  %v16342_v13 = vadd.f32 %v2232_v37, %v2208_v31  ;;  %v16344_v55 = vadd.f32 %v2233_v46, %v2209_v50  ;;  %v18138_v50 = vld [vmem:[#allocation21_spill] sm:$0xff] }
 0x21d   :  { %v1555_v23 = vadd.f32 %v18136_v29, %v18135_v25  ;;  %10938 = vmatprep.mubr.f32.mxu1 %v4607_v34  ;;  %12487 = vmatpush3.bf16.msra.mxu1 %v15874_v42  ;;  %v16346_v48 = vpack.c.bf16 %v8612_v53, %v8611_v43  ;;  %v16349_v56 = vadd.f32 %v2234_v27, %v2210_v54  ;;  %v8616_v42 = vld [vmem:[%s17878_s4 + $0x3e8] sm:$0xff]  ;;  %v4608_v19 = vld [vmem:[#allocation3 + $0x9a] sm:$0xff]  ;;  %v18143_v25 = vld [vmem:[#allocation43_spill] sm:$0xff] }
 0x21e   :  { %12489 = vmatprep.subr.bf16.mxu1 %v15932_v15  ;;  %10536 = vmatmul.mubr.f32.gmra.mrb[34].mxu0 %v3265_v22  ;;  %v16351_v26 = vpack.c.bf16 %v8614_v35, %v8613_v44  ;;  %v16363_v52 = vadd.f32 %v2235_v47, %v2211_v11  ;;  %v16367_v31 = vmul.f32 %v16151_v10, %v16157_v49  ;;  %v4609_v40 = vld [vmem:[#allocation3 + $0xa2] sm:$0xff]  ;;  %v18141_v35 = vld [vmem:[#allocation27_spill] sm:$0xff] }
 0x21f   :  { %v16360_v37 = vadd.f32 %v18137_v33, %v1555_v23  ;;  %10538 = vmatprep.mubr.f32.mxu0 %v3266_v51  ;;  %12231 = vmatpush3.bf16.msra.mxu0 %v16270_v59  ;;  %v1572_v46 = vadd.f32 %v18137_v33, %v18138_v50  ;;  %v16373_v43 = vadd.f32 %v2200_v17, %v16095_v14  ;;  %v3267_v27 = vld [vmem:[#allocation3 + $0x48] sm:$0xff]  ;;  %v18139_v47 = vld [vmem:[#allocation33_spill] sm:$0xff]  ;;  %v4611_v23 = vld [vmem:[#allocation3 + $0xb2] sm:$0xff] }
 0x220   :  { %10939 = vmatmul.mubr.f32.gmra.mrb[36].mxu1 %v4608_v19  ;;  %12233 = vmatprep.subr.bf16.mxu0 %v16279_v39  ;;  %v16376_v53 = vadd.f32 %v2201_v18, %v16194_v36  ;;  %v16380_v54 = vmul.f32 %v16151_v10, %v16163_v5  ;;  %v16384_v1 = vpack.c.bf16 %v8616_v42, %v8615_v3  ;;  %v18140_v44 = vld [vmem:[#allocation26_spill] sm:$0xff]  ;;  %v3268_v5 = vld [vmem:[#allocation3 + $0x50] sm:$0xff]  ;;  %v18144_v51 = vld [vmem:[#allocation28_spill] sm:$0xff] }
 0x221   :  { %v1587_v49 = vmax.f32 %v16360_v37, 0.0  ;;  %10941 = vmatprep.mubr.f32.mxu1 %v4609_v40  ;;  %12491 = vmatpush3.bf16.msra.mxu1 %v15932_v15  ;;  %v1588_v11 = vmax.f32 %v1572_v46, 0.0  ;;  %v1924_v14 = vadd.f32 %v18140_v44, %v18139_v47  ;;  %v1925_v36 = vadd.f32 %v18141_v35, %v16001_v7  ;;  %v4610_v18 = vld [vmem:[#allocation3 + $0xaa] sm:$0xff]  ;;  %v18145_v3 = vld [vmem:[#allocation44_spill] sm:$0xff]  ;;  %v3594_v37 = vld [vmem:[#allocation3 + $0x22] sm:$0xff] }
 0x222   :  { %12493 = vmatprep.subr.bf16.mxu1 %v15934_v61  ;;  %10539 = vmatmul.mubr.f32.gmra.mrb[36].mxu0 %v3267_v27  ;;  %v2202_v34 = vmul.f32 %v16209_v12, %v13994_v60  ;;  %v16395_v15 = vmul.f32 %v16211_v58, %v13994_v60  ;;  %v16401_v17 = vadd.f32 %v18137_v33, %v16014_v6  ;;  %v18142_v58 = vld [vmem:[#allocation24_spill] sm:$0xff]  ;;  %v18146_v19 = vld [vmem:[#allocation23_spill] sm:$0xff] }
 0x223   :  { %1603 = vst [vmem:[#allocation3 + $0xd8] sm:$0xff] %v1587_v49  ;;  %10541 = vmatprep.mubr.f32.mxu0 %v3268_v5  ;;  %12235 = vmatpush3.bf16.msra.mxu0 %v16279_v39  ;;  %1604 = vst [vmem:[#allocation3 + $0xe0] sm:$0xff] %v1588_v11  ;;  %v16405_v7 = vadd.f32 %v18137_v33, %v1924_v14  ;;  %v16408_v12 = vadd.f32 %v18137_v33, %v1925_v36  ;;  %v3269_v46 = vld [vmem:[#allocation3 + $0x58] sm:$0xff]  ;;  %v3270_v14 = vld [vmem:[#allocation3 + $0x60] sm:$0xff] }
 0x224   :  { %v1927_v29 = vadd.f32 %v18143_v25, %v18142_v58  ;;  %10942 = vmatmul.mubr.f32.gmra.mrb[38].mxu1 %v4610_v18  ;;  %12237 = vmatprep.subr.bf16.mxu0 %v16311_v2  ;;  %v16415_v6 = vmul.f32 %v16151_v10, %v16215_v28  ;;  %v1958_v22 = vmax.f32 %v16401_v17, 0.0  ;;  %v1928_v42 = vadd.f32 %v18145_v3, %v18144_v51  ;;  %v18147_v28 = vld [vmem:[#allocation19_spill] sm:$0xff]  ;;  %v18148_v47 = vld [vmem:[#allocation12_spill] sm:$0xff]  ;;  %v18150_v18 = vld [vmem:[#allocation13_spill] sm:$0xff] }
 0x225   :  { %v1929_v50 = vadd.f32 %v18146_v19, %v16110_v9  ;;  %10944 = vmatprep.mubr.f32.mxu1 %v4611_v23  ;;  %12495 = vmatpush3.bf16.msra.mxu1 %v15934_v61  ;;  %v1956_v40 = vmax.f32 %v16405_v7, 0.0  ;;  %v1957_v27 = vmax.f32 %v16408_v12, 0.0  ;;  %v1930_v44 = vadd.f32 %v18148_v47, %v18147_v28  ;;  %v4612_v36 = vld [vmem:[#allocation3 + $0xba] sm:$0xff]  ;;  %v4613_v51 = vld [vmem:[#allocation3 + $0xc2] sm:$0xff]  ;;  %v8786_v12 = vld [vmem:[%s17878_s4 + $0x130] sm:$0xff] }
 0x226   :  { %v16426_v11 = vadd.f32 %v18137_v33, %v1927_v29  ;;  %12497 = vmatprep.subr.bf16.mxu1 %v16003_v0  ;;  %10542 = vmatmul.mubr.f32.gmra.mrb[38].mxu0 %v3269_v46  ;;  %v16432_v9 = vadd.f32 %v2202_v34, %v16248_v16  ;;  %1974 = vst [vmem:[#allocation3 + $0x110] sm:$0xff] %v1958_v22  ;;  %v18149_v34 = vld [vmem:[#allocation30_spill] sm:$0xff]  ;;  %v18151_v25 = vld [vmem:[#allocation17_spill] sm:$0xff]  ;;  %v18152_v29 = vld [vmem:[#allocation31_spill] sm:$0xff] }
 0x227   :  { %v16437_v61 = vadd.f32 %v18137_v33, %v1928_v42  ;;  %v16440_v35 = vadd.f32 %v18137_v33, %v1929_v50  ;;  %10544 = vmatprep.mubr.f32.mxu0 %v3270_v14  ;;  %12239 = vmatpush3.bf16.msra.mxu0 %v16311_v2  ;;  %1972 = vst [vmem:[#allocation3 + $0x100] sm:$0xff] %v1956_v40  ;;  %1973 = vst [vmem:[#allocation3 + $0x108] sm:$0xff] %v1957_v27  ;;  %v18153_v50 = vld [vmem:[#allocation5_spill] sm:$0xff]  ;;  %v3271_v28 = vld [vmem:[#allocation3 + $0x68] sm:$0xff] }
 0x228   :  { %v1959_v16 = vmax.f32 %v16426_v11, 0.0  ;;  %v16449_v5 = vadd.f32 %v18137_v33, %v1930_v44  ;;  %v1931_v58 = vadd.f32 %v18150_v18, %v18149_v34  ;;  %v1932_v23 = vadd.f32 %v18152_v29, %v18151_v25  ;;  %10945 = vmatmul.mubr.f32.gmra.mrb[40].mxu1 %v4612_v36  ;;  %12241 = vmatprep.subr.bf16.mxu0 %v16346_v48  ;;  %v18154_v14 = vld [vmem:[#allocation34_spill] sm:$0xff]  ;;  %v8787_v17 = vld [vmem:[%s17878_s4 + $0x138] sm:$0xff]  ;;  %v8788_v11 = vld [vmem:[%s17878_s4 + $0x140] sm:$0xff] }
 0x229   :  { %v2239_v3 = vmul.f32 %v16151_v10, %v16224_v32  ;;  %v1960_v42 = vmax.f32 %v16437_v61, 0.0  ;;  %v1961_v19 = vmax.f32 %v16440_v35, 0.0  ;;  %v1933_v46 = vadd.f32 %v18153_v50, %v16176_v21  ;;  %10947 = vmatprep.mubr.f32.mxu1 %v4613_v51  ;;  %12499 = vmatpush3.bf16.msra.mxu1 %v16003_v0  ;;  %v3272_v0 = vld [vmem:[#allocation3 + $0x70] sm:$0xff]  ;;  %v18155_v18 = vld [vmem:[#allocation14_spill] sm:$0xff] }
 0x22a   :  { %1975 = vst [vmem:[#allocation3 + $0x118] sm:$0xff] %v1959_v16  ;;  %v17959_v47 = vmax.f32 %v16449_v5, 0.0  ;;  %v16467_v44 = vadd.f32 %v18137_v33, %v1931_v58  ;;  %v16470_v32 = vadd.f32 %v18137_v33, %v1932_v23  ;;  %v16474_v36 = vadd.f32 %v18137_v33, %v18154_v14  ;;  %12501 = vmatprep.subr.bf16.mxu1 %v16038_v63  ;;  %v18156_v58 = vld [vmem:[#allocation20_spill] sm:$0xff]  ;;  %v4614_v29 = vld [vmem:[#allocation3 + $0xca] sm:$0xff] }
 0x22b   :  { %10545 = vmatmul.mubr.f32.gmra.mrb[40].mxu0 %v3271_v28  ;;  %1976 = vst [vmem:[#allocation3 + $0x120] sm:$0xff] %v1960_v42  ;;  %1977 = vst [vmem:[#allocation3 + $0x128] sm:$0xff] %v1961_v19  ;;  %v16482_v21 = vadd.f32 %v18137_v33, %v1933_v46  ;;  %v16486_v34 = vadd.f32 %v18137_v33, %v16272_v8  ;;  %v1934_v25 = vadd.f32 %v18156_v58, %v18155_v18  ;;  %v4768_v46 = vld [vmem:[#allocation3 + $0x80] sm:$0xff]  ;;  %v3273_v18 = vld [vmem:[#allocation3 + $0x78] sm:$0xff] }
 0x22c   :  { %10547 = vmatprep.mubr.f32.mxu0 %v3272_v0  ;;  %12243 = vmatpush3.bf16.msra.mxu0 %v16346_v48  ;;  %v2215_v23 = vadd.f32 %v16395_v15, %v16263_v41  ;;  %1978 = vst [vmem:[#allocation3 + $0x130] sm:$0xff] %v17959_v47  ;;  %v1963_v51 = vmax.f32 %v16467_v44, 0.0  ;;  %v1964_v50 = vmax.f32 %v16470_v32, 0.0  ;;  %v1968_v8 = vmax.f32 %v16474_v36, 0.0  ;;  %v18157_v41 = vld [vmem:[#allocation16_spill] sm:$0xff]  ;;  %v8617_v47 = vld [vmem:[%s17878_s4 + $0x3f0] sm:$0xff] }
 0x22d   :  { %10948 = vmatmul.mubr.f32.gmra.mrb[42].mxu1 %v4614_v29  ;;  %12245 = vmatprep.subr.bf16.mxu0 %v16351_v26  ;;  %v1965_v28 = vmax.f32 %v16482_v21, 0.0  ;;  %v17961_v14 = vmax.f32 %v16486_v34, 0.0  ;;  %v16502_v0 = vadd.f32 %v18137_v33, %v1934_v25  ;;  %v1935_v15 = vadd.f32 %v18157_v41, %v16252_v4  ;;  %v8618_v25 = vld [vmem:[%s17878_s4 + $0x3f8] sm:$0xff]  ;;  %v18158_v4 = vld [vmem:[#allocation29_spill] sm:$0xff]  ;;  %v8789_v61 = vld [vmem:[%s17878_s4 + $0x148] sm:$0xff] }
 0x22e   :  { %12503 = vmatpush3.bf16.msra.mxu1 %v16038_v63  ;;  %10982 = vmatprep.mubr.f32.mxu1 %v4768_v46  ;;  %v2248_v58 = vadd.f32 %v16367_v31, %v16373_v43  ;;  %v2249_v29 = vadd.f32 %v16380_v54, %v16376_v53  ;;  %1979 = vst [vmem:[#allocation3 + $0x138] sm:$0xff] %v1963_v51  ;;  %1980 = vst [vmem:[#allocation3 + $0x140] sm:$0xff] %v1964_v50  ;;  %v3428_v31 = vld [vmem:[#allocation3 + $0x21] sm:$0xff]  ;;  %v8790_v35 = vld [vmem:[%s17878_s4 + $0x150] sm:$0xff] }
 0x22f   :  { %1984 = vst [vmem:[#allocation3 + $0x160] sm:$0xff] %v1968_v8  ;;  %v16525_v63 = vadd.f32 %v18137_v33, %v16299_v38  ;;  %12505 = vmatprep.subr.bf16.mxu1 %v18158_v4  ;;  %10548 = vmatmul.mubr.f32.gmra.mrb[42].mxu0 %v3273_v18  ;;  %v2250_v43 = vadd.f32 %v16415_v6, %v16432_v9  ;;  %1981 = vst [vmem:[#allocation3 + $0x148] sm:$0xff] %v1965_v28  ;;  %v1966_v53 = vmax.f32 %v16502_v0, 0.0  ;;  %v16538_v38 = vld [vmem:[%s17880_s3] ss:$0 sm:$0xff]  ;;  %v8793_v32 = vld [vmem:[%s17878_s4 + $0x168] sm:$0xff] }
 0x230   :  { %1985 = vst [vmem:[#allocation3 + $0x168] sm:$0xff] %v17961_v14  ;;  %v16541_v33 = vadd.f32 %v16538_v38, %v1935_v15  ;;  %v16545_v54 = vadd.f32 %v16538_v38, %v16323_v24  ;;  %12247 = vmatpush3.bf16.msra.mxu0 %v16351_v26  ;;  %10582 = vmatprep.mubr.f32.mxu0 %v3428_v31  ;;  %v8792_v44 = vld [vmem:[%s17878_s4 + $0x160] sm:$0xff]  ;;  %v8794_v21 = vld [vmem:[%s17878_s4 + $0x170] sm:$0xff] }
 0x231   :  { %v2251_v6 = vadd.f32 %v2239_v3, %v2215_v23  ;;  %v17960_v9 = vmax.f32 %v16525_v63, 0.0  ;;  %v16551_v46 = vadd.f32 %v16538_v38, %v16342_v13  ;;  %v16555_v41 = vadd.f32 %v16538_v38, %v16344_v55  ;;  %12249 = vmatprep.subr.bf16.mxu0 %v16384_v1  ;;  %1982 = vst [vmem:[#allocation3 + $0x150] sm:$0xff] %v1966_v53  ;;  %v8619_v13 = vld [vmem:[%s17878_s4 + $0x400] sm:$0xff]  ;;  %v8620_v55 = vld [vmem:[%s17878_s4 + $0x408] sm:$0xff] }
 0x232   :  { %v16558_v15 = vpack.c.bf16 %v8618_v25, %v8617_v47  ;;  %v17967_v24 = vmax.f32 %v16541_v33, 0.0  ;;  %v17962_v3 = vmax.f32 %v16545_v54, 0.0  ;;  %v16566_v23 = vadd.f32 %v16538_v38, %v16349_v56  ;;  %12507 = vmatpush3.bf16.msra.mxu1 %v18158_v4 }
 0x233   :  { %1987 = vst [vmem:[#allocation3 + $0x178] sm:$0xff] %v17960_v9  ;;  %v17966_v47 = vmax.f32 %v16551_v46, 0.0  ;;  %v17963_v18 = vmax.f32 %v16555_v41, 0.0  ;;  %v16581_v56 = vadd.f32 %v16538_v38, %v16363_v52  ;;  %v2260_v25 = vadd.f32 %v16538_v38, %v2248_v58  ;;  %12509 = vmatprep.subr.bf16.mxu1 %v16132_v62 }
 0x234   :  { %1983 = vst [vmem:[#allocation3 + $0x158] sm:$0xff] %v17967_v24  ;;  %2279 = vst [vmem:[#allocation3 + $0x180] sm:$0xff] %v17962_v3  ;;  %v17965_v4 = vmax.f32 %v16566_v23, 0.0  ;;  %v2261_v31 = vadd.f32 %v16538_v38, %v2249_v29  ;;  %v2262_v9 = vadd.f32 %v16538_v38, %v2250_v43  ;;  %12251 = vmatpush3.bf16.msra.mxu0 %v16384_v1  ;;  %v2229_v24 = vld [vmem:[#allocation2 + $0x1f2] sm:$0xff]  ;;  %v18166_v0 = vmax.f32 %v16541_v33, 0.0 }
 0x235   :  { %2280 = vst [vmem:[#allocation3 + $0x188] sm:$0xff] %v17966_v47  ;;  %2281 = vst [vmem:[#allocation3 + $0x190] sm:$0xff] %v17963_v18  ;;  %v17964_v52 = vmax.f32 %v16581_v56, 0.0  ;;  %v2272_v58 = vmax.f32 %v2260_v25, 0.0  ;;  %v2263_v14 = vadd.f32 %v16538_v38, %v2251_v6  ;;  %12253 = vmatprep.subr.bf16.mxu0 %v16558_v15  ;;  %v16600_v3 = vpack.c.bf16 %v8620_v55, %v8619_v13  ;;  %v8621_v18 = vld [vmem:[%s17878_s4 + $0x410] sm:$0xff]  ;;  %v8622_v25 = vld [vmem:[%s17878_s4 + $0x418] sm:$0xff] }
 0x236   :  { %2282 = vst [vmem:[#allocation3 + $0x198] sm:$0xff] %v17965_v4  ;;  %v2273_v29 = vmax.f32 %v2261_v31, 0.0  ;;  %v2274_v43 = vmax.f32 %v2262_v9, 0.0  ;;  %12511 = vmatpush3.bf16.msra.mxu1 %v16132_v62  ;;  %v4769_v9 = vld [vmem:[#allocation3 + $0x88] sm:$0xff]  ;;  %v4770_v62 = vld [vmem:[#allocation3 + $0x90] sm:$0xff]  ;;  %v16616_v13 = vpack.c.bf16 %v8622_v25, %v8621_v18  ;;  %v4772_v18 = vld [vmem:[#allocation3 + $0xa0] sm:$0xff] }
 0x237   :  { %2283 = vst [vmem:[#allocation3 + $0x1a0] sm:$0xff] %v17964_v52  ;;  %2284 = vst [vmem:[#allocation3 + $0x1a8] sm:$0xff] %v2272_v58  ;;  %v2275_v6 = vmax.f32 %v2263_v14, 0.0  ;;  %12513 = vmatprep.subr.bf16.mxu1 %v16203_v20  ;;  %v3429_v55 = vld [vmem:[#allocation3 + $0x29] sm:$0xff]  ;;  %v8623_v14 = vld [vmem:[%s17878_s4 + $0x420] sm:$0xff] }
 0x238   :  { %2285 = vst [vmem:[#allocation3 + $0x1b0] sm:$0xff] %v2273_v29  ;;  %2286 = vst [vmem:[#allocation3 + $0x1b8] sm:$0xff] %v2274_v43  ;;  %12255 = vmatpush3.bf16.msra.mxu0 %v16558_v15  ;;  %v8624_v31 = vld [vmem:[%s17878_s4 + $0x428] sm:$0xff]  ;;  %v3430_v58 = vld [vmem:[#allocation3 + $0x31] sm:$0xff] }
 0x239   :  { %2287 = vst [vmem:[#allocation3 + $0x1c0] sm:$0xff] %v2275_v6  ;;  %10983 = vmatmul.mubr.f32.vlgmr.msra.gmra.mrb[32].mxu1 %v4769_v9  ;;  %12257 = vmatprep.subr.bf16.mxu0 %v16600_v3  ;;  %v4771_v29 = vld [vmem:[#allocation3 + $0x98] sm:$0xff]  ;;  %v8625_v25 = vld [vmem:[%s17878_s4 + $0x430] sm:$0xff]  ;;  %v3432_v9 = vld [vmem:[#allocation3 + $0x41] sm:$0xff] }
 0x23a   :  { %10985 = vmatprep.mubr.f32.mxu1 %v4770_v62  ;;  %12515 = vmatpush3.bf16.msra.mxu1 %v16203_v20  ;;  %v16628_v20 = vpack.c.bf16 %v8624_v31, %v8623_v14  ;;  %v3431_v43 = vld [vmem:[#allocation3 + $0x39] sm:$0xff]  ;;  %v4773_v62 = vld [vmem:[#allocation3 + $0xa8] sm:$0xff] }
 0x23b   :  { %12517 = vmatprep.subr.bf16.mxu1 %v16270_v59  ;;  %10583 = vmatmul.mubr.f32.vlgmr.msra.gmra.mrb[32].mxu0 %v3429_v55  ;;  %v8626_v6 = vld [vmem:[%s17878_s4 + $0x438] sm:$0xff]  ;;  %v4776_v52 = vld [vmem:[#allocation3 + $0xc0] sm:$0xff]  ;;  %v3437_v47 = vld [vmem:[#allocation3 + $0x69] sm:$0xff] }
 0x23c   :  { %10585 = vmatprep.mubr.f32.mxu0 %v3430_v58  ;;  %12259 = vmatpush3.bf16.msra.mxu0 %v16600_v3  ;;  %v1999_v55 = vld [vmem:[#allocation2 + $0x1d8] sm:$0x3f]  ;;  %v16640_v31 = vpack.c.bf16 %v8626_v6, %v8625_v25  ;;  %v3433_v58 = vld [vmem:[#allocation3 + $0x49] sm:$0xff] }
 0x23d   :  { %10986 = vmatmul.mubr.f32.gmra.mrb[34].mxu1 %v4771_v29  ;;  %12261 = vmatprep.subr.bf16.mxu0 %v16616_v13  ;;  %v2023_v14 = vld [vmem:[#allocation2 + $0x1d9] sm:$0x3f]  ;;  %v8627_v29 = vld [vmem:[%s17878_s4 + $0x440] sm:$0xff]  ;;  %v18160_v25 = vld [vmem:[#allocation7_spill] sm:$0xff] }
 0x23e   :  { %10988 = vmatprep.mubr.f32.mxu1 %v4772_v18  ;;  %12519 = vmatpush3.bf16.msra.mxu1 %v16270_v59  ;;  %v4774_v59 = vld [vmem:[#allocation3 + $0xb0] sm:$0xff]  ;;  %v8628_v18 = vld [vmem:[%s17878_s4 + $0x448] sm:$0xff]  ;;  %v2035_v6 = vmul.f32 %v2023_v14, %v18160_v25  ;;  %v8630_v14 = vld [vmem:[%s17878_s4 + $0x458] sm:$0xff] }
 0x23f   :  { %12521 = vmatprep.subr.bf16.mxu1 %v16279_v39  ;;  %10586 = vmatmul.mubr.f32.gmra.mrb[34].mxu0 %v3431_v43  ;;  %v3434_v43 = vld [vmem:[#allocation3 + $0x51] sm:$0xff]  ;;  %v16654_v4 = vpack.c.bf16 %v8628_v18, %v8627_v29  ;;  %v4777_v18 = vld [vmem:[#allocation3 + $0xc8] sm:$0xff] }
 0x240   :  { %10588 = vmatprep.mubr.f32.mxu0 %v3432_v9  ;;  %12263 = vmatpush3.bf16.msra.mxu0 %v16616_v13  ;;  %v18159_v9 = vld [vmem:[#allocation6_spill] sm:$0xff]  ;;  %v18161_v25 = vld [vmem:[#allocation8_spill] sm:$0xff] }
 0x241   :  { %10989 = vmatmul.mubr.f32.gmra.mrb[36].mxu1 %v4773_v62  ;;  %12265 = vmatprep.subr.bf16.mxu0 %v16628_v20  ;;  %v2011_v62 = vmul.f32 %v1999_v55, %v18159_v9  ;;  %v8629_v55 = vld [vmem:[%s17878_s4 + $0x450] sm:$0xff] }
 0x242   :  { %10991 = vmatprep.mubr.f32.mxu1 %v4774_v59  ;;  %12523 = vmatpush3.bf16.msra.mxu1 %v16279_v39  ;;  %v4775_v59 = vld [vmem:[#allocation3 + $0xb8] sm:$0xff] }
 0x243   :  { %12525 = vmatprep.subr.bf16.mxu1 %v16311_v2  ;;  %10589 = vmatmul.mubr.f32.gmra.mrb[36].mxu0 %v3433_v58  ;;  %v2059_v39 = vld [vmem:[#allocation2 + $0x1da] sm:$0x3f]  ;;  %v2047_v9 = vadd.f32 %v2035_v6, %v2011_v62  ;;  %v8631_v62 = vld [vmem:[%s17878_s4 + $0x460] sm:$0xff]  ;;  %v8632_v6 = vld [vmem:[%s17878_s4 + $0x468] sm:$0xff] }
 0x244   :  { %10591 = vmatprep.mubr.f32.mxu0 %v3434_v43  ;;  %12267 = vmatpush3.bf16.msra.mxu0 %v16628_v20  ;;  %v3435_v58 = vld [vmem:[#allocation3 + $0x59] sm:$0xff]  ;;  %v3436_v43 = vld [vmem:[#allocation3 + $0x61] sm:$0xff]  ;;  %v2071_v29 = vmul.f32 %v2059_v39, %v18161_v25  ;;  %v3438_v39 = vld [vmem:[#allocation3 + $0x71] sm:$0xff]  ;;  %v16682_v25 = vpack.c.bf16 %v8632_v6, %v8631_v62 }
 0x245   :  { %10992 = vmatmul.mubr.f32.gmra.mrb[38].mxu1 %v4775_v59  ;;  %12269 = vmatprep.subr.bf16.mxu0 %v16640_v31  ;;  %v16667_v59 = vpack.c.bf16 %v8630_v14, %v8629_v55  ;;  %v4933_v14 = vld [vmem:[#allocation3 + $0x81] sm:$0xff] }
 0x246   :  { %10994 = vmatprep.mubr.f32.mxu1 %v4776_v52  ;;  %12527 = vmatpush3.bf16.msra.mxu1 %v16311_v2  ;;  %v2086_v2 = vld [vmem:[#allocation2 + $0x1e8] sm:$0x3f]  ;;  %v4778_v52 = vld [vmem:[#allocation3 + $0xd0] sm:$0xff]  ;;  %v8764_v62 = vld [vmem:[%s17878_s4 + $0x80] sm:$0xff] }
 0x247   :  { %12529 = vmatprep.subr.bf16.mxu1 %v16346_v48  ;;  %10592 = vmatmul.mubr.f32.gmra.mrb[38].mxu0 %v3435_v58  ;;  %v2083_v58 = vadd.f32 %v2071_v29, %v2047_v9  ;;  %v8633_v9 = vld [vmem:[%s17878_s4 + $0x470] sm:$0xff]  ;;  %v8634_v29 = vld [vmem:[%s17878_s4 + $0x478] sm:$0xff]  ;;  %v8765_v6 = vld [vmem:[%s17878_s4 + $0x88] sm:$0xff] }
 0x248   :  { %10594 = vmatprep.mubr.f32.mxu0 %v3436_v43  ;;  %12271 = vmatpush3.bf16.msra.mxu0 %v16640_v31  ;;  %v18162_v43 = vld [vmem:[#allocation9_spill] sm:$0xff] }
 0x249   :  { %10995 = vmatmul.mubr.f32.gmra.mrb[40].mxu1 %v4777_v18  ;;  %12273 = vmatprep.subr.bf16.mxu0 %v16654_v4  ;;  %v2098_v55 = vmul.f32 %v2086_v2, %v18162_v43  ;;  %v18163_v18 = vld [vmem:[#allocation10_spill] sm:$0xff] }
 0x24a   :  { %10997 = vmatprep.mubr.f32.mxu1 %v4778_v52  ;;  %12531 = vmatpush3.bf16.msra.mxu1 %v16346_v48  ;;  %v2113_v48 = vld [vmem:[#allocation2 + $0x1e9] sm:$0x3f]  ;;  %v16695_v52 = vpack.c.bf16 %v8634_v29, %v8633_v9  ;;  %v8767_v9 = vld [vmem:[%s17878_s4 + $0x98] sm:$0xff] }
 0x24b   :  { %12533 = vmatprep.subr.bf16.mxu1 %v16351_v26  ;;  %10595 = vmatmul.mubr.f32.gmra.mrb[40].mxu0 %v3437_v47  ;;  %v3439_v47 = vld [vmem:[#allocation3 + $0x79] sm:$0xff]  ;;  %v2125_v2 = vmul.f32 %v2113_v48, %v18163_v18  ;;  %v2192_v48 = vld [vmem:[#allocation2 + $0x1e9] sm:$0xff] }
 0x24c   :  { %10597 = vmatprep.mubr.f32.mxu0 %v3438_v39  ;;  %12275 = vmatpush3.bf16.msra.mxu0 %v16654_v4  ;;  %v2204_v18 = vmul.f32 %v2192_v48, %v13994_v60 }
 0x24d   :  { %10998 = vmatmul.mubr.f32.gmra.mrb[42].mxu1 %v1587_v49  ;;  %12277 = vmatprep.subr.bf16.mxu0 %v16667_v59  ;;  %v2110_v49 = vadd.f32 %v2098_v55, %v2083_v58  ;;  %v18164_v58 = vld [vmem:[#allocation11_spill] sm:$0xff]  ;;  %v2167_v55 = vld [vmem:[#allocation2 + $0x1f8] sm:$0x3f] }
 0x24e   :  { %12535 = vmatpush3.bf16.msra.mxu1 %v16351_v26  ;;  %11032 = vmatprep.mubr.f32.mxu1 %v4933_v14  ;;  %v2140_v26 = vld [vmem:[#allocation2 + $0x1ea] sm:$0x3f]  ;;  %v2193_v14 = vld [vmem:[#allocation2 + $0x1f1] sm:$0xff] }
 0x24f   :  { %12537 = vmatprep.subr.bf16.mxu1 %v16384_v1  ;;  %10598 = vmatmul.mubr.f32.gmra.mrb[42].mxu0 %v3439_v47  ;;  %v2137_v39 = vadd.f32 %v2125_v2, %v2110_v49  ;;  %v2152_v43 = vmul.f32 %v2140_v26, %v18164_v58  ;;  %v8766_v47 = vld [vmem:[%s17878_s4 + $0x90] sm:$0xff]  ;;  %v2194_v49 = vld [vmem:[#allocation2 + $0x1f9] sm:$0x3f] }
 0x250   :  { %12279 = vmatpush3.bf16.msra.mxu0 %v16667_v59  ;;  %10632 = vmatprep.mubr.f32.mxu0 %v3594_v37  ;;  %v2179_v37 = vmul.f32 %v2167_v55, %v13991_v57  ;;  %v4934_v2 = vld [vmem:[#allocation3 + $0x89] sm:$0xff]  ;;  %v16723_v58 = vpack.c.bf16 %v8767_v9, %v8766_v47  ;;  %v8768_v57 = vld [vmem:[%s17878_s4 + $0xa0] sm:$0xff]  ;;  %v3596_v55 = vld [vmem:[#allocation3 + $0x32] sm:$0xff] }
 0x251   :  { %12281 = vmatprep.subr.bf16.mxu0 %v16682_v25  ;;  %v2164_v29 = vadd.f32 %v2152_v43, %v2137_v39  ;;  %v2228_v26 = vld [vmem:[#allocation2 + $0x1ea] sm:$0xff]  ;;  %v2206_v43 = vmul.f32 %v2194_v49, %v13994_v60  ;;  %v2230_v9 = vld [vmem:[#allocation2 + $0x1fa] sm:$0x3f] }
 0x252   :  { %12539 = vmatpush3.bf16.msra.mxu1 %v16384_v1  ;;  %v16708_v1 = vpack.c.bf16 %v8765_v6, %v8764_v62  ;;  %v4935_v62 = vld [vmem:[#allocation3 + $0x91] sm:$0xff]  ;;  %v8769_v39 = vld [vmem:[%s17878_s4 + $0xa8] sm:$0xff]  ;;  %v2240_v47 = vmul.f32 %v16151_v10, %v2228_v26 }
 0x253   :  { %12541 = vmatprep.subr.bf16.mxu1 %v16558_v15  ;;  %v3595_v6 = vld [vmem:[#allocation3 + $0x2a] sm:$0xff]  ;;  %v2191_v48 = vadd.f32 %v2179_v37, %v2164_v29  ;;  %v16740_v49 = vpack.c.bf16 %v8769_v39, %v8768_v57 }
 0x254   :  { %12283 = vmatpush3.bf16.msra.mxu0 %v16682_v25  ;;  %v8770_v29 = vld [vmem:[%s17878_s4 + $0xb0] sm:$0xff] }
 0x255   :  { %12285 = vmatprep.subr.bf16.mxu0 %v16695_v52  ;;  %v2218_v37 = vadd.f32 %v2206_v43, %v2191_v48  ;;  %v3599_v39 = vld [vmem:[#allocation3 + $0x4a] sm:$0xff] }
 0x256   :  { %12543 = vmatpush3.bf16.msra.mxu1 %v16558_v15  ;;  %v2205_v15 = vmul.f32 %v2193_v14, %v13994_v60  ;;  %v2216_v14 = vadd.f32 %v2204_v18, %v16296_v45  ;;  %v4937_v60 = vld [vmem:[#allocation3 + $0xa1] sm:$0xff]  ;;  %v2242_v18 = vmul.f32 %v16151_v10, %v2230_v9 }
 0x257   :  { %12545 = vmatprep.subr.bf16.mxu1 %v16600_v3  ;;  %v3597_v45 = vld [vmem:[#allocation3 + $0x3a] sm:$0xff]  ;;  %v8773_v43 = vld [vmem:[%s17878_s4 + $0xc8] sm:$0xff] }
 0x258   :  { %12287 = vmatpush3.bf16.msra.mxu0 %v16695_v52  ;;  %v2254_v48 = vadd.f32 %v2242_v18, %v2218_v37 }
 0x259   :  { %11033 = vmatmul.mubr.f32.vlgmr.msra.gmra.mrb[32].mxu1 %v4934_v2  ;;  %12577 = vmatprep.subr.bf16.mxu0 %v16708_v1  ;;  %v2217_v2 = vadd.f32 %v2205_v15, %v16303_v30  ;;  %v8771_v30 = vld [vmem:[%s17878_s4 + $0xb8] sm:$0xff]  ;;  %v4938_v15 = vld [vmem:[#allocation3 + $0xa9] sm:$0xff] }
 0x25a   :  { %11035 = vmatprep.mubr.f32.mxu1 %v4935_v62  ;;  %12547 = vmatpush3.bf16.msra.mxu1 %v16600_v3  ;;  %v4936_v3 = vld [vmem:[#allocation3 + $0x99] sm:$0xff]  ;;  %v2241_v62 = vmul.f32 %v16151_v10, %v2229_v24  ;;  %v3598_v24 = vld [vmem:[#allocation3 + $0x42] sm:$0xff]  ;;  %v16753_v57 = vpack.c.bf16 %v8771_v30, %v8770_v29  ;;  %v2266_v18 = vadd.f32 %v16538_v38, %v2254_v48  ;;  %v8778_v48 = vld [vmem:[%s17878_s4 + $0xf0] sm:$0xff] }
 0x25b   :  { %12549 = vmatprep.subr.bf16.mxu1 %v16616_v13  ;;  %10633 = vmatmul.mubr.f32.vlgmr.msra.gmra.mrb[32].mxu0 %v3595_v6  ;;  %v4939_v6 = vld [vmem:[#allocation3 + $0xb1] sm:$0xff]  ;;  %v8772_v10 = vld [vmem:[%s17878_s4 + $0xc0] sm:$0xff] }
 0x25c   :  { %10635 = vmatprep.mubr.f32.mxu0 %v3596_v55  ;;  %12579 = vmatpush3.bf16.msra.mxu0 %v16708_v1  ;;  %v2253_v26 = vadd.f32 %v2241_v62, %v2217_v2  ;;  %v3600_v55 = vld [vmem:[#allocation3 + $0x52] sm:$0xff]  ;;  %v3601_v2 = vld [vmem:[#allocation3 + $0x5a] sm:$0xff] }
 0x25d   :  { %11036 = vmatmul.mubr.f32.gmra.mrb[34].mxu1 %v4936_v3  ;;  %12581 = vmatprep.subr.bf16.mxu0 %v16723_v58  ;;  %v8774_v62 = vld [vmem:[%s17878_s4 + $0xd0] sm:$0xff] }
 0x25e   :  { %11038 = vmatprep.mubr.f32.mxu1 %v4937_v60  ;;  %12551 = vmatpush3.bf16.msra.mxu1 %v16616_v13  ;;  %v2252_v13 = vadd.f32 %v2240_v47, %v2216_v14  ;;  %v4940_v14 = vld [vmem:[#allocation3 + $0xb9] sm:$0xff]  ;;  %v16765_v47 = vpack.c.bf16 %v8773_v43, %v8772_v10  ;;  %v2265_v9 = vadd.f32 %v16538_v38, %v2253_v26  ;;  %v8777_v26 = vld [vmem:[%s17878_s4 + $0xe8] sm:$0xff] }
 0x25f   :  { %12553 = vmatprep.subr.bf16.mxu1 %v16628_v20  ;;  %10636 = vmatmul.mubr.f32.gmra.mrb[34].mxu0 %v3597_v45  ;;  %v8775_v60 = vld [vmem:[%s17878_s4 + $0xd8] sm:$0xff]  ;;  %v3602_v45 = vld [vmem:[#allocation3 + $0x62] sm:$0xff] }
 0x260   :  { %10638 = vmatprep.mubr.f32.mxu0 %v3598_v24  ;;  %12583 = vmatpush3.bf16.msra.mxu0 %v16723_v58  ;;  %v16768_v3 = vadd.f32 %v16538_v38, %v2252_v13  ;;  %v2277_v30 = vmax.f32 %v2265_v9, 0.0  ;;  %v4942_v24 = vld [vmem:[#allocation3 + $0xc9] sm:$0xff]  ;;  %v16782_v37 = vpack.c.bf16 %v8775_v60, %v8774_v62  ;;  %v8776_v13 = vld [vmem:[%s17878_s4 + $0xe0] sm:$0xff]  ;;  %v13615_v38 = vmov 0.0   ;;  %v5385_v60 = vld [vmem:[%s17878_s4 + $0x18] sm:$0xff] }
 0x261   :  { %11039 = vmatmul.mubr.f32.gmra.mrb[36].mxu1 %v4938_v15  ;;  %12585 = vmatprep.subr.bf16.mxu0 %v16740_v49  ;;  %v3603_v15 = vld [vmem:[#allocation3 + $0x6a] sm:$0xff]  ;;  %v4944_v10 = vld [vmem:[#allocation3 + $0xd9] sm:$0xff]  ;;  %801 = vst [vmem:[#allocation3 + $0x1d8] sm:$0xff] %v13615_v38  ;;  %802 = vst [vmem:[#allocation3 + $0x1e0] sm:$0xff] %v13615_v38  ;;  %v16797_v43 = vpack.c.bf16 %v8777_v26, %v8776_v13 }
 0x262   :  { %11041 = vmatprep.mubr.f32.mxu1 %v4939_v6  ;;  %12555 = vmatpush3.bf16.msra.mxu1 %v16628_v20  ;;  %v4941_v20 = vld [vmem:[#allocation3 + $0xc1] sm:$0xff]  ;;  %v2276_v29 = vmax.f32 %v16768_v3, 0.0  ;;  %2289 = vst [vmem:[#allocation3 + $0x1d0] sm:$0xff] %v2277_v30  ;;  %v3604_v6 = vld [vmem:[#allocation3 + $0x72] sm:$0xff] }
 0x263   :  { %12557 = vmatprep.subr.bf16.mxu1 %v16640_v31  ;;  %10639 = vmatmul.mubr.f32.gmra.mrb[36].mxu0 %v3599_v39  ;;  %v2278_v39 = vmax.f32 %v2266_v18, 0.0  ;;  %v5382_v9 = vld [vmem:[%s17878_s4] sm:$0xff]  ;;  %v5100_v30 = vld [vmem:[#allocation3 + $0x92] sm:$0xff]  ;;  %v5387_v18 = vld [vmem:[%s17878_s4 + $0x28] sm:$0xff] }
 0x264   :  { %10641 = vmatprep.mubr.f32.mxu0 %v3600_v55  ;;  %12587 = vmatpush3.bf16.msra.mxu0 %v16740_v49  ;;  %2288 = vst [vmem:[#allocation3 + $0x1c8] sm:$0xff] %v2276_v29  ;;  %v3605_v55 = vld [vmem:[#allocation3 + $0x7a] sm:$0xff]  ;;  %v5102_v26 = vld [vmem:[#allocation3 + $0xa2] sm:$0xff] }
 0x265   :  { %11042 = vmatmul.mubr.f32.gmra.mrb[38].mxu1 %v4940_v14  ;;  %12589 = vmatprep.subr.bf16.mxu0 %v16753_v57  ;;  %2290 = vst [vmem:[#allocation3 + $0x1d8] sm:$0x3f] %v2278_v39  ;;  %v8779_v14 = vld [vmem:[%s17878_s4 + $0xf8] sm:$0xff]  ;;  %v5388_v39 = vld [vmem:[%s17878_s4 + $0x30] sm:$0xff]  ;;  %v5402_v38 = vld [vmem:[#allocation3 + $0x121] sm:$0xff] }
 0x266   :  { %11044 = vmatprep.mubr.f32.mxu1 %v4941_v20  ;;  %12559 = vmatpush3.bf16.msra.mxu1 %v16640_v31  ;;  %v4943_v31 = vld [vmem:[#allocation3 + $0xd1] sm:$0xff]  ;;  %v5398_v20 = vld [vmem:[#allocation3 + $0x101] sm:$0xff] }
 0x267   :  { %12561 = vmatprep.subr.bf16.mxu1 %v16654_v4  ;;  %10642 = vmatmul.mubr.f32.gmra.mrb[38].mxu0 %v3601_v2  ;;  %v5383_v2 = vld [vmem:[%s17878_s4 + $0x8] sm:$0xff]  ;;  %v5101_v13 = vld [vmem:[#allocation3 + $0x9a] sm:$0xff] }
 0x268   :  { %10644 = vmatprep.mubr.f32.mxu0 %v3602_v45  ;;  %12591 = vmatpush3.bf16.msra.mxu0 %v16753_v57  ;;  %v16821_v62 = vpack.c.bf16 %v5383_v2, %v5382_v9  ;;  %v5099_v45 = vld [vmem:[#allocation3 + $0x8a] sm:$0xff]  ;;  %v5105_v2 = vld [vmem:[#allocation3 + $0xba] sm:$0xff] }
 0x269   :  { %11045 = vmatmul.mubr.f32.gmra.mrb[40].mxu1 %v4942_v24  ;;  %12593 = vmatprep.subr.bf16.mxu0 %v16765_v47  ;;  %v5404_v9 = vld [vmem:[#allocation3 + $0x131] sm:$0xff] }
 0x26a   :  { %11047 = vmatprep.mubr.f32.mxu1 %v4943_v31  ;;  %12563 = vmatpush3.bf16.msra.mxu1 %v16654_v4  ;;  %v5098_v4 = vld [vmem:[#allocation3 + $0x82] sm:$0xff] }
 0x26b   :  { %12565 = vmatprep.subr.bf16.mxu1 %v16667_v59  ;;  %10645 = vmatmul.mubr.f32.gmra.mrb[40].mxu0 %v3603_v15  ;;  %v5386_v31 = vld [vmem:[%s17878_s4 + $0x20] sm:$0xff]  ;;  %v5400_v15 = vld [vmem:[#allocation3 + $0x111] sm:$0xff] }
 0x26c   :  { %10647 = vmatprep.mubr.f32.mxu0 %v3604_v6  ;;  %12595 = vmatpush3.bf16.msra.mxu0 %v16765_v47  ;;  %v5401_v6 = vld [vmem:[#allocation3 + $0x119] sm:$0xff] }
 0x26d   :  { %11048 = vmatmul.mubr.f32.gmra.mrb[42].mxu1 %v4944_v10  ;;  %12597 = vmatprep.subr.bf16.mxu0 %v16782_v37  ;;  %v5389_v10 = vld [vmem:[%s17878_s4 + $0x38] sm:$0xff] }
 0x26e   :  { %12567 = vmatpush3.bf16.msra.mxu1 %v16667_v59  ;;  %11082 = vmatprep.mubr.f32.mxu1 %v5098_v4  ;;  %v16809_v59 = vpack.c.bf16 %v8779_v14, %v8778_v48  ;;  %v5103_v4 = vld [vmem:[#allocation3 + $0xaa] sm:$0xff]  ;;  %v5390_v14 = vld [vmem:[%s17878_s4 + $0x40] sm:$0xff] }
 0x26f   :  { %12569 = vmatprep.subr.bf16.mxu1 %v16682_v25  ;;  %10648 = vmatmul.mubr.f32.gmra.mrb[42].mxu0 %v3605_v55  ;;  %v5104_v55 = vld [vmem:[#allocation3 + $0xb2] sm:$0xff]  ;;  %v5403_v48 = vld [vmem:[#allocation3 + $0x129] sm:$0xff] }
 0x270   :  { %12599 = vmatpush3.bf16.msra.mxu0 %v16782_v37  ;;  %11132 = vmatprep.mubr.f32.mxu0 %v5398_v20  ;;  %v5391_v20 = vld [vmem:[%s17878_s4 + $0x48] sm:$0xff] }
 0x271   :  { %12601 = vmatprep.subr.bf16.mxu0 %v16797_v43 }
 0x272   :  { %12571 = vmatpush3.bf16.msra.mxu1 %v16682_v25  ;;  %v5384_v25 = vld [vmem:[%s17878_s4 + $0x10] sm:$0xff] }
 0x273   :  { %12573 = vmatprep.subr.bf16.mxu1 %v16695_v52  ;;  %v16833_v24 = vpack.c.bf16 %v5385_v60, %v5384_v25  ;;  %v5106_v25 = vld [vmem:[#allocation3 + $0xc2] sm:$0xff]  ;;  %v5405_v60 = vld [vmem:[#allocation3 + $0x139] sm:$0xff] }
 0x274   :  { %12603 = vmatpush3.bf16.msra.mxu0 %v16797_v43 }
 0x275   :  { %12605 = vmatprep.subr.bf16.mxu0 %v16809_v59 }
 0x276   :  { %12575 = vmatpush3.bf16.msra.mxu1 %v16695_v52  ;;  %v5399_v52 = vld [vmem:[#allocation3 + $0x109] sm:$0xff] }
 0x277   :  { %12865 = vmatprep.subr.bf16.mxu1 %v16708_v1 }
 0x278   :  { %12607 = vmatpush3.bf16.msra.mxu0 %v16809_v59 }
 0x279   :  { %11083 = vmatmul.mubr.f32.vlgmr.msra.gmra.mrb[32].mxu1 %v5099_v45  ;;  %12609 = vmatprep.subr.bf16.mxu0 %v16821_v62  ;;  %v5392_v45 = vld [vmem:[%s17878_s4 + $0x50] sm:$0xff] }
 0x27a   :  { %11085 = vmatprep.mubr.f32.mxu1 %v5100_v30  ;;  %12867 = vmatpush3.bf16.msra.mxu1 %v16708_v1  ;;  %v16845_v1 = vpack.c.bf16 %v5387_v18, %v5386_v31  ;;  %v5393_v30 = vld [vmem:[%s17878_s4 + $0x58] sm:$0xff]  ;;  %v5107_v31 = vld [vmem:[#allocation3 + $0xca] sm:$0xff] }
 0x27b   :  { %12869 = vmatprep.subr.bf16.mxu1 %v16723_v58  ;;  %11133 = vmatmul.mubr.f32.vlgmr.msra.gmra.mrb[44].mxu0 %v5399_v52  ;;  %v5406_v52 = vld [vmem:[#allocation3 + $0x141] sm:$0xff]  ;;  %v5108_v18 = vld [vmem:[#allocation3 + $0xd2] sm:$0xff] }
 0x27c   :  { %11135 = vmatprep.mubr.f32.mxu0 %v5400_v15  ;;  %12611 = vmatpush3.bf16.msra.mxu0 %v16821_v62  ;;  %v5407_v15 = vld [vmem:[#allocation3 + $0x149] sm:$0xff] }
 0x27d   :  { %11086 = vmatmul.mubr.f32.gmra.mrb[34].mxu1 %v5101_v13  ;;  %12613 = vmatprep.subr.bf16.mxu0 %v16833_v24  ;;  %v5394_v13 = vld [vmem:[%s17878_s4 + $0x60] sm:$0xff] }
 0x27e   :  { %11088 = vmatprep.mubr.f32.mxu1 %v5102_v26  ;;  %12871 = vmatpush3.bf16.msra.mxu1 %v16723_v58  ;;  %v16857_v58 = vpack.c.bf16 %v5389_v10, %v5388_v39  ;;  %v5395_v26 = vld [vmem:[%s17878_s4 + $0x68] sm:$0xff]  ;;  %v5109_v39 = vld [vmem:[#allocation3 + $0xda] sm:$0xff] }
 0x27f   :  { %12873 = vmatprep.subr.bf16.mxu1 %v16740_v49  ;;  %11136 = vmatmul.mubr.f32.gmra.mrb[46].mxu0 %v5401_v6  ;;  %v5408_v6 = vld [vmem:[#allocation3 + $0x151] sm:$0xff]  ;;  %v6895_v10 = vld [vmem:[#allocation3 + $0x161] sm:$0xff] }
 0x280   :  { %11138 = vmatprep.mubr.f32.mxu0 %v5402_v38  ;;  %12615 = vmatpush3.bf16.msra.mxu0 %v16833_v24  ;;  %v5409_v38 = vld [vmem:[#allocation3 + $0x159] sm:$0xff] }
 0x281   :  { %11089 = vmatmul.mubr.f32.gmra.mrb[36].mxu1 %v5103_v4  ;;  %12617 = vmatprep.subr.bf16.mxu0 %v16845_v1  ;;  %v5396_v4 = vld [vmem:[%s17878_s4 + $0x70] sm:$0xff] }
 0x282   :  { %11091 = vmatprep.mubr.f32.mxu1 %v5104_v55  ;;  %12875 = vmatpush3.bf16.msra.mxu1 %v16740_v49  ;;  %v16869_v49 = vpack.c.bf16 %v5391_v20, %v5390_v14  ;;  %v5397_v55 = vld [vmem:[%s17878_s4 + $0x78] sm:$0xff]  ;;  %v8781_v14 = vld [vmem:[%s17878_s4 + $0x108] sm:$0xff] }
 0x283   :  { %12877 = vmatprep.subr.bf16.mxu1 %v16753_v57  ;;  %11139 = vmatmul.mubr.f32.gmra.mrb[48].mxu0 %v5403_v48  ;;  %v8780_v48 = vld [vmem:[%s17878_s4 + $0x100] sm:$0xff]  ;;  %v6896_v20 = vld [vmem:[#allocation3 + $0x169] sm:$0xff] }
 0x284   :  { %11141 = vmatprep.mubr.f32.mxu0 %v5404_v9  ;;  %12619 = vmatpush3.bf16.msra.mxu0 %v16845_v1  ;;  %v16919_v7 = vpack.c.bf16 %v8781_v14, %v8780_v48  ;;  %v16930_v9 = vld [vmem:[#allocation3 + $0x171] sm:$0xff]  ;;  %v18171_v14 = vmax.f32 %v16555_v41, 0.0  ;;  %v18172_v41 = vmax.f32 %v16566_v23, 0.0 }
 0x285   :  { %11092 = vmatmul.mubr.f32.gmra.mrb[38].mxu1 %v5105_v2  ;;  %12621 = vmatprep.subr.bf16.mxu0 %v16857_v58  ;;  %v8807_v23 = vld [vmem:[%s17878_s4 + $0x1d8] sm:$0xff] }
 0x286   :  { %11094 = vmatprep.mubr.f32.mxu1 %v5106_v25  ;;  %12879 = vmatpush3.bf16.msra.mxu1 %v16753_v57  ;;  %v16881_v57 = vpack.c.bf16 %v5393_v30, %v5392_v45  ;;  %v8785_v25 = vld [vmem:[%s17878_s4 + $0x128] sm:$0xff]  ;;  %v16990_v30 = vpack.c.bf16 %v8789_v61, %v8788_v11  ;;  %v17181_v11 = vld [vmem:[#allocation3 + $0x1b8] sm:$0xff] }
 0x287   :  { %12881 = vmatprep.subr.bf16.mxu1 %v16765_v47  ;;  %11142 = vmatmul.mubr.f32.gmra.mrb[50].mxu0 %v5405_v60  ;;  %v6898_v60 = vld [vmem:[#allocation3 + $0x179] sm:$0xff]  ;;  %v17184_v61 = vld [vmem:[#allocation3 + $0x162] sm:$0xff] }
 0x288   :  { %11144 = vmatprep.mubr.f32.mxu0 %v5406_v52  ;;  %12623 = vmatpush3.bf16.msra.mxu0 %v16857_v58 }
 0x289   :  { %11095 = vmatmul.mubr.f32.gmra.mrb[40].mxu1 %v5107_v31  ;;  %12625 = vmatprep.subr.bf16.mxu0 %v16869_v49  ;;  %v8798_v31 = vld [vmem:[%s17878_s4 + $0x190] sm:$0xff] }
 0x28a   :  { %11097 = vmatprep.mubr.f32.mxu1 %v5108_v18  ;;  %12883 = vmatpush3.bf16.msra.mxu1 %v16765_v47  ;;  %v16893_v47 = vpack.c.bf16 %v5395_v26, %v5394_v13  ;;  %v8799_v18 = vld [vmem:[%s17878_s4 + $0x198] sm:$0xff]  ;;  %v5677_v26 = vld [vmem:[#allocation3 + $0x10a] sm:$0xff] }
 0x28b   :  { %12885 = vmatprep.subr.bf16.mxu1 %v16782_v37  ;;  %11145 = vmatmul.mubr.f32.gmra.mrb[52].mxu0 %v5407_v15  ;;  %v17073_v15 = vld [vmem:[#allocation3 + $0x170] sm:$0xff]  ;;  %v17076_v13 = vpack.c.bf16 %v8799_v18, %v8798_v31  ;;  %v8817_v31 = vld [vmem:[%s17878_s4 + $0x228] sm:$0xff]  ;;  %v13595_v18 = vld [vmem:[#allocation3 + $0x118] sm:$0xff] }
 0x28c   :  { %11147 = vmatprep.mubr.f32.mxu0 %v5408_v6  ;;  %12627 = vmatpush3.bf16.msra.mxu0 %v16869_v49  ;;  %v8800_v6 = vld [vmem:[%s17878_s4 + $0x1a0] sm:$0xff] }
 0x28d   :  { %11098 = vmatmul.mubr.f32.gmra.mrb[42].mxu1 %v5109_v39  ;;  %12629 = vmatprep.subr.bf16.mxu0 %v16881_v57  ;;  %v17087_v39 = vld [vmem:[#allocation3 + $0x112] sm:$0xff] }
 0x28e   :  { %12887 = vmatpush3.bf16.msra.mxu1 %v16782_v37  ;;  %11582 = vmatprep.mubr.f32.mxu1 %v6895_v10  ;;  %v16907_v37 = vpack.c.bf16 %v5397_v55, %v5396_v4  ;;  %v18168_v10 = vmax.f32 %v16525_v63, 0.0  ;;  %v17099_v4 = vld [vmem:[#allocation3 + $0x11a] sm:$0xff]  ;;  %v8802_v55 = vld [vmem:[%s17878_s4 + $0x1b0] sm:$0xff] }
 0x28f   :  { %12889 = vmatprep.subr.bf16.mxu1 %v16797_v43  ;;  %11148 = vmatmul.mubr.f32.gmra.mrb[54].mxu0 %v5409_v38  ;;  %v18169_v38 = vmax.f32 %v16545_v54, 0.0  ;;  %v8803_v63 = vld [vmem:[%s17878_s4 + $0x1b8] sm:$0xff]  ;;  %v18170_v54 = vmax.f32 %v16551_v46, 0.0  ;;  %v8805_v46 = vld [vmem:[%s17878_s4 + $0x1c8] sm:$0xff] }
 0x290   :  { %12631 = vmatpush3.bf16.msra.mxu0 %v16881_v57  ;;  %11182 = vmatprep.mubr.f32.mxu0 %v1956_v40  ;;  %v8782_v40 = vld [vmem:[%s17878_s4 + $0x110] sm:$0xff]  ;;  %v17116_v48 = vpack.c.bf16 %v8803_v63, %v8802_v55 }
 0x291   :  { %12633 = vmatprep.subr.bf16.mxu0 %v16893_v47  ;;  %v17261_v55 = vld [vmem:[#allocation3 + $0x18a] sm:$0xff] }
 0x292   :  { %12891 = vmatpush3.bf16.msra.mxu1 %v16797_v43  ;;  %v8783_v43 = vld [vmem:[%s17878_s4 + $0x118] sm:$0xff]  ;;  %v13598_v63 = vld [vmem:[#allocation3 + $0x130] sm:$0xff] }
 0x293   :  { %12893 = vmatprep.subr.bf16.mxu1 %v16809_v59  ;;  %v16933_v2 = vpack.c.bf16 %v8783_v43, %v8782_v40  ;;  %v8804_v40 = vld [vmem:[%s17878_s4 + $0x1c0] sm:$0xff]  ;;  %v17131_v43 = vld [vmem:[#allocation3 + $0x132] sm:$0xff] }
 0x294   :  { %12635 = vmatpush3.bf16.msra.mxu0 %v16893_v47 }
 0x295   :  { %12637 = vmatprep.subr.bf16.mxu0 %v16907_v37 }
 0x296   :  { %12895 = vmatpush3.bf16.msra.mxu1 %v16809_v59  ;;  %v8784_v59 = vld [vmem:[%s17878_s4 + $0x120] sm:$0xff] }
 0x297   :  { %12897 = vmatprep.subr.bf16.mxu1 %v16821_v62  ;;  %v16950_v45 = vpack.c.bf16 %v8785_v25, %v8784_v59  ;;  %v17143_v59 = vld [vmem:[#allocation3 + $0x13a] sm:$0xff]  ;;  %v8806_v25 = vld [vmem:[%s17878_s4 + $0x1d0] sm:$0xff] }
 0x298   :  { %12639 = vmatpush3.bf16.msra.mxu0 %v16907_v37 }
 0x299   :  { %11583 = vmatmul.mubr.f32.vlgmr.msra.gmra.mrb[44].mxu1 %v6896_v20  ;;  %12641 = vmatprep.subr.bf16.mxu0 %v16919_v7  ;;  %v17138_v20 = vpack.c.bf16 %v8805_v46, %v8804_v40  ;;  %v8821_v40 = vld [vmem:[%s17878_s4 + $0x248] sm:$0xff]  ;;  %v13599_v46 = vld [vmem:[#allocation3 + $0x138] sm:$0xff] }
 0x29a   :  { %11585 = vmatprep.mubr.f32.mxu1 %v16930_v9  ;;  %12899 = vmatpush3.bf16.msra.mxu1 %v16821_v62  ;;  %v6899_v62 = vld [vmem:[#allocation3 + $0x181] sm:$0xff] }
 0x29b   :  { %12901 = vmatprep.subr.bf16.mxu1 %v16833_v24  ;;  %11183 = vmatmul.mubr.f32.vlgmr.msra.gmra.mrb[44].mxu0 %v1957_v27  ;;  %v16965_v27 = vld [vmem:[#allocation3 + $0x191] sm:$0xff] }
 0x29c   :  { %11185 = vmatprep.mubr.f32.mxu0 %v1958_v22  ;;  %12643 = vmatpush3.bf16.msra.mxu0 %v16919_v7  ;;  %v6900_v22 = vld [vmem:[#allocation3 + $0x189] sm:$0xff] }
 0x29d   :  { %11586 = vmatmul.mubr.f32.gmra.mrb[46].mxu1 %v6898_v60  ;;  %12645 = vmatprep.subr.bf16.mxu0 %v16933_v2  ;;  %v17153_v60 = vld [vmem:[#allocation3 + $0x142] sm:$0xff] }
 0x29e   :  { %11588 = vmatprep.mubr.f32.mxu1 %v6899_v62  ;;  %12903 = vmatpush3.bf16.msra.mxu1 %v16833_v24  ;;  %v16968_v24 = vpack.c.bf16 %v8787_v17, %v8786_v12  ;;  %v17161_v62 = vpack.c.bf16 %v8807_v23, %v8806_v25  ;;  %v17167_v12 = vld [vmem:[#allocation3 + $0x14a] sm:$0xff]  ;;  %v8808_v17 = vld [vmem:[%s17878_s4 + $0x1e0] sm:$0xff] }
 0x29f   :  { %12905 = vmatprep.subr.bf16.mxu1 %v16845_v1  ;;  %11186 = vmatmul.mubr.f32.gmra.mrb[46].mxu0 %v1959_v16  ;;  %v16981_v16 = vld [vmem:[#allocation3 + $0x199] sm:$0xff]  ;;  %v8822_v23 = vld [vmem:[%s17878_s4 + $0x250] sm:$0xff] }
 0x2a0   :  { %11188 = vmatprep.mubr.f32.mxu0 %v1960_v42  ;;  %12647 = vmatpush3.bf16.msra.mxu0 %v16933_v2  ;;  %v18165_v42 = vmax.f32 %v16449_v5, 0.0  ;;  %v8791_v5 = vld [vmem:[%s17878_s4 + $0x158] sm:$0xff] }
 0x2a1   :  { %11589 = vmatmul.mubr.f32.gmra.mrb[48].mxu1 %v6900_v22  ;;  %12649 = vmatprep.subr.bf16.mxu0 %v16950_v45  ;;  %v17012_v52 = vpack.c.bf16 %v8791_v5, %v8790_v35  ;;  %v8809_v22 = vld [vmem:[%s17878_s4 + $0x1e8] sm:$0xff]  ;;  %v8810_v35 = vld [vmem:[%s17878_s4 + $0x1f0] sm:$0xff]  ;;  %v8811_v5 = vld [vmem:[%s17878_s4 + $0x1f8] sm:$0xff] }
 0x2a2   :  { %11591 = vmatprep.mubr.f32.mxu1 %v16965_v27  ;;  %12907 = vmatpush3.bf16.msra.mxu1 %v16845_v1  ;;  %v16987_v1 = vld [vmem:[#allocation3 + $0x1a1] sm:$0xff] }
 0x2a3   :  { %12909 = vmatprep.subr.bf16.mxu1 %v16857_v58  ;;  %11189 = vmatmul.mubr.f32.gmra.mrb[48].mxu0 %v1961_v19  ;;  %v17003_v19 = vld [vmem:[#allocation3 + $0x1a9] sm:$0xff] }
 0x2a4   :  { %11191 = vmatprep.mubr.f32.mxu0 %v18165_v42  ;;  %12651 = vmatpush3.bf16.msra.mxu0 %v16950_v45  ;;  %v17187_v42 = vpack.c.bf16 %v8809_v22, %v8808_v17  ;;  %v8823_v17 = vld [vmem:[%s17878_s4 + $0x258] sm:$0xff]  ;;  %v13601_v22 = vld [vmem:[#allocation3 + $0x148] sm:$0xff] }
 0x2a5   :  { %11592 = vmatmul.mubr.f32.gmra.mrb[50].mxu1 %v16981_v16  ;;  %12653 = vmatprep.subr.bf16.mxu0 %v16968_v24 }
 0x2a6   :  { %11594 = vmatprep.mubr.f32.mxu1 %v16987_v1  ;;  %12911 = vmatpush3.bf16.msra.mxu1 %v16857_v58  ;;  %v17009_v58 = vld [vmem:[#allocation3 + $0x1b1] sm:$0xff] }
 0x2a7   :  { %12913 = vmatprep.subr.bf16.mxu1 %v16869_v49  ;;  %11192 = vmatmul.mubr.f32.gmra.mrb[50].mxu0 %v1963_v51  ;;  %v17025_v51 = vld [vmem:[#allocation3 + $0x1b9] sm:$0xff] }
 0x2a8   :  { %11194 = vmatprep.mubr.f32.mxu0 %v1964_v50  ;;  %12655 = vmatpush3.bf16.msra.mxu0 %v16968_v24  ;;  %v17032_v50 = vpack.c.bf16 %v8793_v32, %v8792_v44  ;;  %v13594_v44 = vld [vmem:[#allocation3 + $0x110] sm:$0xff]  ;;  %v8812_v32 = vld [vmem:[%s17878_s4 + $0x200] sm:$0xff] }
 0x2a9   :  { %11595 = vmatmul.mubr.f32.gmra.mrb[52].mxu1 %v17003_v19  ;;  %12657 = vmatprep.subr.bf16.mxu0 %v16990_v30 }
 0x2aa   :  { %11597 = vmatprep.mubr.f32.mxu1 %v17009_v58  ;;  %12915 = vmatpush3.bf16.msra.mxu1 %v16869_v49  ;;  %v8797_v49 = vld [vmem:[%s17878_s4 + $0x188] sm:$0xff] }
 0x2ab   :  { %12917 = vmatprep.subr.bf16.mxu1 %v16881_v57  ;;  %11195 = vmatmul.mubr.f32.gmra.mrb[52].mxu0 %v1965_v28  ;;  %v8795_v28 = vld [vmem:[%s17878_s4 + $0x178] sm:$0xff] }
 0x2ac   :  { %11197 = vmatprep.mubr.f32.mxu0 %v1966_v53  ;;  %12659 = vmatpush3.bf16.msra.mxu0 %v16990_v30  ;;  %v5676_v53 = vld [vmem:[#allocation3 + $0x102] sm:$0xff]  ;;  %v17048_v36 = vpack.c.bf16 %v8795_v28, %v8794_v21 }
 0x2ad   :  { %11598 = vmatmul.mubr.f32.gmra.mrb[54].mxu1 %v17025_v51  ;;  %12661 = vmatprep.subr.bf16.mxu0 %v17012_v52  ;;  %v8813_v21 = vld [vmem:[%s17878_s4 + $0x208] sm:$0xff] }
 0x2ae   :  { %12919 = vmatpush3.bf16.msra.mxu1 %v16881_v57  ;;  %11632 = vmatprep.mubr.f32.mxu1 %v1968_v8  ;;  %v8796_v8 = vld [vmem:[%s17878_s4 + $0x180] sm:$0xff]  ;;  %v18167_v57 = vmax.f32 %v16486_v34, 0.0  ;;  %v8801_v34 = vld [vmem:[%s17878_s4 + $0x1a8] sm:$0xff]  ;;  %v17215_v28 = vpack.c.bf16 %v8813_v21, %v8812_v32 }
 0x2af   :  { %12921 = vmatprep.subr.bf16.mxu1 %v16893_v47  ;;  %11198 = vmatmul.mubr.f32.gmra.mrb[54].mxu0 %v18166_v0  ;;  %v17060_v33 = vpack.c.bf16 %v8797_v49, %v8796_v8  ;;  %v8815_v0 = vld [vmem:[%s17878_s4 + $0x218] sm:$0xff]  ;;  %v8816_v49 = vld [vmem:[%s17878_s4 + $0x220] sm:$0xff]  ;;  %v8825_v21 = vld [vmem:[%s17878_s4 + $0x268] sm:$0xff] }
 0x2b0   :  { %12663 = vmatpush3.bf16.msra.mxu0 %v17012_v52  ;;  %11232 = vmatprep.mubr.f32.mxu0 %v5676_v53  ;;  %v17225_v53 = vld [vmem:[#allocation3 + $0x16a] sm:$0xff]  ;;  %v17229_v8 = vld [vmem:[#allocation3 + $0x172] sm:$0xff]  ;;  %v8824_v32 = vld [vmem:[%s17878_s4 + $0x260] sm:$0xff] }
 0x2b1   :  { %12665 = vmatprep.subr.bf16.mxu0 %v17032_v50 }
 0x2b2   :  { %12923 = vmatpush3.bf16.msra.mxu1 %v16893_v47  ;;  %v17094_v47 = vpack.c.bf16 %v8801_v34, %v8800_v6  ;;  %v17250_v6 = vpack.c.bf16 %v8817_v31, %v8816_v49  ;;  %v8818_v34 = vld [vmem:[%s17878_s4 + $0x230] sm:$0xff]  ;;  %v13604_v49 = vld [vmem:[#allocation3 + $0x160] sm:$0xff] }
 0x2b3   :  { %12925 = vmatprep.subr.bf16.mxu1 %v16907_v37  ;;  %v8826_v31 = vld [vmem:[%s17878_s4 + $0x270] sm:$0xff] }
 0x2b4   :  { %12667 = vmatpush3.bf16.msra.mxu0 %v17032_v50 }
 0x2b5   :  { %12669 = vmatprep.subr.bf16.mxu0 %v17048_v36 }
 0x2b6   :  { %12927 = vmatpush3.bf16.msra.mxu1 %v16907_v37  ;;  %v17109_v37 = vld [vmem:[#allocation3 + $0x122] sm:$0xff] }
 0x2b7   :  { %12929 = vmatprep.subr.bf16.mxu1 %v16919_v7 }
 0x2b8   :  { %12671 = vmatpush3.bf16.msra.mxu0 %v17048_v36 }
 0x2b9   :  { %11633 = vmatmul.mubr.f32.vlgmr.msra.gmra.mrb[44].mxu1 %v18167_v57  ;;  %12673 = vmatprep.subr.bf16.mxu0 %v17060_v33  ;;  %v17243_v57 = vld [vmem:[#allocation3 + $0x17a] sm:$0xff] }
 0x2ba   :  { %11635 = vmatprep.mubr.f32.mxu1 %v17073_v15  ;;  %12931 = vmatpush3.bf16.msra.mxu1 %v16919_v7  ;;  %v17121_v7 = vld [vmem:[#allocation3 + $0x12a] sm:$0xff] }
 0x2bb   :  { %12933 = vmatprep.subr.bf16.mxu1 %v16933_v2  ;;  %11233 = vmatmul.mubr.f32.vlgmr.msra.gmra.mrb[44].mxu0 %v5677_v26  ;;  %v13596_v26 = vld [vmem:[#allocation3 + $0x120] sm:$0xff] }
 0x2bc   :  { %11235 = vmatprep.mubr.f32.mxu0 %v17087_v39  ;;  %12675 = vmatpush3.bf16.msra.mxu0 %v17060_v33 }
 0x2bd   :  { %11636 = vmatmul.mubr.f32.gmra.mrb[46].mxu1 %v18168_v10  ;;  %12677 = vmatprep.subr.bf16.mxu0 %v17076_v13  ;;  %v8819_v10 = vld [vmem:[%s17878_s4 + $0x238] sm:$0xff] }
 0x2be   :  { %11638 = vmatprep.mubr.f32.mxu1 %v18169_v38  ;;  %12935 = vmatpush3.bf16.msra.mxu1 %v16933_v2  ;;  %v18173_v2 = vmax.f32 %v16581_v56, 0.0  ;;  %v17157_v56 = vld [vmem:[#allocation3 + $0x1a8] sm:$0xff] }
 0x2bf   :  { %12937 = vmatprep.subr.bf16.mxu1 %v16950_v45  ;;  %11236 = vmatmul.mubr.f32.gmra.mrb[46].mxu0 %v17099_v4  ;;  %v13597_v38 = vld [vmem:[#allocation3 + $0x128] sm:$0xff] }
 0x2c0   :  { %11238 = vmatprep.mubr.f32.mxu0 %v17109_v37  ;;  %12679 = vmatpush3.bf16.msra.mxu0 %v17076_v13 }
 0x2c1   :  { %11639 = vmatmul.mubr.f32.gmra.mrb[48].mxu1 %v18170_v54  ;;  %12681 = vmatprep.subr.bf16.mxu0 %v17094_v47  ;;  %v17268_v54 = vpack.c.bf16 %v8819_v10, %v8818_v34  ;;  %v6006_v34 = vld [vmem:[#allocation3 + $0x111] sm:$0xff]  ;;  %v8829_v10 = vld [vmem:[%s17878_s4 + $0x288] sm:$0xff] }
 0x2c2   :  { %11641 = vmatprep.mubr.f32.mxu1 %v18171_v14  ;;  %12939 = vmatpush3.bf16.msra.mxu1 %v16950_v45  ;;  %v17163_v45 = vld [vmem:[#allocation3 + $0x1b0] sm:$0xff]  ;;  %v8820_v14 = vld [vmem:[%s17878_s4 + $0x240] sm:$0xff] }
 0x2c3   :  { %12941 = vmatprep.subr.bf16.mxu1 %v16968_v24  ;;  %11239 = vmatmul.mubr.f32.gmra.mrb[48].mxu0 %v17121_v7  ;;  %v17286_v25 = vpack.c.bf16 %v8821_v40, %v8820_v14  ;;  %v13606_v14 = vld [vmem:[#allocation3 + $0x178] sm:$0xff] }
 0x2c4   :  { %11241 = vmatprep.mubr.f32.mxu0 %v17131_v43  ;;  %12683 = vmatpush3.bf16.msra.mxu0 %v17094_v47 }
 0x2c5   :  { %11642 = vmatmul.mubr.f32.gmra.mrb[50].mxu1 %v18172_v41  ;;  %12685 = vmatprep.subr.bf16.mxu0 %v17116_v48  ;;  %v17279_v41 = vld [vmem:[#allocation3 + $0x19a] sm:$0xff] }
 0x2c6   :  { %11644 = vmatprep.mubr.f32.mxu1 %v18173_v2  ;;  %12943 = vmatpush3.bf16.msra.mxu1 %v16968_v24  ;;  %v17177_v24 = vld [vmem:[#allocation3 + $0x152] sm:$0xff]  ;;  %v13600_v2 = vld [vmem:[#allocation3 + $0x140] sm:$0xff] }
 0x2c7   :  { %12945 = vmatprep.subr.bf16.mxu1 %v16990_v30  ;;  %11242 = vmatmul.mubr.f32.gmra.mrb[50].mxu0 %v17143_v59 }
 0x2c8   :  { %11244 = vmatprep.mubr.f32.mxu0 %v17153_v60  ;;  %12687 = vmatpush3.bf16.msra.mxu0 %v17116_v48 }
 0x2c9   :  { %11645 = vmatmul.mubr.f32.gmra.mrb[52].mxu1 %v17157_v56  ;;  %12689 = vmatprep.subr.bf16.mxu0 %v17138_v20 }
 0x2ca   :  { %11647 = vmatprep.mubr.f32.mxu1 %v17163_v45  ;;  %12947 = vmatpush3.bf16.msra.mxu1 %v16990_v30  ;;  %v17191_v30 = vld [vmem:[#allocation3 + $0x15a] sm:$0xff] }
 0x2cb   :  { %12949 = vmatprep.subr.bf16.mxu1 %v17012_v52  ;;  %11245 = vmatmul.mubr.f32.gmra.mrb[52].mxu0 %v17167_v12 }
 0x2cc   :  { %11247 = vmatprep.mubr.f32.mxu0 %v17177_v24  ;;  %12691 = vmatpush3.bf16.msra.mxu0 %v17138_v20 }
 0x2cd   :  { %11648 = vmatmul.mubr.f32.gmra.mrb[54].mxu1 %v17181_v11  ;;  %12693 = vmatprep.subr.bf16.mxu0 %v17161_v62 }
 0x2ce   :  { %12951 = vmatpush3.bf16.msra.mxu1 %v17012_v52  ;;  %11682 = vmatprep.mubr.f32.mxu1 %v17184_v61  ;;  %v17203_v52 = vpack.c.bf16 %v8811_v5, %v8810_v35  ;;  %v17297_v35 = vld [vmem:[#allocation3 + $0x1aa] sm:$0xff] }
 0x2cf   :  { %12953 = vmatprep.subr.bf16.mxu1 %v17032_v50  ;;  %11248 = vmatmul.mubr.f32.gmra.mrb[54].mxu0 %v17191_v30  ;;  %v13602_v5 = vld [vmem:[#allocation3 + $0x150] sm:$0xff] }
 0x2d0   :  { %12695 = vmatpush3.bf16.msra.mxu0 %v17161_v62  ;;  %11282 = vmatprep.mubr.f32.mxu0 %v13594_v44  ;;  %v17304_v44 = vpack.c.bf16 %v8823_v17, %v8822_v23  ;;  %v8833_v23 = vld [vmem:[%s17878_s4 + $0x2a8] sm:$0xff] }
 0x2d1   :  { %12697 = vmatprep.subr.bf16.mxu0 %v17187_v42  ;;  %v17367_v17 = vld [vmem:[#allocation3 + $0x121] sm:$0xff] }
 0x2d2   :  { %12955 = vmatpush3.bf16.msra.mxu1 %v17032_v50  ;;  %v8814_v50 = vld [vmem:[%s17878_s4 + $0x210] sm:$0xff] }
 0x2d3   :  { %12957 = vmatprep.subr.bf16.mxu1 %v17048_v36 }
 0x2d4   :  { %12699 = vmatpush3.bf16.msra.mxu0 %v17187_v42 }
 0x2d5   :  { %12701 = vmatprep.subr.bf16.mxu0 %v17203_v52 }
 0x2d6   :  { %12959 = vmatpush3.bf16.msra.mxu1 %v17048_v36  ;;  %v17232_v36 = vpack.c.bf16 %v8815_v0, %v8814_v50  ;;  %v13603_v50 = vld [vmem:[#allocation3 + $0x158] sm:$0xff] }
 0x2d7   :  { %12961 = vmatprep.subr.bf16.mxu1 %v17060_v33  ;;  %v17315_v0 = vld [vmem:[#allocation3 + $0x1ba] sm:$0xff] }
 0x2d8   :  { %12703 = vmatpush3.bf16.msra.mxu0 %v17203_v52 }
 0x2d9   :  { %11683 = vmatmul.mubr.f32.vlgmr.msra.gmra.mrb[44].mxu1 %v17225_v53  ;;  %12705 = vmatprep.subr.bf16.mxu0 %v17215_v28 }
 0x2da   :  { %11685 = vmatprep.mubr.f32.mxu1 %v17229_v8  ;;  %12963 = vmatpush3.bf16.msra.mxu1 %v17060_v33  ;;  %v17247_v33 = vld [vmem:[#allocation3 + $0x182] sm:$0xff] }
 0x2db   :  { %12965 = vmatprep.subr.bf16.mxu1 %v17076_v13  ;;  %11283 = vmatmul.mubr.f32.vlgmr.msra.gmra.mrb[44].mxu0 %v13595_v18  ;;  %v8827_v18 = vld [vmem:[%s17878_s4 + $0x278] sm:$0xff] }
 0x2dc   :  { %11285 = vmatprep.mubr.f32.mxu0 %v13596_v26  ;;  %12707 = vmatpush3.bf16.msra.mxu0 %v17215_v28  ;;  %v13605_v26 = vld [vmem:[#allocation3 + $0x168] sm:$0xff] }
 0x2dd   :  { %11686 = vmatmul.mubr.f32.gmra.mrb[46].mxu1 %v17243_v57  ;;  %12709 = vmatprep.subr.bf16.mxu0 %v17232_v36 }
 0x2de   :  { %11688 = vmatprep.mubr.f32.mxu1 %v17247_v33  ;;  %12967 = vmatpush3.bf16.msra.mxu1 %v17076_v13  ;;  %v17265_v13 = vld [vmem:[#allocation3 + $0x192] sm:$0xff] }
 0x2df   :  { %12969 = vmatprep.subr.bf16.mxu1 %v17094_v47  ;;  %11286 = vmatmul.mubr.f32.gmra.mrb[46].mxu0 %v13597_v38 }
 0x2e0   :  { %11288 = vmatprep.mubr.f32.mxu0 %v13598_v63  ;;  %12711 = vmatpush3.bf16.msra.mxu0 %v17232_v36  ;;  %v8831_v63 = vld [vmem:[%s17878_s4 + $0x298] sm:$0xff] }
 0x2e1   :  { %11689 = vmatmul.mubr.f32.gmra.mrb[48].mxu1 %v17261_v55  ;;  %12713 = vmatprep.subr.bf16.mxu0 %v17250_v6 }
 0x2e2   :  { %11691 = vmatprep.mubr.f32.mxu1 %v17265_v13  ;;  %12971 = vmatpush3.bf16.msra.mxu1 %v17094_v47  ;;  %v17283_v47 = vld [vmem:[#allocation3 + $0x1a2] sm:$0xff] }
 0x2e3   :  { %12973 = vmatprep.subr.bf16.mxu1 %v17116_v48  ;;  %11289 = vmatmul.mubr.f32.gmra.mrb[48].mxu0 %v13599_v46  ;;  %v13607_v46 = vld [vmem:[#allocation3 + $0x180] sm:$0xff] }
 0x2e4   :  { %11291 = vmatprep.mubr.f32.mxu0 %v13600_v2  ;;  %12715 = vmatpush3.bf16.msra.mxu0 %v17250_v6  ;;  %v8832_v2 = vld [vmem:[%s17878_s4 + $0x2a0] sm:$0xff] }
 0x2e5   :  { %11692 = vmatmul.mubr.f32.gmra.mrb[50].mxu1 %v17279_v41  ;;  %12717 = vmatprep.subr.bf16.mxu0 %v17268_v54 }
 0x2e6   :  { %11694 = vmatprep.mubr.f32.mxu1 %v17283_v47  ;;  %12975 = vmatpush3.bf16.msra.mxu1 %v17116_v48  ;;  %v17301_v48 = vld [vmem:[#allocation3 + $0x1b2] sm:$0xff] }
 0x2e7   :  { %12977 = vmatprep.subr.bf16.mxu1 %v17138_v20  ;;  %11292 = vmatmul.mubr.f32.gmra.mrb[50].mxu0 %v13601_v22  ;;  %v13608_v22 = vld [vmem:[#allocation3 + $0x188] sm:$0xff] }
 0x2e8   :  { %11294 = vmatprep.mubr.f32.mxu0 %v13602_v5  ;;  %12719 = vmatpush3.bf16.msra.mxu0 %v17268_v54  ;;  %v13609_v5 = vld [vmem:[#allocation3 + $0x190] sm:$0xff] }
 0x2e9   :  { %11695 = vmatmul.mubr.f32.gmra.mrb[52].mxu1 %v17297_v35  ;;  %12721 = vmatprep.subr.bf16.mxu0 %v17286_v25 }
 0x2ea   :  { %11697 = vmatprep.mubr.f32.mxu1 %v17301_v48  ;;  %12979 = vmatpush3.bf16.msra.mxu1 %v17138_v20  ;;  %v17320_v20 = vpack.c.bf16 %v8825_v21, %v8824_v32  ;;  %v6009_v32 = vld [vmem:[#allocation3 + $0x129] sm:$0xff] }
 0x2eb   :  { %12981 = vmatprep.subr.bf16.mxu1 %v17161_v62  ;;  %11295 = vmatmul.mubr.f32.gmra.mrb[52].mxu0 %v13603_v50  ;;  %v8834_v21 = vld [vmem:[%s17878_s4 + $0x2b0] sm:$0xff]  ;;  %v8835_v50 = vld [vmem:[%s17878_s4 + $0x2b8] sm:$0xff] }
 0x2ec   :  { %11297 = vmatprep.mubr.f32.mxu0 %v13604_v49  ;;  %12723 = vmatpush3.bf16.msra.mxu0 %v17286_v25  ;;  %v6010_v49 = vld [vmem:[#allocation3 + $0x131] sm:$0xff] }
 0x2ed   :  { %11698 = vmatmul.mubr.f32.gmra.mrb[54].mxu1 %v17315_v0  ;;  %12725 = vmatprep.subr.bf16.mxu0 %v17304_v44 }
 0x2ee   :  { %12983 = vmatpush3.bf16.msra.mxu1 %v17161_v62  ;;  %11732 = vmatprep.mubr.f32.mxu1 %v17073_v15  ;;  %v17333_v62 = vpack.c.bf16 %v8827_v18, %v8826_v31  ;;  %v8828_v15 = vld [vmem:[%s17878_s4 + $0x280] sm:$0xff]  ;;  %v13610_v31 = vld [vmem:[#allocation3 + $0x198] sm:$0xff] }
 0x2ef   :  { %12985 = vmatprep.subr.bf16.mxu1 %v17187_v42  ;;  %11298 = vmatmul.mubr.f32.gmra.mrb[54].mxu0 %v13605_v26  ;;  %v17345_v38 = vpack.c.bf16 %v8829_v10, %v8828_v15  ;;  %v13611_v18 = vld [vmem:[#allocation3 + $0x1a0] sm:$0xff]  ;;  %v8837_v15 = vld [vmem:[%s17878_s4 + $0x2c8] sm:$0xff] }
 0x2f0   :  { %12727 = vmatpush3.bf16.msra.mxu0 %v17304_v44  ;;  %11332 = vmatprep.mubr.f32.mxu0 %v6006_v34  ;;  %v6011_v26 = vld [vmem:[#allocation3 + $0x139] sm:$0xff]  ;;  %v6012_v10 = vld [vmem:[#allocation3 + $0x141] sm:$0xff] }
 0x2f1   :  { %12729 = vmatprep.subr.bf16.mxu0 %v17320_v20  ;;  %v8836_v34 = vld [vmem:[%s17878_s4 + $0x2c0] sm:$0xff] }
 0x2f2   :  { %12987 = vmatpush3.bf16.msra.mxu1 %v17187_v42  ;;  %v8830_v42 = vld [vmem:[%s17878_s4 + $0x290] sm:$0xff] }
 0x2f3   :  { %12989 = vmatprep.subr.bf16.mxu1 %v17203_v52  ;;  %v17357_v40 = vpack.c.bf16 %v8831_v63, %v8830_v42  ;;  %v6013_v42 = vld [vmem:[#allocation3 + $0x149] sm:$0xff] }
 0x2f4   :  { %12731 = vmatpush3.bf16.msra.mxu0 %v17320_v20  ;;  %v8838_v63 = vld [vmem:[%s17878_s4 + $0x2d0] sm:$0xff] }
 0x2f5   :  { %12733 = vmatprep.subr.bf16.mxu0 %v17333_v62 }
 0x2f6   :  { %12991 = vmatpush3.bf16.msra.mxu1 %v17203_v52  ;;  %v6007_v52 = vld [vmem:[#allocation3 + $0x119] sm:$0xff] }
 0x2f7   :  { %12993 = vmatprep.subr.bf16.mxu1 %v17215_v28 }
 0x2f8   :  { %12735 = vmatpush3.bf16.msra.mxu0 %v17333_v62 }
 0x2f9   :  { %11733 = vmatmul.mubr.f32.vlgmr.msra.gmra.mrb[44].mxu1 %v13606_v14  ;;  %12737 = vmatprep.subr.bf16.mxu0 %v17345_v38  ;;  %v8839_v14 = vld [vmem:[%s17878_s4 + $0x2d8] sm:$0xff] }
 0x2fa   :  { %11735 = vmatprep.mubr.f32.mxu1 %v13607_v46  ;;  %12995 = vmatpush3.bf16.msra.mxu1 %v17215_v28  ;;  %v17372_v28 = vpack.c.bf16 %v8833_v23, %v8832_v2  ;;  %v6015_v46 = vld [vmem:[#allocation3 + $0x159] sm:$0xff]  ;;  %v8841_v2 = vld [vmem:[%s17878_s4 + $0x2e8] sm:$0xff] }
 0x2fb   :  { %12997 = vmatprep.subr.bf16.mxu1 %v17232_v36  ;;  %11333 = vmatmul.mubr.f32.vlgmr.msra.gmra.mrb[44].mxu0 %v6007_v52  ;;  %v8840_v52 = vld [vmem:[%s17878_s4 + $0x2e0] sm:$0xff]  ;;  %v6017_v23 = vld [vmem:[#allocation3 + $0x169] sm:$0xff] }
 0x2fc   :  { %11335 = vmatprep.mubr.f32.mxu0 %v17367_v17  ;;  %12739 = vmatpush3.bf16.msra.mxu0 %v17345_v38 }
 0x2fd   :  { %11736 = vmatmul.mubr.f32.gmra.mrb[46].mxu1 %v13608_v22  ;;  %12741 = vmatprep.subr.bf16.mxu0 %v17357_v40  ;;  %v8842_v22 = vld [vmem:[%s17878_s4 + $0x2f0] sm:$0xff] }
 0x2fe   :  { %11738 = vmatprep.mubr.f32.mxu1 %v13609_v5  ;;  %12999 = vmatpush3.bf16.msra.mxu1 %v17232_v36  ;;  %v17384_v36 = vpack.c.bf16 %v8835_v50, %v8834_v21  ;;  %v8843_v5 = vld [vmem:[%s17878_s4 + $0x2f8] sm:$0xff]  ;;  %v17462_v21 = vld [vmem:[#allocation3 + $0x181] sm:$0xff] }
 0x2ff   :  { %13001 = vmatprep.subr.bf16.mxu1 %v17250_v6  ;;  %11336 = vmatmul.mubr.f32.gmra.mrb[46].mxu0 %v6009_v32  ;;  %v17439_v3 = vpack.c.bf16 %v8843_v5, %v8842_v22  ;;  %v7504_v32 = vld [vmem:[#allocation3 + $0x179] sm:$0xff] }
 0x300   :  { %11338 = vmatprep.mubr.f32.mxu0 %v6010_v49  ;;  %12743 = vmatpush3.bf16.msra.mxu0 %v17357_v40  ;;  %v8849_v49 = vld [vmem:[%s17878_s4 + $0x328] sm:$0xff] }
 0x301   :  { %11739 = vmatmul.mubr.f32.gmra.mrb[48].mxu1 %v13610_v31  ;;  %12745 = vmatprep.subr.bf16.mxu0 %v17372_v28  ;;  %v7506_v31 = vld [vmem:[#allocation3 + $0x189] sm:$0xff] }
 0x302   :  { %11741 = vmatprep.mubr.f32.mxu1 %v13611_v18  ;;  %13003 = vmatpush3.bf16.msra.mxu1 %v17250_v6  ;;  %v17397_v6 = vpack.c.bf16 %v8837_v15, %v8836_v34  ;;  %v8850_v18 = vld [vmem:[%s17878_s4 + $0x330] sm:$0xff] }
 0x303   :  { %13005 = vmatprep.subr.bf16.mxu1 %v17268_v54  ;;  %11339 = vmatmul.mubr.f32.gmra.mrb[48].mxu0 %v6011_v26  ;;  %v6336_v26 = vld [vmem:[#allocation3 + $0x120] sm:$0xff] }
 0x304   :  { %11341 = vmatprep.mubr.f32.mxu0 %v6012_v10  ;;  %12747 = vmatpush3.bf16.msra.mxu0 %v17372_v28 }
 0x305   :  { %11742 = vmatmul.mubr.f32.gmra.mrb[50].mxu1 %v17157_v56  ;;  %12749 = vmatprep.subr.bf16.mxu0 %v17384_v36  ;;  %v6014_v56 = vld [vmem:[#allocation3 + $0x151] sm:$0xff] }
 0x306   :  { %11744 = vmatprep.mubr.f32.mxu1 %v17163_v45  ;;  %13007 = vmatpush3.bf16.msra.mxu1 %v17268_v54  ;;  %v17411_v45 = vpack.c.bf16 %v8839_v14, %v8838_v63  ;;  %v13612_v54 = vld [vmem:[#allocation3 + $0x1c0] sm:$0xff] }
 0x307   :  { %13009 = vmatprep.subr.bf16.mxu1 %v17286_v25  ;;  %11342 = vmatmul.mubr.f32.gmra.mrb[50].mxu0 %v6013_v42  ;;  %v8860_v42 = vld [vmem:[%s17878_s4 + $0x380] sm:$0xff] }
 0x308   :  { %11344 = vmatprep.mubr.f32.mxu0 %v6014_v56  ;;  %12751 = vmatpush3.bf16.msra.mxu0 %v17384_v36 }
 0x309   :  { %11745 = vmatmul.mubr.f32.gmra.mrb[52].mxu1 %v17181_v11  ;;  %12753 = vmatprep.subr.bf16.mxu0 %v17397_v6  ;;  %v6016_v11 = vld [vmem:[#allocation3 + $0x161] sm:$0xff] }
 0x30a   :  { %11747 = vmatprep.mubr.f32.mxu1 %v13612_v54  ;;  %13011 = vmatpush3.bf16.msra.mxu1 %v17286_v25  ;;  %v17425_v25 = vpack.c.bf16 %v8841_v2, %v8840_v52  ;;  %v8862_v2 = vld [vmem:[%s17878_s4 + $0x390] sm:$0xff] }
 0x30b   :  { %13013 = vmatprep.subr.bf16.mxu1 %v17304_v44  ;;  %11345 = vmatmul.mubr.f32.gmra.mrb[52].mxu0 %v6015_v46 }
 0x30c   :  { %11347 = vmatprep.mubr.f32.mxu0 %v6016_v11  ;;  %12755 = vmatpush3.bf16.msra.mxu0 %v17397_v6  ;;  %v8863_v11 = vld [vmem:[%s17878_s4 + $0x398] sm:$0xff] }
 0x30d   :  { %11748 = vmatmul.mubr.f32.gmra.mrb[54].mxu1 %v2276_v29  ;;  %12757 = vmatprep.subr.bf16.mxu0 %v17411_v45  ;;  %v8844_v29 = vld [vmem:[%s17878_s4 + $0x300] sm:$0xff] }
 0x30e   :  { %13015 = vmatpush3.bf16.msra.mxu1 %v17304_v44  ;;  %11782 = vmatprep.mubr.f32.mxu1 %v16930_v9  ;;  %v8845_v9 = vld [vmem:[%s17878_s4 + $0x308] sm:$0xff]  ;;  %v8846_v44 = vld [vmem:[%s17878_s4 + $0x310] sm:$0xff] }
 0x30f   :  { %13017 = vmatprep.subr.bf16.mxu1 %v17320_v20  ;;  %11348 = vmatmul.mubr.f32.gmra.mrb[54].mxu0 %v6017_v23 }
 0x310   :  { %12759 = vmatpush3.bf16.msra.mxu0 %v17411_v45  ;;  %11382 = vmatprep.mubr.f32.mxu0 %v17087_v39  ;;  %v17451_v39 = vpack.c.bf16 %v8845_v9, %v8844_v29 }
 0x311   :  { %12761 = vmatprep.subr.bf16.mxu0 %v17425_v25 }
 0x312   :  { %13019 = vmatpush3.bf16.msra.mxu1 %v17320_v20  ;;  %v8847_v20 = vld [vmem:[%s17878_s4 + $0x318] sm:$0xff] }
 0x313   :  { %13021 = vmatprep.subr.bf16.mxu1 %v17333_v62  ;;  %v17465_v50 = vpack.c.bf16 %v8847_v20, %v8846_v44  ;;  %v6337_v44 = vld [vmem:[#allocation3 + $0x128] sm:$0xff]  ;;  %v8864_v20 = vld [vmem:[%s17878_s4 + $0x3a0] sm:$0xff] }
 0x314   :  { %12763 = vmatpush3.bf16.msra.mxu0 %v17425_v25 }
 0x315   :  { %12765 = vmatprep.subr.bf16.mxu0 %v17439_v3 }
 0x316   :  { %13023 = vmatpush3.bf16.msra.mxu1 %v17333_v62  ;;  %v8848_v62 = vld [vmem:[%s17878_s4 + $0x320] sm:$0xff] }
 0x317   :  { %13025 = vmatprep.subr.bf16.mxu1 %v17345_v38 }
 0x318   :  { %12767 = vmatpush3.bf16.msra.mxu0 %v17439_v3 }
 0x319   :  { %11783 = vmatmul.mubr.f32.vlgmr.msra.gmra.mrb[44].mxu1 %v7504_v32  ;;  %12769 = vmatprep.subr.bf16.mxu0 %v17451_v39 }
 0x31a   :  { %11785 = vmatprep.mubr.f32.mxu1 %v17462_v21  ;;  %13027 = vmatpush3.bf16.msra.mxu1 %v17345_v38  ;;  %v17480_v38 = vpack.c.bf16 %v8849_v49, %v8848_v62 }
 0x31b   :  { %13029 = vmatprep.subr.bf16.mxu1 %v17357_v40  ;;  %11383 = vmatmul.mubr.f32.vlgmr.msra.gmra.mrb[44].mxu0 %v17099_v4  ;;  %v8851_v4 = vld [vmem:[%s17878_s4 + $0x338] sm:$0xff] }
 0x31c   :  { %11385 = vmatprep.mubr.f32.mxu0 %v17109_v37  ;;  %12771 = vmatpush3.bf16.msra.mxu0 %v17451_v39  ;;  %v8852_v37 = vld [vmem:[%s17878_s4 + $0x340] sm:$0xff] }
 0x31d   :  { %11786 = vmatmul.mubr.f32.gmra.mrb[46].mxu1 %v7506_v31  ;;  %12773 = vmatprep.subr.bf16.mxu0 %v17465_v50 }
 0x31e   :  { %11788 = vmatprep.mubr.f32.mxu1 %v16965_v27  ;;  %13031 = vmatpush3.bf16.msra.mxu1 %v17357_v40  ;;  %v17496_v27 = vpack.c.bf16 %v8851_v4, %v8850_v18  ;;  %v8859_v40 = vld [vmem:[%s17878_s4 + $0x378] sm:$0xff] }
 0x31f   :  { %13033 = vmatprep.subr.bf16.mxu1 %v17372_v28  ;;  %11386 = vmatmul.mubr.f32.gmra.mrb[46].mxu0 %v17121_v7  ;;  %v8853_v7 = vld [vmem:[%s17878_s4 + $0x348] sm:$0xff] }
 0x320   :  { %11388 = vmatprep.mubr.f32.mxu0 %v17131_v43  ;;  %12775 = vmatpush3.bf16.msra.mxu0 %v17465_v50  ;;  %v8855_v43 = vld [vmem:[%s17878_s4 + $0x358] sm:$0xff] }
 0x321   :  { %11789 = vmatmul.mubr.f32.gmra.mrb[48].mxu1 %v16981_v16  ;;  %12777 = vmatprep.subr.bf16.mxu0 %v17480_v38  ;;  %v17512_v16 = vpack.c.bf16 %v8853_v7, %v8852_v37 }
 0x322   :  { %11791 = vmatprep.mubr.f32.mxu1 %v16987_v1  ;;  %13035 = vmatpush3.bf16.msra.mxu1 %v17372_v28  ;;  %v8854_v1 = vld [vmem:[%s17878_s4 + $0x350] sm:$0xff] }
 0x323   :  { %13037 = vmatprep.subr.bf16.mxu1 %v17384_v36  ;;  %11389 = vmatmul.mubr.f32.gmra.mrb[48].mxu0 %v17143_v59  ;;  %v8856_v59 = vld [vmem:[%s17878_s4 + $0x360] sm:$0xff] }
 0x324   :  { %11391 = vmatprep.mubr.f32.mxu0 %v17153_v60  ;;  %12779 = vmatpush3.bf16.msra.mxu0 %v17480_v38  ;;  %v8857_v60 = vld [vmem:[%s17878_s4 + $0x368] sm:$0xff] }
 0x325   :  { %11792 = vmatmul.mubr.f32.gmra.mrb[50].mxu1 %v17003_v19  ;;  %12781 = vmatprep.subr.bf16.mxu0 %v17496_v27  ;;  %v7513_v19 = vld [vmem:[#allocation3 + $0x1c1] sm:$0xff] }
 0x326   :  { %11794 = vmatprep.mubr.f32.mxu1 %v17009_v58  ;;  %13039 = vmatpush3.bf16.msra.mxu1 %v17384_v36  ;;  %v17528_v58 = vpack.c.bf16 %v8855_v43, %v8854_v1  ;;  %v6339_v1 = vld [vmem:[#allocation3 + $0x138] sm:$0xff]  ;;  %v8866_v43 = vld [vmem:[%s17878_s4 + $0x3b0] sm:$0xff] }
 0x327   :  { %13041 = vmatprep.subr.bf16.mxu1 %v17397_v6  ;;  %11392 = vmatmul.mubr.f32.gmra.mrb[50].mxu0 %v17167_v12  ;;  %v17546_v12 = vld [vmem:[%s17881_s5] ss:$0 sm:$0xff] }
 0x328   :  { %11394 = vmatprep.mubr.f32.mxu0 %v17177_v24  ;;  %12783 = vmatpush3.bf16.msra.mxu0 %v17496_v27  ;;  %v17550_v24 = vpack.c.bf16 %v8857_v60, %v8856_v59 }
 0x329   :  { %11795 = vmatmul.mubr.f32.gmra.mrb[52].mxu1 %v17025_v51  ;;  %12785 = vmatprep.subr.bf16.mxu0 %v17512_v16  ;;  %v17539_v51 = vld [vmem:[#allocation3 + $0x1c9] sm:$0xff] }
 0x32a   :  { %11797 = vmatprep.mubr.f32.mxu1 %v7513_v19  ;;  %13043 = vmatpush3.bf16.msra.mxu1 %v17397_v6 }
 0x32b   :  { %13045 = vmatprep.subr.bf16.mxu1 %v17411_v45  ;;  %11395 = vmatmul.mubr.f32.gmra.mrb[52].mxu0 %v17191_v30 }
 0x32c   :  { %11397 = vmatprep.mubr.f32.mxu0 %v17184_v61  ;;  %12787 = vmatpush3.bf16.msra.mxu0 %v17512_v16  ;;  %v8858_v61 = vld [vmem:[%s17878_s4 + $0x370] sm:$0xff] }
 0x32d   :  { %11798 = vmatmul.mubr.f32.gmra.mrb[54].mxu1 %v17539_v51  ;;  %12789 = vmatprep.subr.bf16.mxu0 %v17528_v58  ;;  %v17566_v15 = vpack.c.bf16 %v8859_v40, %v8858_v61 }
 0x32e   :  { %13047 = vmatpush3.bf16.msra.mxu1 %v17411_v45  ;;  %11832 = vmatprep.mubr.f32.mxu1 %v17229_v8  ;;  %v10634_v30 = vpop.f32.mrb[32].mxu0 }
 0x32f   :  { %13049 = vmatprep.subr.bf16.mxu1 %v17425_v25  ;;  %v3767_v28 = vadd.f32 %v10634_v30, %v17546_v12  ;;  %v3689_v36 = vpop.f32.mrb[33].mxu0  ;;  %11398 = vmatmul.mubr.f32.gmra.mrb[54].mxu0 %v17225_v53  ;;  %v8861_v53 = vld [vmem:[%s17878_s4 + $0x388] sm:$0xff] }
 0x330   :  { %v3766_v34 = vadd.f32 %v17546_v12, %v3689_v36  ;;  %12791 = vmatpush3.bf16.msra.mxu0 %v17528_v58  ;;  %11432 = vmatprep.mubr.f32.mxu0 %v6336_v26  ;;  %v17580_v54 = vpack.c.bf16 %v8861_v53, %v8860_v42 }
 0x331   :  { %v3779_v8 = vmax.f32 %v3767_v28, 0.0  ;;  %12793 = vmatprep.subr.bf16.mxu0 %v17550_v24 }
 0x332   :  { %13051 = vmatpush3.bf16.msra.mxu1 %v17425_v25  ;;  %v3778_v10 = vmax.f32 %v3766_v34, 0.0  ;;  %v10637_v6 = vpop.f32.mrb[34].mxu0 }
 0x333   :  { %3791 = vst [vmem:[#allocation4 + $0x8] sm:$0xff] %v3779_v8  ;;  %13053 = vmatprep.subr.bf16.mxu1 %v17439_v3  ;;  %v3769_v63 = vadd.f32 %v10637_v6, %v17546_v12  ;;  %v3699_v14 = vpop.f32.mrb[35].mxu0  ;;  %v8868_v6 = vld [vmem:[%s17878_s4 + $0x3c0] sm:$0xff] }
 0x334   :  { %3790 = vst [vmem:[#allocation4] sm:$0xff] %v3778_v10  ;;  %v3768_v56 = vadd.f32 %v17546_v12, %v3699_v14  ;;  %12795 = vmatpush3.bf16.msra.mxu0 %v17550_v24  ;;  %v6341_v10 = vld [vmem:[#allocation3 + $0x148] sm:$0xff] }
 0x335   :  { %v3781_v45 = vmax.f32 %v3769_v63, 0.0  ;;  %12797 = vmatprep.subr.bf16.mxu0 %v17566_v15 }
 0x336   :  { %13055 = vmatpush3.bf16.msra.mxu1 %v17439_v3  ;;  %v3780_v46 = vmax.f32 %v3768_v56, 0.0  ;;  %v10640_v52 = vpop.f32.mrb[36].mxu0  ;;  %v17595_v3 = vpack.c.bf16 %v8863_v11, %v8862_v2  ;;  %v8870_v2 = vld [vmem:[%s17878_s4 + $0x3d0] sm:$0xff]  ;;  %v8871_v11 = vld [vmem:[%s17878_s4 + $0x3d8] sm:$0xff] }
 0x337   :  { %3793 = vst [vmem:[#allocation4 + $0x18] sm:$0xff] %v3781_v45  ;;  %13057 = vmatprep.subr.bf16.mxu1 %v17451_v39  ;;  %v3771_v25 = vadd.f32 %v10640_v52, %v17546_v12  ;;  %v3709_v23 = vpop.f32.mrb[37].mxu0  ;;  %v6343_v52 = vld [vmem:[#allocation3 + $0x158] sm:$0xff] }
 0x338   :  { %3792 = vst [vmem:[#allocation4 + $0x10] sm:$0xff] %v3780_v46  ;;  %v3770_v22 = vadd.f32 %v17546_v12, %v3709_v23  ;;  %12799 = vmatpush3.bf16.msra.mxu0 %v17566_v15  ;;  %v6344_v23 = vld [vmem:[#allocation3 + $0x160] sm:$0xff] }
 0x339   :  { %11833 = vmatmul.mubr.f32.vlgmr.msra.gmra.mrb[44].mxu1 %v17243_v57  ;;  %v3783_v5 = vmax.f32 %v3771_v25, 0.0  ;;  %12801 = vmatprep.subr.bf16.mxu0 %v17580_v54  ;;  %v8865_v57 = vld [vmem:[%s17878_s4 + $0x3a8] sm:$0xff] }
 0x33a   :  { %11835 = vmatprep.mubr.f32.mxu1 %v17247_v33  ;;  %13059 = vmatpush3.bf16.msra.mxu1 %v17451_v39  ;;  %v3782_v29 = vmax.f32 %v3770_v22, 0.0  ;;  %v10643_v9 = vpop.f32.mrb[38].mxu0  ;;  %v6338_v33 = vld [vmem:[#allocation3 + $0x130] sm:$0xff]  ;;  %v17611_v4 = vpack.c.bf16 %v8865_v57, %v8864_v20 }
 0x33b   :  { %3795 = vst [vmem:[#allocation4 + $0x28] sm:$0xff] %v3783_v5  ;;  %13061 = vmatprep.subr.bf16.mxu1 %v17465_v50  ;;  %v3773_v32 = vadd.f32 %v10643_v9, %v17546_v12  ;;  %v3719_v62 = vpop.f32.mrb[39].mxu0  ;;  %11433 = vmatmul.mubr.f32.vlgmr.msra.gmra.mrb[44].mxu0 %v6337_v44  ;;  %v5299_v49 = vld [vmem:[#allocation4] ss:$2 sm:$0xff]  ;;  %v5323_v31 = vld [vmem:[#allocation4 + $0x1] ss:$2 sm:$0xff]  ;;  %v17662_v5 = vpack.c.bf16 %v8871_v11, %v8870_v2 }
 0x33c   :  { %3794 = vst [vmem:[#allocation4 + $0x20] sm:$0xff] %v3782_v29  ;;  %v3772_v39 = vadd.f32 %v17546_v12, %v3719_v62  ;;  %11435 = vmatprep.mubr.f32.mxu0 %v6338_v33  ;;  %12803 = vmatpush3.bf16.msra.mxu0 %v17580_v54  ;;  %v5346_v30 = vmax.f32 %v5299_v49, %v5323_v31  ;;  %v6345_v9 = vld [vmem:[#allocation3 + $0x168] sm:$0xff]  ;;  %v8872_v44 = vld [vmem:[%s17878_s4 + $0x3e0] sm:$0xff]  ;;  %v6346_v20 = vld [vmem:[#allocation3 + $0x170] sm:$0xff] }
 0x33d   :  { %11836 = vmatmul.mubr.f32.gmra.mrb[46].mxu1 %v17261_v55  ;;  %v3785_v18 = vmax.f32 %v3773_v32, 0.0  ;;  %12805 = vmatprep.subr.bf16.mxu0 %v17595_v3  ;;  %v8867_v55 = vld [vmem:[%s17878_s4 + $0x3b8] sm:$0xff]  ;;  %v17676_v32 = vld [vmem:[#allocation3 + $0x1ca] sm:$0xff]  ;;  %v7833_v49 = vld [vmem:[#allocation3 + $0x180] sm:$0xff] }
 0x33e   :  { %11838 = vmatprep.mubr.f32.mxu1 %v17265_v13  ;;  %13063 = vmatpush3.bf16.msra.mxu1 %v17465_v50  ;;  %v3784_v37 = vmax.f32 %v3772_v39, 0.0  ;;  %v10646_v7 = vpop.f32.mrb[40].mxu0  ;;  %v6340_v50 = vld [vmem:[#allocation3 + $0x140] sm:$0xff]  ;;  %v17627_v36 = vpack.c.bf16 %v8867_v55, %v8866_v43 }
 0x33f   :  { %v5301_v19 = vld [vmem:[#allocation4 + $0x10] ss:$2 sm:$0xff]  ;;  %v5325_v59 = vld [vmem:[#allocation4 + $0x11] ss:$2 sm:$0xff]  ;;  %3797 = vst [vmem:[#allocation4 + $0x38] sm:$0xff] %v3785_v18  ;;  %13065 = vmatprep.subr.bf16.mxu1 %v17480_v38  ;;  %v3775_v13 = vadd.f32 %v10646_v7, %v17546_v12  ;;  %v3729_v60 = vpop.f32.mrb[41].mxu0  ;;  %11436 = vmatmul.mubr.f32.gmra.mrb[46].mxu0 %v6339_v1 }
 0x340   :  { %v5347_v61 = vmax.f32 %v5301_v19, %v5325_v59  ;;  %3796 = vst [vmem:[#allocation4 + $0x30] sm:$0xff] %v3784_v37  ;;  %v3774_v40 = vadd.f32 %v17546_v12, %v3729_v60  ;;  %11438 = vmatprep.mubr.f32.mxu0 %v6340_v50  ;;  %12807 = vmatpush3.bf16.msra.mxu0 %v17595_v3  ;;  %v6347_v37 = vld [vmem:[#allocation3 + $0x178] sm:$0xff]  ;;  %v8874_v7 = vld [vmem:[%s17878_s4 + $0x3f0] sm:$0xff] }
 0x341   :  { %11839 = vmatmul.mubr.f32.gmra.mrb[48].mxu1 %v17279_v41  ;;  %v3787_v28 = vmax.f32 %v3775_v13, 0.0  ;;  %12809 = vmatprep.subr.bf16.mxu0 %v17611_v4  ;;  %v8869_v41 = vld [vmem:[%s17878_s4 + $0x3c8] sm:$0xff]  ;;  %v8875_v1 = vld [vmem:[%s17878_s4 + $0x3f8] sm:$0xff] }
 0x342   :  { %v5358_v26 = vmax.f32 %v5346_v30, %v5347_v61  ;;  %11841 = vmatprep.mubr.f32.mxu1 %v17283_v47  ;;  %13067 = vmatpush3.bf16.msra.mxu1 %v17480_v38  ;;  %v3786_v34 = vmax.f32 %v3774_v40, 0.0  ;;  %v10649_v8 = vpop.f32.mrb[42].mxu0  ;;  %v6342_v47 = vld [vmem:[#allocation3 + $0x150] sm:$0xff]  ;;  %v17646_v45 = vpack.c.bf16 %v8869_v41, %v8868_v6  ;;  %v17697_v61 = vpack.c.bf16 %v8875_v1, %v8874_v7  ;;  %v6504_v7 = vld [vmem:[#allocation3 + $0x139] sm:$0xff] }
 0x343   :  { %3799 = vst [vmem:[#allocation4 + $0x48] sm:$0xff] %v3787_v28  ;;  %13069 = vmatprep.subr.bf16.mxu1 %v17496_v27  ;;  %v3777_v42 = vadd.f32 %v10649_v8, %v17546_v12  ;;  %v3739_v53 = vpop.f32.mrb[43].mxu0  ;;  %11439 = vmatmul.mubr.f32.gmra.mrb[48].mxu0 %v6341_v10  ;;  %v5303_v63 = vld [vmem:[#allocation4 + $0x20] ss:$2 sm:$0xff]  ;;  %v5327_v14 = vld [vmem:[#allocation4 + $0x21] ss:$2 sm:$0xff] }
 0x344   :  { %5364 = vst [vmem:[%s17882_s6] sm:$0xff] %v5358_v26  ;;  %3798 = vst [vmem:[#allocation4 + $0x40] sm:$0xff] %v3786_v34  ;;  %v3776_v38 = vadd.f32 %v17546_v12, %v3739_v53  ;;  %11441 = vmatprep.mubr.f32.mxu0 %v6342_v47  ;;  %12811 = vmatpush3.bf16.msra.mxu0 %v17611_v4  ;;  %v8876_v26 = vld [vmem:[%s17878_s4 + $0x400] sm:$0xff]  ;;  %v8878_v53 = vld [vmem:[%s17878_s4 + $0x410] sm:$0xff] }
 0x345   :  { %11842 = vmatmul.mubr.f32.gmra.mrb[50].mxu1 %v17297_v35  ;;  %v3789_v56 = vmax.f32 %v3777_v42, 0.0  ;;  %12813 = vmatprep.subr.bf16.mxu0 %v17627_v36  ;;  %v8879_v47 = vld [vmem:[%s17878_s4 + $0x418] sm:$0xff]  ;;  %v8882_v1 = vld [vmem:[%s17878_s4 + $0x430] sm:$0xff] }
 0x346   :  { %11844 = vmatprep.mubr.f32.mxu1 %v17301_v48  ;;  %13071 = vmatpush3.bf16.msra.mxu1 %v17496_v27  ;;  %v3788_v46 = vmax.f32 %v3776_v38, 0.0  ;;  %v5348_v48 = vmax.f32 %v5303_v63, %v5327_v14  ;;  %v17659_v27 = vld [vmem:[#allocation3 + $0x1c2] sm:$0xff]  ;;  %v17728_v2 = vpack.c.bf16 %v8879_v47, %v8878_v53  ;;  %v7840_v53 = vld [vmem:[#allocation3 + $0x1b8] sm:$0xff] }
 0x347   :  { %v5305_v35 = vld [vmem:[#allocation4 + $0x30] ss:$2 sm:$0xff]  ;;  %v5329_v25 = vld [vmem:[#allocation4 + $0x31] ss:$2 sm:$0xff]  ;;  %3801 = vst [vmem:[#allocation4 + $0x58] sm:$0xff] %v3789_v56  ;;  %13073 = vmatprep.subr.bf16.mxu1 %v17512_v16  ;;  %11442 = vmatmul.mubr.f32.gmra.mrb[50].mxu0 %v6343_v52  ;;  %v7834_v56 = vld [vmem:[#allocation3 + $0x188] sm:$0xff] }
 0x348   :  { %v5349_v22 = vmax.f32 %v5305_v35, %v5329_v25  ;;  %3800 = vst [vmem:[#allocation4 + $0x50] sm:$0xff] %v3788_v46  ;;  %11444 = vmatprep.mubr.f32.mxu0 %v6344_v23  ;;  %12815 = vmatpush3.bf16.msra.mxu0 %v17627_v36  ;;  %v7835_v52 = vld [vmem:[#allocation3 + $0x190] sm:$0xff]  ;;  %v8880_v25 = vld [vmem:[%s17878_s4 + $0x420] sm:$0xff]  ;;  %v8881_v23 = vld [vmem:[%s17878_s4 + $0x428] sm:$0xff] }
 0x349   :  { %11845 = vmatmul.mubr.f32.gmra.mrb[52].mxu1 %v17315_v0  ;;  %12817 = vmatprep.subr.bf16.mxu0 %v17646_v45  ;;  %v8873_v0 = vld [vmem:[%s17878_s4 + $0x3e8] sm:$0xff] }
 0x34a   :  { %v5359_v29 = vmax.f32 %v5348_v48, %v5349_v22  ;;  %11847 = vmatprep.mubr.f32.mxu1 %v17659_v27  ;;  %13075 = vmatpush3.bf16.msra.mxu1 %v17512_v16  ;;  %v17682_v31 = vpack.c.bf16 %v8873_v0, %v8872_v44  ;;  %v6502_v35 = vld [vmem:[#allocation3 + $0x129] sm:$0xff] }
 0x34b   :  { %13077 = vmatprep.subr.bf16.mxu1 %v17528_v58  ;;  %11445 = vmatmul.mubr.f32.gmra.mrb[52].mxu0 %v6345_v9  ;;  %v5307_v16 = vld [vmem:[#allocation4 + $0x40] ss:$2 sm:$0xff]  ;;  %v5331_v62 = vld [vmem:[#allocation4 + $0x41] ss:$2 sm:$0xff]  ;;  %v6503_v9 = vld [vmem:[#allocation3 + $0x131] sm:$0xff] }
 0x34c   :  { %5365 = vst [vmem:[%s17882_s6 + $0x8] sm:$0xff] %v5359_v29  ;;  %v11084_v57 = vpop.f32.mrb[32].mxu1  ;;  %11447 = vmatprep.mubr.f32.mxu0 %v6346_v20  ;;  %12819 = vmatpush3.bf16.msra.mxu0 %v17646_v45  ;;  %v5350_v59 = vmax.f32 %v5307_v16, %v5331_v62  ;;  %v7836_v20 = vld [vmem:[#allocation3 + $0x198] sm:$0xff] }
 0x34d   :  { %v5264_v33 = vadd.f32 %v11084_v57, %v17546_v12  ;;  %v5192_v39 = vpop.f32.mrb[33].mxu1  ;;  %11848 = vmatmul.mubr.f32.gmra.mrb[54].mxu1 %v17676_v32  ;;  %12821 = vmatprep.subr.bf16.mxu0 %v17662_v5 }
 0x34e   :  { %v5263_v18 = vadd.f32 %v17546_v12, %v5192_v39  ;;  %13079 = vmatpush3.bf16.msra.mxu1 %v17528_v58  ;;  %11882 = vmatprep.mubr.f32.mxu1 %v7833_v49  ;;  %v17742_v39 = vpack.c.bf16 %v8881_v23, %v8880_v25  ;;  %v7842_v25 = vld [vmem:[#allocation3 + $0x1c8] sm:$0xff]  ;;  %v13613_v23 = vld [vmem:[#allocation3 + $0x1d0] sm:$0xff] }
 0x34f   :  { %v5309_v43 = vld [vmem:[#allocation4 + $0x50] ss:$2 sm:$0xff]  ;;  %v5333_v55 = vld [vmem:[#allocation4 + $0x51] ss:$2 sm:$0xff]  ;;  %v5276_v19 = vmax.f32 %v5264_v33, 0.0  ;;  %13081 = vmatprep.subr.bf16.mxu1 %v17550_v24  ;;  %11448 = vmatmul.mubr.f32.gmra.mrb[54].mxu0 %v6347_v37  ;;  %v7837_v33 = vld [vmem:[#allocation3 + $0x1a0] sm:$0xff] }
 0x350   :  { %v5351_v13 = vmax.f32 %v5309_v43, %v5333_v55  ;;  %v5275_v60 = vmax.f32 %v5263_v18, 0.0  ;;  %v11087_v58 = vpop.f32.mrb[34].mxu1  ;;  %12823 = vmatpush3.bf16.msra.mxu0 %v17662_v5  ;;  %11482 = vmatprep.mubr.f32.mxu0 %v17367_v17  ;;  %v8877_v17 = vld [vmem:[%s17878_s4 + $0x408] sm:$0xff]  ;;  %v8883_v43 = vld [vmem:[%s17878_s4 + $0x438] sm:$0xff] }
 0x351   :  { %5288 = vst [vmem:[#allocation4 + $0x68] sm:$0xff] %v5276_v19  ;;  %v5266_v50 = vadd.f32 %v11087_v58, %v17546_v12  ;;  %v5202_v30 = vpop.f32.mrb[35].mxu1  ;;  %12825 = vmatprep.subr.bf16.mxu0 %v17682_v31  ;;  %v17714_v41 = vpack.c.bf16 %v8877_v17, %v8876_v26  ;;  %v6505_v19 = vld [vmem:[#allocation3 + $0x141] sm:$0xff]  ;;  %v6506_v26 = vld [vmem:[#allocation3 + $0x149] sm:$0xff] }
 0x352   :  { %v5360_v40 = vmax.f32 %v5350_v59, %v5351_v13  ;;  %5287 = vst [vmem:[#allocation4 + $0x60] sm:$0xff] %v5275_v60  ;;  %v5265_v28 = vadd.f32 %v17546_v12, %v5202_v30  ;;  %13083 = vmatpush3.bf16.msra.mxu1 %v17550_v24  ;;  %v7838_v58 = vld [vmem:[#allocation3 + $0x1a8] sm:$0xff]  ;;  %v7839_v30 = vld [vmem:[#allocation3 + $0x1b0] sm:$0xff]  ;;  %v8884_v17 = vld [vmem:[%s17878_s4 + $0x440] sm:$0xff] }
 0x353   :  { %v5278_v34 = vmax.f32 %v5266_v50, 0.0  ;;  %13085 = vmatprep.subr.bf16.mxu1 %v17566_v15 }
 0x354   :  { %5366 = vst [vmem:[%s17882_s6 + $0x10] sm:$0xff] %v5360_v40  ;;  %v5277_v8 = vmax.f32 %v5265_v28, 0.0  ;;  %v11090_v10 = vpop.f32.mrb[36].mxu1  ;;  %12827 = vmatpush3.bf16.msra.mxu0 %v17682_v31  ;;  %v17756_v40 = vpack.c.bf16 %v8883_v43, %v8882_v1  ;;  %v8000_v1 = vld [vmem:[#allocation3 + $0x191] sm:$0xff] }
 0x355   :  { %5290 = vst [vmem:[#allocation4 + $0x78] sm:$0xff] %v5278_v34  ;;  %v5268_v24 = vadd.f32 %v11090_v10, %v17546_v12  ;;  %v5212_v6 = vpop.f32.mrb[37].mxu1  ;;  %12829 = vmatprep.subr.bf16.mxu0 %v17697_v61  ;;  %v8885_v34 = vld [vmem:[%s17878_s4 + $0x448] sm:$0xff] }
 0x356   :  { %5289 = vst [vmem:[#allocation4 + $0x70] sm:$0xff] %v5277_v8  ;;  %v5267_v42 = vadd.f32 %v17546_v12, %v5212_v6  ;;  %13087 = vmatpush3.bf16.msra.mxu1 %v17566_v15  ;;  %v6507_v6 = vld [vmem:[#allocation3 + $0x151] sm:$0xff] }
 0x357   :  { %v5280_v38 = vmax.f32 %v5268_v24, 0.0  ;;  %13089 = vmatprep.subr.bf16.mxu1 %v17580_v54  ;;  %v6667_v43 = vld [vmem:[#allocation3 + $0x12a] sm:$0xff] }
 0x358   :  { %v5279_v63 = vmax.f32 %v5267_v42, 0.0  ;;  %v11093_v14 = vpop.f32.mrb[38].mxu1  ;;  %12831 = vmatpush3.bf16.msra.mxu0 %v17697_v61 }
 0x359   :  { %5292 = vst [vmem:[#allocation4 + $0x88] sm:$0xff] %v5280_v38  ;;  %v5270_v46 = vadd.f32 %v11093_v14, %v17546_v12  ;;  %v5222_v15 = vpop.f32.mrb[39].mxu1  ;;  %11883 = vmatmul.mubr.f32.vlgmr.msra.gmra.mrb[44].mxu1 %v7834_v56  ;;  %12833 = vmatprep.subr.bf16.mxu0 %v17714_v41  ;;  %v5311_v48 = vld [vmem:[#allocation4 + $0x60] ss:$2 sm:$0xff]  ;;  %v5335_v22 = vld [vmem:[#allocation4 + $0x61] ss:$2 sm:$0xff] }
 0x35a   :  { %5291 = vst [vmem:[#allocation4 + $0x80] sm:$0xff] %v5279_v63  ;;  %v5269_v11 = vadd.f32 %v17546_v12, %v5222_v15  ;;  %11885 = vmatprep.mubr.f32.mxu1 %v7835_v52  ;;  %13091 = vmatpush3.bf16.msra.mxu1 %v17580_v54  ;;  %v5352_v49 = vmax.f32 %v5311_v48, %v5335_v22  ;;  %v7841_v38 = vld [vmem:[#allocation3 + $0x1c0] sm:$0xff]  ;;  %v8886_v15 = vld [vmem:[%s17878_s4 + $0x450] sm:$0xff]  ;;  %v8887_v52 = vld [vmem:[%s17878_s4 + $0x458] sm:$0xff] }
 0x35b   :  { %v5282_v29 = vmax.f32 %v5270_v46, 0.0  ;;  %13093 = vmatprep.subr.bf16.mxu1 %v17595_v3  ;;  %11483 = vmatmul.mubr.f32.vlgmr.msra.gmra.mrb[44].mxu0 %v6502_v35  ;;  %v17772_v63 = vpack.c.bf16 %v8885_v34, %v8884_v17  ;;  %v6508_v46 = vld [vmem:[#allocation3 + $0x159] sm:$0xff]  ;;  %v6510_v48 = vld [vmem:[#allocation3 + $0x169] sm:$0xff] }
 0x35c   :  { %v5281_v44 = vmax.f32 %v5269_v11, 0.0  ;;  %v11096_v0 = vpop.f32.mrb[40].mxu1  ;;  %11485 = vmatprep.mubr.f32.mxu0 %v6503_v9  ;;  %12835 = vmatpush3.bf16.msra.mxu0 %v17714_v41  ;;  %v6509_v11 = vld [vmem:[#allocation3 + $0x161] sm:$0xff]  ;;  %v8009_v17 = vld [vmem:[#allocation3 + $0x1d9] sm:$0xff] }
 0x35d   :  { %v5313_v54 = vld [vmem:[#allocation4 + $0x70] ss:$2 sm:$0xff]  ;;  %v5337_v57 = vld [vmem:[#allocation4 + $0x71] ss:$2 sm:$0xff]  ;;  %5294 = vst [vmem:[#allocation4 + $0x98] sm:$0xff] %v5282_v29  ;;  %v5272_v16 = vadd.f32 %v11096_v0, %v17546_v12  ;;  %v5232_v62 = vpop.f32.mrb[41].mxu1  ;;  %11886 = vmatmul.mubr.f32.gmra.mrb[46].mxu1 %v7836_v20  ;;  %12837 = vmatprep.subr.bf16.mxu0 %v17728_v2 }
 0x35e   :  { %v5353_v18 = vmax.f32 %v5313_v54, %v5337_v57  ;;  %5293 = vst [vmem:[#allocation4 + $0x90] sm:$0xff] %v5281_v44  ;;  %v5271_v37 = vadd.f32 %v17546_v12, %v5232_v62  ;;  %11888 = vmatprep.mubr.f32.mxu1 %v7837_v33  ;;  %13095 = vmatpush3.bf16.msra.mxu1 %v17595_v3  ;;  %v8888_v22 = vld [vmem:[%s17878_s4 + $0x460] sm:$0xff]  ;;  %v8889_v29 = vld [vmem:[%s17878_s4 + $0x468] sm:$0xff]  ;;  %v6511_v0 = vld [vmem:[#allocation3 + $0x171] sm:$0xff] }
 0x35f   :  { %v5284_v55 = vmax.f32 %v5272_v16, 0.0  ;;  %13097 = vmatprep.subr.bf16.mxu1 %v17611_v4  ;;  %11486 = vmatmul.mubr.f32.gmra.mrb[46].mxu0 %v6504_v7  ;;  %v7844_v20 = vld [vmem:[#allocation3 + $0x1d8] sm:$0xff]  ;;  %v17799_v57 = vpack.c.bf16 %v8889_v29, %v8888_v22 }
 0x360   :  { %v5361_v59 = vmax.f32 %v5352_v49, %v5353_v18  ;;  %v5283_v13 = vmax.f32 %v5271_v37, 0.0  ;;  %v11099_v60 = vpop.f32.mrb[42].mxu1  ;;  %11488 = vmatprep.mubr.f32.mxu0 %v6505_v19  ;;  %12839 = vmatpush3.bf16.msra.mxu0 %v17728_v2  ;;  %v6512_v33 = vld [vmem:[#allocation3 + $0x179] sm:$0xff]  ;;  %v8890_v49 = vld [vmem:[%s17878_s4 + $0x470] sm:$0xff]  ;;  %v6666_v37 = vld [vmem:[#allocation3 + $0x122] sm:$0xff] }
 0x361   :  { %5296 = vst [vmem:[#allocation4 + $0xa8] sm:$0xff] %v5284_v55  ;;  %v5274_v3 = vadd.f32 %v11099_v60, %v17546_v12  ;;  %v5242_v50 = vpop.f32.mrb[43].mxu1  ;;  %11889 = vmatmul.mubr.f32.gmra.mrb[48].mxu1 %v7838_v58  ;;  %12841 = vmatprep.subr.bf16.mxu0 %v17742_v39  ;;  %v5315_v8 = vld [vmem:[#allocation4 + $0x80] ss:$2 sm:$0xff]  ;;  %v5339_v10 = vld [vmem:[#allocation4 + $0x81] ss:$2 sm:$0xff] }
 0x362   :  { %5367 = vst [vmem:[%s17882_s6 + $0x18] sm:$0xff] %v5361_v59  ;;  %5295 = vst [vmem:[#allocation4 + $0xa0] sm:$0xff] %v5283_v13  ;;  %v5273_v28 = vadd.f32 %v17546_v12, %v5242_v50  ;;  %11891 = vmatprep.mubr.f32.mxu1 %v7839_v30  ;;  %13099 = vmatpush3.bf16.msra.mxu1 %v17611_v4  ;;  %v5354_v14 = vmax.f32 %v5315_v8, %v5339_v10  ;;  %v8891_v18 = vld [vmem:[%s17878_s4 + $0x478] sm:$0xff]  ;;  %v8002_v19 = vld [vmem:[#allocation3 + $0x1a1] sm:$0xff] }
 0x363   :  { %v5286_v24 = vmax.f32 %v5274_v3, 0.0  ;;  %13101 = vmatprep.subr.bf16.mxu1 %v17627_v36  ;;  %11489 = vmatmul.mubr.f32.gmra.mrb[48].mxu0 %v6506_v26  ;;  %v8001_v55 = vld [vmem:[#allocation3 + $0x199] sm:$0xff]  ;;  %v6670_v59 = vld [vmem:[#allocation3 + $0x142] sm:$0xff]  ;;  %v6671_v60 = vld [vmem:[#allocation3 + $0x14a] sm:$0xff] }
 0x364   :  { %v5285_v42 = vmax.f32 %v5273_v28, 0.0  ;;  %11491 = vmatprep.mubr.f32.mxu0 %v6507_v6  ;;  %12843 = vmatpush3.bf16.msra.mxu0 %v17742_v39  ;;  %v8003_v13 = vld [vmem:[#allocation3 + $0x1a9] sm:$0xff]  ;;  %v6672_v58 = vld [vmem:[#allocation3 + $0x152] sm:$0xff]  ;;  %v6673_v50 = vld [vmem:[#allocation3 + $0x15a] sm:$0xff] }
 0x365   :  { %v5317_v4 = vld [vmem:[#allocation4 + $0x90] ss:$2 sm:$0xff]  ;;  %v5341_v47 = vld [vmem:[#allocation4 + $0x91] ss:$2 sm:$0xff]  ;;  %5298 = vst [vmem:[#allocation4 + $0xb8] sm:$0xff] %v5286_v24  ;;  %11892 = vmatmul.mubr.f32.gmra.mrb[50].mxu1 %v7840_v53  ;;  %12845 = vmatprep.subr.bf16.mxu0 %v17756_v40  ;;  %v6674_v30 = vld [vmem:[#allocation3 + $0x162] sm:$0xff] }
 0x366   :  { %v5355_v56 = vmax.f32 %v5317_v4, %v5341_v47  ;;  %5297 = vst [vmem:[#allocation4 + $0xb0] sm:$0xff] %v5285_v42  ;;  %11894 = vmatprep.mubr.f32.mxu1 %v7841_v38  ;;  %13103 = vmatpush3.bf16.msra.mxu1 %v17627_v36  ;;  %v17784_v36 = vpack.c.bf16 %v8887_v52, %v8886_v15  ;;  %v8005_v3 = vld [vmem:[#allocation3 + $0x1b9] sm:$0xff]  ;;  %v6675_v28 = vld [vmem:[#allocation3 + $0x16a] sm:$0xff]  ;;  %v8167_v24 = vld [vmem:[#allocation3 + $0x1a2] sm:$0xff] }
 0x367   :  { %13105 = vmatprep.subr.bf16.mxu1 %v17646_v45  ;;  %11492 = vmatmul.mubr.f32.gmra.mrb[50].mxu0 %v6508_v46  ;;  %v6676_v26 = vld [vmem:[#allocation3 + $0x172] sm:$0xff]  ;;  %v6677_v34 = vld [vmem:[#allocation3 + $0x17a] sm:$0xff]  ;;  %v8168_v6 = vld [vmem:[#allocation3 + $0x1aa] sm:$0xff] }
 0x368   :  { %v5362_v35 = vmax.f32 %v5354_v14, %v5355_v56  ;;  %11494 = vmatprep.mubr.f32.mxu0 %v6509_v11  ;;  %12847 = vmatpush3.bf16.msra.mxu0 %v17756_v40  ;;  %v8165_v8 = vld [vmem:[#allocation3 + $0x192] sm:$0xff]  ;;  %v8166_v10 = vld [vmem:[#allocation3 + $0x19a] sm:$0xff] }
 0x369   :  { %11895 = vmatmul.mubr.f32.gmra.mrb[52].mxu1 %v7842_v25  ;;  %12849 = vmatprep.subr.bf16.mxu0 %v17772_v63  ;;  %v5319_v9 = vld [vmem:[#allocation4 + $0xa0] ss:$2 sm:$0xff]  ;;  %v5343_v44 = vld [vmem:[#allocation4 + $0xa1] ss:$2 sm:$0xff]  ;;  %v8169_v42 = vld [vmem:[#allocation3 + $0x1b2] sm:$0xff] }
 0x36a   :  { %5368 = vst [vmem:[%s17882_s6 + $0x20] sm:$0xff] %v5362_v35  ;;  %11897 = vmatprep.mubr.f32.mxu1 %v13613_v23  ;;  %13107 = vmatpush3.bf16.msra.mxu1 %v17646_v45  ;;  %v5356_v16 = vmax.f32 %v5319_v9, %v5343_v44  ;;  %v8170_v53 = vld [vmem:[#allocation3 + $0x1ba] sm:$0xff]  ;;  %v8173_v4 = vld [vmem:[#allocation3 + $0x1d2] sm:$0xff] }
 0x36b   :  { %13109 = vmatprep.subr.bf16.mxu1 %v17662_v5  ;;  %11495 = vmatmul.mubr.f32.gmra.mrb[52].mxu0 %v6510_v48  ;;  %v8174_v47 = vld [vmem:[#allocation3 + $0x1da] sm:$0xff] }
 0x36c   :  { %11497 = vmatprep.mubr.f32.mxu0 %v6511_v0  ;;  %12851 = vmatpush3.bf16.msra.mxu0 %v17772_v63 }
 0x36d   :  { %v5321_v45 = vld [vmem:[#allocation4 + $0xb0] ss:$2 sm:$0xff]  ;;  %v5345_v54 = vld [vmem:[#allocation4 + $0xb1] ss:$2 sm:$0xff]  ;;  %11898 = vmatmul.mubr.f32.gmra.mrb[54].mxu1 %v7844_v20  ;;  %12853 = vmatprep.subr.bf16.mxu0 %v17784_v36 }
 0x36e   :  { %v5357_v62 = vmax.f32 %v5321_v45, %v5345_v54  ;;  %13111 = vmatpush3.bf16.msra.mxu1 %v17662_v5  ;;  %11932 = vmatprep.mubr.f32.mxu1 %v17462_v21  ;;  %v17812_v21 = vpack.c.bf16 %v8891_v18, %v8890_v49  ;;  %v7999_v5 = vld [vmem:[#allocation3 + $0x189] sm:$0xff] }
 0x36f   :  { %13113 = vmatprep.subr.bf16.mxu1 %v17682_v31  ;;  %11498 = vmatmul.mubr.f32.gmra.mrb[54].mxu0 %v6512_v33 }
 0x370   :  { %v5363_v7 = vmax.f32 %v5356_v16, %v5357_v62  ;;  %12855 = vmatpush3.bf16.msra.mxu0 %v17784_v36  ;;  %11532 = vmatprep.mubr.f32.mxu0 %v6666_v37 }
 0x371   :  { %12857 = vmatprep.subr.bf16.mxu0 %v17799_v57 }
 0x372   :  { %5369 = vst [vmem:[%s17882_s6 + $0x28] sm:$0xff] %v5363_v7  ;;  %13115 = vmatpush3.bf16.msra.mxu1 %v17682_v31  ;;  %v6668_v31 = vld [vmem:[#allocation3 + $0x132] sm:$0xff] }
 0x373   :  { %13117 = vmatprep.subr.bf16.mxu1 %v17697_v61 }
 0x374   :  { %12859 = vmatpush3.bf16.msra.mxu0 %v17799_v57 }
 0x375   :  { %12861 = vmatprep.subr.bf16.mxu0 %v17812_v21 }
 0x376   :  { %13119 = vmatpush3.bf16.msra.mxu1 %v17697_v61  ;;  %v6669_v61 = vld [vmem:[#allocation3 + $0x13a] sm:$0xff] }
 0x377   :  { %13121 = vmatprep.subr.bf16.mxu1 %v17714_v41 }
 0x378   :  { %12863 = vmatpush3.bf16.msra.mxu0 %v17812_v21 }
 0x379   :  { %11933 = vmatmul.mubr.f32.vlgmr.msra.gmra.mrb[44].mxu1 %v7999_v5 }
 0x37a   :  { %11935 = vmatprep.mubr.f32.mxu1 %v8000_v1  ;;  %13123 = vmatpush3.bf16.msra.mxu1 %v17714_v41  ;;  %v8004_v41 = vld [vmem:[#allocation3 + $0x1b1] sm:$0xff] }
 0x37b   :  { %13125 = vmatprep.subr.bf16.mxu1 %v17728_v2  ;;  %11533 = vmatmul.mubr.f32.vlgmr.msra.gmra.mrb[44].mxu0 %v6667_v43 }
 0x37c   :  { %11535 = vmatprep.mubr.f32.mxu0 %v6668_v31 }
 0x37d   :  { %11936 = vmatmul.mubr.f32.gmra.mrb[46].mxu1 %v8001_v55 }
 0x37e   :  { %11938 = vmatprep.mubr.f32.mxu1 %v8002_v19  ;;  %13127 = vmatpush3.bf16.msra.mxu1 %v17728_v2  ;;  %v8006_v2 = vld [vmem:[#allocation3 + $0x1c1] sm:$0xff] }
 0x37f   :  { %13129 = vmatprep.subr.bf16.mxu1 %v17742_v39  ;;  %11536 = vmatmul.mubr.f32.gmra.mrb[46].mxu0 %v6669_v61 }
 0x380   :  { %11538 = vmatprep.mubr.f32.mxu0 %v6670_v59 }
 0x381   :  { %11939 = vmatmul.mubr.f32.gmra.mrb[48].mxu1 %v8003_v13 }
 0x382   :  { %11941 = vmatprep.mubr.f32.mxu1 %v8004_v41  ;;  %13131 = vmatpush3.bf16.msra.mxu1 %v17742_v39  ;;  %v8008_v39 = vld [vmem:[#allocation3 + $0x1d1] sm:$0xff] }
 0x383   :  { %13133 = vmatprep.subr.bf16.mxu1 %v17756_v40  ;;  %11539 = vmatmul.mubr.f32.gmra.mrb[48].mxu0 %v6671_v60 }
 0x384   :  { %11541 = vmatprep.mubr.f32.mxu0 %v6672_v58 }
 0x385   :  { %11942 = vmatmul.mubr.f32.gmra.mrb[50].mxu1 %v8005_v3 }
 0x386   :  { %11944 = vmatprep.mubr.f32.mxu1 %v8006_v2  ;;  %13135 = vmatpush3.bf16.msra.mxu1 %v17756_v40  ;;  %v8163_v40 = vld [vmem:[#allocation3 + $0x182] sm:$0xff] }
 0x387   :  { %13137 = vmatprep.subr.bf16.mxu1 %v17772_v63  ;;  %11542 = vmatmul.mubr.f32.gmra.mrb[50].mxu0 %v6673_v50 }
 0x388   :  { %11544 = vmatprep.mubr.f32.mxu0 %v6674_v30 }
 0x389   :  { %11945 = vmatmul.mubr.f32.gmra.mrb[52].mxu1 %v17539_v51  ;;  %v8164_v51 = vld [vmem:[#allocation3 + $0x18a] sm:$0xff] }
 0x38a   :  { %11947 = vmatprep.mubr.f32.mxu1 %v8008_v39  ;;  %13139 = vmatpush3.bf16.msra.mxu1 %v17772_v63 }
 0x38b   :  { %13141 = vmatprep.subr.bf16.mxu1 %v17784_v36  ;;  %11545 = vmatmul.mubr.f32.gmra.mrb[52].mxu0 %v6675_v28 }
 0x38c   :  { %11547 = vmatprep.mubr.f32.mxu0 %v6676_v26 }
 0x38d   :  { %11948 = vmatmul.mubr.f32.gmra.mrb[54].mxu1 %v8009_v17 }
 0x38e   :  { %13143 = vmatpush3.bf16.msra.mxu1 %v17784_v36  ;;  %11982 = vmatprep.mubr.f32.mxu1 %v8163_v40 }
 0x38f   :  { %13145 = vmatprep.subr.bf16.mxu1 %v17799_v57  ;;  %11548 = vmatmul.mubr.f32.gmra.mrb[54].mxu0 %v6677_v34 }
 0x392   :  { %13147 = vmatpush3.bf16.msra.mxu1 %v17799_v57 }
 0x393   :  { %13149 = vmatprep.subr.bf16.mxu1 %v17812_v21 }
 0x396   :  { %13151 = vmatpush3.bf16.msra.mxu1 %v17812_v21 }
 0x399   :  { %11983 = vmatmul.mubr.f32.vlgmr.msra.gmra.mrb[44].mxu1 %v8164_v51 }
 0x39a   :  { %11985 = vmatprep.mubr.f32.mxu1 %v8165_v8  ;;  %v13614_v8 = vld [vmem:[%s17881_s5] ss:$0 sm:$0xff] }
 0x39d   :  { %11986 = vmatmul.mubr.f32.gmra.mrb[46].mxu1 %v8166_v10 }
 0x39e   :  { %11988 = vmatprep.mubr.f32.mxu1 %v8167_v24 }
 0x3a1   :  { %11989 = vmatmul.mubr.f32.gmra.mrb[48].mxu1 %v8168_v6 }
 0x3a2   :  { %11991 = vmatprep.mubr.f32.mxu1 %v8169_v42 }
 0x3a5   :  { %11992 = vmatmul.mubr.f32.gmra.mrb[50].mxu1 %v8170_v53 }
 0x3a6   :  { %11994 = vmatprep.mubr.f32.mxu1 %v17659_v27 }
 0x3a9   :  { %11995 = vmatmul.mubr.f32.gmra.mrb[52].mxu1 %v17676_v32 }
 0x3aa   :  { %11997 = vmatprep.mubr.f32.mxu1 %v8173_v4 }
 0x3ad   :  { %11998 = vmatmul.mubr.f32.gmra.mrb[54].mxu1 %v8174_v47 }
 0x44e   :  { %v11534_v38 = vpop.f32.mrb[44].mxu0 }
 0x44f   :  { %v6832_v63 = vadd.f32 %v11534_v38, %v17546_v12  ;;  %v6760_v14 = vpop.f32.mrb[45].mxu0 }
 0x450   :  { %v6831_v56 = vadd.f32 %v17546_v12, %v6760_v14 }
 0x451   :  { %v6844_v46 = vmax.f32 %v6832_v63, 0.0 }
 0x452   :  { %v6843_v15 = vmax.f32 %v6831_v56, 0.0  ;;  %v11537_v52 = vpop.f32.mrb[46].mxu0 }
 0x453   :  { %6856 = vst [vmem:[#allocation4 + $0xc8] sm:$0xff] %v6844_v46  ;;  %v6834_v11 = vadd.f32 %v11537_v52, %v17546_v12  ;;  %v6770_v35 = vpop.f32.mrb[47].mxu0 }
 0x454   :  { %6855 = vst [vmem:[#allocation4 + $0xc0] sm:$0xff] %v6843_v15  ;;  %v6833_v27 = vadd.f32 %v17546_v12, %v6770_v35 }
 0x455   :  { %v6846_v32 = vmax.f32 %v6834_v11, 0.0 }
 0x456   :  { %v6845_v25 = vmax.f32 %v6833_v27, 0.0  ;;  %v11540_v36 = vpop.f32.mrb[48].mxu0 }
 0x457   :  { %6858 = vst [vmem:[#allocation4 + $0xd8] sm:$0xff] %v6846_v32  ;;  %v6836_v23 = vadd.f32 %v11540_v36, %v17546_v12  ;;  %v6780_v48 = vpop.f32.mrb[49].mxu0 }
 0x458   :  { %6857 = vst [vmem:[#allocation4 + $0xd0] sm:$0xff] %v6845_v25  ;;  %v6835_v22 = vadd.f32 %v17546_v12, %v6780_v48 }
 0x459   :  { %v6848_v29 = vmax.f32 %v6836_v23, 0.0 }
 0x45a   :  { %v6847_v9 = vmax.f32 %v6835_v22, 0.0  ;;  %v11543_v44 = vpop.f32.mrb[50].mxu0 }
 0x45b   :  { %6860 = vst [vmem:[#allocation4 + $0xe8] sm:$0xff] %v6848_v29  ;;  %v6838_v0 = vadd.f32 %v11543_v44, %v17546_v12  ;;  %v6790_v20 = vpop.f32.mrb[51].mxu0  ;;  %v8365_v54 = vld [vmem:[#allocation4 + $0xc0] ss:$2 sm:$0xff]  ;;  %v8389_v57 = vld [vmem:[#allocation4 + $0xc1] ss:$2 sm:$0xff] }
 0x45c   :  { %6859 = vst [vmem:[#allocation4 + $0xe0] sm:$0xff] %v6847_v9  ;;  %v6837_v45 = vadd.f32 %v17546_v12, %v6790_v20  ;;  %v8412_v21 = vmax.f32 %v8365_v54, %v8389_v57 }
 0x45d   :  { %v6850_v16 = vmax.f32 %v6838_v0, 0.0 }
 0x45e   :  { %v6849_v62 = vmax.f32 %v6837_v45, 0.0  ;;  %v11546_v33 = vpop.f32.mrb[52].mxu0 }
 0x45f   :  { %v8367_v49 = vld [vmem:[#allocation4 + $0xd0] ss:$2 sm:$0xff]  ;;  %v8391_v18 = vld [vmem:[#allocation4 + $0xd1] ss:$2 sm:$0xff]  ;;  %6862 = vst [vmem:[#allocation4 + $0xf8] sm:$0xff] %v6850_v16  ;;  %v6840_v37 = vadd.f32 %v11546_v33, %v17546_v12  ;;  %v6800_v7 = vpop.f32.mrb[53].mxu0 }
 0x460   :  { %v8413_v5 = vmax.f32 %v8367_v49, %v8391_v18  ;;  %6861 = vst [vmem:[#allocation4 + $0xf0] sm:$0xff] %v6849_v62  ;;  %v6839_v1 = vadd.f32 %v17546_v12, %v6800_v7 }
 0x461   :  { %v6852_v43 = vmax.f32 %v6840_v37, 0.0 }
 0x462   :  { %v8424_v31 = vmax.f32 %v8412_v21, %v8413_v5  ;;  %v6851_v55 = vmax.f32 %v6839_v1, 0.0  ;;  %v11549_v19 = vpop.f32.mrb[54].mxu0 }
 0x463   :  { %6864 = vst [vmem:[#allocation4 + $0x108] sm:$0xff] %v6852_v43  ;;  %v6842_v61 = vadd.f32 %v11549_v19, %v17546_v12  ;;  %v6810_v59 = vpop.f32.mrb[55].mxu0  ;;  %v8369_v41 = vld [vmem:[#allocation4 + $0xe0] ss:$2 sm:$0xff]  ;;  %v8393_v60 = vld [vmem:[#allocation4 + $0xe1] ss:$2 sm:$0xff] }
 0x464   :  { %9020 = vst [vmem:[%s17882_s6 + $0x30] sm:$0xff] %v8424_v31  ;;  %6863 = vst [vmem:[#allocation4 + $0x100] sm:$0xff] %v6851_v55  ;;  %v6841_v13 = vadd.f32 %v17546_v12, %v6810_v59  ;;  %v8414_v30 = vmax.f32 %v8369_v41, %v8393_v60 }
 0x465   :  { %v6854_v58 = vmax.f32 %v6842_v61, 0.0 }
 0x466   :  { %v6853_v3 = vmax.f32 %v6841_v13, 0.0 }
 0x467   :  { %v8371_v2 = vld [vmem:[#allocation4 + $0xf0] ss:$2 sm:$0xff]  ;;  %v8395_v50 = vld [vmem:[#allocation4 + $0xf1] ss:$2 sm:$0xff]  ;;  %6866 = vst [vmem:[#allocation4 + $0x118] sm:$0xff] %v6854_v58 }
 0x468   :  { %v8415_v39 = vmax.f32 %v8371_v2, %v8395_v50  ;;  %6865 = vst [vmem:[#allocation4 + $0x110] sm:$0xff] %v6853_v3 }
 0x46a   :  { %v8425_v28 = vmax.f32 %v8414_v30, %v8415_v39 }
 0x46b   :  { %v8373_v17 = vld [vmem:[#allocation4 + $0x100] ss:$2 sm:$0xff]  ;;  %v8397_v40 = vld [vmem:[#allocation4 + $0x101] ss:$2 sm:$0xff] }
 0x46c   :  { %9021 = vst [vmem:[%s17882_s6 + $0x38] sm:$0xff] %v8425_v28  ;;  %v11984_v26 = vpop.f32.mrb[44].mxu1  ;;  %v8416_v53 = vmax.f32 %v8373_v17, %v8397_v40 }
 0x46d   :  { %v8329_v34 = vadd.f32 %v11984_v26, %v17546_v12  ;;  %v8257_v51 = vpop.f32.mrb[45].mxu1 }
 0x46e   :  { %v8328_v10 = vadd.f32 %v13614_v8, %v8257_v51 }
 0x46f   :  { %v8375_v24 = vld [vmem:[#allocation4 + $0x110] ss:$2 sm:$0xff]  ;;  %v8399_v6 = vld [vmem:[#allocation4 + $0x111] ss:$2 sm:$0xff]  ;;  %v8341_v42 = vmax.f32 %v8329_v34, 0.0 }
 0x470   :  { %v8417_v4 = vmax.f32 %v8375_v24, %v8399_v6  ;;  %v8340_v47 = vmax.f32 %v8328_v10, 0.0  ;;  %v11987_v38 = vpop.f32.mrb[46].mxu1 }
 0x471   :  { %8353 = vst [vmem:[#allocation4 + $0x128] sm:$0xff] %v8341_v42  ;;  %v8331_v63 = vadd.f32 %v13614_v8, %v11987_v38  ;;  %v8267_v14 = vpop.f32.mrb[47].mxu1 }
 0x472   :  { %v8426_v56 = vmax.f32 %v8416_v53, %v8417_v4  ;;  %8352 = vst [vmem:[#allocation4 + $0x120] sm:$0xff] %v8340_v47  ;;  %v8330_v46 = vadd.f32 %v13614_v8, %v8267_v14 }
 0x473   :  { %v8343_v12 = vmax.f32 %v8331_v63, 0.0 }
 0x474   :  { %9022 = vst [vmem:[%s17882_s6 + $0x40] sm:$0xff] %v8426_v56  ;;  %v8342_v15 = vmax.f32 %v8330_v46, 0.0  ;;  %v11990_v52 = vpop.f32.mrb[48].mxu1 }
 0x475   :  { %8355 = vst [vmem:[#allocation4 + $0x138] sm:$0xff] %v8343_v12  ;;  %v8333_v11 = vadd.f32 %v13614_v8, %v11990_v52  ;;  %v8277_v35 = vpop.f32.mrb[49].mxu1 }
 0x476   :  { %8354 = vst [vmem:[#allocation4 + $0x130] sm:$0xff] %v8342_v15  ;;  %v8332_v27 = vadd.f32 %v13614_v8, %v8277_v35 }
 0x477   :  { %v8345_v32 = vmax.f32 %v8333_v11, 0.0 }
 0x478   :  { %v8344_v25 = vmax.f32 %v8332_v27, 0.0  ;;  %v11993_v36 = vpop.f32.mrb[50].mxu1 }
 0x479   :  { %8357 = vst [vmem:[#allocation4 + $0x148] sm:$0xff] %v8345_v32  ;;  %v8335_v23 = vadd.f32 %v13614_v8, %v11993_v36  ;;  %v8287_v48 = vpop.f32.mrb[51].mxu1  ;;  %v8377_v29 = vld [vmem:[#allocation4 + $0x120] ss:$2 sm:$0xff]  ;;  %v8401_v9 = vld [vmem:[#allocation4 + $0x121] ss:$2 sm:$0xff] }
 0x47a   :  { %8356 = vst [vmem:[#allocation4 + $0x140] sm:$0xff] %v8344_v25  ;;  %v8334_v22 = vadd.f32 %v13614_v8, %v8287_v48  ;;  %v8418_v62 = vmax.f32 %v8377_v29, %v8401_v9 }
 0x47b   :  { %v8347_v44 = vmax.f32 %v8335_v23, 0.0 }
 0x47c   :  { %v8346_v0 = vmax.f32 %v8334_v22, 0.0  ;;  %v11996_v20 = vpop.f32.mrb[52].mxu1 }
 0x47d   :  { %v8379_v45 = vld [vmem:[#allocation4 + $0x130] ss:$2 sm:$0xff]  ;;  %v8403_v54 = vld [vmem:[#allocation4 + $0x131] ss:$2 sm:$0xff]  ;;  %8359 = vst [vmem:[#allocation4 + $0x158] sm:$0xff] %v8347_v44  ;;  %v8337_v57 = vadd.f32 %v13614_v8, %v11996_v20  ;;  %v8297_v16 = vpop.f32.mrb[53].mxu1 }
 0x47e   :  { %v8419_v33 = vmax.f32 %v8379_v45, %v8403_v54  ;;  %8358 = vst [vmem:[#allocation4 + $0x150] sm:$0xff] %v8346_v0  ;;  %v8336_v49 = vadd.f32 %v13614_v8, %v8297_v16 }
 0x47f   :  { %v8349_v18 = vmax.f32 %v8337_v57, 0.0 }
 0x480   :  { %v8427_v37 = vmax.f32 %v8418_v62, %v8419_v33  ;;  %v8348_v7 = vmax.f32 %v8336_v49, 0.0  ;;  %v11999_v21 = vpop.f32.mrb[54].mxu1 }
 0x481   :  { %8361 = vst [vmem:[#allocation4 + $0x168] sm:$0xff] %v8349_v18  ;;  %v8339_v5 = vadd.f32 %v13614_v8, %v11999_v21  ;;  %v8307_v1 = vpop.f32.mrb[55].mxu1  ;;  %v8381_v31 = vld [vmem:[#allocation4 + $0x140] ss:$2 sm:$0xff]  ;;  %v8405_v55 = vld [vmem:[#allocation4 + $0x141] ss:$2 sm:$0xff] }
 0x482   :  { %9023 = vst [vmem:[%s17882_s6 + $0x48] sm:$0xff] %v8427_v37  ;;  %8360 = vst [vmem:[#allocation4 + $0x160] sm:$0xff] %v8348_v7  ;;  %v8338_v43 = vadd.f32 %v13614_v8, %v8307_v1  ;;  %v8420_v41 = vmax.f32 %v8381_v31, %v8405_v55 }
 0x483   :  { %v8351_v19 = vmax.f32 %v8339_v5, 0.0 }
 0x484   :  { %v8350_v61 = vmax.f32 %v8338_v43, 0.0 }
 0x485   :  { %v8383_v59 = vld [vmem:[#allocation4 + $0x150] ss:$2 sm:$0xff]  ;;  %v8407_v13 = vld [vmem:[#allocation4 + $0x151] ss:$2 sm:$0xff]  ;;  %8363 = vst [vmem:[#allocation4 + $0x178] sm:$0xff] %v8351_v19 }
 0x486   :  { %v8421_v60 = vmax.f32 %v8383_v59, %v8407_v13  ;;  %8362 = vst [vmem:[#allocation4 + $0x170] sm:$0xff] %v8350_v61 }
 0x488   :  { %v8428_v58 = vmax.f32 %v8420_v41, %v8421_v60 }
 0x489   :  { %v8385_v3 = vld [vmem:[#allocation4 + $0x160] ss:$2 sm:$0xff]  ;;  %v8409_v2 = vld [vmem:[#allocation4 + $0x161] ss:$2 sm:$0xff] }
 0x48a   :  { %9024 = vst [vmem:[%s17882_s6 + $0x50] sm:$0xff] %v8428_v58  ;;  %v8422_v39 = vmax.f32 %v8385_v3, %v8409_v2 }
 0x48d   :  { %v8387_v50 = vld [vmem:[#allocation4 + $0x170] ss:$2 sm:$0xff]  ;;  %v8411_v30 = vld [vmem:[#allocation4 + $0x171] ss:$2 sm:$0xff] }
 0x48e   :  { %v8423_v28 = vmax.f32 %v8387_v50, %v8411_v30 }
 0x490   :  { %v8429_v26 = vmax.f32 %v8422_v39, %v8423_v28 }
 0x492   :  { %9025 = vst [vmem:[%s17882_s6 + $0x58] sm:$0xff] %v8429_v26 }

</bundles_post_ra>
